<compile_context>
chip_gen: v7x
topology: tpu7x:2x2x1
jax: 0.10.0
libtpu: 0.0.40
codegen_flags: <defaults>
</compile_context>

<pallas_src>
import numpy as np
import jax
import jax.numpy as jnp
from jax import lax
from jax.experimental import pallas as pl
from jax.experimental.pallas import tpu as pltpu

_GUARD = 128  # lane guard so every 3x3 tap is a static, in-bounds lane slice


# -----------------------------------------------------------------------------
# Geometry: per resolution level, pixels live on a zero-padded (H+2)x(W+2) grid
# flattened onto the lane axis and rounded up to a multiple of 128 lanes.
# -----------------------------------------------------------------------------
def _round_up(v, m):
    return ((v + m - 1) // m) * m


def _make_levels(height, width, depth):
    assert height % (1 << (depth - 1)) == 0 and width % (1 << (depth - 1)) == 0
    levels = []
    for l in range(depth):
        h, w = height >> l, width >> l
        hp, wp = h + 2, w + 2
        t = hp * wp
        levels.append(dict(H=h, W=w, Hp=hp, Wp=wp, T=t, Tp=_round_up(t, 128)))
    return levels


def _flat(yp, xp, wp):
    return yp * wp + xp


def _build_masks(levels):
    """(1, Tp) masks: 1.0 at valid pixels, 0.0 at padding border / lane slack."""
    out = []
    for lv in levels:
        m = np.zeros((1, lv["Tp"]), np.float32)
        for y in range(lv["H"]):
            base = _flat(y + 1, 1, lv["Wp"])
            m[0, base:base + lv["W"]] = 1.0
        out.append(jnp.asarray(m))
    return out


def _build_pools(levels):
    """P_l (Tp_l, Tp_{l+1}): 2x2 average pool as a selection matmul."""
    out = []
    for l in range(len(levels) - 1):
        a, b = levels[l], levels[l + 1]
        p = np.zeros((a["Tp"], b["Tp"]), np.float32)
        for yo in range(b["H"]):
            for xo in range(b["W"]):
                qo = _flat(yo + 1, xo + 1, b["Wp"])
                for dy in range(2):
                    for dx in range(2):
                        qi = _flat(2 * yo + dy + 1, 2 * xo + dx + 1, a["Wp"])
                        p[qi, qo] = 0.25
        out.append(jnp.asarray(p))
    return out


def _build_up_scatters(levels):
    """S_tgt (4, Tp_{tgt+1}, Tp_tgt): stride-2 scatter for ConvTranspose2d(2,2)."""
    out = []
    for tgt in range(len(levels) - 1):
        hi, lo = levels[tgt], levels[tgt + 1]
        s = np.zeros((4, lo["Tp"], hi["Tp"]), np.float32)
        for y in range(lo["H"]):
            for x in range(lo["W"]):
                ql = _flat(y + 1, x + 1, lo["Wp"])
                for dy in range(2):
                    for dx in range(2):
                        qh = _flat(2 * y + dy + 1, 2 * x + dx + 1, hi["Wp"])
                        s[dy * 2 + dx, ql, qh] = 1.0
        out.append(jnp.asarray(s))
    return out


# -----------------------------------------------------------------------------
# Parameter packing (torch layouts -> kernel layouts, weights cast to bf16 once)
# -----------------------------------------------------------------------------
def _pack_conv3x3(w):                       # (Cout, Cin, 3, 3) -> (9, Cout, Cin)
    co, ci = w.shape[0], w.shape[1]
    w = jnp.asarray(w, jnp.float32)
    return jnp.transpose(w, (2, 3, 0, 1)).reshape(9, co, ci).astype(jnp.bfloat16)


def _pack_upconv(w):                        # (Cin, Cout, 2, 2) -> (4, Cout, Cin)
    ci, co = w.shape[0], w.shape[1]
    w = jnp.asarray(w, jnp.float32)
    return jnp.transpose(w, (2, 3, 1, 0)).reshape(4, co, ci).astype(jnp.bfloat16)


def _pack_bias(b):                          # (C,) -> (C, 1) f32
    return jnp.asarray(b, jnp.float32).reshape(-1, 1)


# -----------------------------------------------------------------------------
# In-kernel building blocks (operate on values in the (C, Tp) layout)
# -----------------------------------------------------------------------------
def _conv3x3_relu(srcs, w_refs, b_ref, wp, mask):
    """3x3 'same' conv + bias + ReLU.  srcs: list of (C_i, Tp) f32 values,
    w_refs: list of (9, Cout, C_i) bf16 refs (multiple srcs == channel concat)."""
    acc = None
    for x, w_ref in zip(srcs, w_refs):
        xb = x.astype(jnp.bfloat16)
        c, tp = xb.shape
        guard = jnp.zeros((c, _GUARD), jnp.bfloat16)
        xg = jnp.concatenate([guard, xb, guard], axis=1)       # aligned lane concat
        for ky in range(3):
            for kx in range(3):
                t = ky * 3 + kx
                s = (ky - 1) * wp + (kx - 1)
                tap = xg[:, _GUARD + s:_GUARD + s + tp]        # static lane slice
                d = jnp.dot(w_ref[t], tap, preferred_element_type=jnp.float32)
                acc = d if acc is None else acc + d
    y = jnp.maximum(acc + b_ref[...], 0.0)
    return y * mask                                            # re-zero pad border


def _upconv2x2(x, w_ref, b_ref, s_ref, mask):
    """ConvTranspose2d(k=2, s=2): per-tap channel matmul + scatter matmul."""
    xb = x.astype(jnp.bfloat16)
    acc = None
    for t in range(4):
        z = jnp.dot(w_ref[t], xb, preferred_element_type=jnp.float32)   # (Cout, Tlo)
        d = jnp.dot(z, s_ref[t], preferred_element_type=jnp.float32)    # (Cout, Thi)
        acc = d if acc is None else acc + d
    return (acc + b_ref[...]) * mask


def _make_kernel(levels, depth, n_classes):
    def kernel(*refs):
        refs = list(refs)
        out_ref = refs.pop()
        it = iter(refs)
        x_ref = next(it)
        down = [tuple(next(it) for _ in range(4)) for _ in range(depth)]
        pools = [next(it) for _ in range(depth - 1)]
        ups = [tuple(next(it) for _ in range(8)) for _ in range(depth - 1)]
        w_last = next(it)
        b_last = next(it)
        masks = [next(it)[...] for _ in range(depth)]

        act = x_ref[...]                                       # (Cin, Tp0) f32
        bridges = []
        # ---------------- encoder ----------------
        for l in range(depth):
            w1, b1, w2, b2 = down[l]
            wp = levels[l]["Wp"]
            act = _conv3x3_relu([act], [w1], b1, wp, masks[l])
            act = _conv3x3_relu([act], [w2], b2, wp, masks[l])
            if l != depth - 1:
                bridges.append(act)
                act = jnp.dot(act, pools[l][...], preferred_element_type=jnp.float32)
        # ---------------- decoder ----------------
        for i in range(depth - 1):
            tgt = depth - 2 - i
            wu, bu, su, wc1a, wc1b, bc1, wc2, bc2 = ups[i]
            wp = levels[tgt]["Wp"]
            up = _upconv2x2(act, wu, bu, su, masks[tgt])
            # center_crop is the identity here (padded convs keep sizes matched);
            # channel concat [up, bridge] is realized by split conv weights.
            act = _conv3x3_relu([up, bridges[tgt]], [wc1a, wc1b], bc1, wp, masks[tgt])
            act = _conv3x3_relu([act], [wc2], bc2, wp, masks[tgt])
        # ---------------- 1x1 head + softmax over channels (sublane axis) -----
        logits = jnp.dot(w_last[...], act, preferred_element_type=jnp.float32)
        logits = logits + b_last[...]
        mx = jnp.max(logits, axis=0, keepdims=True)
        e = jnp.exp(logits - mx)
        probs = e / jnp.sum(e, axis=0, keepdims=True)
        out_ref[...] = probs.astype(out_ref.dtype)

    return kernel


# -----------------------------------------------------------------------------
# Wrapper: build constants, pack params, one pallas_call for the whole network
# -----------------------------------------------------------------------------
def _const_spec(arr):
    zeros = (0,) * arr.ndim
    return pl.BlockSpec(arr.shape, lambda n, _z=zeros: _z)


def build_unet_forward(params, *, in_channels, n_classes, depth, wf, height, width):
    levels = _make_levels(height, width, depth)
    chans = [2 ** (wf + l) for l in range(depth)]
    masks = _build_masks(levels)
    pools = _build_pools(levels)
    scatters = _build_up_scatters(levels)

    const_inputs = []
    for l in range(depth):
        (w1, b1), (w2, b2) = params["down"][l]["c1"], params["down"][l]["c2"]
        const_inputs += [_pack_conv3x3(w1), _pack_bias(b1),
                         _pack_conv3x3(w2), _pack_bias(b2)]
    for l in range(depth - 1):
        const_inputs.append(pools[l])
    for i, tgt in enumerate(reversed(range(depth - 1))):
        pu = params["up"][i]
        wu, bu = pu["up"]
        wc1, bc1 = pu["c1"]
        wc2, bc2 = pu["c2"]
        c_t = chans[tgt]
        const_inputs += [
            _pack_upconv(wu), _pack_bias(bu), scatters[tgt],
            _pack_conv3x3(wc1[:, :c_t]), _pack_conv3x3(wc1[:, c_t:]), _pack_bias(bc1),
            _pack_conv3x3(wc2), _pack_bias(bc2),
        ]
    wl, bl = params["last"]
    const_inputs += [jnp.asarray(wl, jnp.float32).reshape(n_classes, chans[0]),
                     _pack_bias(bl)]
    for l in range(depth):
        const_inputs.append(masks[l])

    kernel = _make_kernel(levels, depth, n_classes)
    t0, tp0 = levels[0]["T"], levels[0]["Tp"]
    hp0, wp0 = levels[0]["Hp"], levels[0]["Wp"]

    in_specs = [pl.BlockSpec((None, in_channels, tp0), lambda n: (n, 0, 0))]
    in_specs += [_const_spec(a) for a in const_inputs]
    out_spec = pl.BlockSpec((None, n_classes, tp0), lambda n: (n, 0, 0))

    def forward(x_nchw):
        n = x_nchw.shape[0]
        xp = jnp.pad(x_nchw, ((0, 0), (0, 0), (1, 1), (1, 1)))
        xp = xp.reshape(n, in_channels, t0)
        xp = jnp.pad(xp, ((0, 0), (0, 0), (0, tp0 - t0)))
        out = pl.pallas_call(
            kernel,
            out_shape=jax.ShapeDtypeStruct((n, n_classes, tp0), jnp.float32),
            grid=(n,),
            in_specs=in_specs,
            out_specs=out_spec,
            compiler_params=pltpu.CompilerParams(
                dimension_semantics=("parallel",)),
        )(xp, *const_inputs)
        out = out[:, :, :t0].reshape(n, n_classes, hp0, wp0)
        return out[:, :, 1:-1, 1:-1]                       # drop the zero border

    return forward


# -----------------------------------------------------------------------------
# Deterministic parameter initialization (shapes per the PyTorch __init__)
# -----------------------------------------------------------------------------
def init_params(key, in_channels=4, n_classes=2, depth=3, wf=3):
    keys = iter(jax.random.split(key, 64))

    def conv_init(cout, cin, k):
        k1, k2 = jax.random.split(next(keys))
        bound = 1.0 / np.sqrt(cin * k * k)
        w = jax.random.uniform(k1, (cout, cin, k, k), jnp.float32, -bound, bound)
        b = jax.random.uniform(k2, (cout,), jnp.float32, -bound, bound)
        return w, b

    def convT_init(cin, cout, k):
        k1, k2 = jax.random.split(next(keys))
        bound = 1.0 / np.sqrt(cin * k * k)
        w = jax.random.uniform(k1, (cin, cout, k, k), jnp.float32, -bound, bound)
        b = jax.random.uniform(k2, (cout,), jnp.float32, -bound, bound)
        return w, b

    params = {"down": [], "up": []}
    prev = in_channels
    for i in range(depth):
        out = 2 ** (wf + i)
        params["down"].append({"c1": conv_init(out, prev, 3),
                               "c2": conv_init(out, out, 3)})
        prev = out
    for i in reversed(range(depth - 1)):
        out = 2 ** (wf + i)
        params["up"].append({
            "up": convT_init(prev, out, 2),
            "c1": conv_init(out, prev, 3),   # concat gives prev (= 2*out) channels
            "c2": conv_init(out, out, 3),
        })
        prev = out
    params["last"] = conv_init(n_classes, prev, 1)
    return params


# -----------------------------------------------------------------------------
# Pure-JAX reference (mirrors the PyTorch forward) for a correctness check
# -----------------------------------------------------------------------------
def reference_forward(x, params):
    def conv3x3(x, w, b):
        y = lax.conv_general_dilated(x, w, (1, 1), ((1, 1), (1, 1)),
                                     dimension_numbers=("NCHW", "OIHW", "NCHW"))
        return jnp.maximum(y + b[None, :, None, None], 0.0)

    def upconv(x, w, b):
        n, ci, h, ww = x.shape
        co = w.shape[1]
        y = jnp.einsum("nchw,cdij->ndhiwj", x, w).reshape(n, co, 2 * h, 2 * ww)
        return y + b[None, :, None, None]

    def pool(x):
        n, c, h, ww = x.shape
        return x.reshape(n, c, h // 2, 2, ww // 2, 2).mean(axis=(3, 5))

    blocks = []
    act = x
    depth = len(params["down"])
    for l, p in enumerate(params["down"]):
        act = conv3x3(act, *p["c1"])
        act = conv3x3(act, *p["c2"])
        if l != depth - 1:
            blocks.append(act)
            act = pool(act)
    for i, p in enumerate(params["up"]):
        up = upconv(act, *p["up"])
        act = jnp.concatenate([up, blocks[-i - 1]], axis=1)
        act = conv3x3(act, *p["c1"])
        act = conv3x3(act, *p["c2"])
    wl, bl = params["last"]
    logits = jnp.einsum("nchw,oc->nohw", act, wl.reshape(wl.shape[0], wl.shape[1]))
    logits = logits + bl[None, :, None, None]
    return jax.nn.softmax(logits, axis=1)


# -----------------------------------------------------------------------------
if __name__ == "__main__":
    key = jax.random.PRNGKey(0)
    kx, kp = jax.random.split(key)
    x = jax.random.normal(kx, (2, 4, 16, 16), jnp.float32)     # NCHW like PyTorch
    params = init_params(kp, in_channels=4, n_classes=2, depth=3, wf=3)

    forward = build_unet_forward(params, in_channels=4, n_classes=2, depth=3,
                                 wf=3, height=16, width=16)
    out = jax.block_until_ready(jax.jit(forward)(x))

    assert out.shape == (2, 2, 16, 16), out.shape
    assert bool(jnp.all(jnp.isfinite(out)))

    ref = jax.block_until_ready(jax.jit(lambda a: reference_forward(a, params))(x))
    err = float(jnp.max(jnp.abs(out - ref)))
    assert err < 8e-2, f"mismatch vs pure-JAX reference: max |err| = {err}"

    print("KERNEL_OK")
</pallas_src>

<mosaic_0001>
module attributes {stable_mosaic.version = 11 : i64} {
  func.func @kernel(%arg0: i32, %arg1: memref<1x4x384xf32, #tpu.memory_space<vmem>>, %arg2: memref<9x8x4xbf16, #tpu.memory_space<vmem>>, %arg3: memref<8x1xf32, #tpu.memory_space<vmem>>, %arg4: memref<9x8x8xbf16, #tpu.memory_space<vmem>>, %arg5: memref<8x1xf32, #tpu.memory_space<vmem>>, %arg6: memref<9x16x8xbf16, #tpu.memory_space<vmem>>, %arg7: memref<16x1xf32, #tpu.memory_space<vmem>>, %arg8: memref<9x16x16xbf16, #tpu.memory_space<vmem>>, %arg9: memref<16x1xf32, #tpu.memory_space<vmem>>, %arg10: memref<9x32x16xbf16, #tpu.memory_space<vmem>>, %arg11: memref<32x1xf32, #tpu.memory_space<vmem>>, %arg12: memref<9x32x32xbf16, #tpu.memory_space<vmem>>, %arg13: memref<32x1xf32, #tpu.memory_space<vmem>>, %arg14: memref<384x128xf32, #tpu.memory_space<vmem>>, %arg15: memref<128x128xf32, #tpu.memory_space<vmem>>, %arg16: memref<4x16x32xbf16, #tpu.memory_space<vmem>>, %arg17: memref<16x1xf32, #tpu.memory_space<vmem>>, %arg18: memref<4x128x128xf32, #tpu.memory_space<vmem>>, %arg19: memref<9x16x16xbf16, #tpu.memory_space<vmem>>, %arg20: memref<9x16x16xbf16, #tpu.memory_space<vmem>>, %arg21: memref<16x1xf32, #tpu.memory_space<vmem>>, %arg22: memref<9x16x16xbf16, #tpu.memory_space<vmem>>, %arg23: memref<16x1xf32, #tpu.memory_space<vmem>>, %arg24: memref<4x8x16xbf16, #tpu.memory_space<vmem>>, %arg25: memref<8x1xf32, #tpu.memory_space<vmem>>, %arg26: memref<4x128x384xf32, #tpu.memory_space<vmem>>, %arg27: memref<9x8x8xbf16, #tpu.memory_space<vmem>>, %arg28: memref<9x8x8xbf16, #tpu.memory_space<vmem>>, %arg29: memref<8x1xf32, #tpu.memory_space<vmem>>, %arg30: memref<9x8x8xbf16, #tpu.memory_space<vmem>>, %arg31: memref<8x1xf32, #tpu.memory_space<vmem>>, %arg32: memref<2x8xf32, #tpu.memory_space<vmem>>, %arg33: memref<2x1xf32, #tpu.memory_space<vmem>>, %arg34: memref<1x384xf32, #tpu.memory_space<vmem>>, %arg35: memref<1x128xf32, #tpu.memory_space<vmem>>, %arg36: memref<1x128xf32, #tpu.memory_space<vmem>>, %arg37: memref<1x2x384xf32, #tpu.memory_space<vmem>>) attributes {dimension_semantics = [#tpu.dimension_semantics<parallel>], iteration_bounds = array<i64: 2>, scalar_prefetch = 0 : i64, scratch_operands = 0 : i64, tpu.core_type = #tpu.core_type<tc>, window_params = [{transform_indices = @transform_0, window_bounds = array<i64: 1, 4, 384>}, {pipeline_mode = #tpu.pipeline_mode<synchronous>, transform_indices = @transform_1, window_bounds = array<i64: 9, 8, 4>}, {pipeline_mode = #tpu.pipeline_mode<synchronous>, transform_indices = @transform_2, window_bounds = array<i64: 8, 1>}, {pipeline_mode = #tpu.pipeline_mode<synchronous>, transform_indices = @transform_3, window_bounds = array<i64: 9, 8, 8>}, {pipeline_mode = #tpu.pipeline_mode<synchronous>, transform_indices = @transform_4, window_bounds = array<i64: 8, 1>}, {pipeline_mode = #tpu.pipeline_mode<synchronous>, transform_indices = @transform_5, window_bounds = array<i64: 9, 16, 8>}, {pipeline_mode = #tpu.pipeline_mode<synchronous>, transform_indices = @transform_6, window_bounds = array<i64: 16, 1>}, {pipeline_mode = #tpu.pipeline_mode<synchronous>, transform_indices = @transform_7, window_bounds = array<i64: 9, 16, 16>}, {pipeline_mode = #tpu.pipeline_mode<synchronous>, transform_indices = @transform_8, window_bounds = array<i64: 16, 1>}, {pipeline_mode = #tpu.pipeline_mode<synchronous>, transform_indices = @transform_9, window_bounds = array<i64: 9, 32, 16>}, {pipeline_mode = #tpu.pipeline_mode<synchronous>, transform_indices = @transform_10, window_bounds = array<i64: 32, 1>}, {pipeline_mode = #tpu.pipeline_mode<synchronous>, transform_indices = @transform_11, window_bounds = array<i64: 9, 32, 32>}, {pipeline_mode = #tpu.pipeline_mode<synchronous>, transform_indices = @transform_12, window_bounds = array<i64: 32, 1>}, {pipeline_mode = #tpu.pipeline_mode<synchronous>, transform_indices = @transform_13, window_bounds = array<i64: 384, 128>}, {pipeline_mode = #tpu.pipeline_mode<synchronous>, transform_indices = @transform_14, window_bounds = array<i64: 128, 128>}, {pipeline_mode = #tpu.pipeline_mode<synchronous>, transform_indices = @transform_15, window_bounds = array<i64: 4, 16, 32>}, {pipeline_mode = #tpu.pipeline_mode<synchronous>, transform_indices = @transform_16, window_bounds = array<i64: 16, 1>}, {pipeline_mode = #tpu.pipeline_mode<synchronous>, transform_indices = @transform_17, window_bounds = array<i64: 4, 128, 128>}, {pipeline_mode = #tpu.pipeline_mode<synchronous>, transform_indices = @transform_18, window_bounds = array<i64: 9, 16, 16>}, {pipeline_mode = #tpu.pipeline_mode<synchronous>, transform_indices = @transform_19, window_bounds = array<i64: 9, 16, 16>}, {pipeline_mode = #tpu.pipeline_mode<synchronous>, transform_indices = @transform_20, window_bounds = array<i64: 16, 1>}, {pipeline_mode = #tpu.pipeline_mode<synchronous>, transform_indices = @transform_21, window_bounds = array<i64: 9, 16, 16>}, {pipeline_mode = #tpu.pipeline_mode<synchronous>, transform_indices = @transform_22, window_bounds = array<i64: 16, 1>}, {pipeline_mode = #tpu.pipeline_mode<synchronous>, transform_indices = @transform_23, window_bounds = array<i64: 4, 8, 16>}, {pipeline_mode = #tpu.pipeline_mode<synchronous>, transform_indices = @transform_24, window_bounds = array<i64: 8, 1>}, {pipeline_mode = #tpu.pipeline_mode<synchronous>, transform_indices = @transform_25, window_bounds = array<i64: 4, 128, 384>}, {pipeline_mode = #tpu.pipeline_mode<synchronous>, transform_indices = @transform_26, window_bounds = array<i64: 9, 8, 8>}, {pipeline_mode = #tpu.pipeline_mode<synchronous>, transform_indices = @transform_27, window_bounds = array<i64: 9, 8, 8>}, {pipeline_mode = #tpu.pipeline_mode<synchronous>, transform_indices = @transform_28, window_bounds = array<i64: 8, 1>}, {pipeline_mode = #tpu.pipeline_mode<synchronous>, transform_indices = @transform_29, window_bounds = array<i64: 9, 8, 8>}, {pipeline_mode = #tpu.pipeline_mode<synchronous>, transform_indices = @transform_30, window_bounds = array<i64: 8, 1>}, {pipeline_mode = #tpu.pipeline_mode<synchronous>, transform_indices = @transform_31, window_bounds = array<i64: 2, 8>}, {pipeline_mode = #tpu.pipeline_mode<synchronous>, transform_indices = @transform_32, window_bounds = array<i64: 2, 1>}, {pipeline_mode = #tpu.pipeline_mode<synchronous>, transform_indices = @transform_33, window_bounds = array<i64: 1, 384>}, {pipeline_mode = #tpu.pipeline_mode<synchronous>, transform_indices = @transform_34, window_bounds = array<i64: 1, 128>}, {pipeline_mode = #tpu.pipeline_mode<synchronous>, transform_indices = @transform_35, window_bounds = array<i64: 1, 128>}, {transform_indices = @transform_36, window_bounds = array<i64: 1, 2, 384>}]} {
    %c0 = arith.constant 0 : index
    %c0_0 = arith.constant 0 : index
    %0 = vector.load %arg34[%c0, %c0_0] : memref<1x384xf32, #tpu.memory_space<vmem>>, vector<1x384xf32>
    %c0_1 = arith.constant 0 : index
    %c0_2 = arith.constant 0 : index
    %1 = vector.load %arg35[%c0_1, %c0_2] : memref<1x128xf32, #tpu.memory_space<vmem>>, vector<1x128xf32>
    %c0_3 = arith.constant 0 : index
    %c0_4 = arith.constant 0 : index
    %2 = vector.load %arg36[%c0_3, %c0_4] : memref<1x128xf32, #tpu.memory_space<vmem>>, vector<1x128xf32>
    %c0_5 = arith.constant 0 : index
    %c0_6 = arith.constant 0 : index
    %c0_7 = arith.constant 0 : index
    %3 = vector.load %arg1[%c0_5, %c0_6, %c0_7] : memref<1x4x384xf32, #tpu.memory_space<vmem>>, vector<1x4x384xf32>
    %4 = vector.shape_cast %3 : vector<1x4x384xf32> to vector<4x384xf32>
    %5 = arith.truncf %4 : vector<4x384xf32> to vector<4x384xbf16>
    %cst = arith.constant 0.000000e+00 : bf16
    %6 = vector.broadcast %cst : bf16 to vector<4x128xbf16>
    %7 = tpu.concatenate %6, %5, %6 in 1 : vector<4x128xbf16>, vector<4x384xbf16>, vector<4x128xbf16> -> vector<4x640xbf16>
    %8 = vector.extract_strided_slice %7 {offsets = [0, 109], sizes = [4, 384], strides = [1, 1]} : vector<4x640xbf16> to vector<4x384xbf16>
    %c0_8 = arith.constant 0 : index
    %c0_9 = arith.constant 0 : index
    %c0_10 = arith.constant 0 : index
    %9 = vector.load %arg2[%c0_8, %c0_9, %c0_10] : memref<9x8x4xbf16, #tpu.memory_space<vmem>>, vector<1x8x4xbf16>
    %10 = vector.shape_cast %9 : vector<1x8x4xbf16> to vector<8x4xbf16>
    %cst_11 = arith.constant dense<0.000000e+00> : vector<8x384xf32>
    %11 = tpu.matmul %10, %8, %cst_11 {dimension_numbers = #tpu.dot_dimension_numbers<[1], [0], [0], [1], [0, 0, 1, 1], [], []>} : vector<8x4xbf16>, vector<4x384xbf16>, vector<8x384xf32> -> vector<8x384xf32>
    %12 = vector.extract_strided_slice %7 {offsets = [0, 110], sizes = [4, 384], strides = [1, 1]} : vector<4x640xbf16> to vector<4x384xbf16>
    %c1 = arith.constant 1 : index
    %c0_12 = arith.constant 0 : index
    %c0_13 = arith.constant 0 : index
    %13 = vector.load %arg2[%c1, %c0_12, %c0_13] : memref<9x8x4xbf16, #tpu.memory_space<vmem>>, vector<1x8x4xbf16>
    %14 = vector.shape_cast %13 : vector<1x8x4xbf16> to vector<8x4xbf16>
    %cst_14 = arith.constant dense<0.000000e+00> : vector<8x384xf32>
    %15 = tpu.matmul %14, %12, %cst_14 {dimension_numbers = #tpu.dot_dimension_numbers<[1], [0], [0], [1], [0, 0, 1, 1], [], []>} : vector<8x4xbf16>, vector<4x384xbf16>, vector<8x384xf32> -> vector<8x384xf32>
    %16 = arith.addf %11, %15 : vector<8x384xf32>
    %17 = vector.extract_strided_slice %7 {offsets = [0, 111], sizes = [4, 384], strides = [1, 1]} : vector<4x640xbf16> to vector<4x384xbf16>
    %c2 = arith.constant 2 : index
    %c0_15 = arith.constant 0 : index
    %c0_16 = arith.constant 0 : index
    %18 = vector.load %arg2[%c2, %c0_15, %c0_16] : memref<9x8x4xbf16, #tpu.memory_space<vmem>>, vector<1x8x4xbf16>
    %19 = vector.shape_cast %18 : vector<1x8x4xbf16> to vector<8x4xbf16>
    %cst_17 = arith.constant dense<0.000000e+00> : vector<8x384xf32>
    %20 = tpu.matmul %19, %17, %cst_17 {dimension_numbers = #tpu.dot_dimension_numbers<[1], [0], [0], [1], [0, 0, 1, 1], [], []>} : vector<8x4xbf16>, vector<4x384xbf16>, vector<8x384xf32> -> vector<8x384xf32>
    %21 = arith.addf %16, %20 : vector<8x384xf32>
    %22 = vector.extract_strided_slice %7 {offsets = [0, 127], sizes = [4, 384], strides = [1, 1]} : vector<4x640xbf16> to vector<4x384xbf16>
    %c3 = arith.constant 3 : index
    %c0_18 = arith.constant 0 : index
    %c0_19 = arith.constant 0 : index
    %23 = vector.load %arg2[%c3, %c0_18, %c0_19] : memref<9x8x4xbf16, #tpu.memory_space<vmem>>, vector<1x8x4xbf16>
    %24 = vector.shape_cast %23 : vector<1x8x4xbf16> to vector<8x4xbf16>
    %cst_20 = arith.constant dense<0.000000e+00> : vector<8x384xf32>
    %25 = tpu.matmul %24, %22, %cst_20 {dimension_numbers = #tpu.dot_dimension_numbers<[1], [0], [0], [1], [0, 0, 1, 1], [], []>} : vector<8x4xbf16>, vector<4x384xbf16>, vector<8x384xf32> -> vector<8x384xf32>
    %26 = arith.addf %21, %25 : vector<8x384xf32>
    %27 = vector.extract_strided_slice %7 {offsets = [0, 128], sizes = [4, 384], strides = [1, 1]} : vector<4x640xbf16> to vector<4x384xbf16>
    %c4 = arith.constant 4 : index
    %c0_21 = arith.constant 0 : index
    %c0_22 = arith.constant 0 : index
    %28 = vector.load %arg2[%c4, %c0_21, %c0_22] : memref<9x8x4xbf16, #tpu.memory_space<vmem>>, vector<1x8x4xbf16>
    %29 = vector.shape_cast %28 : vector<1x8x4xbf16> to vector<8x4xbf16>
    %cst_23 = arith.constant dense<0.000000e+00> : vector<8x384xf32>
    %30 = tpu.matmul %29, %27, %cst_23 {dimension_numbers = #tpu.dot_dimension_numbers<[1], [0], [0], [1], [0, 0, 1, 1], [], []>} : vector<8x4xbf16>, vector<4x384xbf16>, vector<8x384xf32> -> vector<8x384xf32>
    %31 = arith.addf %26, %30 : vector<8x384xf32>
    %32 = vector.extract_strided_slice %7 {offsets = [0, 129], sizes = [4, 384], strides = [1, 1]} : vector<4x640xbf16> to vector<4x384xbf16>
    %c5 = arith.constant 5 : index
    %c0_24 = arith.constant 0 : index
    %c0_25 = arith.constant 0 : index
    %33 = vector.load %arg2[%c5, %c0_24, %c0_25] : memref<9x8x4xbf16, #tpu.memory_space<vmem>>, vector<1x8x4xbf16>
    %34 = vector.shape_cast %33 : vector<1x8x4xbf16> to vector<8x4xbf16>
    %cst_26 = arith.constant dense<0.000000e+00> : vector<8x384xf32>
    %35 = tpu.matmul %34, %32, %cst_26 {dimension_numbers = #tpu.dot_dimension_numbers<[1], [0], [0], [1], [0, 0, 1, 1], [], []>} : vector<8x4xbf16>, vector<4x384xbf16>, vector<8x384xf32> -> vector<8x384xf32>
    %36 = arith.addf %31, %35 : vector<8x384xf32>
    %37 = vector.extract_strided_slice %7 {offsets = [0, 145], sizes = [4, 384], strides = [1, 1]} : vector<4x640xbf16> to vector<4x384xbf16>
    %c6 = arith.constant 6 : index
    %c0_27 = arith.constant 0 : index
    %c0_28 = arith.constant 0 : index
    %38 = vector.load %arg2[%c6, %c0_27, %c0_28] : memref<9x8x4xbf16, #tpu.memory_space<vmem>>, vector<1x8x4xbf16>
    %39 = vector.shape_cast %38 : vector<1x8x4xbf16> to vector<8x4xbf16>
    %cst_29 = arith.constant dense<0.000000e+00> : vector<8x384xf32>
    %40 = tpu.matmul %39, %37, %cst_29 {dimension_numbers = #tpu.dot_dimension_numbers<[1], [0], [0], [1], [0, 0, 1, 1], [], []>} : vector<8x4xbf16>, vector<4x384xbf16>, vector<8x384xf32> -> vector<8x384xf32>
    %41 = arith.addf %36, %40 : vector<8x384xf32>
    %42 = vector.extract_strided_slice %7 {offsets = [0, 146], sizes = [4, 384], strides = [1, 1]} : vector<4x640xbf16> to vector<4x384xbf16>
    %c7 = arith.constant 7 : index
    %c0_30 = arith.constant 0 : index
    %c0_31 = arith.constant 0 : index
    %43 = vector.load %arg2[%c7, %c0_30, %c0_31] : memref<9x8x4xbf16, #tpu.memory_space<vmem>>, vector<1x8x4xbf16>
    %44 = vector.shape_cast %43 : vector<1x8x4xbf16> to vector<8x4xbf16>
    %cst_32 = arith.constant dense<0.000000e+00> : vector<8x384xf32>
    %45 = tpu.matmul %44, %42, %cst_32 {dimension_numbers = #tpu.dot_dimension_numbers<[1], [0], [0], [1], [0, 0, 1, 1], [], []>} : vector<8x4xbf16>, vector<4x384xbf16>, vector<8x384xf32> -> vector<8x384xf32>
    %46 = arith.addf %41, %45 : vector<8x384xf32>
    %47 = vector.extract_strided_slice %7 {offsets = [0, 147], sizes = [4, 384], strides = [1, 1]} : vector<4x640xbf16> to vector<4x384xbf16>
    %c8 = arith.constant 8 : index
    %c0_33 = arith.constant 0 : index
    %c0_34 = arith.constant 0 : index
    %48 = vector.load %arg2[%c8, %c0_33, %c0_34] : memref<9x8x4xbf16, #tpu.memory_space<vmem>>, vector<1x8x4xbf16>
    %49 = vector.shape_cast %48 : vector<1x8x4xbf16> to vector<8x4xbf16>
    %cst_35 = arith.constant dense<0.000000e+00> : vector<8x384xf32>
    %50 = tpu.matmul %49, %47, %cst_35 {dimension_numbers = #tpu.dot_dimension_numbers<[1], [0], [0], [1], [0, 0, 1, 1], [], []>} : vector<8x4xbf16>, vector<4x384xbf16>, vector<8x384xf32> -> vector<8x384xf32>
    %51 = arith.addf %46, %50 : vector<8x384xf32>
    %c0_36 = arith.constant 0 : index
    %c0_37 = arith.constant 0 : index
    %52 = vector.load %arg3[%c0_36, %c0_37] : memref<8x1xf32, #tpu.memory_space<vmem>>, vector<8x1xf32>
    %53 = vector.broadcast %52 : vector<8x1xf32> to vector<8x384xf32>
    %54 = arith.addf %51, %53 : vector<8x384xf32>
    %cst_38 = arith.constant 0.000000e+00 : f32
    %55 = vector.broadcast %cst_38 : f32 to vector<8x384xf32>
    %56 = arith.maximumf %54, %55 : vector<8x384xf32>
    %57 = vector.broadcast %0 : vector<1x384xf32> to vector<8x384xf32>
    %58 = arith.mulf %56, %57 : vector<8x384xf32>
    %59 = arith.truncf %58 : vector<8x384xf32> to vector<8x384xbf16>
    %cst_39 = arith.constant 0.000000e+00 : bf16
    %60 = vector.broadcast %cst_39 : bf16 to vector<8x128xbf16>
    %61 = tpu.concatenate %60, %59, %60 in 1 : vector<8x128xbf16>, vector<8x384xbf16>, vector<8x128xbf16> -> vector<8x640xbf16>
    %62 = vector.extract_strided_slice %61 {offsets = [0, 109], sizes = [8, 384], strides = [1, 1]} : vector<8x640xbf16> to vector<8x384xbf16>
    %c0_40 = arith.constant 0 : index
    %c0_41 = arith.constant 0 : index
    %c0_42 = arith.constant 0 : index
    %63 = vector.load %arg4[%c0_40, %c0_41, %c0_42] : memref<9x8x8xbf16, #tpu.memory_space<vmem>>, vector<1x8x8xbf16>
    %64 = vector.shape_cast %63 : vector<1x8x8xbf16> to vector<8x8xbf16>
    %cst_43 = arith.constant dense<0.000000e+00> : vector<8x384xf32>
    %65 = tpu.matmul %64, %62, %cst_43 {dimension_numbers = #tpu.dot_dimension_numbers<[1], [0], [0], [1], [0, 0, 1, 1], [], []>} : vector<8x8xbf16>, vector<8x384xbf16>, vector<8x384xf32> -> vector<8x384xf32>
    %66 = vector.extract_strided_slice %61 {offsets = [0, 110], sizes = [8, 384], strides = [1, 1]} : vector<8x640xbf16> to vector<8x384xbf16>
    %c1_44 = arith.constant 1 : index
    %c0_45 = arith.constant 0 : index
    %c0_46 = arith.constant 0 : index
    %67 = vector.load %arg4[%c1_44, %c0_45, %c0_46] : memref<9x8x8xbf16, #tpu.memory_space<vmem>>, vector<1x8x8xbf16>
    %68 = vector.shape_cast %67 : vector<1x8x8xbf16> to vector<8x8xbf16>
    %cst_47 = arith.constant dense<0.000000e+00> : vector<8x384xf32>
    %69 = tpu.matmul %68, %66, %cst_47 {dimension_numbers = #tpu.dot_dimension_numbers<[1], [0], [0], [1], [0, 0, 1, 1], [], []>} : vector<8x8xbf16>, vector<8x384xbf16>, vector<8x384xf32> -> vector<8x384xf32>
    %70 = arith.addf %65, %69 : vector<8x384xf32>
    %71 = vector.extract_strided_slice %61 {offsets = [0, 111], sizes = [8, 384], strides = [1, 1]} : vector<8x640xbf16> to vector<8x384xbf16>
    %c2_48 = arith.constant 2 : index
    %c0_49 = arith.constant 0 : index
    %c0_50 = arith.constant 0 : index
    %72 = vector.load %arg4[%c2_48, %c0_49, %c0_50] : memref<9x8x8xbf16, #tpu.memory_space<vmem>>, vector<1x8x8xbf16>
    %73 = vector.shape_cast %72 : vector<1x8x8xbf16> to vector<8x8xbf16>
    %cst_51 = arith.constant dense<0.000000e+00> : vector<8x384xf32>
    %74 = tpu.matmul %73, %71, %cst_51 {dimension_numbers = #tpu.dot_dimension_numbers<[1], [0], [0], [1], [0, 0, 1, 1], [], []>} : vector<8x8xbf16>, vector<8x384xbf16>, vector<8x384xf32> -> vector<8x384xf32>
    %75 = arith.addf %70, %74 : vector<8x384xf32>
    %76 = vector.extract_strided_slice %61 {offsets = [0, 127], sizes = [8, 384], strides = [1, 1]} : vector<8x640xbf16> to vector<8x384xbf16>
    %c3_52 = arith.constant 3 : index
    %c0_53 = arith.constant 0 : index
    %c0_54 = arith.constant 0 : index
    %77 = vector.load %arg4[%c3_52, %c0_53, %c0_54] : memref<9x8x8xbf16, #tpu.memory_space<vmem>>, vector<1x8x8xbf16>
    %78 = vector.shape_cast %77 : vector<1x8x8xbf16> to vector<8x8xbf16>
    %cst_55 = arith.constant dense<0.000000e+00> : vector<8x384xf32>
    %79 = tpu.matmul %78, %76, %cst_55 {dimension_numbers = #tpu.dot_dimension_numbers<[1], [0], [0], [1], [0, 0, 1, 1], [], []>} : vector<8x8xbf16>, vector<8x384xbf16>, vector<8x384xf32> -> vector<8x384xf32>
    %80 = arith.addf %75, %79 : vector<8x384xf32>
    %81 = vector.extract_strided_slice %61 {offsets = [0, 128], sizes = [8, 384], strides = [1, 1]} : vector<8x640xbf16> to vector<8x384xbf16>
    %c4_56 = arith.constant 4 : index
    %c0_57 = arith.constant 0 : index
    %c0_58 = arith.constant 0 : index
    %82 = vector.load %arg4[%c4_56, %c0_57, %c0_58] : memref<9x8x8xbf16, #tpu.memory_space<vmem>>, vector<1x8x8xbf16>
    %83 = vector.shape_cast %82 : vector<1x8x8xbf16> to vector<8x8xbf16>
    %cst_59 = arith.constant dense<0.000000e+00> : vector<8x384xf32>
    %84 = tpu.matmul %83, %81, %cst_59 {dimension_numbers = #tpu.dot_dimension_numbers<[1], [0], [0], [1], [0, 0, 1, 1], [], []>} : vector<8x8xbf16>, vector<8x384xbf16>, vector<8x384xf32> -> vector<8x384xf32>
    %85 = arith.addf %80, %84 : vector<8x384xf32>
    %86 = vector.extract_strided_slice %61 {offsets = [0, 129], sizes = [8, 384], strides = [1, 1]} : vector<8x640xbf16> to vector<8x384xbf16>
    %c5_60 = arith.constant 5 : index
    %c0_61 = arith.constant 0 : index
    %c0_62 = arith.constant 0 : index
    %87 = vector.load %arg4[%c5_60, %c0_61, %c0_62] : memref<9x8x8xbf16, #tpu.memory_space<vmem>>, vector<1x8x8xbf16>
    %88 = vector.shape_cast %87 : vector<1x8x8xbf16> to vector<8x8xbf16>
    %cst_63 = arith.constant dense<0.000000e+00> : vector<8x384xf32>
    %89 = tpu.matmul %88, %86, %cst_63 {dimension_numbers = #tpu.dot_dimension_numbers<[1], [0], [0], [1], [0, 0, 1, 1], [], []>} : vector<8x8xbf16>, vector<8x384xbf16>, vector<8x384xf32> -> vector<8x384xf32>
    %90 = arith.addf %85, %89 : vector<8x384xf32>
    %91 = vector.extract_strided_slice %61 {offsets = [0, 145], sizes = [8, 384], strides = [1, 1]} : vector<8x640xbf16> to vector<8x384xbf16>
    %c6_64 = arith.constant 6 : index
    %c0_65 = arith.constant 0 : index
    %c0_66 = arith.constant 0 : index
    %92 = vector.load %arg4[%c6_64, %c0_65, %c0_66] : memref<9x8x8xbf16, #tpu.memory_space<vmem>>, vector<1x8x8xbf16>
    %93 = vector.shape_cast %92 : vector<1x8x8xbf16> to vector<8x8xbf16>
    %cst_67 = arith.constant dense<0.000000e+00> : vector<8x384xf32>
    %94 = tpu.matmul %93, %91, %cst_67 {dimension_numbers = #tpu.dot_dimension_numbers<[1], [0], [0], [1], [0, 0, 1, 1], [], []>} : vector<8x8xbf16>, vector<8x384xbf16>, vector<8x384xf32> -> vector<8x384xf32>
    %95 = arith.addf %90, %94 : vector<8x384xf32>
    %96 = vector.extract_strided_slice %61 {offsets = [0, 146], sizes = [8, 384], strides = [1, 1]} : vector<8x640xbf16> to vector<8x384xbf16>
    %c7_68 = arith.constant 7 : index
    %c0_69 = arith.constant 0 : index
    %c0_70 = arith.constant 0 : index
    %97 = vector.load %arg4[%c7_68, %c0_69, %c0_70] : memref<9x8x8xbf16, #tpu.memory_space<vmem>>, vector<1x8x8xbf16>
    %98 = vector.shape_cast %97 : vector<1x8x8xbf16> to vector<8x8xbf16>
    %cst_71 = arith.constant dense<0.000000e+00> : vector<8x384xf32>
    %99 = tpu.matmul %98, %96, %cst_71 {dimension_numbers = #tpu.dot_dimension_numbers<[1], [0], [0], [1], [0, 0, 1, 1], [], []>} : vector<8x8xbf16>, vector<8x384xbf16>, vector<8x384xf32> -> vector<8x384xf32>
    %100 = arith.addf %95, %99 : vector<8x384xf32>
    %101 = vector.extract_strided_slice %61 {offsets = [0, 147], sizes = [8, 384], strides = [1, 1]} : vector<8x640xbf16> to vector<8x384xbf16>
    %c8_72 = arith.constant 8 : index
    %c0_73 = arith.constant 0 : index
    %c0_74 = arith.constant 0 : index
    %102 = vector.load %arg4[%c8_72, %c0_73, %c0_74] : memref<9x8x8xbf16, #tpu.memory_space<vmem>>, vector<1x8x8xbf16>
    %103 = vector.shape_cast %102 : vector<1x8x8xbf16> to vector<8x8xbf16>
    %cst_75 = arith.constant dense<0.000000e+00> : vector<8x384xf32>
    %104 = tpu.matmul %103, %101, %cst_75 {dimension_numbers = #tpu.dot_dimension_numbers<[1], [0], [0], [1], [0, 0, 1, 1], [], []>} : vector<8x8xbf16>, vector<8x384xbf16>, vector<8x384xf32> -> vector<8x384xf32>
    %105 = arith.addf %100, %104 : vector<8x384xf32>
    %c0_76 = arith.constant 0 : index
    %c0_77 = arith.constant 0 : index
    %106 = vector.load %arg5[%c0_76, %c0_77] : memref<8x1xf32, #tpu.memory_space<vmem>>, vector<8x1xf32>
    %107 = vector.broadcast %106 : vector<8x1xf32> to vector<8x384xf32>
    %108 = arith.addf %105, %107 : vector<8x384xf32>
    %cst_78 = arith.constant 0.000000e+00 : f32
    %109 = vector.broadcast %cst_78 : f32 to vector<8x384xf32>
    %110 = arith.maximumf %108, %109 : vector<8x384xf32>
    %111 = vector.broadcast %0 : vector<1x384xf32> to vector<8x384xf32>
    %112 = arith.mulf %110, %111 : vector<8x384xf32>
    %c0_79 = arith.constant 0 : index
    %c0_80 = arith.constant 0 : index
    %113 = vector.load %arg14[%c0_79, %c0_80] : memref<384x128xf32, #tpu.memory_space<vmem>>, vector<384x128xf32>
    %cst_81 = arith.constant dense<0.000000e+00> : vector<8x128xf32>
    %114 = tpu.matmul %112, %113, %cst_81 {dimension_numbers = #tpu.dot_dimension_numbers<[1], [0], [0], [1], [0, 0, 1, 1], [], []>} : vector<8x384xf32>, vector<384x128xf32>, vector<8x128xf32> -> vector<8x128xf32>
    %115 = arith.truncf %114 : vector<8x128xf32> to vector<8x128xbf16>
    %cst_82 = arith.constant 0.000000e+00 : bf16
    %116 = vector.broadcast %cst_82 : bf16 to vector<8x128xbf16>
    %117 = tpu.concatenate %116, %115, %116 in 1 : vector<8x128xbf16>, vector<8x128xbf16>, vector<8x128xbf16> -> vector<8x384xbf16>
    %118 = vector.extract_strided_slice %117 {offsets = [0, 117], sizes = [8, 128], strides = [1, 1]} : vector<8x384xbf16> to vector<8x128xbf16>
    %c0_83 = arith.constant 0 : index
    %c0_84 = arith.constant 0 : index
    %c0_85 = arith.constant 0 : index
    %119 = vector.load %arg6[%c0_83, %c0_84, %c0_85] : memref<9x16x8xbf16, #tpu.memory_space<vmem>>, vector<1x16x8xbf16>
    %120 = vector.shape_cast %119 : vector<1x16x8xbf16> to vector<16x8xbf16>
    %cst_86 = arith.constant dense<0.000000e+00> : vector<16x128xf32>
    %121 = tpu.matmul %120, %118, %cst_86 {dimension_numbers = #tpu.dot_dimension_numbers<[1], [0], [0], [1], [0, 0, 1, 1], [], []>} : vector<16x8xbf16>, vector<8x128xbf16>, vector<16x128xf32> -> vector<16x128xf32>
    %122 = vector.extract_strided_slice %117 {offsets = [0, 118], sizes = [8, 128], strides = [1, 1]} : vector<8x384xbf16> to vector<8x128xbf16>
    %c1_87 = arith.constant 1 : index
    %c0_88 = arith.constant 0 : index
    %c0_89 = arith.constant 0 : index
    %123 = vector.load %arg6[%c1_87, %c0_88, %c0_89] : memref<9x16x8xbf16, #tpu.memory_space<vmem>>, vector<1x16x8xbf16>
    %124 = vector.shape_cast %123 : vector<1x16x8xbf16> to vector<16x8xbf16>
    %cst_90 = arith.constant dense<0.000000e+00> : vector<16x128xf32>
    %125 = tpu.matmul %124, %122, %cst_90 {dimension_numbers = #tpu.dot_dimension_numbers<[1], [0], [0], [1], [0, 0, 1, 1], [], []>} : vector<16x8xbf16>, vector<8x128xbf16>, vector<16x128xf32> -> vector<16x128xf32>
    %126 = arith.addf %121, %125 : vector<16x128xf32>
    %127 = vector.extract_strided_slice %117 {offsets = [0, 119], sizes = [8, 128], strides = [1, 1]} : vector<8x384xbf16> to vector<8x128xbf16>
    %c2_91 = arith.constant 2 : index
    %c0_92 = arith.constant 0 : index
    %c0_93 = arith.constant 0 : index
    %128 = vector.load %arg6[%c2_91, %c0_92, %c0_93] : memref<9x16x8xbf16, #tpu.memory_space<vmem>>, vector<1x16x8xbf16>
    %129 = vector.shape_cast %128 : vector<1x16x8xbf16> to vector<16x8xbf16>
    %cst_94 = arith.constant dense<0.000000e+00> : vector<16x128xf32>
    %130 = tpu.matmul %129, %127, %cst_94 {dimension_numbers = #tpu.dot_dimension_numbers<[1], [0], [0], [1], [0, 0, 1, 1], [], []>} : vector<16x8xbf16>, vector<8x128xbf16>, vector<16x128xf32> -> vector<16x128xf32>
    %131 = arith.addf %126, %130 : vector<16x128xf32>
    %132 = vector.extract_strided_slice %117 {offsets = [0, 127], sizes = [8, 128], strides = [1, 1]} : vector<8x384xbf16> to vector<8x128xbf16>
    %c3_95 = arith.constant 3 : index
    %c0_96 = arith.constant 0 : index
    %c0_97 = arith.constant 0 : index
    %133 = vector.load %arg6[%c3_95, %c0_96, %c0_97] : memref<9x16x8xbf16, #tpu.memory_space<vmem>>, vector<1x16x8xbf16>
    %134 = vector.shape_cast %133 : vector<1x16x8xbf16> to vector<16x8xbf16>
    %cst_98 = arith.constant dense<0.000000e+00> : vector<16x128xf32>
    %135 = tpu.matmul %134, %132, %cst_98 {dimension_numbers = #tpu.dot_dimension_numbers<[1], [0], [0], [1], [0, 0, 1, 1], [], []>} : vector<16x8xbf16>, vector<8x128xbf16>, vector<16x128xf32> -> vector<16x128xf32>
    %136 = arith.addf %131, %135 : vector<16x128xf32>
    %137 = vector.extract_strided_slice %117 {offsets = [0, 128], sizes = [8, 128], strides = [1, 1]} : vector<8x384xbf16> to vector<8x128xbf16>
    %c4_99 = arith.constant 4 : index
    %c0_100 = arith.constant 0 : index
    %c0_101 = arith.constant 0 : index
    %138 = vector.load %arg6[%c4_99, %c0_100, %c0_101] : memref<9x16x8xbf16, #tpu.memory_space<vmem>>, vector<1x16x8xbf16>
    %139 = vector.shape_cast %138 : vector<1x16x8xbf16> to vector<16x8xbf16>
    %cst_102 = arith.constant dense<0.000000e+00> : vector<16x128xf32>
    %140 = tpu.matmul %139, %137, %cst_102 {dimension_numbers = #tpu.dot_dimension_numbers<[1], [0], [0], [1], [0, 0, 1, 1], [], []>} : vector<16x8xbf16>, vector<8x128xbf16>, vector<16x128xf32> -> vector<16x128xf32>
    %141 = arith.addf %136, %140 : vector<16x128xf32>
    %142 = vector.extract_strided_slice %117 {offsets = [0, 129], sizes = [8, 128], strides = [1, 1]} : vector<8x384xbf16> to vector<8x128xbf16>
    %c5_103 = arith.constant 5 : index
    %c0_104 = arith.constant 0 : index
    %c0_105 = arith.constant 0 : index
    %143 = vector.load %arg6[%c5_103, %c0_104, %c0_105] : memref<9x16x8xbf16, #tpu.memory_space<vmem>>, vector<1x16x8xbf16>
    %144 = vector.shape_cast %143 : vector<1x16x8xbf16> to vector<16x8xbf16>
    %cst_106 = arith.constant dense<0.000000e+00> : vector<16x128xf32>
    %145 = tpu.matmul %144, %142, %cst_106 {dimension_numbers = #tpu.dot_dimension_numbers<[1], [0], [0], [1], [0, 0, 1, 1], [], []>} : vector<16x8xbf16>, vector<8x128xbf16>, vector<16x128xf32> -> vector<16x128xf32>
    %146 = arith.addf %141, %145 : vector<16x128xf32>
    %147 = vector.extract_strided_slice %117 {offsets = [0, 137], sizes = [8, 128], strides = [1, 1]} : vector<8x384xbf16> to vector<8x128xbf16>
    %c6_107 = arith.constant 6 : index
    %c0_108 = arith.constant 0 : index
    %c0_109 = arith.constant 0 : index
    %148 = vector.load %arg6[%c6_107, %c0_108, %c0_109] : memref<9x16x8xbf16, #tpu.memory_space<vmem>>, vector<1x16x8xbf16>
    %149 = vector.shape_cast %148 : vector<1x16x8xbf16> to vector<16x8xbf16>
    %cst_110 = arith.constant dense<0.000000e+00> : vector<16x128xf32>
    %150 = tpu.matmul %149, %147, %cst_110 {dimension_numbers = #tpu.dot_dimension_numbers<[1], [0], [0], [1], [0, 0, 1, 1], [], []>} : vector<16x8xbf16>, vector<8x128xbf16>, vector<16x128xf32> -> vector<16x128xf32>
    %151 = arith.addf %146, %150 : vector<16x128xf32>
    %152 = vector.extract_strided_slice %117 {offsets = [0, 138], sizes = [8, 128], strides = [1, 1]} : vector<8x384xbf16> to vector<8x128xbf16>
    %c7_111 = arith.constant 7 : index
    %c0_112 = arith.constant 0 : index
    %c0_113 = arith.constant 0 : index
    %153 = vector.load %arg6[%c7_111, %c0_112, %c0_113] : memref<9x16x8xbf16, #tpu.memory_space<vmem>>, vector<1x16x8xbf16>
    %154 = vector.shape_cast %153 : vector<1x16x8xbf16> to vector<16x8xbf16>
    %cst_114 = arith.constant dense<0.000000e+00> : vector<16x128xf32>
    %155 = tpu.matmul %154, %152, %cst_114 {dimension_numbers = #tpu.dot_dimension_numbers<[1], [0], [0], [1], [0, 0, 1, 1], [], []>} : vector<16x8xbf16>, vector<8x128xbf16>, vector<16x128xf32> -> vector<16x128xf32>
    %156 = arith.addf %151, %155 : vector<16x128xf32>
    %157 = vector.extract_strided_slice %117 {offsets = [0, 139], sizes = [8, 128], strides = [1, 1]} : vector<8x384xbf16> to vector<8x128xbf16>
    %c8_115 = arith.constant 8 : index
    %c0_116 = arith.constant 0 : index
    %c0_117 = arith.constant 0 : index
    %158 = vector.load %arg6[%c8_115, %c0_116, %c0_117] : memref<9x16x8xbf16, #tpu.memory_space<vmem>>, vector<1x16x8xbf16>
    %159 = vector.shape_cast %158 : vector<1x16x8xbf16> to vector<16x8xbf16>
    %cst_118 = arith.constant dense<0.000000e+00> : vector<16x128xf32>
    %160 = tpu.matmul %159, %157, %cst_118 {dimension_numbers = #tpu.dot_dimension_numbers<[1], [0], [0], [1], [0, 0, 1, 1], [], []>} : vector<16x8xbf16>, vector<8x128xbf16>, vector<16x128xf32> -> vector<16x128xf32>
    %161 = arith.addf %156, %160 : vector<16x128xf32>
    %c0_119 = arith.constant 0 : index
    %c0_120 = arith.constant 0 : index
    %162 = vector.load %arg7[%c0_119, %c0_120] : memref<16x1xf32, #tpu.memory_space<vmem>>, vector<16x1xf32>
    %163 = vector.broadcast %162 : vector<16x1xf32> to vector<16x128xf32>
    %164 = arith.addf %161, %163 : vector<16x128xf32>
    %cst_121 = arith.constant 0.000000e+00 : f32
    %165 = vector.broadcast %cst_121 : f32 to vector<16x128xf32>
    %166 = arith.maximumf %164, %165 : vector<16x128xf32>
    %167 = vector.broadcast %1 : vector<1x128xf32> to vector<16x128xf32>
    %168 = arith.mulf %166, %167 : vector<16x128xf32>
    %169 = arith.truncf %168 : vector<16x128xf32> to vector<16x128xbf16>
    %cst_122 = arith.constant 0.000000e+00 : bf16
    %170 = vector.broadcast %cst_122 : bf16 to vector<16x128xbf16>
    %171 = tpu.concatenate %170, %169, %170 in 1 : vector<16x128xbf16>, vector<16x128xbf16>, vector<16x128xbf16> -> vector<16x384xbf16>
    %172 = vector.extract_strided_slice %171 {offsets = [0, 117], sizes = [16, 128], strides = [1, 1]} : vector<16x384xbf16> to vector<16x128xbf16>
    %c0_123 = arith.constant 0 : index
    %c0_124 = arith.constant 0 : index
    %c0_125 = arith.constant 0 : index
    %173 = vector.load %arg8[%c0_123, %c0_124, %c0_125] : memref<9x16x16xbf16, #tpu.memory_space<vmem>>, vector<1x16x16xbf16>
    %174 = vector.shape_cast %173 : vector<1x16x16xbf16> to vector<16x16xbf16>
    %cst_126 = arith.constant dense<0.000000e+00> : vector<16x128xf32>
    %175 = tpu.matmul %174, %172, %cst_126 {dimension_numbers = #tpu.dot_dimension_numbers<[1], [0], [0], [1], [0, 0, 1, 1], [], []>} : vector<16x16xbf16>, vector<16x128xbf16>, vector<16x128xf32> -> vector<16x128xf32>
    %176 = vector.extract_strided_slice %171 {offsets = [0, 118], sizes = [16, 128], strides = [1, 1]} : vector<16x384xbf16> to vector<16x128xbf16>
    %c1_127 = arith.constant 1 : index
    %c0_128 = arith.constant 0 : index
    %c0_129 = arith.constant 0 : index
    %177 = vector.load %arg8[%c1_127, %c0_128, %c0_129] : memref<9x16x16xbf16, #tpu.memory_space<vmem>>, vector<1x16x16xbf16>
    %178 = vector.shape_cast %177 : vector<1x16x16xbf16> to vector<16x16xbf16>
    %cst_130 = arith.constant dense<0.000000e+00> : vector<16x128xf32>
    %179 = tpu.matmul %178, %176, %cst_130 {dimension_numbers = #tpu.dot_dimension_numbers<[1], [0], [0], [1], [0, 0, 1, 1], [], []>} : vector<16x16xbf16>, vector<16x128xbf16>, vector<16x128xf32> -> vector<16x128xf32>
    %180 = arith.addf %175, %179 : vector<16x128xf32>
    %181 = vector.extract_strided_slice %171 {offsets = [0, 119], sizes = [16, 128], strides = [1, 1]} : vector<16x384xbf16> to vector<16x128xbf16>
    %c2_131 = arith.constant 2 : index
    %c0_132 = arith.constant 0 : index
    %c0_133 = arith.constant 0 : index
    %182 = vector.load %arg8[%c2_131, %c0_132, %c0_133] : memref<9x16x16xbf16, #tpu.memory_space<vmem>>, vector<1x16x16xbf16>
    %183 = vector.shape_cast %182 : vector<1x16x16xbf16> to vector<16x16xbf16>
    %cst_134 = arith.constant dense<0.000000e+00> : vector<16x128xf32>
    %184 = tpu.matmul %183, %181, %cst_134 {dimension_numbers = #tpu.dot_dimension_numbers<[1], [0], [0], [1], [0, 0, 1, 1], [], []>} : vector<16x16xbf16>, vector<16x128xbf16>, vector<16x128xf32> -> vector<16x128xf32>
    %185 = arith.addf %180, %184 : vector<16x128xf32>
    %186 = vector.extract_strided_slice %171 {offsets = [0, 127], sizes = [16, 128], strides = [1, 1]} : vector<16x384xbf16> to vector<16x128xbf16>
    %c3_135 = arith.constant 3 : index
    %c0_136 = arith.constant 0 : index
    %c0_137 = arith.constant 0 : index
    %187 = vector.load %arg8[%c3_135, %c0_136, %c0_137] : memref<9x16x16xbf16, #tpu.memory_space<vmem>>, vector<1x16x16xbf16>
    %188 = vector.shape_cast %187 : vector<1x16x16xbf16> to vector<16x16xbf16>
    %cst_138 = arith.constant dense<0.000000e+00> : vector<16x128xf32>
    %189 = tpu.matmul %188, %186, %cst_138 {dimension_numbers = #tpu.dot_dimension_numbers<[1], [0], [0], [1], [0, 0, 1, 1], [], []>} : vector<16x16xbf16>, vector<16x128xbf16>, vector<16x128xf32> -> vector<16x128xf32>
    %190 = arith.addf %185, %189 : vector<16x128xf32>
    %191 = vector.extract_strided_slice %171 {offsets = [0, 128], sizes = [16, 128], strides = [1, 1]} : vector<16x384xbf16> to vector<16x128xbf16>
    %c4_139 = arith.constant 4 : index
    %c0_140 = arith.constant 0 : index
    %c0_141 = arith.constant 0 : index
    %192 = vector.load %arg8[%c4_139, %c0_140, %c0_141] : memref<9x16x16xbf16, #tpu.memory_space<vmem>>, vector<1x16x16xbf16>
    %193 = vector.shape_cast %192 : vector<1x16x16xbf16> to vector<16x16xbf16>
    %cst_142 = arith.constant dense<0.000000e+00> : vector<16x128xf32>
    %194 = tpu.matmul %193, %191, %cst_142 {dimension_numbers = #tpu.dot_dimension_numbers<[1], [0], [0], [1], [0, 0, 1, 1], [], []>} : vector<16x16xbf16>, vector<16x128xbf16>, vector<16x128xf32> -> vector<16x128xf32>
    %195 = arith.addf %190, %194 : vector<16x128xf32>
    %196 = vector.extract_strided_slice %171 {offsets = [0, 129], sizes = [16, 128], strides = [1, 1]} : vector<16x384xbf16> to vector<16x128xbf16>
    %c5_143 = arith.constant 5 : index
    %c0_144 = arith.constant 0 : index
    %c0_145 = arith.constant 0 : index
    %197 = vector.load %arg8[%c5_143, %c0_144, %c0_145] : memref<9x16x16xbf16, #tpu.memory_space<vmem>>, vector<1x16x16xbf16>
    %198 = vector.shape_cast %197 : vector<1x16x16xbf16> to vector<16x16xbf16>
    %cst_146 = arith.constant dense<0.000000e+00> : vector<16x128xf32>
    %199 = tpu.matmul %198, %196, %cst_146 {dimension_numbers = #tpu.dot_dimension_numbers<[1], [0], [0], [1], [0, 0, 1, 1], [], []>} : vector<16x16xbf16>, vector<16x128xbf16>, vector<16x128xf32> -> vector<16x128xf32>
    %200 = arith.addf %195, %199 : vector<16x128xf32>
    %201 = vector.extract_strided_slice %171 {offsets = [0, 137], sizes = [16, 128], strides = [1, 1]} : vector<16x384xbf16> to vector<16x128xbf16>
    %c6_147 = arith.constant 6 : index
    %c0_148 = arith.constant 0 : index
    %c0_149 = arith.constant 0 : index
    %202 = vector.load %arg8[%c6_147, %c0_148, %c0_149] : memref<9x16x16xbf16, #tpu.memory_space<vmem>>, vector<1x16x16xbf16>
    %203 = vector.shape_cast %202 : vector<1x16x16xbf16> to vector<16x16xbf16>
    %cst_150 = arith.constant dense<0.000000e+00> : vector<16x128xf32>
    %204 = tpu.matmul %203, %201, %cst_150 {dimension_numbers = #tpu.dot_dimension_numbers<[1], [0], [0], [1], [0, 0, 1, 1], [], []>} : vector<16x16xbf16>, vector<16x128xbf16>, vector<16x128xf32> -> vector<16x128xf32>
    %205 = arith.addf %200, %204 : vector<16x128xf32>
    %206 = vector.extract_strided_slice %171 {offsets = [0, 138], sizes = [16, 128], strides = [1, 1]} : vector<16x384xbf16> to vector<16x128xbf16>
    %c7_151 = arith.constant 7 : index
    %c0_152 = arith.constant 0 : index
    %c0_153 = arith.constant 0 : index
    %207 = vector.load %arg8[%c7_151, %c0_152, %c0_153] : memref<9x16x16xbf16, #tpu.memory_space<vmem>>, vector<1x16x16xbf16>
    %208 = vector.shape_cast %207 : vector<1x16x16xbf16> to vector<16x16xbf16>
    %cst_154 = arith.constant dense<0.000000e+00> : vector<16x128xf32>
    %209 = tpu.matmul %208, %206, %cst_154 {dimension_numbers = #tpu.dot_dimension_numbers<[1], [0], [0], [1], [0, 0, 1, 1], [], []>} : vector<16x16xbf16>, vector<16x128xbf16>, vector<16x128xf32> -> vector<16x128xf32>
    %210 = arith.addf %205, %209 : vector<16x128xf32>
    %211 = vector.extract_strided_slice %171 {offsets = [0, 139], sizes = [16, 128], strides = [1, 1]} : vector<16x384xbf16> to vector<16x128xbf16>
    %c8_155 = arith.constant 8 : index
    %c0_156 = arith.constant 0 : index
    %c0_157 = arith.constant 0 : index
    %212 = vector.load %arg8[%c8_155, %c0_156, %c0_157] : memref<9x16x16xbf16, #tpu.memory_space<vmem>>, vector<1x16x16xbf16>
    %213 = vector.shape_cast %212 : vector<1x16x16xbf16> to vector<16x16xbf16>
    %cst_158 = arith.constant dense<0.000000e+00> : vector<16x128xf32>
    %214 = tpu.matmul %213, %211, %cst_158 {dimension_numbers = #tpu.dot_dimension_numbers<[1], [0], [0], [1], [0, 0, 1, 1], [], []>} : vector<16x16xbf16>, vector<16x128xbf16>, vector<16x128xf32> -> vector<16x128xf32>
    %215 = arith.addf %210, %214 : vector<16x128xf32>
    %c0_159 = arith.constant 0 : index
    %c0_160 = arith.constant 0 : index
    %216 = vector.load %arg9[%c0_159, %c0_160] : memref<16x1xf32, #tpu.memory_space<vmem>>, vector<16x1xf32>
    %217 = vector.broadcast %216 : vector<16x1xf32> to vector<16x128xf32>
    %218 = arith.addf %215, %217 : vector<16x128xf32>
    %cst_161 = arith.constant 0.000000e+00 : f32
    %219 = vector.broadcast %cst_161 : f32 to vector<16x128xf32>
    %220 = arith.maximumf %218, %219 : vector<16x128xf32>
    %221 = vector.broadcast %1 : vector<1x128xf32> to vector<16x128xf32>
    %222 = arith.mulf %220, %221 : vector<16x128xf32>
    %c0_162 = arith.constant 0 : index
    %c0_163 = arith.constant 0 : index
    %223 = vector.load %arg15[%c0_162, %c0_163] : memref<128x128xf32, #tpu.memory_space<vmem>>, vector<128x128xf32>
    %cst_164 = arith.constant dense<0.000000e+00> : vector<16x128xf32>
    %224 = tpu.matmul %222, %223, %cst_164 {dimension_numbers = #tpu.dot_dimension_numbers<[1], [0], [0], [1], [0, 0, 1, 1], [], []>} : vector<16x128xf32>, vector<128x128xf32>, vector<16x128xf32> -> vector<16x128xf32>
    %225 = arith.truncf %224 : vector<16x128xf32> to vector<16x128xbf16>
    %cst_165 = arith.constant 0.000000e+00 : bf16
    %226 = vector.broadcast %cst_165 : bf16 to vector<16x128xbf16>
    %227 = tpu.concatenate %226, %225, %226 in 1 : vector<16x128xbf16>, vector<16x128xbf16>, vector<16x128xbf16> -> vector<16x384xbf16>
    %228 = vector.extract_strided_slice %227 {offsets = [0, 121], sizes = [16, 128], strides = [1, 1]} : vector<16x384xbf16> to vector<16x128xbf16>
    %c0_166 = arith.constant 0 : index
    %c0_167 = arith.constant 0 : index
    %c0_168 = arith.constant 0 : index
    %229 = vector.load %arg10[%c0_166, %c0_167, %c0_168] : memref<9x32x16xbf16, #tpu.memory_space<vmem>>, vector<1x32x16xbf16>
    %230 = vector.shape_cast %229 : vector<1x32x16xbf16> to vector<32x16xbf16>
    %cst_169 = arith.constant dense<0.000000e+00> : vector<32x128xf32>
    %231 = tpu.matmul %230, %228, %cst_169 {dimension_numbers = #tpu.dot_dimension_numbers<[1], [0], [0], [1], [0, 0, 1, 1], [], []>} : vector<32x16xbf16>, vector<16x128xbf16>, vector<32x128xf32> -> vector<32x128xf32>
    %232 = vector.extract_strided_slice %227 {offsets = [0, 122], sizes = [16, 128], strides = [1, 1]} : vector<16x384xbf16> to vector<16x128xbf16>
    %c1_170 = arith.constant 1 : index
    %c0_171 = arith.constant 0 : index
    %c0_172 = arith.constant 0 : index
    %233 = vector.load %arg10[%c1_170, %c0_171, %c0_172] : memref<9x32x16xbf16, #tpu.memory_space<vmem>>, vector<1x32x16xbf16>
    %234 = vector.shape_cast %233 : vector<1x32x16xbf16> to vector<32x16xbf16>
    %cst_173 = arith.constant dense<0.000000e+00> : vector<32x128xf32>
    %235 = tpu.matmul %234, %232, %cst_173 {dimension_numbers = #tpu.dot_dimension_numbers<[1], [0], [0], [1], [0, 0, 1, 1], [], []>} : vector<32x16xbf16>, vector<16x128xbf16>, vector<32x128xf32> -> vector<32x128xf32>
    %236 = arith.addf %231, %235 : vector<32x128xf32>
    %237 = vector.extract_strided_slice %227 {offsets = [0, 123], sizes = [16, 128], strides = [1, 1]} : vector<16x384xbf16> to vector<16x128xbf16>
    %c2_174 = arith.constant 2 : index
    %c0_175 = arith.constant 0 : index
    %c0_176 = arith.constant 0 : index
    %238 = vector.load %arg10[%c2_174, %c0_175, %c0_176] : memref<9x32x16xbf16, #tpu.memory_space<vmem>>, vector<1x32x16xbf16>
    %239 = vector.shape_cast %238 : vector<1x32x16xbf16> to vector<32x16xbf16>
    %cst_177 = arith.constant dense<0.000000e+00> : vector<32x128xf32>
    %240 = tpu.matmul %239, %237, %cst_177 {dimension_numbers = #tpu.dot_dimension_numbers<[1], [0], [0], [1], [0, 0, 1, 1], [], []>} : vector<32x16xbf16>, vector<16x128xbf16>, vector<32x128xf32> -> vector<32x128xf32>
    %241 = arith.addf %236, %240 : vector<32x128xf32>
    %242 = vector.extract_strided_slice %227 {offsets = [0, 127], sizes = [16, 128], strides = [1, 1]} : vector<16x384xbf16> to vector<16x128xbf16>
    %c3_178 = arith.constant 3 : index
    %c0_179 = arith.constant 0 : index
    %c0_180 = arith.constant 0 : index
    %243 = vector.load %arg10[%c3_178, %c0_179, %c0_180] : memref<9x32x16xbf16, #tpu.memory_space<vmem>>, vector<1x32x16xbf16>
    %244 = vector.shape_cast %243 : vector<1x32x16xbf16> to vector<32x16xbf16>
    %cst_181 = arith.constant dense<0.000000e+00> : vector<32x128xf32>
    %245 = tpu.matmul %244, %242, %cst_181 {dimension_numbers = #tpu.dot_dimension_numbers<[1], [0], [0], [1], [0, 0, 1, 1], [], []>} : vector<32x16xbf16>, vector<16x128xbf16>, vector<32x128xf32> -> vector<32x128xf32>
    %246 = arith.addf %241, %245 : vector<32x128xf32>
    %247 = vector.extract_strided_slice %227 {offsets = [0, 128], sizes = [16, 128], strides = [1, 1]} : vector<16x384xbf16> to vector<16x128xbf16>
    %c4_182 = arith.constant 4 : index
    %c0_183 = arith.constant 0 : index
    %c0_184 = arith.constant 0 : index
    %248 = vector.load %arg10[%c4_182, %c0_183, %c0_184] : memref<9x32x16xbf16, #tpu.memory_space<vmem>>, vector<1x32x16xbf16>
    %249 = vector.shape_cast %248 : vector<1x32x16xbf16> to vector<32x16xbf16>
    %cst_185 = arith.constant dense<0.000000e+00> : vector<32x128xf32>
    %250 = tpu.matmul %249, %247, %cst_185 {dimension_numbers = #tpu.dot_dimension_numbers<[1], [0], [0], [1], [0, 0, 1, 1], [], []>} : vector<32x16xbf16>, vector<16x128xbf16>, vector<32x128xf32> -> vector<32x128xf32>
    %251 = arith.addf %246, %250 : vector<32x128xf32>
    %252 = vector.extract_strided_slice %227 {offsets = [0, 129], sizes = [16, 128], strides = [1, 1]} : vector<16x384xbf16> to vector<16x128xbf16>
    %c5_186 = arith.constant 5 : index
    %c0_187 = arith.constant 0 : index
    %c0_188 = arith.constant 0 : index
    %253 = vector.load %arg10[%c5_186, %c0_187, %c0_188] : memref<9x32x16xbf16, #tpu.memory_space<vmem>>, vector<1x32x16xbf16>
    %254 = vector.shape_cast %253 : vector<1x32x16xbf16> to vector<32x16xbf16>
    %cst_189 = arith.constant dense<0.000000e+00> : vector<32x128xf32>
    %255 = tpu.matmul %254, %252, %cst_189 {dimension_numbers = #tpu.dot_dimension_numbers<[1], [0], [0], [1], [0, 0, 1, 1], [], []>} : vector<32x16xbf16>, vector<16x128xbf16>, vector<32x128xf32> -> vector<32x128xf32>
    %256 = arith.addf %251, %255 : vector<32x128xf32>
    %257 = vector.extract_strided_slice %227 {offsets = [0, 133], sizes = [16, 128], strides = [1, 1]} : vector<16x384xbf16> to vector<16x128xbf16>
    %c6_190 = arith.constant 6 : index
    %c0_191 = arith.constant 0 : index
    %c0_192 = arith.constant 0 : index
    %258 = vector.load %arg10[%c6_190, %c0_191, %c0_192] : memref<9x32x16xbf16, #tpu.memory_space<vmem>>, vector<1x32x16xbf16>
    %259 = vector.shape_cast %258 : vector<1x32x16xbf16> to vector<32x16xbf16>
    %cst_193 = arith.constant dense<0.000000e+00> : vector<32x128xf32>
    %260 = tpu.matmul %259, %257, %cst_193 {dimension_numbers = #tpu.dot_dimension_numbers<[1], [0], [0], [1], [0, 0, 1, 1], [], []>} : vector<32x16xbf16>, vector<16x128xbf16>, vector<32x128xf32> -> vector<32x128xf32>
    %261 = arith.addf %256, %260 : vector<32x128xf32>
    %262 = vector.extract_strided_slice %227 {offsets = [0, 134], sizes = [16, 128], strides = [1, 1]} : vector<16x384xbf16> to vector<16x128xbf16>
    %c7_194 = arith.constant 7 : index
    %c0_195 = arith.constant 0 : index
    %c0_196 = arith.constant 0 : index
    %263 = vector.load %arg10[%c7_194, %c0_195, %c0_196] : memref<9x32x16xbf16, #tpu.memory_space<vmem>>, vector<1x32x16xbf16>
    %264 = vector.shape_cast %263 : vector<1x32x16xbf16> to vector<32x16xbf16>
    %cst_197 = arith.constant dense<0.000000e+00> : vector<32x128xf32>
    %265 = tpu.matmul %264, %262, %cst_197 {dimension_numbers = #tpu.dot_dimension_numbers<[1], [0], [0], [1], [0, 0, 1, 1], [], []>} : vector<32x16xbf16>, vector<16x128xbf16>, vector<32x128xf32> -> vector<32x128xf32>
    %266 = arith.addf %261, %265 : vector<32x128xf32>
    %267 = vector.extract_strided_slice %227 {offsets = [0, 135], sizes = [16, 128], strides = [1, 1]} : vector<16x384xbf16> to vector<16x128xbf16>
    %c8_198 = arith.constant 8 : index
    %c0_199 = arith.constant 0 : index
    %c0_200 = arith.constant 0 : index
    %268 = vector.load %arg10[%c8_198, %c0_199, %c0_200] : memref<9x32x16xbf16, #tpu.memory_space<vmem>>, vector<1x32x16xbf16>
    %269 = vector.shape_cast %268 : vector<1x32x16xbf16> to vector<32x16xbf16>
    %cst_201 = arith.constant dense<0.000000e+00> : vector<32x128xf32>
    %270 = tpu.matmul %269, %267, %cst_201 {dimension_numbers = #tpu.dot_dimension_numbers<[1], [0], [0], [1], [0, 0, 1, 1], [], []>} : vector<32x16xbf16>, vector<16x128xbf16>, vector<32x128xf32> -> vector<32x128xf32>
    %271 = arith.addf %266, %270 : vector<32x128xf32>
    %c0_202 = arith.constant 0 : index
    %c0_203 = arith.constant 0 : index
    %272 = vector.load %arg11[%c0_202, %c0_203] : memref<32x1xf32, #tpu.memory_space<vmem>>, vector<32x1xf32>
    %273 = vector.broadcast %272 : vector<32x1xf32> to vector<32x128xf32>
    %274 = arith.addf %271, %273 : vector<32x128xf32>
    %cst_204 = arith.constant 0.000000e+00 : f32
    %275 = vector.broadcast %cst_204 : f32 to vector<32x128xf32>
    %276 = arith.maximumf %274, %275 : vector<32x128xf32>
    %277 = vector.broadcast %2 : vector<1x128xf32> to vector<32x128xf32>
    %278 = arith.mulf %276, %277 : vector<32x128xf32>
    %279 = arith.truncf %278 : vector<32x128xf32> to vector<32x128xbf16>
    %cst_205 = arith.constant 0.000000e+00 : bf16
    %280 = vector.broadcast %cst_205 : bf16 to vector<32x128xbf16>
    %281 = tpu.concatenate %280, %279, %280 in 1 : vector<32x128xbf16>, vector<32x128xbf16>, vector<32x128xbf16> -> vector<32x384xbf16>
    %282 = vector.extract_strided_slice %281 {offsets = [0, 121], sizes = [32, 128], strides = [1, 1]} : vector<32x384xbf16> to vector<32x128xbf16>
    %c0_206 = arith.constant 0 : index
    %c0_207 = arith.constant 0 : index
    %c0_208 = arith.constant 0 : index
    %283 = vector.load %arg12[%c0_206, %c0_207, %c0_208] : memref<9x32x32xbf16, #tpu.memory_space<vmem>>, vector<1x32x32xbf16>
    %284 = vector.shape_cast %283 : vector<1x32x32xbf16> to vector<32x32xbf16>
    %cst_209 = arith.constant dense<0.000000e+00> : vector<32x128xf32>
    %285 = tpu.matmul %284, %282, %cst_209 {dimension_numbers = #tpu.dot_dimension_numbers<[1], [0], [0], [1], [0, 0, 1, 1], [], []>} : vector<32x32xbf16>, vector<32x128xbf16>, vector<32x128xf32> -> vector<32x128xf32>
    %286 = vector.extract_strided_slice %281 {offsets = [0, 122], sizes = [32, 128], strides = [1, 1]} : vector<32x384xbf16> to vector<32x128xbf16>
    %c1_210 = arith.constant 1 : index
    %c0_211 = arith.constant 0 : index
    %c0_212 = arith.constant 0 : index
    %287 = vector.load %arg12[%c1_210, %c0_211, %c0_212] : memref<9x32x32xbf16, #tpu.memory_space<vmem>>, vector<1x32x32xbf16>
    %288 = vector.shape_cast %287 : vector<1x32x32xbf16> to vector<32x32xbf16>
    %cst_213 = arith.constant dense<0.000000e+00> : vector<32x128xf32>
    %289 = tpu.matmul %288, %286, %cst_213 {dimension_numbers = #tpu.dot_dimension_numbers<[1], [0], [0], [1], [0, 0, 1, 1], [], []>} : vector<32x32xbf16>, vector<32x128xbf16>, vector<32x128xf32> -> vector<32x128xf32>
    %290 = arith.addf %285, %289 : vector<32x128xf32>
    %291 = vector.extract_strided_slice %281 {offsets = [0, 123], sizes = [32, 128], strides = [1, 1]} : vector<32x384xbf16> to vector<32x128xbf16>
    %c2_214 = arith.constant 2 : index
    %c0_215 = arith.constant 0 : index
    %c0_216 = arith.constant 0 : index
    %292 = vector.load %arg12[%c2_214, %c0_215, %c0_216] : memref<9x32x32xbf16, #tpu.memory_space<vmem>>, vector<1x32x32xbf16>
    %293 = vector.shape_cast %292 : vector<1x32x32xbf16> to vector<32x32xbf16>
    %cst_217 = arith.constant dense<0.000000e+00> : vector<32x128xf32>
    %294 = tpu.matmul %293, %291, %cst_217 {dimension_numbers = #tpu.dot_dimension_numbers<[1], [0], [0], [1], [0, 0, 1, 1], [], []>} : vector<32x32xbf16>, vector<32x128xbf16>, vector<32x128xf32> -> vector<32x128xf32>
    %295 = arith.addf %290, %294 : vector<32x128xf32>
    %296 = vector.extract_strided_slice %281 {offsets = [0, 127], sizes = [32, 128], strides = [1, 1]} : vector<32x384xbf16> to vector<32x128xbf16>
    %c3_218 = arith.constant 3 : index
    %c0_219 = arith.constant 0 : index
    %c0_220 = arith.constant 0 : index
    %297 = vector.load %arg12[%c3_218, %c0_219, %c0_220] : memref<9x32x32xbf16, #tpu.memory_space<vmem>>, vector<1x32x32xbf16>
    %298 = vector.shape_cast %297 : vector<1x32x32xbf16> to vector<32x32xbf16>
    %cst_221 = arith.constant dense<0.000000e+00> : vector<32x128xf32>
    %299 = tpu.matmul %298, %296, %cst_221 {dimension_numbers = #tpu.dot_dimension_numbers<[1], [0], [0], [1], [0, 0, 1, 1], [], []>} : vector<32x32xbf16>, vector<32x128xbf16>, vector<32x128xf32> -> vector<32x128xf32>
    %300 = arith.addf %295, %299 : vector<32x128xf32>
    %301 = vector.extract_strided_slice %281 {offsets = [0, 128], sizes = [32, 128], strides = [1, 1]} : vector<32x384xbf16> to vector<32x128xbf16>
    %c4_222 = arith.constant 4 : index
    %c0_223 = arith.constant 0 : index
    %c0_224 = arith.constant 0 : index
    %302 = vector.load %arg12[%c4_222, %c0_223, %c0_224] : memref<9x32x32xbf16, #tpu.memory_space<vmem>>, vector<1x32x32xbf16>
    %303 = vector.shape_cast %302 : vector<1x32x32xbf16> to vector<32x32xbf16>
    %cst_225 = arith.constant dense<0.000000e+00> : vector<32x128xf32>
    %304 = tpu.matmul %303, %301, %cst_225 {dimension_numbers = #tpu.dot_dimension_numbers<[1], [0], [0], [1], [0, 0, 1, 1], [], []>} : vector<32x32xbf16>, vector<32x128xbf16>, vector<32x128xf32> -> vector<32x128xf32>
    %305 = arith.addf %300, %304 : vector<32x128xf32>
    %306 = vector.extract_strided_slice %281 {offsets = [0, 129], sizes = [32, 128], strides = [1, 1]} : vector<32x384xbf16> to vector<32x128xbf16>
    %c5_226 = arith.constant 5 : index
    %c0_227 = arith.constant 0 : index
    %c0_228 = arith.constant 0 : index
    %307 = vector.load %arg12[%c5_226, %c0_227, %c0_228] : memref<9x32x32xbf16, #tpu.memory_space<vmem>>, vector<1x32x32xbf16>
    %308 = vector.shape_cast %307 : vector<1x32x32xbf16> to vector<32x32xbf16>
    %cst_229 = arith.constant dense<0.000000e+00> : vector<32x128xf32>
    %309 = tpu.matmul %308, %306, %cst_229 {dimension_numbers = #tpu.dot_dimension_numbers<[1], [0], [0], [1], [0, 0, 1, 1], [], []>} : vector<32x32xbf16>, vector<32x128xbf16>, vector<32x128xf32> -> vector<32x128xf32>
    %310 = arith.addf %305, %309 : vector<32x128xf32>
    %311 = vector.extract_strided_slice %281 {offsets = [0, 133], sizes = [32, 128], strides = [1, 1]} : vector<32x384xbf16> to vector<32x128xbf16>
    %c6_230 = arith.constant 6 : index
    %c0_231 = arith.constant 0 : index
    %c0_232 = arith.constant 0 : index
    %312 = vector.load %arg12[%c6_230, %c0_231, %c0_232] : memref<9x32x32xbf16, #tpu.memory_space<vmem>>, vector<1x32x32xbf16>
    %313 = vector.shape_cast %312 : vector<1x32x32xbf16> to vector<32x32xbf16>
    %cst_233 = arith.constant dense<0.000000e+00> : vector<32x128xf32>
    %314 = tpu.matmul %313, %311, %cst_233 {dimension_numbers = #tpu.dot_dimension_numbers<[1], [0], [0], [1], [0, 0, 1, 1], [], []>} : vector<32x32xbf16>, vector<32x128xbf16>, vector<32x128xf32> -> vector<32x128xf32>
    %315 = arith.addf %310, %314 : vector<32x128xf32>
    %316 = vector.extract_strided_slice %281 {offsets = [0, 134], sizes = [32, 128], strides = [1, 1]} : vector<32x384xbf16> to vector<32x128xbf16>
    %c7_234 = arith.constant 7 : index
    %c0_235 = arith.constant 0 : index
    %c0_236 = arith.constant 0 : index
    %317 = vector.load %arg12[%c7_234, %c0_235, %c0_236] : memref<9x32x32xbf16, #tpu.memory_space<vmem>>, vector<1x32x32xbf16>
    %318 = vector.shape_cast %317 : vector<1x32x32xbf16> to vector<32x32xbf16>
    %cst_237 = arith.constant dense<0.000000e+00> : vector<32x128xf32>
    %319 = tpu.matmul %318, %316, %cst_237 {dimension_numbers = #tpu.dot_dimension_numbers<[1], [0], [0], [1], [0, 0, 1, 1], [], []>} : vector<32x32xbf16>, vector<32x128xbf16>, vector<32x128xf32> -> vector<32x128xf32>
    %320 = arith.addf %315, %319 : vector<32x128xf32>
    %321 = vector.extract_strided_slice %281 {offsets = [0, 135], sizes = [32, 128], strides = [1, 1]} : vector<32x384xbf16> to vector<32x128xbf16>
    %c8_238 = arith.constant 8 : index
    %c0_239 = arith.constant 0 : index
    %c0_240 = arith.constant 0 : index
    %322 = vector.load %arg12[%c8_238, %c0_239, %c0_240] : memref<9x32x32xbf16, #tpu.memory_space<vmem>>, vector<1x32x32xbf16>
    %323 = vector.shape_cast %322 : vector<1x32x32xbf16> to vector<32x32xbf16>
    %cst_241 = arith.constant dense<0.000000e+00> : vector<32x128xf32>
    %324 = tpu.matmul %323, %321, %cst_241 {dimension_numbers = #tpu.dot_dimension_numbers<[1], [0], [0], [1], [0, 0, 1, 1], [], []>} : vector<32x32xbf16>, vector<32x128xbf16>, vector<32x128xf32> -> vector<32x128xf32>
    %325 = arith.addf %320, %324 : vector<32x128xf32>
    %c0_242 = arith.constant 0 : index
    %c0_243 = arith.constant 0 : index
    %326 = vector.load %arg13[%c0_242, %c0_243] : memref<32x1xf32, #tpu.memory_space<vmem>>, vector<32x1xf32>
    %327 = vector.broadcast %326 : vector<32x1xf32> to vector<32x128xf32>
    %328 = arith.addf %325, %327 : vector<32x128xf32>
    %cst_244 = arith.constant 0.000000e+00 : f32
    %329 = vector.broadcast %cst_244 : f32 to vector<32x128xf32>
    %330 = arith.maximumf %328, %329 : vector<32x128xf32>
    %331 = vector.broadcast %2 : vector<1x128xf32> to vector<32x128xf32>
    %332 = arith.mulf %330, %331 : vector<32x128xf32>
    %333 = arith.truncf %332 : vector<32x128xf32> to vector<32x128xbf16>
    %c0_245 = arith.constant 0 : index
    %c0_246 = arith.constant 0 : index
    %c0_247 = arith.constant 0 : index
    %334 = vector.load %arg16[%c0_245, %c0_246, %c0_247] : memref<4x16x32xbf16, #tpu.memory_space<vmem>>, vector<1x16x32xbf16>
    %335 = vector.shape_cast %334 : vector<1x16x32xbf16> to vector<16x32xbf16>
    %cst_248 = arith.constant dense<0.000000e+00> : vector<16x128xf32>
    %336 = tpu.matmul %335, %333, %cst_248 {dimension_numbers = #tpu.dot_dimension_numbers<[1], [0], [0], [1], [0, 0, 1, 1], [], []>} : vector<16x32xbf16>, vector<32x128xbf16>, vector<16x128xf32> -> vector<16x128xf32>
    %c0_249 = arith.constant 0 : index
    %c0_250 = arith.constant 0 : index
    %c0_251 = arith.constant 0 : index
    %337 = vector.load %arg18[%c0_249, %c0_250, %c0_251] : memref<4x128x128xf32, #tpu.memory_space<vmem>>, vector<1x128x128xf32>
    %338 = vector.shape_cast %337 : vector<1x128x128xf32> to vector<128x128xf32>
    %cst_252 = arith.constant dense<0.000000e+00> : vector<16x128xf32>
    %339 = tpu.matmul %336, %338, %cst_252 {dimension_numbers = #tpu.dot_dimension_numbers<[1], [0], [0], [1], [0, 0, 1, 1], [], []>} : vector<16x128xf32>, vector<128x128xf32>, vector<16x128xf32> -> vector<16x128xf32>
    %c1_253 = arith.constant 1 : index
    %c0_254 = arith.constant 0 : index
    %c0_255 = arith.constant 0 : index
    %340 = vector.load %arg16[%c1_253, %c0_254, %c0_255] : memref<4x16x32xbf16, #tpu.memory_space<vmem>>, vector<1x16x32xbf16>
    %341 = vector.shape_cast %340 : vector<1x16x32xbf16> to vector<16x32xbf16>
    %cst_256 = arith.constant dense<0.000000e+00> : vector<16x128xf32>
    %342 = tpu.matmul %341, %333, %cst_256 {dimension_numbers = #tpu.dot_dimension_numbers<[1], [0], [0], [1], [0, 0, 1, 1], [], []>} : vector<16x32xbf16>, vector<32x128xbf16>, vector<16x128xf32> -> vector<16x128xf32>
    %c1_257 = arith.constant 1 : index
    %c0_258 = arith.constant 0 : index
    %c0_259 = arith.constant 0 : index
    %343 = vector.load %arg18[%c1_257, %c0_258, %c0_259] : memref<4x128x128xf32, #tpu.memory_space<vmem>>, vector<1x128x128xf32>
    %344 = vector.shape_cast %343 : vector<1x128x128xf32> to vector<128x128xf32>
    %cst_260 = arith.constant dense<0.000000e+00> : vector<16x128xf32>
    %345 = tpu.matmul %342, %344, %cst_260 {dimension_numbers = #tpu.dot_dimension_numbers<[1], [0], [0], [1], [0, 0, 1, 1], [], []>} : vector<16x128xf32>, vector<128x128xf32>, vector<16x128xf32> -> vector<16x128xf32>
    %346 = arith.addf %339, %345 : vector<16x128xf32>
    %c2_261 = arith.constant 2 : index
    %c0_262 = arith.constant 0 : index
    %c0_263 = arith.constant 0 : index
    %347 = vector.load %arg16[%c2_261, %c0_262, %c0_263] : memref<4x16x32xbf16, #tpu.memory_space<vmem>>, vector<1x16x32xbf16>
    %348 = vector.shape_cast %347 : vector<1x16x32xbf16> to vector<16x32xbf16>
    %cst_264 = arith.constant dense<0.000000e+00> : vector<16x128xf32>
    %349 = tpu.matmul %348, %333, %cst_264 {dimension_numbers = #tpu.dot_dimension_numbers<[1], [0], [0], [1], [0, 0, 1, 1], [], []>} : vector<16x32xbf16>, vector<32x128xbf16>, vector<16x128xf32> -> vector<16x128xf32>
    %c2_265 = arith.constant 2 : index
    %c0_266 = arith.constant 0 : index
    %c0_267 = arith.constant 0 : index
    %350 = vector.load %arg18[%c2_265, %c0_266, %c0_267] : memref<4x128x128xf32, #tpu.memory_space<vmem>>, vector<1x128x128xf32>
    %351 = vector.shape_cast %350 : vector<1x128x128xf32> to vector<128x128xf32>
    %cst_268 = arith.constant dense<0.000000e+00> : vector<16x128xf32>
    %352 = tpu.matmul %349, %351, %cst_268 {dimension_numbers = #tpu.dot_dimension_numbers<[1], [0], [0], [1], [0, 0, 1, 1], [], []>} : vector<16x128xf32>, vector<128x128xf32>, vector<16x128xf32> -> vector<16x128xf32>
    %353 = arith.addf %346, %352 : vector<16x128xf32>
    %c3_269 = arith.constant 3 : index
    %c0_270 = arith.constant 0 : index
    %c0_271 = arith.constant 0 : index
    %354 = vector.load %arg16[%c3_269, %c0_270, %c0_271] : memref<4x16x32xbf16, #tpu.memory_space<vmem>>, vector<1x16x32xbf16>
    %355 = vector.shape_cast %354 : vector<1x16x32xbf16> to vector<16x32xbf16>
    %cst_272 = arith.constant dense<0.000000e+00> : vector<16x128xf32>
    %356 = tpu.matmul %355, %333, %cst_272 {dimension_numbers = #tpu.dot_dimension_numbers<[1], [0], [0], [1], [0, 0, 1, 1], [], []>} : vector<16x32xbf16>, vector<32x128xbf16>, vector<16x128xf32> -> vector<16x128xf32>
    %c3_273 = arith.constant 3 : index
    %c0_274 = arith.constant 0 : index
    %c0_275 = arith.constant 0 : index
    %357 = vector.load %arg18[%c3_273, %c0_274, %c0_275] : memref<4x128x128xf32, #tpu.memory_space<vmem>>, vector<1x128x128xf32>
    %358 = vector.shape_cast %357 : vector<1x128x128xf32> to vector<128x128xf32>
    %cst_276 = arith.constant dense<0.000000e+00> : vector<16x128xf32>
    %359 = tpu.matmul %356, %358, %cst_276 {dimension_numbers = #tpu.dot_dimension_numbers<[1], [0], [0], [1], [0, 0, 1, 1], [], []>} : vector<16x128xf32>, vector<128x128xf32>, vector<16x128xf32> -> vector<16x128xf32>
    %360 = arith.addf %353, %359 : vector<16x128xf32>
    %c0_277 = arith.constant 0 : index
    %c0_278 = arith.constant 0 : index
    %361 = vector.load %arg17[%c0_277, %c0_278] : memref<16x1xf32, #tpu.memory_space<vmem>>, vector<16x1xf32>
    %362 = vector.broadcast %361 : vector<16x1xf32> to vector<16x128xf32>
    %363 = arith.addf %360, %362 : vector<16x128xf32>
    %364 = vector.broadcast %1 : vector<1x128xf32> to vector<16x128xf32>
    %365 = arith.mulf %363, %364 : vector<16x128xf32>
    %366 = arith.truncf %365 : vector<16x128xf32> to vector<16x128xbf16>
    %cst_279 = arith.constant 0.000000e+00 : bf16
    %367 = vector.broadcast %cst_279 : bf16 to vector<16x128xbf16>
    %368 = tpu.concatenate %367, %366, %367 in 1 : vector<16x128xbf16>, vector<16x128xbf16>, vector<16x128xbf16> -> vector<16x384xbf16>
    %369 = vector.extract_strided_slice %368 {offsets = [0, 117], sizes = [16, 128], strides = [1, 1]} : vector<16x384xbf16> to vector<16x128xbf16>
    %c0_280 = arith.constant 0 : index
    %c0_281 = arith.constant 0 : index
    %c0_282 = arith.constant 0 : index
    %370 = vector.load %arg19[%c0_280, %c0_281, %c0_282] : memref<9x16x16xbf16, #tpu.memory_space<vmem>>, vector<1x16x16xbf16>
    %371 = vector.shape_cast %370 : vector<1x16x16xbf16> to vector<16x16xbf16>
    %cst_283 = arith.constant dense<0.000000e+00> : vector<16x128xf32>
    %372 = tpu.matmul %371, %369, %cst_283 {dimension_numbers = #tpu.dot_dimension_numbers<[1], [0], [0], [1], [0, 0, 1, 1], [], []>} : vector<16x16xbf16>, vector<16x128xbf16>, vector<16x128xf32> -> vector<16x128xf32>
    %373 = vector.extract_strided_slice %368 {offsets = [0, 118], sizes = [16, 128], strides = [1, 1]} : vector<16x384xbf16> to vector<16x128xbf16>
    %c1_284 = arith.constant 1 : index
    %c0_285 = arith.constant 0 : index
    %c0_286 = arith.constant 0 : index
    %374 = vector.load %arg19[%c1_284, %c0_285, %c0_286] : memref<9x16x16xbf16, #tpu.memory_space<vmem>>, vector<1x16x16xbf16>
    %375 = vector.shape_cast %374 : vector<1x16x16xbf16> to vector<16x16xbf16>
    %cst_287 = arith.constant dense<0.000000e+00> : vector<16x128xf32>
    %376 = tpu.matmul %375, %373, %cst_287 {dimension_numbers = #tpu.dot_dimension_numbers<[1], [0], [0], [1], [0, 0, 1, 1], [], []>} : vector<16x16xbf16>, vector<16x128xbf16>, vector<16x128xf32> -> vector<16x128xf32>
    %377 = arith.addf %372, %376 : vector<16x128xf32>
    %378 = vector.extract_strided_slice %368 {offsets = [0, 119], sizes = [16, 128], strides = [1, 1]} : vector<16x384xbf16> to vector<16x128xbf16>
    %c2_288 = arith.constant 2 : index
    %c0_289 = arith.constant 0 : index
    %c0_290 = arith.constant 0 : index
    %379 = vector.load %arg19[%c2_288, %c0_289, %c0_290] : memref<9x16x16xbf16, #tpu.memory_space<vmem>>, vector<1x16x16xbf16>
    %380 = vector.shape_cast %379 : vector<1x16x16xbf16> to vector<16x16xbf16>
    %cst_291 = arith.constant dense<0.000000e+00> : vector<16x128xf32>
    %381 = tpu.matmul %380, %378, %cst_291 {dimension_numbers = #tpu.dot_dimension_numbers<[1], [0], [0], [1], [0, 0, 1, 1], [], []>} : vector<16x16xbf16>, vector<16x128xbf16>, vector<16x128xf32> -> vector<16x128xf32>
    %382 = arith.addf %377, %381 : vector<16x128xf32>
    %383 = vector.extract_strided_slice %368 {offsets = [0, 127], sizes = [16, 128], strides = [1, 1]} : vector<16x384xbf16> to vector<16x128xbf16>
    %c3_292 = arith.constant 3 : index
    %c0_293 = arith.constant 0 : index
    %c0_294 = arith.constant 0 : index
    %384 = vector.load %arg19[%c3_292, %c0_293, %c0_294] : memref<9x16x16xbf16, #tpu.memory_space<vmem>>, vector<1x16x16xbf16>
    %385 = vector.shape_cast %384 : vector<1x16x16xbf16> to vector<16x16xbf16>
    %cst_295 = arith.constant dense<0.000000e+00> : vector<16x128xf32>
    %386 = tpu.matmul %385, %383, %cst_295 {dimension_numbers = #tpu.dot_dimension_numbers<[1], [0], [0], [1], [0, 0, 1, 1], [], []>} : vector<16x16xbf16>, vector<16x128xbf16>, vector<16x128xf32> -> vector<16x128xf32>
    %387 = arith.addf %382, %386 : vector<16x128xf32>
    %388 = vector.extract_strided_slice %368 {offsets = [0, 128], sizes = [16, 128], strides = [1, 1]} : vector<16x384xbf16> to vector<16x128xbf16>
    %c4_296 = arith.constant 4 : index
    %c0_297 = arith.constant 0 : index
    %c0_298 = arith.constant 0 : index
    %389 = vector.load %arg19[%c4_296, %c0_297, %c0_298] : memref<9x16x16xbf16, #tpu.memory_space<vmem>>, vector<1x16x16xbf16>
    %390 = vector.shape_cast %389 : vector<1x16x16xbf16> to vector<16x16xbf16>
    %cst_299 = arith.constant dense<0.000000e+00> : vector<16x128xf32>
    %391 = tpu.matmul %390, %388, %cst_299 {dimension_numbers = #tpu.dot_dimension_numbers<[1], [0], [0], [1], [0, 0, 1, 1], [], []>} : vector<16x16xbf16>, vector<16x128xbf16>, vector<16x128xf32> -> vector<16x128xf32>
    %392 = arith.addf %387, %391 : vector<16x128xf32>
    %393 = vector.extract_strided_slice %368 {offsets = [0, 129], sizes = [16, 128], strides = [1, 1]} : vector<16x384xbf16> to vector<16x128xbf16>
    %c5_300 = arith.constant 5 : index
    %c0_301 = arith.constant 0 : index
    %c0_302 = arith.constant 0 : index
    %394 = vector.load %arg19[%c5_300, %c0_301, %c0_302] : memref<9x16x16xbf16, #tpu.memory_space<vmem>>, vector<1x16x16xbf16>
    %395 = vector.shape_cast %394 : vector<1x16x16xbf16> to vector<16x16xbf16>
    %cst_303 = arith.constant dense<0.000000e+00> : vector<16x128xf32>
    %396 = tpu.matmul %395, %393, %cst_303 {dimension_numbers = #tpu.dot_dimension_numbers<[1], [0], [0], [1], [0, 0, 1, 1], [], []>} : vector<16x16xbf16>, vector<16x128xbf16>, vector<16x128xf32> -> vector<16x128xf32>
    %397 = arith.addf %392, %396 : vector<16x128xf32>
    %398 = vector.extract_strided_slice %368 {offsets = [0, 137], sizes = [16, 128], strides = [1, 1]} : vector<16x384xbf16> to vector<16x128xbf16>
    %c6_304 = arith.constant 6 : index
    %c0_305 = arith.constant 0 : index
    %c0_306 = arith.constant 0 : index
    %399 = vector.load %arg19[%c6_304, %c0_305, %c0_306] : memref<9x16x16xbf16, #tpu.memory_space<vmem>>, vector<1x16x16xbf16>
    %400 = vector.shape_cast %399 : vector<1x16x16xbf16> to vector<16x16xbf16>
    %cst_307 = arith.constant dense<0.000000e+00> : vector<16x128xf32>
    %401 = tpu.matmul %400, %398, %cst_307 {dimension_numbers = #tpu.dot_dimension_numbers<[1], [0], [0], [1], [0, 0, 1, 1], [], []>} : vector<16x16xbf16>, vector<16x128xbf16>, vector<16x128xf32> -> vector<16x128xf32>
    %402 = arith.addf %397, %401 : vector<16x128xf32>
    %403 = vector.extract_strided_slice %368 {offsets = [0, 138], sizes = [16, 128], strides = [1, 1]} : vector<16x384xbf16> to vector<16x128xbf16>
    %c7_308 = arith.constant 7 : index
    %c0_309 = arith.constant 0 : index
    %c0_310 = arith.constant 0 : index
    %404 = vector.load %arg19[%c7_308, %c0_309, %c0_310] : memref<9x16x16xbf16, #tpu.memory_space<vmem>>, vector<1x16x16xbf16>
    %405 = vector.shape_cast %404 : vector<1x16x16xbf16> to vector<16x16xbf16>
    %cst_311 = arith.constant dense<0.000000e+00> : vector<16x128xf32>
    %406 = tpu.matmul %405, %403, %cst_311 {dimension_numbers = #tpu.dot_dimension_numbers<[1], [0], [0], [1], [0, 0, 1, 1], [], []>} : vector<16x16xbf16>, vector<16x128xbf16>, vector<16x128xf32> -> vector<16x128xf32>
    %407 = arith.addf %402, %406 : vector<16x128xf32>
    %408 = vector.extract_strided_slice %368 {offsets = [0, 139], sizes = [16, 128], strides = [1, 1]} : vector<16x384xbf16> to vector<16x128xbf16>
    %c8_312 = arith.constant 8 : index
    %c0_313 = arith.constant 0 : index
    %c0_314 = arith.constant 0 : index
    %409 = vector.load %arg19[%c8_312, %c0_313, %c0_314] : memref<9x16x16xbf16, #tpu.memory_space<vmem>>, vector<1x16x16xbf16>
    %410 = vector.shape_cast %409 : vector<1x16x16xbf16> to vector<16x16xbf16>
    %cst_315 = arith.constant dense<0.000000e+00> : vector<16x128xf32>
    %411 = tpu.matmul %410, %408, %cst_315 {dimension_numbers = #tpu.dot_dimension_numbers<[1], [0], [0], [1], [0, 0, 1, 1], [], []>} : vector<16x16xbf16>, vector<16x128xbf16>, vector<16x128xf32> -> vector<16x128xf32>
    %412 = arith.addf %407, %411 : vector<16x128xf32>
    %413 = arith.truncf %222 : vector<16x128xf32> to vector<16x128xbf16>
    %cst_316 = arith.constant 0.000000e+00 : bf16
    %414 = vector.broadcast %cst_316 : bf16 to vector<16x128xbf16>
    %415 = tpu.concatenate %414, %413, %414 in 1 : vector<16x128xbf16>, vector<16x128xbf16>, vector<16x128xbf16> -> vector<16x384xbf16>
    %416 = vector.extract_strided_slice %415 {offsets = [0, 117], sizes = [16, 128], strides = [1, 1]} : vector<16x384xbf16> to vector<16x128xbf16>
    %c0_317 = arith.constant 0 : index
    %c0_318 = arith.constant 0 : index
    %c0_319 = arith.constant 0 : index
    %417 = vector.load %arg20[%c0_317, %c0_318, %c0_319] : memref<9x16x16xbf16, #tpu.memory_space<vmem>>, vector<1x16x16xbf16>
    %418 = vector.shape_cast %417 : vector<1x16x16xbf16> to vector<16x16xbf16>
    %cst_320 = arith.constant dense<0.000000e+00> : vector<16x128xf32>
    %419 = tpu.matmul %418, %416, %cst_320 {dimension_numbers = #tpu.dot_dimension_numbers<[1], [0], [0], [1], [0, 0, 1, 1], [], []>} : vector<16x16xbf16>, vector<16x128xbf16>, vector<16x128xf32> -> vector<16x128xf32>
    %420 = arith.addf %412, %419 : vector<16x128xf32>
    %421 = vector.extract_strided_slice %415 {offsets = [0, 118], sizes = [16, 128], strides = [1, 1]} : vector<16x384xbf16> to vector<16x128xbf16>
    %c1_321 = arith.constant 1 : index
    %c0_322 = arith.constant 0 : index
    %c0_323 = arith.constant 0 : index
    %422 = vector.load %arg20[%c1_321, %c0_322, %c0_323] : memref<9x16x16xbf16, #tpu.memory_space<vmem>>, vector<1x16x16xbf16>
    %423 = vector.shape_cast %422 : vector<1x16x16xbf16> to vector<16x16xbf16>
    %cst_324 = arith.constant dense<0.000000e+00> : vector<16x128xf32>
    %424 = tpu.matmul %423, %421, %cst_324 {dimension_numbers = #tpu.dot_dimension_numbers<[1], [0], [0], [1], [0, 0, 1, 1], [], []>} : vector<16x16xbf16>, vector<16x128xbf16>, vector<16x128xf32> -> vector<16x128xf32>
    %425 = arith.addf %420, %424 : vector<16x128xf32>
    %426 = vector.extract_strided_slice %415 {offsets = [0, 119], sizes = [16, 128], strides = [1, 1]} : vector<16x384xbf16> to vector<16x128xbf16>
    %c2_325 = arith.constant 2 : index
    %c0_326 = arith.constant 0 : index
    %c0_327 = arith.constant 0 : index
    %427 = vector.load %arg20[%c2_325, %c0_326, %c0_327] : memref<9x16x16xbf16, #tpu.memory_space<vmem>>, vector<1x16x16xbf16>
    %428 = vector.shape_cast %427 : vector<1x16x16xbf16> to vector<16x16xbf16>
    %cst_328 = arith.constant dense<0.000000e+00> : vector<16x128xf32>
    %429 = tpu.matmul %428, %426, %cst_328 {dimension_numbers = #tpu.dot_dimension_numbers<[1], [0], [0], [1], [0, 0, 1, 1], [], []>} : vector<16x16xbf16>, vector<16x128xbf16>, vector<16x128xf32> -> vector<16x128xf32>
    %430 = arith.addf %425, %429 : vector<16x128xf32>
    %431 = vector.extract_strided_slice %415 {offsets = [0, 127], sizes = [16, 128], strides = [1, 1]} : vector<16x384xbf16> to vector<16x128xbf16>
    %c3_329 = arith.constant 3 : index
    %c0_330 = arith.constant 0 : index
    %c0_331 = arith.constant 0 : index
    %432 = vector.load %arg20[%c3_329, %c0_330, %c0_331] : memref<9x16x16xbf16, #tpu.memory_space<vmem>>, vector<1x16x16xbf16>
    %433 = vector.shape_cast %432 : vector<1x16x16xbf16> to vector<16x16xbf16>
    %cst_332 = arith.constant dense<0.000000e+00> : vector<16x128xf32>
    %434 = tpu.matmul %433, %431, %cst_332 {dimension_numbers = #tpu.dot_dimension_numbers<[1], [0], [0], [1], [0, 0, 1, 1], [], []>} : vector<16x16xbf16>, vector<16x128xbf16>, vector<16x128xf32> -> vector<16x128xf32>
    %435 = arith.addf %430, %434 : vector<16x128xf32>
    %436 = vector.extract_strided_slice %415 {offsets = [0, 128], sizes = [16, 128], strides = [1, 1]} : vector<16x384xbf16> to vector<16x128xbf16>
    %c4_333 = arith.constant 4 : index
    %c0_334 = arith.constant 0 : index
    %c0_335 = arith.constant 0 : index
    %437 = vector.load %arg20[%c4_333, %c0_334, %c0_335] : memref<9x16x16xbf16, #tpu.memory_space<vmem>>, vector<1x16x16xbf16>
    %438 = vector.shape_cast %437 : vector<1x16x16xbf16> to vector<16x16xbf16>
    %cst_336 = arith.constant dense<0.000000e+00> : vector<16x128xf32>
    %439 = tpu.matmul %438, %436, %cst_336 {dimension_numbers = #tpu.dot_dimension_numbers<[1], [0], [0], [1], [0, 0, 1, 1], [], []>} : vector<16x16xbf16>, vector<16x128xbf16>, vector<16x128xf32> -> vector<16x128xf32>
    %440 = arith.addf %435, %439 : vector<16x128xf32>
    %441 = vector.extract_strided_slice %415 {offsets = [0, 129], sizes = [16, 128], strides = [1, 1]} : vector<16x384xbf16> to vector<16x128xbf16>
    %c5_337 = arith.constant 5 : index
    %c0_338 = arith.constant 0 : index
    %c0_339 = arith.constant 0 : index
    %442 = vector.load %arg20[%c5_337, %c0_338, %c0_339] : memref<9x16x16xbf16, #tpu.memory_space<vmem>>, vector<1x16x16xbf16>
    %443 = vector.shape_cast %442 : vector<1x16x16xbf16> to vector<16x16xbf16>
    %cst_340 = arith.constant dense<0.000000e+00> : vector<16x128xf32>
    %444 = tpu.matmul %443, %441, %cst_340 {dimension_numbers = #tpu.dot_dimension_numbers<[1], [0], [0], [1], [0, 0, 1, 1], [], []>} : vector<16x16xbf16>, vector<16x128xbf16>, vector<16x128xf32> -> vector<16x128xf32>
    %445 = arith.addf %440, %444 : vector<16x128xf32>
    %446 = vector.extract_strided_slice %415 {offsets = [0, 137], sizes = [16, 128], strides = [1, 1]} : vector<16x384xbf16> to vector<16x128xbf16>
    %c6_341 = arith.constant 6 : index
    %c0_342 = arith.constant 0 : index
    %c0_343 = arith.constant 0 : index
    %447 = vector.load %arg20[%c6_341, %c0_342, %c0_343] : memref<9x16x16xbf16, #tpu.memory_space<vmem>>, vector<1x16x16xbf16>
    %448 = vector.shape_cast %447 : vector<1x16x16xbf16> to vector<16x16xbf16>
    %cst_344 = arith.constant dense<0.000000e+00> : vector<16x128xf32>
    %449 = tpu.matmul %448, %446, %cst_344 {dimension_numbers = #tpu.dot_dimension_numbers<[1], [0], [0], [1], [0, 0, 1, 1], [], []>} : vector<16x16xbf16>, vector<16x128xbf16>, vector<16x128xf32> -> vector<16x128xf32>
    %450 = arith.addf %445, %449 : vector<16x128xf32>
    %451 = vector.extract_strided_slice %415 {offsets = [0, 138], sizes = [16, 128], strides = [1, 1]} : vector<16x384xbf16> to vector<16x128xbf16>
    %c7_345 = arith.constant 7 : index
    %c0_346 = arith.constant 0 : index
    %c0_347 = arith.constant 0 : index
    %452 = vector.load %arg20[%c7_345, %c0_346, %c0_347] : memref<9x16x16xbf16, #tpu.memory_space<vmem>>, vector<1x16x16xbf16>
    %453 = vector.shape_cast %452 : vector<1x16x16xbf16> to vector<16x16xbf16>
    %cst_348 = arith.constant dense<0.000000e+00> : vector<16x128xf32>
    %454 = tpu.matmul %453, %451, %cst_348 {dimension_numbers = #tpu.dot_dimension_numbers<[1], [0], [0], [1], [0, 0, 1, 1], [], []>} : vector<16x16xbf16>, vector<16x128xbf16>, vector<16x128xf32> -> vector<16x128xf32>
    %455 = arith.addf %450, %454 : vector<16x128xf32>
    %456 = vector.extract_strided_slice %415 {offsets = [0, 139], sizes = [16, 128], strides = [1, 1]} : vector<16x384xbf16> to vector<16x128xbf16>
    %c8_349 = arith.constant 8 : index
    %c0_350 = arith.constant 0 : index
    %c0_351 = arith.constant 0 : index
    %457 = vector.load %arg20[%c8_349, %c0_350, %c0_351] : memref<9x16x16xbf16, #tpu.memory_space<vmem>>, vector<1x16x16xbf16>
    %458 = vector.shape_cast %457 : vector<1x16x16xbf16> to vector<16x16xbf16>
    %cst_352 = arith.constant dense<0.000000e+00> : vector<16x128xf32>
    %459 = tpu.matmul %458, %456, %cst_352 {dimension_numbers = #tpu.dot_dimension_numbers<[1], [0], [0], [1], [0, 0, 1, 1], [], []>} : vector<16x16xbf16>, vector<16x128xbf16>, vector<16x128xf32> -> vector<16x128xf32>
    %460 = arith.addf %455, %459 : vector<16x128xf32>
    %c0_353 = arith.constant 0 : index
    %c0_354 = arith.constant 0 : index
    %461 = vector.load %arg21[%c0_353, %c0_354] : memref<16x1xf32, #tpu.memory_space<vmem>>, vector<16x1xf32>
    %462 = vector.broadcast %461 : vector<16x1xf32> to vector<16x128xf32>
    %463 = arith.addf %460, %462 : vector<16x128xf32>
    %cst_355 = arith.constant 0.000000e+00 : f32
    %464 = vector.broadcast %cst_355 : f32 to vector<16x128xf32>
    %465 = arith.maximumf %463, %464 : vector<16x128xf32>
    %466 = vector.broadcast %1 : vector<1x128xf32> to vector<16x128xf32>
    %467 = arith.mulf %465, %466 : vector<16x128xf32>
    %468 = arith.truncf %467 : vector<16x128xf32> to vector<16x128xbf16>
    %cst_356 = arith.constant 0.000000e+00 : bf16
    %469 = vector.broadcast %cst_356 : bf16 to vector<16x128xbf16>
    %470 = tpu.concatenate %469, %468, %469 in 1 : vector<16x128xbf16>, vector<16x128xbf16>, vector<16x128xbf16> -> vector<16x384xbf16>
    %471 = vector.extract_strided_slice %470 {offsets = [0, 117], sizes = [16, 128], strides = [1, 1]} : vector<16x384xbf16> to vector<16x128xbf16>
    %c0_357 = arith.constant 0 : index
    %c0_358 = arith.constant 0 : index
    %c0_359 = arith.constant 0 : index
    %472 = vector.load %arg22[%c0_357, %c0_358, %c0_359] : memref<9x16x16xbf16, #tpu.memory_space<vmem>>, vector<1x16x16xbf16>
    %473 = vector.shape_cast %472 : vector<1x16x16xbf16> to vector<16x16xbf16>
    %cst_360 = arith.constant dense<0.000000e+00> : vector<16x128xf32>
    %474 = tpu.matmul %473, %471, %cst_360 {dimension_numbers = #tpu.dot_dimension_numbers<[1], [0], [0], [1], [0, 0, 1, 1], [], []>} : vector<16x16xbf16>, vector<16x128xbf16>, vector<16x128xf32> -> vector<16x128xf32>
    %475 = vector.extract_strided_slice %470 {offsets = [0, 118], sizes = [16, 128], strides = [1, 1]} : vector<16x384xbf16> to vector<16x128xbf16>
    %c1_361 = arith.constant 1 : index
    %c0_362 = arith.constant 0 : index
    %c0_363 = arith.constant 0 : index
    %476 = vector.load %arg22[%c1_361, %c0_362, %c0_363] : memref<9x16x16xbf16, #tpu.memory_space<vmem>>, vector<1x16x16xbf16>
    %477 = vector.shape_cast %476 : vector<1x16x16xbf16> to vector<16x16xbf16>
    %cst_364 = arith.constant dense<0.000000e+00> : vector<16x128xf32>
    %478 = tpu.matmul %477, %475, %cst_364 {dimension_numbers = #tpu.dot_dimension_numbers<[1], [0], [0], [1], [0, 0, 1, 1], [], []>} : vector<16x16xbf16>, vector<16x128xbf16>, vector<16x128xf32> -> vector<16x128xf32>
    %479 = arith.addf %474, %478 : vector<16x128xf32>
    %480 = vector.extract_strided_slice %470 {offsets = [0, 119], sizes = [16, 128], strides = [1, 1]} : vector<16x384xbf16> to vector<16x128xbf16>
    %c2_365 = arith.constant 2 : index
    %c0_366 = arith.constant 0 : index
    %c0_367 = arith.constant 0 : index
    %481 = vector.load %arg22[%c2_365, %c0_366, %c0_367] : memref<9x16x16xbf16, #tpu.memory_space<vmem>>, vector<1x16x16xbf16>
    %482 = vector.shape_cast %481 : vector<1x16x16xbf16> to vector<16x16xbf16>
    %cst_368 = arith.constant dense<0.000000e+00> : vector<16x128xf32>
    %483 = tpu.matmul %482, %480, %cst_368 {dimension_numbers = #tpu.dot_dimension_numbers<[1], [0], [0], [1], [0, 0, 1, 1], [], []>} : vector<16x16xbf16>, vector<16x128xbf16>, vector<16x128xf32> -> vector<16x128xf32>
    %484 = arith.addf %479, %483 : vector<16x128xf32>
    %485 = vector.extract_strided_slice %470 {offsets = [0, 127], sizes = [16, 128], strides = [1, 1]} : vector<16x384xbf16> to vector<16x128xbf16>
    %c3_369 = arith.constant 3 : index
    %c0_370 = arith.constant 0 : index
    %c0_371 = arith.constant 0 : index
    %486 = vector.load %arg22[%c3_369, %c0_370, %c0_371] : memref<9x16x16xbf16, #tpu.memory_space<vmem>>, vector<1x16x16xbf16>
    %487 = vector.shape_cast %486 : vector<1x16x16xbf16> to vector<16x16xbf16>
    %cst_372 = arith.constant dense<0.000000e+00> : vector<16x128xf32>
    %488 = tpu.matmul %487, %485, %cst_372 {dimension_numbers = #tpu.dot_dimension_numbers<[1], [0], [0], [1], [0, 0, 1, 1], [], []>} : vector<16x16xbf16>, vector<16x128xbf16>, vector<16x128xf32> -> vector<16x128xf32>
    %489 = arith.addf %484, %488 : vector<16x128xf32>
    %490 = vector.extract_strided_slice %470 {offsets = [0, 128], sizes = [16, 128], strides = [1, 1]} : vector<16x384xbf16> to vector<16x128xbf16>
    %c4_373 = arith.constant 4 : index
    %c0_374 = arith.constant 0 : index
    %c0_375 = arith.constant 0 : index
    %491 = vector.load %arg22[%c4_373, %c0_374, %c0_375] : memref<9x16x16xbf16, #tpu.memory_space<vmem>>, vector<1x16x16xbf16>
    %492 = vector.shape_cast %491 : vector<1x16x16xbf16> to vector<16x16xbf16>
    %cst_376 = arith.constant dense<0.000000e+00> : vector<16x128xf32>
    %493 = tpu.matmul %492, %490, %cst_376 {dimension_numbers = #tpu.dot_dimension_numbers<[1], [0], [0], [1], [0, 0, 1, 1], [], []>} : vector<16x16xbf16>, vector<16x128xbf16>, vector<16x128xf32> -> vector<16x128xf32>
    %494 = arith.addf %489, %493 : vector<16x128xf32>
    %495 = vector.extract_strided_slice %470 {offsets = [0, 129], sizes = [16, 128], strides = [1, 1]} : vector<16x384xbf16> to vector<16x128xbf16>
    %c5_377 = arith.constant 5 : index
    %c0_378 = arith.constant 0 : index
    %c0_379 = arith.constant 0 : index
    %496 = vector.load %arg22[%c5_377, %c0_378, %c0_379] : memref<9x16x16xbf16, #tpu.memory_space<vmem>>, vector<1x16x16xbf16>
    %497 = vector.shape_cast %496 : vector<1x16x16xbf16> to vector<16x16xbf16>
    %cst_380 = arith.constant dense<0.000000e+00> : vector<16x128xf32>
    %498 = tpu.matmul %497, %495, %cst_380 {dimension_numbers = #tpu.dot_dimension_numbers<[1], [0], [0], [1], [0, 0, 1, 1], [], []>} : vector<16x16xbf16>, vector<16x128xbf16>, vector<16x128xf32> -> vector<16x128xf32>
    %499 = arith.addf %494, %498 : vector<16x128xf32>
    %500 = vector.extract_strided_slice %470 {offsets = [0, 137], sizes = [16, 128], strides = [1, 1]} : vector<16x384xbf16> to vector<16x128xbf16>
    %c6_381 = arith.constant 6 : index
    %c0_382 = arith.constant 0 : index
    %c0_383 = arith.constant 0 : index
    %501 = vector.load %arg22[%c6_381, %c0_382, %c0_383] : memref<9x16x16xbf16, #tpu.memory_space<vmem>>, vector<1x16x16xbf16>
    %502 = vector.shape_cast %501 : vector<1x16x16xbf16> to vector<16x16xbf16>
    %cst_384 = arith.constant dense<0.000000e+00> : vector<16x128xf32>
    %503 = tpu.matmul %502, %500, %cst_384 {dimension_numbers = #tpu.dot_dimension_numbers<[1], [0], [0], [1], [0, 0, 1, 1], [], []>} : vector<16x16xbf16>, vector<16x128xbf16>, vector<16x128xf32> -> vector<16x128xf32>
    %504 = arith.addf %499, %503 : vector<16x128xf32>
    %505 = vector.extract_strided_slice %470 {offsets = [0, 138], sizes = [16, 128], strides = [1, 1]} : vector<16x384xbf16> to vector<16x128xbf16>
    %c7_385 = arith.constant 7 : index
    %c0_386 = arith.constant 0 : index
    %c0_387 = arith.constant 0 : index
    %506 = vector.load %arg22[%c7_385, %c0_386, %c0_387] : memref<9x16x16xbf16, #tpu.memory_space<vmem>>, vector<1x16x16xbf16>
    %507 = vector.shape_cast %506 : vector<1x16x16xbf16> to vector<16x16xbf16>
    %cst_388 = arith.constant dense<0.000000e+00> : vector<16x128xf32>
    %508 = tpu.matmul %507, %505, %cst_388 {dimension_numbers = #tpu.dot_dimension_numbers<[1], [0], [0], [1], [0, 0, 1, 1], [], []>} : vector<16x16xbf16>, vector<16x128xbf16>, vector<16x128xf32> -> vector<16x128xf32>
    %509 = arith.addf %504, %508 : vector<16x128xf32>
    %510 = vector.extract_strided_slice %470 {offsets = [0, 139], sizes = [16, 128], strides = [1, 1]} : vector<16x384xbf16> to vector<16x128xbf16>
    %c8_389 = arith.constant 8 : index
    %c0_390 = arith.constant 0 : index
    %c0_391 = arith.constant 0 : index
    %511 = vector.load %arg22[%c8_389, %c0_390, %c0_391] : memref<9x16x16xbf16, #tpu.memory_space<vmem>>, vector<1x16x16xbf16>
    %512 = vector.shape_cast %511 : vector<1x16x16xbf16> to vector<16x16xbf16>
    %cst_392 = arith.constant dense<0.000000e+00> : vector<16x128xf32>
    %513 = tpu.matmul %512, %510, %cst_392 {dimension_numbers = #tpu.dot_dimension_numbers<[1], [0], [0], [1], [0, 0, 1, 1], [], []>} : vector<16x16xbf16>, vector<16x128xbf16>, vector<16x128xf32> -> vector<16x128xf32>
    %514 = arith.addf %509, %513 : vector<16x128xf32>
    %c0_393 = arith.constant 0 : index
    %c0_394 = arith.constant 0 : index
    %515 = vector.load %arg23[%c0_393, %c0_394] : memref<16x1xf32, #tpu.memory_space<vmem>>, vector<16x1xf32>
    %516 = vector.broadcast %515 : vector<16x1xf32> to vector<16x128xf32>
    %517 = arith.addf %514, %516 : vector<16x128xf32>
    %cst_395 = arith.constant 0.000000e+00 : f32
    %518 = vector.broadcast %cst_395 : f32 to vector<16x128xf32>
    %519 = arith.maximumf %517, %518 : vector<16x128xf32>
    %520 = vector.broadcast %1 : vector<1x128xf32> to vector<16x128xf32>
    %521 = arith.mulf %519, %520 : vector<16x128xf32>
    %522 = arith.truncf %521 : vector<16x128xf32> to vector<16x128xbf16>
    %c0_396 = arith.constant 0 : index
    %c0_397 = arith.constant 0 : index
    %c0_398 = arith.constant 0 : index
    %523 = vector.load %arg24[%c0_396, %c0_397, %c0_398] : memref<4x8x16xbf16, #tpu.memory_space<vmem>>, vector<1x8x16xbf16>
    %524 = vector.shape_cast %523 : vector<1x8x16xbf16> to vector<8x16xbf16>
    %cst_399 = arith.constant dense<0.000000e+00> : vector<8x128xf32>
    %525 = tpu.matmul %524, %522, %cst_399 {dimension_numbers = #tpu.dot_dimension_numbers<[1], [0], [0], [1], [0, 0, 1, 1], [], []>} : vector<8x16xbf16>, vector<16x128xbf16>, vector<8x128xf32> -> vector<8x128xf32>
    %c0_400 = arith.constant 0 : index
    %c0_401 = arith.constant 0 : index
    %c0_402 = arith.constant 0 : index
    %526 = vector.load %arg26[%c0_400, %c0_401, %c0_402] : memref<4x128x384xf32, #tpu.memory_space<vmem>>, vector<1x128x384xf32>
    %527 = vector.shape_cast %526 : vector<1x128x384xf32> to vector<128x384xf32>
    %cst_403 = arith.constant dense<0.000000e+00> : vector<8x384xf32>
    %528 = tpu.matmul %525, %527, %cst_403 {dimension_numbers = #tpu.dot_dimension_numbers<[1], [0], [0], [1], [0, 0, 1, 1], [], []>} : vector<8x128xf32>, vector<128x384xf32>, vector<8x384xf32> -> vector<8x384xf32>
    %c1_404 = arith.constant 1 : index
    %c0_405 = arith.constant 0 : index
    %c0_406 = arith.constant 0 : index
    %529 = vector.load %arg24[%c1_404, %c0_405, %c0_406] : memref<4x8x16xbf16, #tpu.memory_space<vmem>>, vector<1x8x16xbf16>
    %530 = vector.shape_cast %529 : vector<1x8x16xbf16> to vector<8x16xbf16>
    %cst_407 = arith.constant dense<0.000000e+00> : vector<8x128xf32>
    %531 = tpu.matmul %530, %522, %cst_407 {dimension_numbers = #tpu.dot_dimension_numbers<[1], [0], [0], [1], [0, 0, 1, 1], [], []>} : vector<8x16xbf16>, vector<16x128xbf16>, vector<8x128xf32> -> vector<8x128xf32>
    %c1_408 = arith.constant 1 : index
    %c0_409 = arith.constant 0 : index
    %c0_410 = arith.constant 0 : index
    %532 = vector.load %arg26[%c1_408, %c0_409, %c0_410] : memref<4x128x384xf32, #tpu.memory_space<vmem>>, vector<1x128x384xf32>
    %533 = vector.shape_cast %532 : vector<1x128x384xf32> to vector<128x384xf32>
    %cst_411 = arith.constant dense<0.000000e+00> : vector<8x384xf32>
    %534 = tpu.matmul %531, %533, %cst_411 {dimension_numbers = #tpu.dot_dimension_numbers<[1], [0], [0], [1], [0, 0, 1, 1], [], []>} : vector<8x128xf32>, vector<128x384xf32>, vector<8x384xf32> -> vector<8x384xf32>
    %535 = arith.addf %528, %534 : vector<8x384xf32>
    %c2_412 = arith.constant 2 : index
    %c0_413 = arith.constant 0 : index
    %c0_414 = arith.constant 0 : index
    %536 = vector.load %arg24[%c2_412, %c0_413, %c0_414] : memref<4x8x16xbf16, #tpu.memory_space<vmem>>, vector<1x8x16xbf16>
    %537 = vector.shape_cast %536 : vector<1x8x16xbf16> to vector<8x16xbf16>
    %cst_415 = arith.constant dense<0.000000e+00> : vector<8x128xf32>
    %538 = tpu.matmul %537, %522, %cst_415 {dimension_numbers = #tpu.dot_dimension_numbers<[1], [0], [0], [1], [0, 0, 1, 1], [], []>} : vector<8x16xbf16>, vector<16x128xbf16>, vector<8x128xf32> -> vector<8x128xf32>
    %c2_416 = arith.constant 2 : index
    %c0_417 = arith.constant 0 : index
    %c0_418 = arith.constant 0 : index
    %539 = vector.load %arg26[%c2_416, %c0_417, %c0_418] : memref<4x128x384xf32, #tpu.memory_space<vmem>>, vector<1x128x384xf32>
    %540 = vector.shape_cast %539 : vector<1x128x384xf32> to vector<128x384xf32>
    %cst_419 = arith.constant dense<0.000000e+00> : vector<8x384xf32>
    %541 = tpu.matmul %538, %540, %cst_419 {dimension_numbers = #tpu.dot_dimension_numbers<[1], [0], [0], [1], [0, 0, 1, 1], [], []>} : vector<8x128xf32>, vector<128x384xf32>, vector<8x384xf32> -> vector<8x384xf32>
    %542 = arith.addf %535, %541 : vector<8x384xf32>
    %c3_420 = arith.constant 3 : index
    %c0_421 = arith.constant 0 : index
    %c0_422 = arith.constant 0 : index
    %543 = vector.load %arg24[%c3_420, %c0_421, %c0_422] : memref<4x8x16xbf16, #tpu.memory_space<vmem>>, vector<1x8x16xbf16>
    %544 = vector.shape_cast %543 : vector<1x8x16xbf16> to vector<8x16xbf16>
    %cst_423 = arith.constant dense<0.000000e+00> : vector<8x128xf32>
    %545 = tpu.matmul %544, %522, %cst_423 {dimension_numbers = #tpu.dot_dimension_numbers<[1], [0], [0], [1], [0, 0, 1, 1], [], []>} : vector<8x16xbf16>, vector<16x128xbf16>, vector<8x128xf32> -> vector<8x128xf32>
    %c3_424 = arith.constant 3 : index
    %c0_425 = arith.constant 0 : index
    %c0_426 = arith.constant 0 : index
    %546 = vector.load %arg26[%c3_424, %c0_425, %c0_426] : memref<4x128x384xf32, #tpu.memory_space<vmem>>, vector<1x128x384xf32>
    %547 = vector.shape_cast %546 : vector<1x128x384xf32> to vector<128x384xf32>
    %cst_427 = arith.constant dense<0.000000e+00> : vector<8x384xf32>
    %548 = tpu.matmul %545, %547, %cst_427 {dimension_numbers = #tpu.dot_dimension_numbers<[1], [0], [0], [1], [0, 0, 1, 1], [], []>} : vector<8x128xf32>, vector<128x384xf32>, vector<8x384xf32> -> vector<8x384xf32>
    %549 = arith.addf %542, %548 : vector<8x384xf32>
    %c0_428 = arith.constant 0 : index
    %c0_429 = arith.constant 0 : index
    %550 = vector.load %arg25[%c0_428, %c0_429] : memref<8x1xf32, #tpu.memory_space<vmem>>, vector<8x1xf32>
    %551 = vector.broadcast %550 : vector<8x1xf32> to vector<8x384xf32>
    %552 = arith.addf %549, %551 : vector<8x384xf32>
    %553 = vector.broadcast %0 : vector<1x384xf32> to vector<8x384xf32>
    %554 = arith.mulf %552, %553 : vector<8x384xf32>
    %555 = arith.truncf %554 : vector<8x384xf32> to vector<8x384xbf16>
    %cst_430 = arith.constant 0.000000e+00 : bf16
    %556 = vector.broadcast %cst_430 : bf16 to vector<8x128xbf16>
    %557 = tpu.concatenate %556, %555, %556 in 1 : vector<8x128xbf16>, vector<8x384xbf16>, vector<8x128xbf16> -> vector<8x640xbf16>
    %558 = vector.extract_strided_slice %557 {offsets = [0, 109], sizes = [8, 384], strides = [1, 1]} : vector<8x640xbf16> to vector<8x384xbf16>
    %c0_431 = arith.constant 0 : index
    %c0_432 = arith.constant 0 : index
    %c0_433 = arith.constant 0 : index
    %559 = vector.load %arg27[%c0_431, %c0_432, %c0_433] : memref<9x8x8xbf16, #tpu.memory_space<vmem>>, vector<1x8x8xbf16>
    %560 = vector.shape_cast %559 : vector<1x8x8xbf16> to vector<8x8xbf16>
    %cst_434 = arith.constant dense<0.000000e+00> : vector<8x384xf32>
    %561 = tpu.matmul %560, %558, %cst_434 {dimension_numbers = #tpu.dot_dimension_numbers<[1], [0], [0], [1], [0, 0, 1, 1], [], []>} : vector<8x8xbf16>, vector<8x384xbf16>, vector<8x384xf32> -> vector<8x384xf32>
    %562 = vector.extract_strided_slice %557 {offsets = [0, 110], sizes = [8, 384], strides = [1, 1]} : vector<8x640xbf16> to vector<8x384xbf16>
    %c1_435 = arith.constant 1 : index
    %c0_436 = arith.constant 0 : index
    %c0_437 = arith.constant 0 : index
    %563 = vector.load %arg27[%c1_435, %c0_436, %c0_437] : memref<9x8x8xbf16, #tpu.memory_space<vmem>>, vector<1x8x8xbf16>
    %564 = vector.shape_cast %563 : vector<1x8x8xbf16> to vector<8x8xbf16>
    %cst_438 = arith.constant dense<0.000000e+00> : vector<8x384xf32>
    %565 = tpu.matmul %564, %562, %cst_438 {dimension_numbers = #tpu.dot_dimension_numbers<[1], [0], [0], [1], [0, 0, 1, 1], [], []>} : vector<8x8xbf16>, vector<8x384xbf16>, vector<8x384xf32> -> vector<8x384xf32>
    %566 = arith.addf %561, %565 : vector<8x384xf32>
    %567 = vector.extract_strided_slice %557 {offsets = [0, 111], sizes = [8, 384], strides = [1, 1]} : vector<8x640xbf16> to vector<8x384xbf16>
    %c2_439 = arith.constant 2 : index
    %c0_440 = arith.constant 0 : index
    %c0_441 = arith.constant 0 : index
    %568 = vector.load %arg27[%c2_439, %c0_440, %c0_441] : memref<9x8x8xbf16, #tpu.memory_space<vmem>>, vector<1x8x8xbf16>
    %569 = vector.shape_cast %568 : vector<1x8x8xbf16> to vector<8x8xbf16>
    %cst_442 = arith.constant dense<0.000000e+00> : vector<8x384xf32>
    %570 = tpu.matmul %569, %567, %cst_442 {dimension_numbers = #tpu.dot_dimension_numbers<[1], [0], [0], [1], [0, 0, 1, 1], [], []>} : vector<8x8xbf16>, vector<8x384xbf16>, vector<8x384xf32> -> vector<8x384xf32>
    %571 = arith.addf %566, %570 : vector<8x384xf32>
    %572 = vector.extract_strided_slice %557 {offsets = [0, 127], sizes = [8, 384], strides = [1, 1]} : vector<8x640xbf16> to vector<8x384xbf16>
    %c3_443 = arith.constant 3 : index
    %c0_444 = arith.constant 0 : index
    %c0_445 = arith.constant 0 : index
    %573 = vector.load %arg27[%c3_443, %c0_444, %c0_445] : memref<9x8x8xbf16, #tpu.memory_space<vmem>>, vector<1x8x8xbf16>
    %574 = vector.shape_cast %573 : vector<1x8x8xbf16> to vector<8x8xbf16>
    %cst_446 = arith.constant dense<0.000000e+00> : vector<8x384xf32>
    %575 = tpu.matmul %574, %572, %cst_446 {dimension_numbers = #tpu.dot_dimension_numbers<[1], [0], [0], [1], [0, 0, 1, 1], [], []>} : vector<8x8xbf16>, vector<8x384xbf16>, vector<8x384xf32> -> vector<8x384xf32>
    %576 = arith.addf %571, %575 : vector<8x384xf32>
    %577 = vector.extract_strided_slice %557 {offsets = [0, 128], sizes = [8, 384], strides = [1, 1]} : vector<8x640xbf16> to vector<8x384xbf16>
    %c4_447 = arith.constant 4 : index
    %c0_448 = arith.constant 0 : index
    %c0_449 = arith.constant 0 : index
    %578 = vector.load %arg27[%c4_447, %c0_448, %c0_449] : memref<9x8x8xbf16, #tpu.memory_space<vmem>>, vector<1x8x8xbf16>
    %579 = vector.shape_cast %578 : vector<1x8x8xbf16> to vector<8x8xbf16>
    %cst_450 = arith.constant dense<0.000000e+00> : vector<8x384xf32>
    %580 = tpu.matmul %579, %577, %cst_450 {dimension_numbers = #tpu.dot_dimension_numbers<[1], [0], [0], [1], [0, 0, 1, 1], [], []>} : vector<8x8xbf16>, vector<8x384xbf16>, vector<8x384xf32> -> vector<8x384xf32>
    %581 = arith.addf %576, %580 : vector<8x384xf32>
    %582 = vector.extract_strided_slice %557 {offsets = [0, 129], sizes = [8, 384], strides = [1, 1]} : vector<8x640xbf16> to vector<8x384xbf16>
    %c5_451 = arith.constant 5 : index
    %c0_452 = arith.constant 0 : index
    %c0_453 = arith.constant 0 : index
    %583 = vector.load %arg27[%c5_451, %c0_452, %c0_453] : memref<9x8x8xbf16, #tpu.memory_space<vmem>>, vector<1x8x8xbf16>
    %584 = vector.shape_cast %583 : vector<1x8x8xbf16> to vector<8x8xbf16>
    %cst_454 = arith.constant dense<0.000000e+00> : vector<8x384xf32>
    %585 = tpu.matmul %584, %582, %cst_454 {dimension_numbers = #tpu.dot_dimension_numbers<[1], [0], [0], [1], [0, 0, 1, 1], [], []>} : vector<8x8xbf16>, vector<8x384xbf16>, vector<8x384xf32> -> vector<8x384xf32>
    %586 = arith.addf %581, %585 : vector<8x384xf32>
    %587 = vector.extract_strided_slice %557 {offsets = [0, 145], sizes = [8, 384], strides = [1, 1]} : vector<8x640xbf16> to vector<8x384xbf16>
    %c6_455 = arith.constant 6 : index
    %c0_456 = arith.constant 0 : index
    %c0_457 = arith.constant 0 : index
    %588 = vector.load %arg27[%c6_455, %c0_456, %c0_457] : memref<9x8x8xbf16, #tpu.memory_space<vmem>>, vector<1x8x8xbf16>
    %589 = vector.shape_cast %588 : vector<1x8x8xbf16> to vector<8x8xbf16>
    %cst_458 = arith.constant dense<0.000000e+00> : vector<8x384xf32>
    %590 = tpu.matmul %589, %587, %cst_458 {dimension_numbers = #tpu.dot_dimension_numbers<[1], [0], [0], [1], [0, 0, 1, 1], [], []>} : vector<8x8xbf16>, vector<8x384xbf16>, vector<8x384xf32> -> vector<8x384xf32>
    %591 = arith.addf %586, %590 : vector<8x384xf32>
    %592 = vector.extract_strided_slice %557 {offsets = [0, 146], sizes = [8, 384], strides = [1, 1]} : vector<8x640xbf16> to vector<8x384xbf16>
    %c7_459 = arith.constant 7 : index
    %c0_460 = arith.constant 0 : index
    %c0_461 = arith.constant 0 : index
    %593 = vector.load %arg27[%c7_459, %c0_460, %c0_461] : memref<9x8x8xbf16, #tpu.memory_space<vmem>>, vector<1x8x8xbf16>
    %594 = vector.shape_cast %593 : vector<1x8x8xbf16> to vector<8x8xbf16>
    %cst_462 = arith.constant dense<0.000000e+00> : vector<8x384xf32>
    %595 = tpu.matmul %594, %592, %cst_462 {dimension_numbers = #tpu.dot_dimension_numbers<[1], [0], [0], [1], [0, 0, 1, 1], [], []>} : vector<8x8xbf16>, vector<8x384xbf16>, vector<8x384xf32> -> vector<8x384xf32>
    %596 = arith.addf %591, %595 : vector<8x384xf32>
    %597 = vector.extract_strided_slice %557 {offsets = [0, 147], sizes = [8, 384], strides = [1, 1]} : vector<8x640xbf16> to vector<8x384xbf16>
    %c8_463 = arith.constant 8 : index
    %c0_464 = arith.constant 0 : index
    %c0_465 = arith.constant 0 : index
    %598 = vector.load %arg27[%c8_463, %c0_464, %c0_465] : memref<9x8x8xbf16, #tpu.memory_space<vmem>>, vector<1x8x8xbf16>
    %599 = vector.shape_cast %598 : vector<1x8x8xbf16> to vector<8x8xbf16>
    %cst_466 = arith.constant dense<0.000000e+00> : vector<8x384xf32>
    %600 = tpu.matmul %599, %597, %cst_466 {dimension_numbers = #tpu.dot_dimension_numbers<[1], [0], [0], [1], [0, 0, 1, 1], [], []>} : vector<8x8xbf16>, vector<8x384xbf16>, vector<8x384xf32> -> vector<8x384xf32>
    %601 = arith.addf %596, %600 : vector<8x384xf32>
    %602 = arith.truncf %112 : vector<8x384xf32> to vector<8x384xbf16>
    %cst_467 = arith.constant 0.000000e+00 : bf16
    %603 = vector.broadcast %cst_467 : bf16 to vector<8x128xbf16>
    %604 = tpu.concatenate %603, %602, %603 in 1 : vector<8x128xbf16>, vector<8x384xbf16>, vector<8x128xbf16> -> vector<8x640xbf16>
    %605 = vector.extract_strided_slice %604 {offsets = [0, 109], sizes = [8, 384], strides = [1, 1]} : vector<8x640xbf16> to vector<8x384xbf16>
    %c0_468 = arith.constant 0 : index
    %c0_469 = arith.constant 0 : index
    %c0_470 = arith.constant 0 : index
    %606 = vector.load %arg28[%c0_468, %c0_469, %c0_470] : memref<9x8x8xbf16, #tpu.memory_space<vmem>>, vector<1x8x8xbf16>
    %607 = vector.shape_cast %606 : vector<1x8x8xbf16> to vector<8x8xbf16>
    %cst_471 = arith.constant dense<0.000000e+00> : vector<8x384xf32>
    %608 = tpu.matmul %607, %605, %cst_471 {dimension_numbers = #tpu.dot_dimension_numbers<[1], [0], [0], [1], [0, 0, 1, 1], [], []>} : vector<8x8xbf16>, vector<8x384xbf16>, vector<8x384xf32> -> vector<8x384xf32>
    %609 = arith.addf %601, %608 : vector<8x384xf32>
    %610 = vector.extract_strided_slice %604 {offsets = [0, 110], sizes = [8, 384], strides = [1, 1]} : vector<8x640xbf16> to vector<8x384xbf16>
    %c1_472 = arith.constant 1 : index
    %c0_473 = arith.constant 0 : index
    %c0_474 = arith.constant 0 : index
    %611 = vector.load %arg28[%c1_472, %c0_473, %c0_474] : memref<9x8x8xbf16, #tpu.memory_space<vmem>>, vector<1x8x8xbf16>
    %612 = vector.shape_cast %611 : vector<1x8x8xbf16> to vector<8x8xbf16>
    %cst_475 = arith.constant dense<0.000000e+00> : vector<8x384xf32>
    %613 = tpu.matmul %612, %610, %cst_475 {dimension_numbers = #tpu.dot_dimension_numbers<[1], [0], [0], [1], [0, 0, 1, 1], [], []>} : vector<8x8xbf16>, vector<8x384xbf16>, vector<8x384xf32> -> vector<8x384xf32>
    %614 = arith.addf %609, %613 : vector<8x384xf32>
    %615 = vector.extract_strided_slice %604 {offsets = [0, 111], sizes = [8, 384], strides = [1, 1]} : vector<8x640xbf16> to vector<8x384xbf16>
    %c2_476 = arith.constant 2 : index
    %c0_477 = arith.constant 0 : index
    %c0_478 = arith.constant 0 : index
    %616 = vector.load %arg28[%c2_476, %c0_477, %c0_478] : memref<9x8x8xbf16, #tpu.memory_space<vmem>>, vector<1x8x8xbf16>
    %617 = vector.shape_cast %616 : vector<1x8x8xbf16> to vector<8x8xbf16>
    %cst_479 = arith.constant dense<0.000000e+00> : vector<8x384xf32>
    %618 = tpu.matmul %617, %615, %cst_479 {dimension_numbers = #tpu.dot_dimension_numbers<[1], [0], [0], [1], [0, 0, 1, 1], [], []>} : vector<8x8xbf16>, vector<8x384xbf16>, vector<8x384xf32> -> vector<8x384xf32>
    %619 = arith.addf %614, %618 : vector<8x384xf32>
    %620 = vector.extract_strided_slice %604 {offsets = [0, 127], sizes = [8, 384], strides = [1, 1]} : vector<8x640xbf16> to vector<8x384xbf16>
    %c3_480 = arith.constant 3 : index
    %c0_481 = arith.constant 0 : index
    %c0_482 = arith.constant 0 : index
    %621 = vector.load %arg28[%c3_480, %c0_481, %c0_482] : memref<9x8x8xbf16, #tpu.memory_space<vmem>>, vector<1x8x8xbf16>
    %622 = vector.shape_cast %621 : vector<1x8x8xbf16> to vector<8x8xbf16>
    %cst_483 = arith.constant dense<0.000000e+00> : vector<8x384xf32>
    %623 = tpu.matmul %622, %620, %cst_483 {dimension_numbers = #tpu.dot_dimension_numbers<[1], [0], [0], [1], [0, 0, 1, 1], [], []>} : vector<8x8xbf16>, vector<8x384xbf16>, vector<8x384xf32> -> vector<8x384xf32>
    %624 = arith.addf %619, %623 : vector<8x384xf32>
    %625 = vector.extract_strided_slice %604 {offsets = [0, 128], sizes = [8, 384], strides = [1, 1]} : vector<8x640xbf16> to vector<8x384xbf16>
    %c4_484 = arith.constant 4 : index
    %c0_485 = arith.constant 0 : index
    %c0_486 = arith.constant 0 : index
    %626 = vector.load %arg28[%c4_484, %c0_485, %c0_486] : memref<9x8x8xbf16, #tpu.memory_space<vmem>>, vector<1x8x8xbf16>
    %627 = vector.shape_cast %626 : vector<1x8x8xbf16> to vector<8x8xbf16>
    %cst_487 = arith.constant dense<0.000000e+00> : vector<8x384xf32>
    %628 = tpu.matmul %627, %625, %cst_487 {dimension_numbers = #tpu.dot_dimension_numbers<[1], [0], [0], [1], [0, 0, 1, 1], [], []>} : vector<8x8xbf16>, vector<8x384xbf16>, vector<8x384xf32> -> vector<8x384xf32>
    %629 = arith.addf %624, %628 : vector<8x384xf32>
    %630 = vector.extract_strided_slice %604 {offsets = [0, 129], sizes = [8, 384], strides = [1, 1]} : vector<8x640xbf16> to vector<8x384xbf16>
    %c5_488 = arith.constant 5 : index
    %c0_489 = arith.constant 0 : index
    %c0_490 = arith.constant 0 : index
    %631 = vector.load %arg28[%c5_488, %c0_489, %c0_490] : memref<9x8x8xbf16, #tpu.memory_space<vmem>>, vector<1x8x8xbf16>
    %632 = vector.shape_cast %631 : vector<1x8x8xbf16> to vector<8x8xbf16>
    %cst_491 = arith.constant dense<0.000000e+00> : vector<8x384xf32>
    %633 = tpu.matmul %632, %630, %cst_491 {dimension_numbers = #tpu.dot_dimension_numbers<[1], [0], [0], [1], [0, 0, 1, 1], [], []>} : vector<8x8xbf16>, vector<8x384xbf16>, vector<8x384xf32> -> vector<8x384xf32>
    %634 = arith.addf %629, %633 : vector<8x384xf32>
    %635 = vector.extract_strided_slice %604 {offsets = [0, 145], sizes = [8, 384], strides = [1, 1]} : vector<8x640xbf16> to vector<8x384xbf16>
    %c6_492 = arith.constant 6 : index
    %c0_493 = arith.constant 0 : index
    %c0_494 = arith.constant 0 : index
    %636 = vector.load %arg28[%c6_492, %c0_493, %c0_494] : memref<9x8x8xbf16, #tpu.memory_space<vmem>>, vector<1x8x8xbf16>
    %637 = vector.shape_cast %636 : vector<1x8x8xbf16> to vector<8x8xbf16>
    %cst_495 = arith.constant dense<0.000000e+00> : vector<8x384xf32>
    %638 = tpu.matmul %637, %635, %cst_495 {dimension_numbers = #tpu.dot_dimension_numbers<[1], [0], [0], [1], [0, 0, 1, 1], [], []>} : vector<8x8xbf16>, vector<8x384xbf16>, vector<8x384xf32> -> vector<8x384xf32>
    %639 = arith.addf %634, %638 : vector<8x384xf32>
    %640 = vector.extract_strided_slice %604 {offsets = [0, 146], sizes = [8, 384], strides = [1, 1]} : vector<8x640xbf16> to vector<8x384xbf16>
    %c7_496 = arith.constant 7 : index
    %c0_497 = arith.constant 0 : index
    %c0_498 = arith.constant 0 : index
    %641 = vector.load %arg28[%c7_496, %c0_497, %c0_498] : memref<9x8x8xbf16, #tpu.memory_space<vmem>>, vector<1x8x8xbf16>
    %642 = vector.shape_cast %641 : vector<1x8x8xbf16> to vector<8x8xbf16>
    %cst_499 = arith.constant dense<0.000000e+00> : vector<8x384xf32>
    %643 = tpu.matmul %642, %640, %cst_499 {dimension_numbers = #tpu.dot_dimension_numbers<[1], [0], [0], [1], [0, 0, 1, 1], [], []>} : vector<8x8xbf16>, vector<8x384xbf16>, vector<8x384xf32> -> vector<8x384xf32>
    %644 = arith.addf %639, %643 : vector<8x384xf32>
    %645 = vector.extract_strided_slice %604 {offsets = [0, 147], sizes = [8, 384], strides = [1, 1]} : vector<8x640xbf16> to vector<8x384xbf16>
    %c8_500 = arith.constant 8 : index
    %c0_501 = arith.constant 0 : index
    %c0_502 = arith.constant 0 : index
    %646 = vector.load %arg28[%c8_500, %c0_501, %c0_502] : memref<9x8x8xbf16, #tpu.memory_space<vmem>>, vector<1x8x8xbf16>
    %647 = vector.shape_cast %646 : vector<1x8x8xbf16> to vector<8x8xbf16>
    %cst_503 = arith.constant dense<0.000000e+00> : vector<8x384xf32>
    %648 = tpu.matmul %647, %645, %cst_503 {dimension_numbers = #tpu.dot_dimension_numbers<[1], [0], [0], [1], [0, 0, 1, 1], [], []>} : vector<8x8xbf16>, vector<8x384xbf16>, vector<8x384xf32> -> vector<8x384xf32>
    %649 = arith.addf %644, %648 : vector<8x384xf32>
    %c0_504 = arith.constant 0 : index
    %c0_505 = arith.constant 0 : index
    %650 = vector.load %arg29[%c0_504, %c0_505] : memref<8x1xf32, #tpu.memory_space<vmem>>, vector<8x1xf32>
    %651 = vector.broadcast %650 : vector<8x1xf32> to vector<8x384xf32>
    %652 = arith.addf %649, %651 : vector<8x384xf32>
    %cst_506 = arith.constant 0.000000e+00 : f32
    %653 = vector.broadcast %cst_506 : f32 to vector<8x384xf32>
    %654 = arith.maximumf %652, %653 : vector<8x384xf32>
    %655 = vector.broadcast %0 : vector<1x384xf32> to vector<8x384xf32>
    %656 = arith.mulf %654, %655 : vector<8x384xf32>
    %657 = arith.truncf %656 : vector<8x384xf32> to vector<8x384xbf16>
    %cst_507 = arith.constant 0.000000e+00 : bf16
    %658 = vector.broadcast %cst_507 : bf16 to vector<8x128xbf16>
    %659 = tpu.concatenate %658, %657, %658 in 1 : vector<8x128xbf16>, vector<8x384xbf16>, vector<8x128xbf16> -> vector<8x640xbf16>
    %660 = vector.extract_strided_slice %659 {offsets = [0, 109], sizes = [8, 384], strides = [1, 1]} : vector<8x640xbf16> to vector<8x384xbf16>
    %c0_508 = arith.constant 0 : index
    %c0_509 = arith.constant 0 : index
    %c0_510 = arith.constant 0 : index
    %661 = vector.load %arg30[%c0_508, %c0_509, %c0_510] : memref<9x8x8xbf16, #tpu.memory_space<vmem>>, vector<1x8x8xbf16>
    %662 = vector.shape_cast %661 : vector<1x8x8xbf16> to vector<8x8xbf16>
    %cst_511 = arith.constant dense<0.000000e+00> : vector<8x384xf32>
    %663 = tpu.matmul %662, %660, %cst_511 {dimension_numbers = #tpu.dot_dimension_numbers<[1], [0], [0], [1], [0, 0, 1, 1], [], []>} : vector<8x8xbf16>, vector<8x384xbf16>, vector<8x384xf32> -> vector<8x384xf32>
    %664 = vector.extract_strided_slice %659 {offsets = [0, 110], sizes = [8, 384], strides = [1, 1]} : vector<8x640xbf16> to vector<8x384xbf16>
    %c1_512 = arith.constant 1 : index
    %c0_513 = arith.constant 0 : index
    %c0_514 = arith.constant 0 : index
    %665 = vector.load %arg30[%c1_512, %c0_513, %c0_514] : memref<9x8x8xbf16, #tpu.memory_space<vmem>>, vector<1x8x8xbf16>
    %666 = vector.shape_cast %665 : vector<1x8x8xbf16> to vector<8x8xbf16>
    %cst_515 = arith.constant dense<0.000000e+00> : vector<8x384xf32>
    %667 = tpu.matmul %666, %664, %cst_515 {dimension_numbers = #tpu.dot_dimension_numbers<[1], [0], [0], [1], [0, 0, 1, 1], [], []>} : vector<8x8xbf16>, vector<8x384xbf16>, vector<8x384xf32> -> vector<8x384xf32>
    %668 = arith.addf %663, %667 : vector<8x384xf32>
    %669 = vector.extract_strided_slice %659 {offsets = [0, 111], sizes = [8, 384], strides = [1, 1]} : vector<8x640xbf16> to vector<8x384xbf16>
    %c2_516 = arith.constant 2 : index
    %c0_517 = arith.constant 0 : index
    %c0_518 = arith.constant 0 : index
    %670 = vector.load %arg30[%c2_516, %c0_517, %c0_518] : memref<9x8x8xbf16, #tpu.memory_space<vmem>>, vector<1x8x8xbf16>
    %671 = vector.shape_cast %670 : vector<1x8x8xbf16> to vector<8x8xbf16>
    %cst_519 = arith.constant dense<0.000000e+00> : vector<8x384xf32>
    %672 = tpu.matmul %671, %669, %cst_519 {dimension_numbers = #tpu.dot_dimension_numbers<[1], [0], [0], [1], [0, 0, 1, 1], [], []>} : vector<8x8xbf16>, vector<8x384xbf16>, vector<8x384xf32> -> vector<8x384xf32>
    %673 = arith.addf %668, %672 : vector<8x384xf32>
    %674 = vector.extract_strided_slice %659 {offsets = [0, 127], sizes = [8, 384], strides = [1, 1]} : vector<8x640xbf16> to vector<8x384xbf16>
    %c3_520 = arith.constant 3 : index
    %c0_521 = arith.constant 0 : index
    %c0_522 = arith.constant 0 : index
    %675 = vector.load %arg30[%c3_520, %c0_521, %c0_522] : memref<9x8x8xbf16, #tpu.memory_space<vmem>>, vector<1x8x8xbf16>
    %676 = vector.shape_cast %675 : vector<1x8x8xbf16> to vector<8x8xbf16>
    %cst_523 = arith.constant dense<0.000000e+00> : vector<8x384xf32>
    %677 = tpu.matmul %676, %674, %cst_523 {dimension_numbers = #tpu.dot_dimension_numbers<[1], [0], [0], [1], [0, 0, 1, 1], [], []>} : vector<8x8xbf16>, vector<8x384xbf16>, vector<8x384xf32> -> vector<8x384xf32>
    %678 = arith.addf %673, %677 : vector<8x384xf32>
    %679 = vector.extract_strided_slice %659 {offsets = [0, 128], sizes = [8, 384], strides = [1, 1]} : vector<8x640xbf16> to vector<8x384xbf16>
    %c4_524 = arith.constant 4 : index
    %c0_525 = arith.constant 0 : index
    %c0_526 = arith.constant 0 : index
    %680 = vector.load %arg30[%c4_524, %c0_525, %c0_526] : memref<9x8x8xbf16, #tpu.memory_space<vmem>>, vector<1x8x8xbf16>
    %681 = vector.shape_cast %680 : vector<1x8x8xbf16> to vector<8x8xbf16>
    %cst_527 = arith.constant dense<0.000000e+00> : vector<8x384xf32>
    %682 = tpu.matmul %681, %679, %cst_527 {dimension_numbers = #tpu.dot_dimension_numbers<[1], [0], [0], [1], [0, 0, 1, 1], [], []>} : vector<8x8xbf16>, vector<8x384xbf16>, vector<8x384xf32> -> vector<8x384xf32>
    %683 = arith.addf %678, %682 : vector<8x384xf32>
    %684 = vector.extract_strided_slice %659 {offsets = [0, 129], sizes = [8, 384], strides = [1, 1]} : vector<8x640xbf16> to vector<8x384xbf16>
    %c5_528 = arith.constant 5 : index
    %c0_529 = arith.constant 0 : index
    %c0_530 = arith.constant 0 : index
    %685 = vector.load %arg30[%c5_528, %c0_529, %c0_530] : memref<9x8x8xbf16, #tpu.memory_space<vmem>>, vector<1x8x8xbf16>
    %686 = vector.shape_cast %685 : vector<1x8x8xbf16> to vector<8x8xbf16>
    %cst_531 = arith.constant dense<0.000000e+00> : vector<8x384xf32>
    %687 = tpu.matmul %686, %684, %cst_531 {dimension_numbers = #tpu.dot_dimension_numbers<[1], [0], [0], [1], [0, 0, 1, 1], [], []>} : vector<8x8xbf16>, vector<8x384xbf16>, vector<8x384xf32> -> vector<8x384xf32>
    %688 = arith.addf %683, %687 : vector<8x384xf32>
    %689 = vector.extract_strided_slice %659 {offsets = [0, 145], sizes = [8, 384], strides = [1, 1]} : vector<8x640xbf16> to vector<8x384xbf16>
    %c6_532 = arith.constant 6 : index
    %c0_533 = arith.constant 0 : index
    %c0_534 = arith.constant 0 : index
    %690 = vector.load %arg30[%c6_532, %c0_533, %c0_534] : memref<9x8x8xbf16, #tpu.memory_space<vmem>>, vector<1x8x8xbf16>
    %691 = vector.shape_cast %690 : vector<1x8x8xbf16> to vector<8x8xbf16>
    %cst_535 = arith.constant dense<0.000000e+00> : vector<8x384xf32>
    %692 = tpu.matmul %691, %689, %cst_535 {dimension_numbers = #tpu.dot_dimension_numbers<[1], [0], [0], [1], [0, 0, 1, 1], [], []>} : vector<8x8xbf16>, vector<8x384xbf16>, vector<8x384xf32> -> vector<8x384xf32>
    %693 = arith.addf %688, %692 : vector<8x384xf32>
    %694 = vector.extract_strided_slice %659 {offsets = [0, 146], sizes = [8, 384], strides = [1, 1]} : vector<8x640xbf16> to vector<8x384xbf16>
    %c7_536 = arith.constant 7 : index
    %c0_537 = arith.constant 0 : index
    %c0_538 = arith.constant 0 : index
    %695 = vector.load %arg30[%c7_536, %c0_537, %c0_538] : memref<9x8x8xbf16, #tpu.memory_space<vmem>>, vector<1x8x8xbf16>
    %696 = vector.shape_cast %695 : vector<1x8x8xbf16> to vector<8x8xbf16>
    %cst_539 = arith.constant dense<0.000000e+00> : vector<8x384xf32>
    %697 = tpu.matmul %696, %694, %cst_539 {dimension_numbers = #tpu.dot_dimension_numbers<[1], [0], [0], [1], [0, 0, 1, 1], [], []>} : vector<8x8xbf16>, vector<8x384xbf16>, vector<8x384xf32> -> vector<8x384xf32>
    %698 = arith.addf %693, %697 : vector<8x384xf32>
    %699 = vector.extract_strided_slice %659 {offsets = [0, 147], sizes = [8, 384], strides = [1, 1]} : vector<8x640xbf16> to vector<8x384xbf16>
    %c8_540 = arith.constant 8 : index
    %c0_541 = arith.constant 0 : index
    %c0_542 = arith.constant 0 : index
    %700 = vector.load %arg30[%c8_540, %c0_541, %c0_542] : memref<9x8x8xbf16, #tpu.memory_space<vmem>>, vector<1x8x8xbf16>
    %701 = vector.shape_cast %700 : vector<1x8x8xbf16> to vector<8x8xbf16>
    %cst_543 = arith.constant dense<0.000000e+00> : vector<8x384xf32>
    %702 = tpu.matmul %701, %699, %cst_543 {dimension_numbers = #tpu.dot_dimension_numbers<[1], [0], [0], [1], [0, 0, 1, 1], [], []>} : vector<8x8xbf16>, vector<8x384xbf16>, vector<8x384xf32> -> vector<8x384xf32>
    %703 = arith.addf %698, %702 : vector<8x384xf32>
    %c0_544 = arith.constant 0 : index
    %c0_545 = arith.constant 0 : index
    %704 = vector.load %arg31[%c0_544, %c0_545] : memref<8x1xf32, #tpu.memory_space<vmem>>, vector<8x1xf32>
    %705 = vector.broadcast %704 : vector<8x1xf32> to vector<8x384xf32>
    %706 = arith.addf %703, %705 : vector<8x384xf32>
    %cst_546 = arith.constant 0.000000e+00 : f32
    %707 = vector.broadcast %cst_546 : f32 to vector<8x384xf32>
    %708 = arith.maximumf %706, %707 : vector<8x384xf32>
    %709 = vector.broadcast %0 : vector<1x384xf32> to vector<8x384xf32>
    %710 = arith.mulf %708, %709 : vector<8x384xf32>
    %c0_547 = arith.constant 0 : index
    %c0_548 = arith.constant 0 : index
    %711 = vector.load %arg32[%c0_547, %c0_548] : memref<2x8xf32, #tpu.memory_space<vmem>>, vector<2x8xf32>
    %cst_549 = arith.constant dense<0.000000e+00> : vector<2x384xf32>
    %712 = tpu.matmul %711, %710, %cst_549 {dimension_numbers = #tpu.dot_dimension_numbers<[1], [0], [0], [1], [0, 0, 1, 1], [], []>} : vector<2x8xf32>, vector<8x384xf32>, vector<2x384xf32> -> vector<2x384xf32>
    %c0_550 = arith.constant 0 : index
    %c0_551 = arith.constant 0 : index
    %713 = vector.load %arg33[%c0_550, %c0_551] : memref<2x1xf32, #tpu.memory_space<vmem>>, vector<2x1xf32>
    %714 = vector.broadcast %713 : vector<2x1xf32> to vector<2x384xf32>
    %715 = arith.addf %712, %714 : vector<2x384xf32>
    %cst_552 = arith.constant dense<0xFF800000> : vector<384xf32>
    %716 = vector.multi_reduction <maximumf>, %715, %cst_552 [0] : vector<2x384xf32> to vector<384xf32>
    %717 = vector.shape_cast %716 : vector<384xf32> to vector<1x384xf32>
    %718 = vector.broadcast %717 : vector<1x384xf32> to vector<2x384xf32>
    %719 = arith.subf %715, %718 : vector<2x384xf32>
    %720 = math.exp %719 : vector<2x384xf32>
    %cst_553 = arith.constant dense<0.000000e+00> : vector<384xf32>
    %721 = vector.multi_reduction <add>, %720, %cst_553 [0] : vector<2x384xf32> to vector<384xf32>
    %722 = vector.shape_cast %721 : vector<384xf32> to vector<1x384xf32>
    %723 = vector.broadcast %722 : vector<1x384xf32> to vector<2x384xf32>
    %724 = arith.divf %720, %723 : vector<2x384xf32>
    %c0_554 = arith.constant 0 : index
    %c0_555 = arith.constant 0 : index
    %c0_556 = arith.constant 0 : index
    %725 = vector.load %arg37[%c0_554, %c0_555, %c0_556] : memref<1x2x384xf32, #tpu.memory_space<vmem>>, vector<1x2x384xf32>
    %726 = vector.shape_cast %725 : vector<1x2x384xf32> to vector<2x384xf32>
    %727 = vector.shape_cast %724 : vector<2x384xf32> to vector<1x2x384xf32>
    tpu.vector_store %arg37[%c0_554, %c0_555, %c0_556], %727 {strides = array<i32>} : memref<1x2x384xf32, #tpu.memory_space<vmem>>, vector<1x2x384xf32>,
    return
  }
  func.func @transform_0(%arg0: i32) -> (i32, i32, i32) {
    %c0_i32 = arith.constant 0 : i32
    %c0_i32_0 = arith.constant 0 : i32
    %c0_i32_1 = arith.constant 0 : i32
    return %arg0, %c0_i32, %c0_i32_0 : i32, i32, i32
  }
  func.func @transform_1(%arg0: i32) -> (i32, i32, i32) {
    %c0_i32 = arith.constant 0 : i32
    %c0_i32_0 = arith.constant 0 : i32
    %c0_i32_1 = arith.constant 0 : i32
    %c0_i32_2 = arith.constant 0 : i32
    return %c0_i32, %c0_i32_0, %c0_i32_1 : i32, i32, i32
  }
  func.func @transform_2(%arg0: i32) -> (i32, i32) {
    %c0_i32 = arith.constant 0 : i32
    %c0_i32_0 = arith.constant 0 : i32
    %c0_i32_1 = arith.constant 0 : i32
    return %c0_i32, %c0_i32_0 : i32, i32
  }
  func.func @transform_3(%arg0: i32) -> (i32, i32, i32) {
    %c0_i32 = arith.constant 0 : i32
    %c0_i32_0 = arith.constant 0 : i32
    %c0_i32_1 = arith.constant 0 : i32
    %c0_i32_2 = arith.constant 0 : i32
    return %c0_i32, %c0_i32_0, %c0_i32_1 : i32, i32, i32
  }
  func.func @transform_4(%arg0: i32) -> (i32, i32) {
    %c0_i32 = arith.constant 0 : i32
    %c0_i32_0 = arith.constant 0 : i32
    %c0_i32_1 = arith.constant 0 : i32
    return %c0_i32, %c0_i32_0 : i32, i32
  }
  func.func @transform_5(%arg0: i32) -> (i32, i32, i32) {
    %c0_i32 = arith.constant 0 : i32
    %c0_i32_0 = arith.constant 0 : i32
    %c0_i32_1 = arith.constant 0 : i32
    %c0_i32_2 = arith.constant 0 : i32
    return %c0_i32, %c0_i32_0, %c0_i32_1 : i32, i32, i32
  }
  func.func @transform_6(%arg0: i32) -> (i32, i32) {
    %c0_i32 = arith.constant 0 : i32
    %c0_i32_0 = arith.constant 0 : i32
    %c0_i32_1 = arith.constant 0 : i32
    return %c0_i32, %c0_i32_0 : i32, i32
  }
  func.func @transform_7(%arg0: i32) -> (i32, i32, i32) {
    %c0_i32 = arith.constant 0 : i32
    %c0_i32_0 = arith.constant 0 : i32
    %c0_i32_1 = arith.constant 0 : i32
    %c0_i32_2 = arith.constant 0 : i32
    return %c0_i32, %c0_i32_0, %c0_i32_1 : i32, i32, i32
  }
  func.func @transform_8(%arg0: i32) -> (i32, i32) {
    %c0_i32 = arith.constant 0 : i32
    %c0_i32_0 = arith.constant 0 : i32
    %c0_i32_1 = arith.constant 0 : i32
    return %c0_i32, %c0_i32_0 : i32, i32
  }
  func.func @transform_9(%arg0: i32) -> (i32, i32, i32) {
    %c0_i32 = arith.constant 0 : i32
    %c0_i32_0 = arith.constant 0 : i32
    %c0_i32_1 = arith.constant 0 : i32
    %c0_i32_2 = arith.constant 0 : i32
    return %c0_i32, %c0_i32_0, %c0_i32_1 : i32, i32, i32
  }
  func.func @transform_10(%arg0: i32) -> (i32, i32) {
    %c0_i32 = arith.constant 0 : i32
    %c0_i32_0 = arith.constant 0 : i32
    %c0_i32_1 = arith.constant 0 : i32
    return %c0_i32, %c0_i32_0 : i32, i32
  }
  func.func @transform_11(%arg0: i32) -> (i32, i32, i32) {
    %c0_i32 = arith.constant 0 : i32
    %c0_i32_0 = arith.constant 0 : i32
    %c0_i32_1 = arith.constant 0 : i32
    %c0_i32_2 = arith.constant 0 : i32
    return %c0_i32, %c0_i32_0, %c0_i32_1 : i32, i32, i32
  }
  func.func @transform_12(%arg0: i32) -> (i32, i32) {
    %c0_i32 = arith.constant 0 : i32
    %c0_i32_0 = arith.constant 0 : i32
    %c0_i32_1 = arith.constant 0 : i32
    return %c0_i32, %c0_i32_0 : i32, i32
  }
  func.func @transform_13(%arg0: i32) -> (i32, i32) {
    %c0_i32 = arith.constant 0 : i32
    %c0_i32_0 = arith.constant 0 : i32
    %c0_i32_1 = arith.constant 0 : i32
    return %c0_i32, %c0_i32_0 : i32, i32
  }
  func.func @transform_14(%arg0: i32) -> (i32, i32) {
    %c0_i32 = arith.constant 0 : i32
    %c0_i32_0 = arith.constant 0 : i32
    %c0_i32_1 = arith.constant 0 : i32
    return %c0_i32, %c0_i32_0 : i32, i32
  }
  func.func @transform_15(%arg0: i32) -> (i32, i32, i32) {
    %c0_i32 = arith.constant 0 : i32
    %c0_i32_0 = arith.constant 0 : i32
    %c0_i32_1 = arith.constant 0 : i32
    %c0_i32_2 = arith.constant 0 : i32
    return %c0_i32, %c0_i32_0, %c0_i32_1 : i32, i32, i32
  }
  func.func @transform_16(%arg0: i32) -> (i32, i32) {
    %c0_i32 = arith.constant 0 : i32
    %c0_i32_0 = arith.constant 0 : i32
    %c0_i32_1 = arith.constant 0 : i32
    return %c0_i32, %c0_i32_0 : i32, i32
  }
  func.func @transform_17(%arg0: i32) -> (i32, i32, i32) {
    %c0_i32 = arith.constant 0 : i32
    %c0_i32_0 = arith.constant 0 : i32
    %c0_i32_1 = arith.constant 0 : i32
    %c0_i32_2 = arith.constant 0 : i32
    return %c0_i32, %c0_i32_0, %c0_i32_1 : i32, i32, i32
  }
  func.func @transform_18(%arg0: i32) -> (i32, i32, i32) {
    %c0_i32 = arith.constant 0 : i32
    %c0_i32_0 = arith.constant 0 : i32
    %c0_i32_1 = arith.constant 0 : i32
    %c0_i32_2 = arith.constant 0 : i32
    return %c0_i32, %c0_i32_0, %c0_i32_1 : i32, i32, i32
  }
  func.func @transform_19(%arg0: i32) -> (i32, i32, i32) {
    %c0_i32 = arith.constant 0 : i32
    %c0_i32_0 = arith.constant 0 : i32
    %c0_i32_1 = arith.constant 0 : i32
    %c0_i32_2 = arith.constant 0 : i32
    return %c0_i32, %c0_i32_0, %c0_i32_1 : i32, i32, i32
  }
  func.func @transform_20(%arg0: i32) -> (i32, i32) {
    %c0_i32 = arith.constant 0 : i32
    %c0_i32_0 = arith.constant 0 : i32
    %c0_i32_1 = arith.constant 0 : i32
    return %c0_i32, %c0_i32_0 : i32, i32
  }
  func.func @transform_21(%arg0: i32) -> (i32, i32, i32) {
    %c0_i32 = arith.constant 0 : i32
    %c0_i32_0 = arith.constant 0 : i32
    %c0_i32_1 = arith.constant 0 : i32
    %c0_i32_2 = arith.constant 0 : i32
    return %c0_i32, %c0_i32_0, %c0_i32_1 : i32, i32, i32
  }
  func.func @transform_22(%arg0: i32) -> (i32, i32) {
    %c0_i32 = arith.constant 0 : i32
    %c0_i32_0 = arith.constant 0 : i32
    %c0_i32_1 = arith.constant 0 : i32
    return %c0_i32, %c0_i32_0 : i32, i32
  }
  func.func @transform_23(%arg0: i32) -> (i32, i32, i32) {
    %c0_i32 = arith.constant 0 : i32
    %c0_i32_0 = arith.constant 0 : i32
    %c0_i32_1 = arith.constant 0 : i32
    %c0_i32_2 = arith.constant 0 : i32
    return %c0_i32, %c0_i32_0, %c0_i32_1 : i32, i32, i32
  }
  func.func @transform_24(%arg0: i32) -> (i32, i32) {
    %c0_i32 = arith.constant 0 : i32
    %c0_i32_0 = arith.constant 0 : i32
    %c0_i32_1 = arith.constant 0 : i32
    return %c0_i32, %c0_i32_0 : i32, i32
  }
  func.func @transform_25(%arg0: i32) -> (i32, i32, i32) {
    %c0_i32 = arith.constant 0 : i32
    %c0_i32_0 = arith.constant 0 : i32
    %c0_i32_1 = arith.constant 0 : i32
    %c0_i32_2 = arith.constant 0 : i32
    return %c0_i32, %c0_i32_0, %c0_i32_1 : i32, i32, i32
  }
  func.func @transform_26(%arg0: i32) -> (i32, i32, i32) {
    %c0_i32 = arith.constant 0 : i32
    %c0_i32_0 = arith.constant 0 : i32
    %c0_i32_1 = arith.constant 0 : i32
    %c0_i32_2 = arith.constant 0 : i32
    return %c0_i32, %c0_i32_0, %c0_i32_1 : i32, i32, i32
  }
  func.func @transform_27(%arg0: i32) -> (i32, i32, i32) {
    %c0_i32 = arith.constant 0 : i32
    %c0_i32_0 = arith.constant 0 : i32
    %c0_i32_1 = arith.constant 0 : i32
    %c0_i32_2 = arith.constant 0 : i32
    return %c0_i32, %c0_i32_0, %c0_i32_1 : i32, i32, i32
  }
  func.func @transform_28(%arg0: i32) -> (i32, i32) {
    %c0_i32 = arith.constant 0 : i32
    %c0_i32_0 = arith.constant 0 : i32
    %c0_i32_1 = arith.constant 0 : i32
    return %c0_i32, %c0_i32_0 : i32, i32
  }
  func.func @transform_29(%arg0: i32) -> (i32, i32, i32) {
    %c0_i32 = arith.constant 0 : i32
    %c0_i32_0 = arith.constant 0 : i32
    %c0_i32_1 = arith.constant 0 : i32
    %c0_i32_2 = arith.constant 0 : i32
    return %c0_i32, %c0_i32_0, %c0_i32_1 : i32, i32, i32
  }
  func.func @transform_30(%arg0: i32) -> (i32, i32) {
    %c0_i32 = arith.constant 0 : i32
    %c0_i32_0 = arith.constant 0 : i32
    %c0_i32_1 = arith.constant 0 : i32
    return %c0_i32, %c0_i32_0 : i32, i32
  }
  func.func @transform_31(%arg0: i32) -> (i32, i32) {
    %c0_i32 = arith.constant 0 : i32
    %c0_i32_0 = arith.constant 0 : i32
    %c0_i32_1 = arith.constant 0 : i32
    return %c0_i32, %c0_i32_0 : i32, i32
  }
  func.func @transform_32(%arg0: i32) -> (i32, i32) {
    %c0_i32 = arith.constant 0 : i32
    %c0_i32_0 = arith.constant 0 : i32
    %c0_i32_1 = arith.constant 0 : i32
    return %c0_i32, %c0_i32_0 : i32, i32
  }
  func.func @transform_33(%arg0: i32) -> (i32, i32) {
    %c0_i32 = arith.constant 0 : i32
    %c0_i32_0 = arith.constant 0 : i32
    %c0_i32_1 = arith.constant 0 : i32
    return %c0_i32, %c0_i32_0 : i32, i32
  }
  func.func @transform_34(%arg0: i32) -> (i32, i32) {
    %c0_i32 = arith.constant 0 : i32
    %c0_i32_0 = arith.constant 0 : i32
    %c0_i32_1 = arith.constant 0 : i32
    return %c0_i32, %c0_i32_0 : i32, i32
  }
  func.func @transform_35(%arg0: i32) -> (i32, i32) {
    %c0_i32 = arith.constant 0 : i32
    %c0_i32_0 = arith.constant 0 : i32
    %c0_i32_1 = arith.constant 0 : i32
    return %c0_i32, %c0_i32_0 : i32, i32
  }
  func.func @transform_36(%arg0: i32) -> (i32, i32, i32) {
    %c0_i32 = arith.constant 0 : i32
    %c0_i32_0 = arith.constant 0 : i32
    %c0_i32_1 = arith.constant 0 : i32
    return %arg0, %c0_i32, %c0_i32_0 : i32, i32, i32
  }
}

</mosaic_0001>

<bundles_post_ra>
// kernel: forward.1
= control target key start
LH: loop header
LB: loop body
LE: loop exit
PB: predicated region body
PF: predicated region fallthrough
CT: control target
= control target key end

     0   :  { %s17050_s6 = smov 1   ;;  %s17051_s10 = smov 2   ;;  %s19543_s0 = inlined_call_operand.smem [shape: u32[37], index: -1, kind: input, shape index: {}] }
   0x1   :  { %s17156_s5 = sld [smem:[%s19543_s0]]   ;;  %s17052_s14 = smov 3  }
   0x2   :  { %s17161_s9 = sld [smem:[%s19543_s0 + %s17050_s6]]   ;;  %s17053_s18 = smov 4  }
   0x3   :  { %s17166_s13 = sld [smem:[%s19543_s0 + %s17051_s10]]   ;;  %s17054_s22 = smov 5  }
   0x4   :  { %s17171_s17 = sld [smem:[%s19543_s0 + %s17052_s14]]   ;;  %s17055_s26 = smov 6  }
   0x5   :  { %s17176_s21 = sld [smem:[%s19543_s0 + %s17053_s18]]   ;;  %s17056_s30 = smov 7  }
   0x6   :  { %s17181_s25 = sld [smem:[%s19543_s0 + %s17054_s22]]   ;;  %s17057_s4 = smov 8  }
   0x7   :  { %19623 = sst [smem:[#allocation65_spill]] %s17156_s5  ;;  %s17058_s10 = smov 9  }
   0x8   :  { %19624 = sst [smem:[#allocation66_spill]] %s17161_s9  ;;  %s17059_s15 = smov 10  }
   0x9   :  { %19625 = sst [smem:[#allocation67_spill]] %s17166_s13  ;;  %s17060_s20 = smov 11  }
   0xa   :  { %19626 = sst [smem:[#allocation68_spill]] %s17171_s17  ;;  %s17062_s1 = smov 13  }
   0xb   :  { %s17186_s29 = sld [smem:[%s19543_s0 + %s17055_s26]]   ;;  %s17061_s26 = smov 12  }
   0xc   :  { %19627 = sst [smem:[#allocation69_spill]] %s17181_s25  ;;  %s17063_s7 = smov 14  }
   0xd   :  { %s17191_s3 = sld [smem:[%s19543_s0 + %s17056_s30]]   ;;  %s17065_s22 = smov 16  }
   0xe   :  { %s17196_s8 = sld [smem:[%s19543_s0 + %s17057_s4]]   ;;  %s17066_s28 = smov 17  }
   0xf   :  { %s17201_s14 = sld [smem:[%s19543_s0 + %s17058_s10]]  }
  0x10   :  { %s17206_s19 = sld [smem:[%s19543_s0 + %s17059_s15]]   ;;  %s17064_s15 = smov 15  }
  0x11   :  { %s17211_s24 = sld [smem:[%s19543_s0 + %s17060_s20]]  }
  0x12   :  { %s17216_s30 = sld [smem:[%s19543_s0 + %s17061_s26]]  }
  0x13   :  { %19628 = sst [smem:[#allocation70_spill]] %s17191_s3 }
  0x14   :  { %19629 = sst [smem:[#allocation71_spill]] %s17196_s8 }
  0x15   :  { %19630 = sst [smem:[#allocation72_spill]] %s17201_s14 }
  0x16   :  { %s17221_s6 = sld [smem:[%s19543_s0 + %s17062_s1]]  }
  0x17   :  { %19631 = sst [smem:[#allocation73_spill]] %s17211_s24 }
  0x18   :  { %19632 = sst [smem:[#allocation74_spill]] %s17216_s30 }
  0x19   :  { %s17226_s12 = sld [smem:[%s19543_s0 + %s17063_s7]]   ;;  %s17067_s7 = smov 18  }
  0x1a   :  { %s17231_s20 = sld [smem:[%s19543_s0 + %s17064_s15]]   ;;  %s17068_s15 = smov 19  }
  0x1b   :  { %s17236_s27 = sld [smem:[%s19543_s0 + %s17065_s22]]   ;;  %s17069_s22 = smov 20  }
  0x1c   :  { %19633 = sst [smem:[#allocation75_spill]] %s17221_s6 }
  0x1d   :  { %s17241_s4 = sld [smem:[%s19543_s0 + %s17066_s28]]   ;;  %s17070_s28 = smov 21  }
  0x1e   :  { %s17246_s24 = sld [smem:[%s19543_s0 + %s17067_s7]]   ;;  %s17071_s7 = smov 22  }
  0x1f   :  { %19634 = sst [smem:[#allocation76_spill]] %s17226_s12 }
  0x20   :  { %s17251_s5 = sld [smem:[%s19543_s0 + %s17068_s15]]   ;;  %s17072_s15 = smov 23  }
  0x21   :  { %19635 = sst [smem:[#allocation77_spill]] %s17236_s27 }
  0x22   :  { %s17256_s27 = sld [smem:[%s19543_s0 + %s17069_s22]]   ;;  %s17073_s22 = smov 24  }
  0x23   :  { %19636 = sst [smem:[#allocation78_spill]] %s17241_s4 }
  0x24   :  { %s17261_s4 = sld [smem:[%s19543_s0 + %s17070_s28]]   ;;  %s17074_s28 = smov 25  }
  0x25   :  { %s17266_s12 = sld [smem:[%s19543_s0 + %s17071_s7]]   ;;  %s17075_s7 = smov 26  }
  0x26   :  { %19637 = sst [smem:[#allocation79_spill]] %s17251_s5 }
  0x27   :  { %s17271_s5 = sld [smem:[%s19543_s0 + %s17072_s15]]   ;;  %s17076_s15 = smov 27  }
  0x28   :  { %s17276_s30 = sld [smem:[%s19543_s0 + %s17073_s22]]   ;;  %s17077_s22 = smov 28  }
  0x29   :  { %s17291_s14 = sld [smem:[%s19543_s0 + %s17076_s15]]   ;;  %s17080_s15 = smov 31  }
  0x2a   :  { %19638 = sst [smem:[#allocation80_spill]] %s17261_s4 }
  0x2b   :  { %19639 = sst [smem:[#allocation81_spill]] %s17266_s12 }
  0x2c   :  { %s17281_s4 = sld [smem:[%s19543_s0 + %s17074_s28]]   ;;  %s17078_s28 = smov 29  }
  0x2d   :  { %19640 = sst [smem:[#allocation82_spill]] %s17271_s5 }
  0x2e   :  { %19641 = sst [smem:[#allocation83_spill]] %s17276_s30 }
  0x2f   :  { %s17286_s12 = sld [smem:[%s19543_s0 + %s17075_s7]]   ;;  %s17079_s7 = smov 30  }
  0x30   :  { %19644 = sst [smem:[#allocation86_spill]] %s17291_s14 }
  0x31   :  { %s17296_s30 = sld [smem:[%s19543_s0 + %s17077_s22]]   ;;  %s17081_s22 = smov 32  }
  0x32   :  { %19642 = sst [smem:[#allocation84_spill]] %s17281_s4 }
  0x33   :  { %s17301_s3 = sld [smem:[%s19543_s0 + %s17078_s28]]   ;;  %s17082_s28 = smov 33  }
  0x34   :  { %s17311_s25 = sld [smem:[%s19543_s0 + %s17080_s15]]   ;;  %s17084_s15 = smov 35  }
  0x35   :  { %19643 = sst [smem:[#allocation85_spill]] %s17286_s12 }
  0x36   :  { %s17306_s12 = sld [smem:[%s19543_s0 + %s17079_s7]]   ;;  %s17083_s7 = smov 34  }
  0x37   :  { %19645 = sst [smem:[#allocation87_spill]] %s17296_s30 }
  0x38   :  { %s17316_s30 = sld [smem:[%s19543_s0 + %s17081_s22]]   ;;  %s17085_s22 = smov 36  }
  0x39   :  { %19646 = sst [smem:[#allocation88_spill]] %s17301_s3 }
  0x3a   :  { %s17321_s17 = sld [smem:[%s19543_s0 + %s17082_s28]]  }
  0x3b   :  { %s17331_s9 = sld [smem:[%s19543_s0 + %s17084_s15]]  }
  0x3c   :  { %19647 = sst [smem:[#allocation89_spill]] %s17306_s12 }
  0x3d   :  { %s17326_s12 = sld [smem:[%s19543_s0 + %s17083_s7]]  }
  0x3e   :  { %19648 = sst [smem:[#allocation90_spill]] %s17316_s30 }
  0x3f   :  { %s17336_s30 = sld [smem:[%s19543_s0 + %s17085_s22]]  }
  0x40   :  { %78 = vsyncpa [#allocation3], 0 }
  0x41   :  { %79 = vsyncpa [#allocation5], 0 }
  0x42   :  { %80 = vsyncpa [#allocation8], 0 }
  0x43   :  { %81 = vsyncpa [#allocation11], 0 }
  0x44   :  { %82 = vsyncpa [#allocation14], 0 }
  0x45   :  { %83 = vsyncpa [#allocation17], 0 }
  0x46   :  { %84 = vsyncpa [#allocation20], 0 }
  0x47   :  { %85 = vsyncpa [#allocation23], 0 }
  0x48   :  { %86 = vsyncpa [#allocation26], 0 }
  0x49   :  { %87 = vsyncpa [#allocation29], 0 }
  0x4a   :  { %88 = vsyncpa [#allocation32], 0 }
  0x4b   :  { %89 = vsyncpa [#allocation35], 0 }
  0x4c   :  { %90 = vsyncpa [#allocation38], 0 }
  0x4d   :  { %91 = vsyncpa [#allocation41], 0 }
  0x4e   :  { %92 = vsyncpa [#allocation44], 0 }
  0x4f   :  { %93 = vsyncpa [#allocation47], 0  ;;  %s17338_s28 = smov 0  }
  0x50 LB: > { %s19649_s14 = sld [smem:[#allocation86_spill]]  ;;  %s19650_s8 = sld [smem:[#allocation71_spill]]  ;;  %s17048_s28 = sphi %s17338_s28, %s99_s28  }
  0x51   : > { %s19651_s4 = sld [smem:[#allocation84_spill]]  ;;  %s19652_s3 = sld [smem:[#allocation88_spill]] }
  0x52   : > { %s19653_s6 = sld [smem:[#allocation75_spill]]  ;;  %s19654_s5 = sld [smem:[#allocation82_spill]] }
  0x53   : > { %s19655_s13 = sld [smem:[#allocation67_spill]]  ;;  %s17086_s0 = smov [#allocation4]  }
  0x54   : > { %s917_s1 = sshll.u32 %s17086_s0, 4  ;;  %s17344_s2 = sadd.s32 4294967295, %s17048_s28   ;;  %s918_s1 = int_to_ptr.vmem [resolvable:$true] %s917_s1 }
  0x55   : > { %p13075_p0 = scmp.ge.s32.totalorder %s17048_s28, 1  ;;  %p891_p1 = scmp.lt.s32.totalorder %s17048_s28, 3 }
  0x56   : > { %p19562_p2 = scmp.eq.s32.totalorder %s17344_s2, 0  ;;  %s17087_s10 = smov [#allocation7]  }
  0x57   : > { %p17349_p3 = pnand %p13075_p0, %p891_p1  ;;  %s941_s11 = sshll.u32 %s17087_s10, 4  ;;  %s17355_s11 = int_to_ptr.vmem [resolvable:$true] %s941_s11 }
  0x58   : > { %s17088_s15 = smov [#allocation10]  }
  0x59   : > { %s19656_s7 = scalar_select %p17349_p3, 1, 0 }
  0x5a   : > { %p15747_p4 = pneg %p17349_p3  ;;  %s964_s16 = sshll.u32 %s17088_s15, 4  ;;  %s17363_s16 = int_to_ptr.vmem [resolvable:$true] %s964_s16 }
  0x5b   : > { %s16110_s22 = scalar_lea.hbm %s19655_s13, 128 }
  0x5c   : > { %p17359_p5 = pnand %p19562_p2, %p15747_p4  ;;  %p16111_p6 = scmp.ne.s32.totalorder %s19655_s13, %s16110_s22 }
  0x5d   : > { %p16117_p10 = scmp.lt.u32.totalorder %s16110_s22, %s19655_s13 }
  0x5e   : > { %p17369_p7 = pneg %p17359_p5 }
  0x60   : > { %p16113_p8 = pnand %p17369_p7, %p16111_p6 }
  0x62   : > { %p16114_p9 = pneg %p16113_p8 }
  0x64   : > { %p16119_p11 = pnand %p16117_p10, %p16114_p9 }
  0x66   : > { %16122 = shalt.err (!%p16119_p11)
}
  0x67   : > { %s16123_s26 = scalar_lea.vmem %s918_s1, 128  ;;  %p16131_p1 = scmp.lt.s32.totalorder %s918_s1, %s918_s1 }
  0x68   : > { %p16124_p12 = scmp.ne.s32.totalorder %s918_s1, %s16123_s26  ;;  %p16132_p4 = scmp.lt.s32.totalorder %s16123_s26, %s16123_s26 }
  0x6a   : > { %p16126_p13 = pnand %p16124_p12, %p17369_p7  ;;  %p16133_p2 = por %p16132_p4, %p16131_p1 }
  0x6c   : > { %p16127_p0 = pneg %p16126_p13 }
  0x6e   : > { %p16134_p3 = pnand %p16133_p2, %p16127_p0 }
  0x70   : > { %16137 = shalt.err (!%p16134_p3)
}
  0x71   : > { %15753 = dma.hbm_to_vmem [thread:$0]  (!%p17359_p5), %s19655_s13, 128, %s918_s1, [#allocation5]  }
  0x72   : > { %s16138_s0 = scalar_lea.hbm %s17176_s21, 128 }
  0x73   : > { %p16139_p6 = scmp.ne.s32.totalorder %s17176_s21, %s16138_s0  ;;  %p16145_p10 = scmp.lt.u32.totalorder %s16138_s0, %s17176_s21 }
  0x75   : > { %p16141_p8 = pnand %p16139_p6, %p17369_p7 }
  0x77   : > { %p16142_p9 = pneg %p16141_p8 }
  0x79   : > { %p16147_p11 = pnand %p16145_p10, %p16142_p9 }
  0x7b   : > { %16150 = shalt.err (!%p16147_p11)
}
  0x7c   : > { %s16151_s10 = scalar_lea.vmem %s17355_s11, 128  ;;  %p16159_p13 = scmp.lt.s32.totalorder %s17355_s11, %s17355_s11 }
  0x7d   : > { %p16152_p2 = scmp.ne.s32.totalorder %s17355_s11, %s16151_s10  ;;  %p16160_p0 = scmp.lt.s32.totalorder %s16151_s10, %s16151_s10 }
  0x7f   : > { %p16154_p3 = pnand %p16152_p2, %p17369_p7  ;;  %p16161_p1 = por %p16160_p0, %p16159_p13 }
  0x81   : > { %p16155_p12 = pneg %p16154_p3 }
  0x83   : > { %p16162_p4 = pnand %p16161_p1, %p16155_p12 }
  0x85   : > { %16165 = shalt.err (!%p16162_p4)
}
  0x86   : > { %15759 = dma.hbm_to_vmem [thread:$0]  (!%p17359_p5), %s17176_s21, 128, %s17355_s11, [#allocation8]  }
  0x87   : > { %s16166_s1 = scalar_lea.hbm %s17186_s29, 256 }
  0x88   : > { %p16167_p6 = scmp.ne.s32.totalorder %s17186_s29, %s16166_s1  ;;  %p16173_p10 = scmp.lt.u32.totalorder %s16166_s1, %s17186_s29 }
  0x8a   : > { %p16169_p8 = pnand %p16167_p6, %p17369_p7 }
  0x8c   : > { %p16170_p9 = pneg %p16169_p8 }
  0x8e   : > { %p16175_p11 = pnand %p16173_p10, %p16170_p9 }
  0x90   : > { %16178 = shalt.err (!%p16175_p11)
}
  0x91   : > { %s16179_s15 = scalar_lea.vmem %s17363_s16, 256  ;;  %p16187_p13 = scmp.lt.s32.totalorder %s17363_s16, %s17363_s16 }
  0x92   : > { %p16180_p2 = scmp.ne.s32.totalorder %s17363_s16, %s16179_s15  ;;  %p16188_p0 = scmp.lt.s32.totalorder %s16179_s15, %s16179_s15 }
  0x94   : > { %p16182_p3 = pnand %p16180_p2, %p17369_p7  ;;  %p16189_p1 = por %p16188_p0, %p16187_p13 }
  0x96   : > { %p16183_p12 = pneg %p16182_p3 }
  0x98   : > { %p16190_p4 = pnand %p16189_p1, %p16183_p12 }
  0x9a   : > { %16193 = shalt.err (!%p16190_p4)
}
  0x9b   : > { %s19565_s11 = smov 128   ;;  %s19567_s22 = smov 8  }
  0x9c   : > { %15765 = dma.hbm_to_vmem [thread:$0]  (!%p17359_p5), %s17186_s29, 256, %s17363_s16, [#allocation11], %s19565_s11, %s19565_s11, %s19567_s22  }
  0x9d   : > { %s17091_s26 = smov [#allocation13]   ;;  %s17092_s10 = smov [#allocation16]  }
  0x9e   : > { %s990_s0 = sshll.u32 %s17091_s26, 4  ;;  %s1016_s1 = sshll.u32 %s17092_s10, 4  ;;  %s991_s0 = int_to_ptr.vmem [resolvable:$true] %s990_s0  ;;  %s1017_s1 = int_to_ptr.vmem [resolvable:$true] %s1016_s1 }
  0x9f   : > { %s16194_s15 = scalar_lea.hbm %s19650_s8, 256 }
  0xa0   : > { %p16195_p6 = scmp.ne.s32.totalorder %s19650_s8, %s16194_s15  ;;  %p16201_p10 = scmp.lt.u32.totalorder %s16194_s15, %s19650_s8 }
  0xa2   : > { %p16197_p8 = pnand %p16195_p6, %p17369_p7 }
  0xa4   : > { %p16198_p9 = pneg %p16197_p8 }
  0xa6   : > { %p16203_p11 = pnand %p16201_p10, %p16198_p9 }
  0xa8   : > { %16206 = shalt.err (!%p16203_p11)
}
  0xa9   : > { %s16207_s13 = scalar_lea.vmem %s991_s0, 256  ;;  %p16215_p13 = scmp.lt.s32.totalorder %s991_s0, %s991_s0 }
  0xaa   : > { %p16208_p2 = scmp.ne.s32.totalorder %s991_s0, %s16207_s13  ;;  %p16216_p0 = scmp.lt.s32.totalorder %s16207_s13, %s16207_s13 }
  0xac   : > { %p16210_p3 = pnand %p16208_p2, %p17369_p7  ;;  %p16217_p1 = por %p16216_p0, %p16215_p13 }
  0xae   : > { %p16211_p12 = pneg %p16210_p3 }
  0xb0   : > { %p16218_p4 = pnand %p16217_p1, %p16211_p12 }
  0xb2   : > { %16221 = shalt.err (!%p16218_p4)
}
  0xb3   : > { %15771 = dma.hbm_to_vmem [thread:$0]  (!%p17359_p5), %s19650_s8, 256, %s991_s0, [#allocation14], %s19565_s11, %s19565_s11, %s19567_s22  }
  0xb4   : > { %s16222_s16 = scalar_lea.hbm %s17206_s19, 512 }
  0xb5   : > { %p16223_p6 = scmp.ne.s32.totalorder %s17206_s19, %s16222_s16  ;;  %p16229_p10 = scmp.lt.u32.totalorder %s16222_s16, %s17206_s19 }
  0xb7   : > { %p16225_p8 = pnand %p16223_p6, %p17369_p7 }
  0xb9   : > { %p16226_p9 = pneg %p16225_p8 }
  0xbb   : > { %p16231_p11 = pnand %p16229_p10, %p16226_p9 }
  0xbd   : > { %16234 = shalt.err (!%p16231_p11)
}
  0xbe   : > { %s16235_s13 = scalar_lea.vmem %s1017_s1, 512  ;;  %p16243_p13 = scmp.lt.s32.totalorder %s1017_s1, %s1017_s1 }
  0xbf   : > { %p16236_p2 = scmp.ne.s32.totalorder %s1017_s1, %s16235_s13  ;;  %p16244_p0 = scmp.lt.s32.totalorder %s16235_s13, %s16235_s13 }
  0xc1   : > { %p16238_p3 = pnand %p16236_p2, %p17369_p7  ;;  %p16245_p1 = por %p16244_p0, %p16243_p13 }
  0xc3   : > { %p16239_p12 = pneg %p16238_p3 }
  0xc5   : > { %p16246_p4 = pnand %p16245_p1, %p16239_p12 }
  0xc7   : > { %16249 = shalt.err (!%p16246_p4)
}
  0xc8   : > { %15777 = dma.hbm_to_vmem [thread:$0]  (!%p17359_p5), %s17206_s19, 512, %s1017_s1, [#allocation17], %s19565_s11, %s19565_s11, %s19567_s22  }
  0xc9   : > { %s17093_s26 = smov [#allocation19]   ;;  %s16250_s10 = scalar_lea.hbm %s19653_s6, 6144 }
  0xca   : > { %s1045_s0 = sshll.u32 %s17093_s26, 4  ;;  %p16251_p6 = scmp.ne.s32.totalorder %s19653_s6, %s16250_s10  ;;  %s1046_s0 = int_to_ptr.vmem [resolvable:$true] %s1045_s0 }
  0xcb   : > { %p16257_p10 = scmp.lt.u32.totalorder %s16250_s10, %s19653_s6 }
  0xcc   : > { %p16253_p8 = pnand %p16251_p6, %p17369_p7 }
  0xce   : > { %p16254_p9 = pneg %p16253_p8 }
  0xd0   : > { %p16259_p11 = pnand %p16257_p10, %p16254_p9 }
  0xd2   : > { %16262 = shalt.err (!%p16259_p11)
}
  0xd3   : > { %s16263_s15 = scalar_lea.vmem %s1046_s0, 6144  ;;  %p16271_p13 = scmp.lt.s32.totalorder %s1046_s0, %s1046_s0 }
  0xd4   : > { %p16264_p2 = scmp.ne.s32.totalorder %s1046_s0, %s16263_s15  ;;  %p16272_p0 = scmp.lt.s32.totalorder %s16263_s15, %s16263_s15 }
  0xd6   : > { %p16266_p3 = pnand %p16264_p2, %p17369_p7  ;;  %p16273_p1 = por %p16272_p0, %p16271_p13 }
  0xd8   : > { %p16267_p12 = pneg %p16266_p3 }
  0xda   : > { %p16274_p4 = pnand %p16273_p1, %p16267_p12 }
  0xdc   : > { %16277 = shalt.err (!%p16274_p4)
}
  0xdd   : > { %15783 = dma.hbm_to_vmem [thread:$0]  (!%p17359_p5), %s19653_s6, 6144, %s1046_s0, [#allocation20], %s19565_s11, %s19565_s11, %s19567_s22  }
  0xde   : > { %s17094_s1 = smov [#allocation22]   ;;  %s17095_s13 = smov [#allocation25]  }
  0xdf   : > { %s1071_s16 = sshll.u32 %s17094_s1, 4  ;;  %s1100_s26 = sshll.u32 %s17095_s13, 4  ;;  %s1072_s16 = int_to_ptr.vmem [resolvable:$true] %s1071_s16  ;;  %s17453_s26 = int_to_ptr.vmem [resolvable:$true] %s1100_s26 }
  0xe0   : > { %s16278_s10 = scalar_lea.hbm %s17231_s20, 512 }
  0xe1   : > { %p16279_p6 = scmp.ne.s32.totalorder %s17231_s20, %s16278_s10  ;;  %p16285_p10 = scmp.lt.u32.totalorder %s16278_s10, %s17231_s20 }
  0xe3   : > { %p16281_p8 = pnand %p16279_p6, %p17369_p7 }
  0xe5   : > { %p16282_p9 = pneg %p16281_p8 }
  0xe7   : > { %p16287_p11 = pnand %p16285_p10, %p16282_p9 }
  0xe9   : > { %16290 = shalt.err (!%p16287_p11)
}
  0xea   : > { %s16291_s15 = scalar_lea.vmem %s1072_s16, 512  ;;  %p16299_p13 = scmp.lt.s32.totalorder %s1072_s16, %s1072_s16 }
  0xeb   : > { %p16292_p2 = scmp.ne.s32.totalorder %s1072_s16, %s16291_s15  ;;  %p16300_p0 = scmp.lt.s32.totalorder %s16291_s15, %s16291_s15 }
  0xed   : > { %p16294_p3 = pnand %p16292_p2, %p17369_p7  ;;  %p16301_p1 = por %p16300_p0, %p16299_p13 }
  0xef   : > { %p16295_p12 = pneg %p16294_p3 }
  0xf1   : > { %p16302_p4 = pnand %p16301_p1, %p16295_p12 }
  0xf3   : > { %16305 = shalt.err (!%p16302_p4)
}
  0xf4   : > { %s19569_s0 = smov 64   ;;  %s19571_s1 = smov 4  }
  0xf5   : > { %15789 = dma.hbm_to_vmem [thread:$0]  (!%p17359_p5), %s17231_s20, 512, %s1072_s16, [#allocation23], %s19569_s0, %s19569_s0, %s19571_s1  }
  0xf6   : > { %s16306_s13 = scalar_lea.hbm %s17246_s24, 1152 }
  0xf7   : > { %p16307_p6 = scmp.ne.s32.totalorder %s17246_s24, %s16306_s13  ;;  %p16313_p10 = scmp.lt.u32.totalorder %s16306_s13, %s17246_s24 }
  0xf9   : > { %p16309_p8 = pnand %p16307_p6, %p17369_p7 }
  0xfb   : > { %p16310_p9 = pneg %p16309_p8 }
  0xfd   : > { %p16315_p11 = pnand %p16313_p10, %p16310_p9 }
  0xff   : > { %16318 = shalt.err (!%p16315_p11)
}
 0x100   : > { %s16319_s10 = scalar_lea.vmem %s17453_s26, 1152  ;;  %p16327_p13 = scmp.lt.s32.totalorder %s17453_s26, %s17453_s26 }
 0x101   : > { %p16320_p2 = scmp.ne.s32.totalorder %s17453_s26, %s16319_s10  ;;  %p16328_p0 = scmp.lt.s32.totalorder %s16319_s10, %s16319_s10 }
 0x103   : > { %p16322_p3 = pnand %p16320_p2, %p17369_p7  ;;  %p16329_p1 = por %p16328_p0, %p16327_p13 }
 0x105   : > { %p16323_p12 = pneg %p16322_p3 }
 0x107   : > { %p16330_p4 = pnand %p16329_p1, %p16323_p12 }
 0x109   : > { %16333 = shalt.err (!%p16330_p4)
}
 0x10a   : > { %15795 = dma.hbm_to_vmem [thread:$0]  (!%p17359_p5), %s17246_s24, 1152, %s17453_s26, [#allocation26], %s19569_s0, %s19569_s0, %s19571_s1  }
 0x10b   : > { %s17098_s16 = smov [#allocation28]   ;;  %s17099_s13 = smov [#allocation31]  }
 0x10c   : > { %s1126_s15 = sshll.u32 %s17098_s16, 4  ;;  %s1155_s11 = sshll.u32 %s17099_s13, 4  ;;  %s1127_s15 = int_to_ptr.vmem [resolvable:$true] %s1126_s15  ;;  %s17486_s11 = int_to_ptr.vmem [resolvable:$true] %s1155_s11 }
 0x10d   : > { %s16334_s10 = scalar_lea.hbm %s17256_s27, 256 }
 0x10e   : > { %p16335_p6 = scmp.ne.s32.totalorder %s17256_s27, %s16334_s10  ;;  %p16341_p10 = scmp.lt.u32.totalorder %s16334_s10, %s17256_s27 }
 0x110   : > { %p16337_p8 = pnand %p16335_p6, %p17369_p7 }
 0x112   : > { %p16338_p9 = pneg %p16337_p8 }
 0x114   : > { %p16343_p11 = pnand %p16341_p10, %p16338_p9 }
 0x116   : > { %16346 = shalt.err (!%p16343_p11)
}
 0x117   : > { %s16347_s22 = scalar_lea.vmem %s1127_s15, 256  ;;  %p16355_p13 = scmp.lt.s32.totalorder %s1127_s15, %s1127_s15 }
 0x118   : > { %p16348_p2 = scmp.ne.s32.totalorder %s1127_s15, %s16347_s22  ;;  %p16356_p0 = scmp.lt.s32.totalorder %s16347_s22, %s16347_s22 }
 0x11a   : > { %p16350_p3 = pnand %p16348_p2, %p17369_p7  ;;  %p16357_p1 = por %p16356_p0, %p16355_p13 }
 0x11c   : > { %p16351_p12 = pneg %p16350_p3 }
 0x11e   : > { %p16358_p4 = pnand %p16357_p1, %p16351_p12 }
 0x120   : > { %16361 = shalt.err (!%p16358_p4)
}
 0x121   : > { %s19659_s26 = smov 8   ;;  %s19660_s16 = smov 128  }
 0x122   : > { %15801 = dma.hbm_to_vmem [thread:$0]  (!%p17359_p5), %s17256_s27, 256, %s1127_s15, [#allocation29], %s19660_s16, %s19660_s16, %s19659_s26  }
 0x123   : > { %s16362_s13 = scalar_lea.hbm %s19654_s5, 256 }
 0x124   : > { %p16363_p6 = scmp.ne.s32.totalorder %s19654_s5, %s16362_s13  ;;  %p16369_p10 = scmp.lt.u32.totalorder %s16362_s13, %s19654_s5 }
 0x126   : > { %p16365_p8 = pnand %p16363_p6, %p17369_p7 }
 0x128   : > { %p16366_p9 = pneg %p16365_p8 }
 0x12a   : > { %p16371_p11 = pnand %p16369_p10, %p16366_p9 }
 0x12c   : > { %16374 = shalt.err (!%p16371_p11)
}
 0x12d   : > { %s16375_s22 = scalar_lea.vmem %s17486_s11, 256  ;;  %p16383_p13 = scmp.lt.s32.totalorder %s17486_s11, %s17486_s11 }
 0x12e   : > { %p16376_p2 = scmp.ne.s32.totalorder %s17486_s11, %s16375_s22  ;;  %p16384_p0 = scmp.lt.s32.totalorder %s16375_s22, %s16375_s22 }
 0x130   : > { %p16378_p3 = pnand %p16376_p2, %p17369_p7  ;;  %p16385_p1 = por %p16384_p0, %p16383_p13 }
 0x132   : > { %p16379_p12 = pneg %p16378_p3 }
 0x134   : > { %p16386_p4 = pnand %p16385_p1, %p16379_p12 }
 0x136   : > { %16389 = shalt.err (!%p16386_p4)
}
 0x137   : > { %15807 = dma.hbm_to_vmem [thread:$0]  (!%p17359_p5), %s19654_s5, 256, %s17486_s11, [#allocation32], %s19569_s0, %s19569_s0, %s19571_s1  }
 0x138   : > { %s17100_s15 = smov [#allocation34]   ;;  %s16390_s13 = scalar_lea.hbm %s19651_s4, 24576 }
 0x139   : > { %s1179_s10 = sshll.u32 %s17100_s15, 4  ;;  %p16391_p6 = scmp.ne.s32.totalorder %s19651_s4, %s16390_s13  ;;  %s1180_s10 = int_to_ptr.vmem [resolvable:$true] %s1179_s10 }
 0x13a   : > { %p16397_p10 = scmp.lt.u32.totalorder %s16390_s13, %s19651_s4 }
 0x13b   : > { %p16393_p8 = pnand %p16391_p6, %p17369_p7 }
 0x13d   : > { %p16394_p9 = pneg %p16393_p8 }
 0x13f   : > { %p16399_p11 = pnand %p16397_p10, %p16394_p9 }
 0x141   : > { %16402 = shalt.err (!%p16399_p11)
}
 0x142   : > { %s16403_s22 = scalar_lea.vmem %s1180_s10, 24576  ;;  %p16411_p13 = scmp.lt.s32.totalorder %s1180_s10, %s1180_s10 }
 0x143   : > { %p16404_p2 = scmp.ne.s32.totalorder %s1180_s10, %s16403_s22  ;;  %p16412_p0 = scmp.lt.s32.totalorder %s16403_s22, %s16403_s22 }
 0x145   : > { %p16406_p3 = pnand %p16404_p2, %p17369_p7  ;;  %p16413_p1 = por %p16412_p0, %p16411_p13 }
 0x147   : > { %p16407_p12 = pneg %p16406_p3 }
 0x149   : > { %p16414_p4 = pnand %p16413_p1, %p16407_p12 }
 0x14b   : > { %16417 = shalt.err (!%p16414_p4)
}
 0x14c   : > { %s17101_s11 = smov 384   ;;  %s17102_s15 = smov 24  }
 0x14d   : > { %15813 = dma.hbm_to_vmem [thread:$0]  (!%p17359_p5), %s19651_s4, 24576, %s1180_s10, [#allocation35], %s17101_s11, %s17101_s11, %s17102_s15  }
 0x14e   : > { %s17103_s13 = smov [#allocation37]   ;;  %s17104_s1 = smov [#allocation40]  }
 0x14f   : > { %s1205_s0 = sshll.u32 %s17103_s13, 4  ;;  %s1229_s5 = sshll.u32 %s17104_s1, 4  ;;  %s1206_s0 = int_to_ptr.vmem [resolvable:$true] %s1205_s0  ;;  %s1230_s5 = int_to_ptr.vmem [resolvable:$true] %s1229_s5 }
 0x150   : > { %s16418_s6 = scalar_lea.hbm %s19649_s14, 576 }
 0x151   : > { %p16419_p6 = scmp.ne.s32.totalorder %s19649_s14, %s16418_s6  ;;  %p16425_p10 = scmp.lt.u32.totalorder %s16418_s6, %s19649_s14 }
 0x153   : > { %p16421_p8 = pnand %p16419_p6, %p17369_p7 }
 0x155   : > { %p16422_p9 = pneg %p16421_p8 }
 0x157   : > { %p16427_p11 = pnand %p16425_p10, %p16422_p9 }
 0x159   : > { %16430 = shalt.err (!%p16427_p11)
}
 0x15a   : > { %s16431_s22 = scalar_lea.vmem %s1206_s0, 576  ;;  %p16439_p13 = scmp.lt.s32.totalorder %s1206_s0, %s1206_s0 }
 0x15b   : > { %p16432_p2 = scmp.ne.s32.totalorder %s1206_s0, %s16431_s22  ;;  %p16440_p0 = scmp.lt.s32.totalorder %s16431_s22, %s16431_s22 }
 0x15d   : > { %p16434_p3 = pnand %p16432_p2, %p17369_p7  ;;  %p16441_p1 = por %p16440_p0, %p16439_p13 }
 0x15f   : > { %p16435_p12 = pneg %p16434_p3 }
 0x161   : > { %p16442_p4 = pnand %p16441_p1, %p16435_p12 }
 0x163   : > { %16445 = shalt.err (!%p16442_p4)
}
 0x164   : > { %s19661_s1 = smov 4   ;;  %s19662_s10 = smov 64  }
 0x165   : > { %15819 = dma.hbm_to_vmem [thread:$0]  (!%p17359_p5), %s19649_s14, 576, %s1206_s0, [#allocation38], %s19662_s10, %s19662_s10, %s19661_s1  }
 0x166   : > { %s16446_s6 = scalar_lea.hbm %s19652_s3, 576 }
 0x167   : > { %p16447_p6 = scmp.ne.s32.totalorder %s19652_s3, %s16446_s6  ;;  %p16453_p10 = scmp.lt.u32.totalorder %s16446_s6, %s19652_s3 }
 0x169   : > { %p16449_p8 = pnand %p16447_p6, %p17369_p7 }
 0x16b   : > { %p16450_p9 = pneg %p16449_p8 }
 0x16d   : > { %p16455_p11 = pnand %p16453_p10, %p16450_p9 }
 0x16f   : > { %16458 = shalt.err (!%p16455_p11)
}
 0x170   : > { %s16459_s11 = scalar_lea.vmem %s1230_s5, 576  ;;  %p16467_p13 = scmp.lt.s32.totalorder %s1230_s5, %s1230_s5 }
 0x171   : > { %p16460_p2 = scmp.ne.s32.totalorder %s1230_s5, %s16459_s11  ;;  %p16468_p0 = scmp.lt.s32.totalorder %s16459_s11, %s16459_s11 }
 0x173   : > { %p16462_p3 = pnand %p16460_p2, %p17369_p7  ;;  %p16469_p1 = por %p16468_p0, %p16467_p13 }
 0x175   : > { %p16463_p12 = pneg %p16462_p3 }
 0x177   : > { %p16470_p4 = pnand %p16469_p1, %p16463_p12 }
 0x179   : > { %16473 = shalt.err (!%p16470_p4)
}
 0x17a   : > { %15825 = dma.hbm_to_vmem [thread:$0]  (!%p17359_p5), %s19652_s3, 576, %s1230_s5, [#allocation41], %s19662_s10, %s19662_s10, %s19661_s1  }
 0x17b   : > { %s17105_s0 = smov [#allocation43]   ;;  %s17106_s13 = smov [#allocation46]  }
 0x17c   : > { %s1254_s15 = sshll.u32 %s17105_s0, 4  ;;  %s1276_s22 = sshll.u32 %s17106_s13, 4  ;;  %s1255_s15 = int_to_ptr.vmem [resolvable:$true] %s1254_s15  ;;  %s1277_s22 = int_to_ptr.vmem [resolvable:$true] %s1276_s22 }
 0x17d   : > { %s16474_s6 = scalar_lea.hbm %s17311_s25, 32 }
 0x17e   : > { %p16475_p6 = scmp.ne.s32.totalorder %s17311_s25, %s16474_s6  ;;  %p16481_p10 = scmp.lt.u32.totalorder %s16474_s6, %s17311_s25 }
 0x180   : > { %p16477_p8 = pnand %p16475_p6, %p17369_p7 }
 0x182   : > { %p16478_p9 = pneg %p16477_p8 }
 0x184   : > { %p16483_p11 = pnand %p16481_p10, %p16478_p9 }
 0x186   : > { %16486 = shalt.err (!%p16483_p11)
}
 0x187   : > { %s16487_s11 = scalar_lea.vmem %s1255_s15, 32  ;;  %p16495_p13 = scmp.lt.s32.totalorder %s1255_s15, %s1255_s15 }
 0x188   : > { %p16488_p2 = scmp.ne.s32.totalorder %s1255_s15, %s16487_s11  ;;  %p16496_p0 = scmp.lt.s32.totalorder %s16487_s11, %s16487_s11 }
 0x18a   : > { %p16490_p3 = pnand %p16488_p2, %p17369_p7  ;;  %p16497_p1 = por %p16496_p0, %p16495_p13 }
 0x18c   : > { %p16491_p12 = pneg %p16490_p3 }
 0x18e   : > { %p16498_p4 = pnand %p16497_p1, %p16491_p12 }
 0x190   : > { %16501 = shalt.err (!%p16498_p4)
}
 0x191   : > { %15831 = dma.hbm_to_vmem [thread:$0]  (!%p17359_p5), %s17311_s25, 32, %s1255_s15, [#allocation44]  }
 0x192   : > { %s16502_s5 = scalar_lea.hbm %s17321_s17, 48 }
 0x193   : > { %p16503_p6 = scmp.ne.s32.totalorder %s17321_s17, %s16502_s5  ;;  %p16509_p10 = scmp.lt.u32.totalorder %s16502_s5, %s17321_s17 }
 0x195   : > { %p16505_p8 = pnand %p16503_p6, %p17369_p7 }
 0x197   : > { %p16506_p9 = pneg %p16505_p8 }
 0x199   : > { %p16511_p11 = pnand %p16509_p10, %p16506_p9 }
 0x19b   : > { %16514 = shalt.err (!%p16511_p11)
}
 0x19c   : > { %s16515_s0 = scalar_lea.vmem %s1277_s22, 48  ;;  %s16522_s13 = scalar_lea.vmem %s1277_s22, 64 }
 0x19d   : > { %p16516_p2 = scmp.ne.s32.totalorder %s1277_s22, %s16515_s0  ;;  %p16523_p13 = scmp.lt.s32.totalorder %s1277_s22, %s1277_s22 }
 0x19e   : > { %p16524_p0 = scmp.lt.s32.totalorder %s16522_s13, %s16515_s0 }
 0x19f   : > { %p16518_p3 = pnand %p16516_p2, %p17369_p7 }
 0x1a0   : > { %p16525_p1 = por %p16524_p0, %p16523_p13 }
 0x1a1   : > { %p16519_p12 = pneg %p16518_p3 }
 0x1a3   : > { %p16526_p4 = pnand %p16525_p1, %p16519_p12 }
 0x1a5   : > { %16529 = shalt.err (!%p16526_p4)
}
 0x1a6   : > { %s19663_s15 = sld [smem:[#allocation66_spill]]  ;;  %s17107_s6 = smov [#allocation2]  }
 0x1a7   : > { %15837 = dma.hbm_to_vmem [thread:$0]  (!%p17359_p5), %s17321_s17, 48, %s1277_s22, [#allocation47]  }
 0x1a8   : > { %s903_s11 = sshll.u32 %s17107_s6, 4  ;;  %s904_s11 = int_to_ptr.vmem [resolvable:$true] %s903_s11 }
 0x1ac   : > { %s16530_s5 = scalar_lea.hbm %s19663_s15, 576 }
 0x1ad   : > { %p16531_p6 = scmp.ne.s32.totalorder %s19663_s15, %s16530_s5  ;;  %p16537_p10 = scmp.lt.u32.totalorder %s16530_s5, %s19663_s15 }
 0x1af   : > { %p16533_p8 = pnand %p16531_p6, %p17369_p7 }
 0x1b1   : > { %p16534_p9 = pneg %p16533_p8 }
 0x1b3   : > { %p16539_p11 = pnand %p16537_p10, %p16534_p9 }
 0x1b5   : > { %16542 = shalt.err (!%p16539_p11)
}
 0x1b6   : > { %s16543_s0 = scalar_lea.vmem %s904_s11, 576  ;;  %p16551_p13 = scmp.lt.s32.totalorder %s904_s11, %s904_s11 }
 0x1b7   : > { %p16544_p2 = scmp.ne.s32.totalorder %s904_s11, %s16543_s0  ;;  %p16552_p0 = scmp.lt.s32.totalorder %s16543_s0, %s16543_s0 }
 0x1b9   : > { %p16546_p3 = pnand %p16544_p2, %p17369_p7  ;;  %p16553_p1 = por %p16552_p0, %p16551_p13 }
 0x1bb   : > { %p16547_p12 = pneg %p16546_p3 }
 0x1bd   : > { %p16554_p4 = pnand %p16553_p1, %p16547_p12 }
 0x1bf   : > { %16557 = shalt.err (!%p16554_p4)
}
 0x1c0   : > { %s19664_s22 = sld [smem:[#allocation68_spill]]  ;;  %s17108_s13 = smov [#allocation6]  }
 0x1c1   : > { %15750 = dma.hbm_to_vmem [thread:$0]  (!%p17359_p5), %s19663_s15, 576, %s904_s11, [#allocation3], %s19662_s10, %s19662_s10, %s19661_s1  }
 0x1c2   : > { %s927_s6 = sshll.u32 %s17108_s13, 4  ;;  %s17109_s5 = smov [#allocation9]   ;;  %s928_s6 = int_to_ptr.vmem [resolvable:$true] %s927_s6 }
 0x1c3   : > { %s951_s3 = sshll.u32 %s17109_s5, 4  ;;  %s952_s3 = int_to_ptr.vmem [resolvable:$true] %s951_s3 }
 0x1c6   : > { %s16558_s0 = scalar_lea.hbm %s19664_s22, 576 }
 0x1c7   : > { %p16559_p6 = scmp.ne.s32.totalorder %s19664_s22, %s16558_s0  ;;  %p16565_p10 = scmp.lt.u32.totalorder %s16558_s0, %s19664_s22 }
 0x1c9   : > { %p16561_p8 = pnand %p16559_p6, %p17369_p7 }
 0x1cb   : > { %p16562_p9 = pneg %p16561_p8 }
 0x1cd   : > { %p16567_p11 = pnand %p16565_p10, %p16562_p9 }
 0x1cf   : > { %16570 = shalt.err (!%p16567_p11)
}
 0x1d0   : > { %s16571_s4 = scalar_lea.vmem %s928_s6, 576  ;;  %p16579_p13 = scmp.lt.s32.totalorder %s928_s6, %s928_s6 }
 0x1d1   : > { %p16572_p2 = scmp.ne.s32.totalorder %s928_s6, %s16571_s4  ;;  %p16580_p0 = scmp.lt.s32.totalorder %s16571_s4, %s16571_s4 }
 0x1d3   : > { %p16574_p3 = pnand %p16572_p2, %p17369_p7  ;;  %p16581_p1 = por %p16580_p0, %p16579_p13 }
 0x1d5   : > { %p16575_p12 = pneg %p16574_p3 }
 0x1d7   : > { %p16582_p4 = pnand %p16581_p1, %p16575_p12 }
 0x1d9   : > { %16585 = shalt.err (!%p16582_p4)
}
 0x1da   : > { %s19665_s11 = sld [smem:[#allocation69_spill]] }
 0x1db   : > { %15756 = dma.hbm_to_vmem [thread:$0]  (!%p17359_p5), %s19664_s22, 576, %s928_s6, [#allocation5], %s19662_s10, %s19662_s10, %s19661_s1  }
 0x1e0   : > { %s16586_s13 = scalar_lea.hbm %s19665_s11, 1152 }
 0x1e1   : > { %p16587_p6 = scmp.ne.s32.totalorder %s19665_s11, %s16586_s13  ;;  %p16593_p10 = scmp.lt.u32.totalorder %s16586_s13, %s19665_s11 }
 0x1e3   : > { %p16589_p8 = pnand %p16587_p6, %p17369_p7 }
 0x1e5   : > { %p16590_p9 = pneg %p16589_p8 }
 0x1e7   : > { %p16595_p11 = pnand %p16593_p10, %p16590_p9 }
 0x1e9   : > { %16598 = shalt.err (!%p16595_p11)
}
 0x1ea   : > { %s16599_s4 = scalar_lea.vmem %s952_s3, 1152  ;;  %p16607_p13 = scmp.lt.s32.totalorder %s952_s3, %s952_s3 }
 0x1eb   : > { %p16600_p2 = scmp.ne.s32.totalorder %s952_s3, %s16599_s4  ;;  %p16608_p0 = scmp.lt.s32.totalorder %s16599_s4, %s16599_s4 }
 0x1ed   : > { %p16602_p3 = pnand %p16600_p2, %p17369_p7  ;;  %p16609_p1 = por %p16608_p0, %p16607_p13 }
 0x1ef   : > { %p16603_p12 = pneg %p16602_p3 }
 0x1f1   : > { %p16610_p4 = pnand %p16609_p1, %p16603_p12 }
 0x1f3   : > { %16613 = shalt.err (!%p16610_p4)
}
 0x1f4   : > { %s19666_s6 = sld [smem:[#allocation70_spill]]  ;;  %s17110_s5 = smov [#allocation12]  }
 0x1f5   : > { %15762 = dma.hbm_to_vmem [thread:$0]  (!%p17359_p5), %s19665_s11, 1152, %s952_s3, [#allocation8], %s19662_s10, %s19662_s10, %s19661_s1  }
 0x1f6   : > { %s977_s0 = sshll.u32 %s17110_s5, 4  ;;  %s17111_s13 = smov [#allocation15]   ;;  %s978_s0 = int_to_ptr.vmem [resolvable:$true] %s977_s0 }
 0x1f7   : > { %s1003_s8 = sshll.u32 %s17111_s13, 4  ;;  %s1004_s8 = int_to_ptr.vmem [resolvable:$true] %s1003_s8 }
 0x1fa   : > { %s16614_s4 = scalar_lea.hbm %s19666_s6, 1152 }
 0x1fb   : > { %p16615_p6 = scmp.ne.s32.totalorder %s19666_s6, %s16614_s4  ;;  %p16621_p10 = scmp.lt.u32.totalorder %s16614_s4, %s19666_s6 }
 0x1fd   : > { %p16617_p8 = pnand %p16615_p6, %p17369_p7 }
 0x1ff   : > { %p16618_p9 = pneg %p16617_p8 }
 0x201   : > { %p16623_p11 = pnand %p16621_p10, %p16618_p9 }
 0x203   : > { %16626 = shalt.err (!%p16623_p11)
}
 0x204   : > { %s16627_s14 = scalar_lea.vmem %s978_s0, 1152  ;;  %p16635_p13 = scmp.lt.s32.totalorder %s978_s0, %s978_s0 }
 0x205   : > { %p16628_p2 = scmp.ne.s32.totalorder %s978_s0, %s16627_s14  ;;  %p16636_p0 = scmp.lt.s32.totalorder %s16627_s14, %s16627_s14 }
 0x207   : > { %p16630_p3 = pnand %p16628_p2, %p17369_p7  ;;  %p16637_p1 = por %p16636_p0, %p16635_p13 }
 0x209   : > { %p16631_p12 = pneg %p16630_p3 }
 0x20b   : > { %p16638_p4 = pnand %p16637_p1, %p16631_p12 }
 0x20d   : > { %16641 = shalt.err (!%p16638_p4)
}
 0x20e   : > { %s19667_s3 = sld [smem:[#allocation72_spill]] }
 0x20f   : > { %15768 = dma.hbm_to_vmem [thread:$0]  (!%p17359_p5), %s19666_s6, 1152, %s978_s0, [#allocation11], %s19662_s10, %s19662_s10, %s19661_s1  }
 0x214   : > { %s16642_s5 = scalar_lea.hbm %s19667_s3, 2304 }
 0x215   : > { %p16643_p6 = scmp.ne.s32.totalorder %s19667_s3, %s16642_s5  ;;  %p16649_p10 = scmp.lt.u32.totalorder %s16642_s5, %s19667_s3 }
 0x217   : > { %p16645_p8 = pnand %p16643_p6, %p17369_p7 }
 0x219   : > { %p16646_p9 = pneg %p16645_p8 }
 0x21b   : > { %p16651_p11 = pnand %p16649_p10, %p16646_p9 }
 0x21d   : > { %16654 = shalt.err (!%p16651_p11)
}
 0x21e   : > { %s16655_s14 = scalar_lea.vmem %s1004_s8, 2304  ;;  %p16663_p13 = scmp.lt.s32.totalorder %s1004_s8, %s1004_s8 }
 0x21f   : > { %p16656_p2 = scmp.ne.s32.totalorder %s1004_s8, %s16655_s14  ;;  %p16664_p0 = scmp.lt.s32.totalorder %s16655_s14, %s16655_s14 }
 0x221   : > { %p16658_p3 = pnand %p16656_p2, %p17369_p7  ;;  %p16665_p1 = por %p16664_p0, %p16663_p13 }
 0x223   : > { %p16659_p12 = pneg %p16658_p3 }
 0x225   : > { %p16666_p4 = pnand %p16665_p1, %p16659_p12 }
 0x227   : > { %16669 = shalt.err (!%p16666_p4)
}
 0x228   : > { %s19668_s0 = sld [smem:[#allocation74_spill]]  ;;  %s17112_s13 = smov [#allocation18]  }
 0x229   : > { %15774 = dma.hbm_to_vmem [thread:$0]  (!%p17359_p5), %s19667_s3, 2304, %s1004_s8, [#allocation14], %s19662_s10, %s19662_s10, %s19661_s1  }
 0x22a   : > { %s1032_s4 = sshll.u32 %s17112_s13, 4  ;;  %s17113_s5 = smov [#allocation21]   ;;  %s1033_s4 = int_to_ptr.vmem [resolvable:$true] %s1032_s4 }
 0x22b   : > { %s1058_s6 = sshll.u32 %s17113_s5, 4  ;;  %s1059_s6 = int_to_ptr.vmem [resolvable:$true] %s1058_s6 }
 0x22e   : > { %s16670_s14 = scalar_lea.hbm %s19668_s0, 512 }
 0x22f   : > { %p16671_p6 = scmp.ne.s32.totalorder %s19668_s0, %s16670_s14  ;;  %p16677_p10 = scmp.lt.u32.totalorder %s16670_s14, %s19668_s0 }
 0x231   : > { %p16673_p8 = pnand %p16671_p6, %p17369_p7 }
 0x233   : > { %p16674_p9 = pneg %p16673_p8 }
 0x235   : > { %p16679_p11 = pnand %p16677_p10, %p16674_p9 }
 0x237   : > { %16682 = shalt.err (!%p16679_p11)
}
 0x238   : > { %s16683_s11 = scalar_lea.vmem %s1033_s4, 512  ;;  %p16691_p13 = scmp.lt.s32.totalorder %s1033_s4, %s1033_s4 }
 0x239   : > { %p16684_p2 = scmp.ne.s32.totalorder %s1033_s4, %s16683_s11  ;;  %p16692_p0 = scmp.lt.s32.totalorder %s16683_s11, %s16683_s11 }
 0x23b   : > { %p16686_p3 = pnand %p16684_p2, %p17369_p7  ;;  %p16693_p1 = por %p16692_p0, %p16691_p13 }
 0x23d   : > { %p16687_p12 = pneg %p16686_p3 }
 0x23f   : > { %p16694_p4 = pnand %p16693_p1, %p16687_p12 }
 0x241   : > { %16697 = shalt.err (!%p16694_p4)
}
 0x242   : > { %s19669_s8 = sld [smem:[#allocation76_spill]] }
 0x243   : > { %15780 = dma.hbm_to_vmem [thread:$0]  (!%p17359_p5), %s19668_s0, 512, %s1033_s4, [#allocation17], %s19660_s16, %s19660_s16, %s19659_s26  }
 0x248   : > { %s16698_s13 = scalar_lea.hbm %s19669_s8, 2048 }
 0x249   : > { %p16699_p6 = scmp.ne.s32.totalorder %s19669_s8, %s16698_s13  ;;  %p16705_p10 = scmp.lt.u32.totalorder %s16698_s13, %s19669_s8 }
 0x24b   : > { %p16701_p8 = pnand %p16699_p6, %p17369_p7 }
 0x24d   : > { %p16702_p9 = pneg %p16701_p8 }
 0x24f   : > { %p16707_p11 = pnand %p16705_p10, %p16702_p9 }
 0x251   : > { %16710 = shalt.err (!%p16707_p11)
}
 0x252   : > { %s16711_s11 = scalar_lea.vmem %s1059_s6, 2048  ;;  %p16719_p13 = scmp.lt.s32.totalorder %s1059_s6, %s1059_s6 }
 0x253   : > { %p16712_p2 = scmp.ne.s32.totalorder %s1059_s6, %s16711_s11  ;;  %p16720_p0 = scmp.lt.s32.totalorder %s16711_s11, %s16711_s11 }
 0x255   : > { %p16714_p3 = pnand %p16712_p2, %p17369_p7  ;;  %p16721_p1 = por %p16720_p0, %p16719_p13 }
 0x257   : > { %p16715_p12 = pneg %p16714_p3 }
 0x259   : > { %p16722_p4 = pnand %p16721_p1, %p16715_p12 }
 0x25b   : > { %16725 = shalt.err (!%p16722_p4)
}
 0x25c   : > { %s19670_s4 = sld [smem:[#allocation77_spill]]  ;;  %s17114_s5 = smov [#allocation24]  }
 0x25d   : > { %15786 = dma.hbm_to_vmem [thread:$0]  (!%p17359_p5), %s19669_s8, 2048, %s1059_s6, [#allocation20], %s19660_s16, %s19660_s16, %s19659_s26  }
 0x25e   : > { %s1084_s14 = sshll.u32 %s17114_s5, 4  ;;  %s17115_s13 = smov [#allocation27]   ;;  %s1085_s14 = int_to_ptr.vmem [resolvable:$true] %s1084_s14 }
 0x25f   : > { %s1113_s0 = sshll.u32 %s17115_s13, 4  ;;  %s1114_s0 = int_to_ptr.vmem [resolvable:$true] %s1113_s0 }
 0x262   : > { %s16726_s11 = scalar_lea.hbm %s19670_s4, 256 }
 0x263   : > { %p16727_p6 = scmp.ne.s32.totalorder %s19670_s4, %s16726_s11  ;;  %p16733_p10 = scmp.lt.u32.totalorder %s16726_s11, %s19670_s4 }
 0x265   : > { %p16729_p8 = pnand %p16727_p6, %p17369_p7 }
 0x267   : > { %p16730_p9 = pneg %p16729_p8 }
 0x269   : > { %p16735_p11 = pnand %p16733_p10, %p16730_p9 }
 0x26b   : > { %16738 = shalt.err (!%p16735_p11)
}
 0x26c   : > { %s16739_s3 = scalar_lea.vmem %s1085_s14, 256  ;;  %p16747_p13 = scmp.lt.s32.totalorder %s1085_s14, %s1085_s14 }
 0x26d   : > { %p16740_p2 = scmp.ne.s32.totalorder %s1085_s14, %s16739_s3  ;;  %p16748_p0 = scmp.lt.s32.totalorder %s16739_s3, %s16739_s3 }
 0x26f   : > { %p16742_p3 = pnand %p16740_p2, %p17369_p7  ;;  %p16749_p1 = por %p16748_p0, %p16747_p13 }
 0x271   : > { %p16743_p12 = pneg %p16742_p3 }
 0x273   : > { %p16750_p4 = pnand %p16749_p1, %p16743_p12 }
 0x275   : > { %16753 = shalt.err (!%p16750_p4)
}
 0x276   : > { %s19671_s6 = sld [smem:[#allocation79_spill]] }
 0x277   : > { %15792 = dma.hbm_to_vmem [thread:$0]  (!%p17359_p5), %s19670_s4, 256, %s1085_s14, [#allocation23], %s19660_s16, %s19660_s16, %s19659_s26  }
 0x27c   : > { %s16754_s5 = scalar_lea.hbm %s19671_s6, 1152 }
 0x27d   : > { %p16755_p6 = scmp.ne.s32.totalorder %s19671_s6, %s16754_s5  ;;  %p16761_p10 = scmp.lt.u32.totalorder %s16754_s5, %s19671_s6 }
 0x27f   : > { %p16757_p8 = pnand %p16755_p6, %p17369_p7 }
 0x281   : > { %p16758_p9 = pneg %p16757_p8 }
 0x283   : > { %p16763_p11 = pnand %p16761_p10, %p16758_p9 }
 0x285   : > { %16766 = shalt.err (!%p16763_p11)
}
 0x286   : > { %s16767_s3 = scalar_lea.vmem %s1114_s0, 1152  ;;  %p16775_p13 = scmp.lt.s32.totalorder %s1114_s0, %s1114_s0 }
 0x287   : > { %p16768_p2 = scmp.ne.s32.totalorder %s1114_s0, %s16767_s3  ;;  %p16776_p0 = scmp.lt.s32.totalorder %s16767_s3, %s16767_s3 }
 0x289   : > { %p16770_p3 = pnand %p16768_p2, %p17369_p7  ;;  %p16777_p1 = por %p16776_p0, %p16775_p13 }
 0x28b   : > { %p16771_p12 = pneg %p16770_p3 }
 0x28d   : > { %p16778_p4 = pnand %p16777_p1, %p16771_p12 }
 0x28f   : > { %16781 = shalt.err (!%p16778_p4)
}
 0x290   : > { %s19672_s14 = sld [smem:[#allocation81_spill]]  ;;  %s17116_s13 = smov [#allocation30]  }
 0x291   : > { %15798 = dma.hbm_to_vmem [thread:$0]  (!%p17359_p5), %s19671_s6, 1152, %s1114_s0, [#allocation26], %s19662_s10, %s19662_s10, %s19661_s1  }
 0x292   : > { %s1142_s11 = sshll.u32 %s17116_s13, 4  ;;  %s17117_s5 = smov [#allocation33]   ;;  %s1143_s11 = int_to_ptr.vmem [resolvable:$true] %s1142_s11 }
 0x293   : > { %s1169_s4 = sshll.u32 %s17117_s5, 4  ;;  %s1170_s4 = int_to_ptr.vmem [resolvable:$true] %s1169_s4 }
 0x296   : > { %s16782_s3 = scalar_lea.hbm %s19672_s14, 256 }
 0x297   : > { %p16783_p6 = scmp.ne.s32.totalorder %s19672_s14, %s16782_s3  ;;  %p16789_p10 = scmp.lt.u32.totalorder %s16782_s3, %s19672_s14 }
 0x299   : > { %p16785_p8 = pnand %p16783_p6, %p17369_p7 }
 0x29b   : > { %p16786_p9 = pneg %p16785_p8 }
 0x29d   : > { %p16791_p11 = pnand %p16789_p10, %p16786_p9 }
 0x29f   : > { %16794 = shalt.err (!%p16791_p11)
}
 0x2a0   : > { %s16795_s8 = scalar_lea.vmem %s1143_s11, 256  ;;  %p16803_p13 = scmp.lt.s32.totalorder %s1143_s11, %s1143_s11 }
 0x2a1   : > { %p16796_p2 = scmp.ne.s32.totalorder %s1143_s11, %s16795_s8  ;;  %p16804_p0 = scmp.lt.s32.totalorder %s16795_s8, %s16795_s8 }
 0x2a3   : > { %p16798_p3 = pnand %p16796_p2, %p17369_p7  ;;  %p16805_p1 = por %p16804_p0, %p16803_p13 }
 0x2a5   : > { %p16799_p12 = pneg %p16798_p3 }
 0x2a7   : > { %p16806_p4 = pnand %p16805_p1, %p16799_p12 }
 0x2a9   : > { %16809 = shalt.err (!%p16806_p4)
}
 0x2aa   : > { %s19673_s0 = sld [smem:[#allocation83_spill]] }
 0x2ab   : > { %15804 = dma.hbm_to_vmem [thread:$0]  (!%p17359_p5), %s19672_s14, 256, %s1143_s11, [#allocation29], %s19660_s16, %s19660_s16, %s19659_s26  }
 0x2b0   : > { %s16810_s13 = scalar_lea.hbm %s19673_s0, 128 }
 0x2b1   : > { %p16811_p6 = scmp.ne.s32.totalorder %s19673_s0, %s16810_s13  ;;  %p16817_p10 = scmp.lt.u32.totalorder %s16810_s13, %s19673_s0 }
 0x2b3   : > { %p16813_p8 = pnand %p16811_p6, %p17369_p7 }
 0x2b5   : > { %p16814_p9 = pneg %p16813_p8 }
 0x2b7   : > { %p16819_p11 = pnand %p16817_p10, %p16814_p9 }
 0x2b9   : > { %16822 = shalt.err (!%p16819_p11)
}
 0x2ba   : > { %s16823_s8 = scalar_lea.vmem %s1170_s4, 128  ;;  %p16831_p13 = scmp.lt.s32.totalorder %s1170_s4, %s1170_s4 }
 0x2bb   : > { %p16824_p2 = scmp.ne.s32.totalorder %s1170_s4, %s16823_s8  ;;  %p16832_p0 = scmp.lt.s32.totalorder %s16823_s8, %s16823_s8 }
 0x2bd   : > { %p16826_p3 = pnand %p16824_p2, %p17369_p7  ;;  %p16833_p1 = por %p16832_p0, %p16831_p13 }
 0x2bf   : > { %p16827_p12 = pneg %p16826_p3 }
 0x2c1   : > { %p16834_p4 = pnand %p16833_p1, %p16827_p12 }
 0x2c3   : > { %16837 = shalt.err (!%p16834_p4)
}
 0x2c4   : > { %s19674_s26 = sld [smem:[#allocation85_spill]]  ;;  %s17118_s16 = smov [#allocation36]  }
 0x2c5   : > { %15810 = dma.hbm_to_vmem [thread:$0]  (!%p17359_p5), %s19673_s0, 128, %s1170_s4, [#allocation32]  }
 0x2c6   : > { %s1192_s11 = sshll.u32 %s17118_s16, 4  ;;  %s17119_s5 = smov [#allocation39]   ;;  %s1193_s11 = int_to_ptr.vmem [resolvable:$true] %s1192_s11 }
 0x2c7   : > { %s1219_s3 = sshll.u32 %s17119_s5, 4  ;;  %s1220_s3 = int_to_ptr.vmem [resolvable:$true] %s1219_s3 }
 0x2ca   : > { %s16838_s13 = scalar_lea.hbm %s19674_s26, 576 }
 0x2cb   : > { %p16839_p6 = scmp.ne.s32.totalorder %s19674_s26, %s16838_s13  ;;  %p16845_p10 = scmp.lt.u32.totalorder %s16838_s13, %s19674_s26 }
 0x2cd   : > { %p16841_p8 = pnand %p16839_p6, %p17369_p7 }
 0x2cf   : > { %p16842_p9 = pneg %p16841_p8 }
 0x2d1   : > { %p16847_p11 = pnand %p16845_p10, %p16842_p9 }
 0x2d3   : > { %16850 = shalt.err (!%p16847_p11)
}
 0x2d4   : > { %s16851_s8 = scalar_lea.vmem %s1193_s11, 576  ;;  %p16859_p13 = scmp.lt.s32.totalorder %s1193_s11, %s1193_s11 }
 0x2d5   : > { %p16852_p2 = scmp.ne.s32.totalorder %s1193_s11, %s16851_s8  ;;  %p16860_p0 = scmp.lt.s32.totalorder %s16851_s8, %s16851_s8 }
 0x2d7   : > { %p16854_p3 = pnand %p16852_p2, %p17369_p7  ;;  %p16861_p1 = por %p16860_p0, %p16859_p13 }
 0x2d9   : > { %p16855_p12 = pneg %p16854_p3 }
 0x2db   : > { %p16862_p4 = pnand %p16861_p1, %p16855_p12 }
 0x2dd   : > { %16865 = shalt.err (!%p16862_p4)
}
 0x2de   : > { %s19675_s4 = sld [smem:[#allocation87_spill]] }
 0x2df   : > { %15816 = dma.hbm_to_vmem [thread:$0]  (!%p17359_p5), %s19674_s26, 576, %s1193_s11, [#allocation35], %s19662_s10, %s19662_s10, %s19661_s1  }
 0x2e4   : > { %s16866_s16 = scalar_lea.hbm %s19675_s4, 128 }
 0x2e5   : > { %p16867_p6 = scmp.ne.s32.totalorder %s19675_s4, %s16866_s16  ;;  %p16873_p10 = scmp.lt.u32.totalorder %s16866_s16, %s19675_s4 }
 0x2e7   : > { %p16869_p8 = pnand %p16867_p6, %p17369_p7 }
 0x2e9   : > { %p16870_p9 = pneg %p16869_p8 }
 0x2eb   : > { %p16875_p11 = pnand %p16873_p10, %p16870_p9 }
 0x2ed   : > { %16878 = shalt.err (!%p16875_p11)
}
 0x2ee   : > { %s16879_s5 = scalar_lea.vmem %s1220_s3, 128  ;;  %p16887_p13 = scmp.lt.s32.totalorder %s1220_s3, %s1220_s3 }
 0x2ef   : > { %p16880_p2 = scmp.ne.s32.totalorder %s1220_s3, %s16879_s5  ;;  %p16888_p0 = scmp.lt.s32.totalorder %s16879_s5, %s16879_s5 }
 0x2f1   : > { %p16882_p3 = pnand %p16880_p2, %p17369_p7  ;;  %p16889_p1 = por %p16888_p0, %p16887_p13 }
 0x2f3   : > { %p16883_p12 = pneg %p16882_p3 }
 0x2f5   : > { %p16890_p4 = pnand %p16889_p1, %p16883_p12 }
 0x2f7   : > { %16893 = shalt.err (!%p16890_p4)
}
 0x2f8   : > { %s19676_s1 = sld [smem:[#allocation89_spill]]  ;;  %s17120_s10 = smov [#allocation42]  }
 0x2f9   : > { %15822 = dma.hbm_to_vmem [thread:$0]  (!%p17359_p5), %s19675_s4, 128, %s1220_s3, [#allocation38]  }
 0x2fa   : > { %s1243_s11 = sshll.u32 %s17120_s10, 4  ;;  %s17121_s13 = smov [#allocation45]   ;;  %s1244_s11 = int_to_ptr.vmem [resolvable:$true] %s1243_s11 }
 0x2fb   : > { %s1265_s8 = sshll.u32 %s17121_s13, 4  ;;  %s1266_s8 = int_to_ptr.vmem [resolvable:$true] %s1265_s8 }
 0x2fe   : > { %s16894_s16 = scalar_lea.hbm %s19676_s1, 128 }
 0x2ff   : > { %p16895_p6 = scmp.ne.s32.totalorder %s19676_s1, %s16894_s16  ;;  %p16901_p10 = scmp.lt.u32.totalorder %s16894_s16, %s19676_s1 }
 0x301   : > { %p16897_p8 = pnand %p16895_p6, %p17369_p7 }
 0x303   : > { %p16898_p9 = pneg %p16897_p8 }
 0x305   : > { %p16903_p11 = pnand %p16901_p10, %p16898_p9 }
 0x307   : > { %16906 = shalt.err (!%p16903_p11)
}
 0x308   : > { %s16907_s5 = scalar_lea.vmem %s1244_s11, 128  ;;  %p16915_p13 = scmp.lt.s32.totalorder %s1244_s11, %s1244_s11 }
 0x309   : > { %p16908_p2 = scmp.ne.s32.totalorder %s1244_s11, %s16907_s5  ;;  %p16916_p0 = scmp.lt.s32.totalorder %s16907_s5, %s16907_s5 }
 0x30b   : > { %p16910_p3 = pnand %p16908_p2, %p17369_p7  ;;  %p16917_p1 = por %p16916_p0, %p16915_p13 }
 0x30d   : > { %p16911_p12 = pneg %p16910_p3 }
 0x30f   : > { %p16918_p4 = pnand %p16917_p1, %p16911_p12 }
 0x311   : > { %16921 = shalt.err (!%p16918_p4)
}
 0x312   : > { %s19677_s3 = sld [smem:[#allocation90_spill]] }
 0x313   : > { %15828 = dma.hbm_to_vmem [thread:$0]  (!%p17359_p5), %s19676_s1, 128, %s1244_s11, [#allocation41]  }
 0x318   : > { %s16922_s10 = scalar_lea.hbm %s19677_s3, 32 }
 0x319   : > { %p16923_p6 = scmp.ne.s32.totalorder %s19677_s3, %s16922_s10  ;;  %p16929_p10 = scmp.lt.u32.totalorder %s16922_s10, %s19677_s3 }
 0x31b   : > { %p16925_p8 = pnand %p16923_p6, %p17369_p7 }
 0x31d   : > { %p16926_p9 = pneg %p16925_p8 }
 0x31f   : > { %p16931_p11 = pnand %p16929_p10, %p16926_p9 }
 0x321   : > { %16934 = shalt.err (!%p16931_p11)
}
 0x322   : > { %s16935_s13 = scalar_lea.vmem %s1266_s8, 32  ;;  %p16943_p13 = scmp.lt.s32.totalorder %s1266_s8, %s1266_s8 }
 0x323   : > { %p16936_p2 = scmp.ne.s32.totalorder %s1266_s8, %s16935_s13  ;;  %p16944_p0 = scmp.lt.s32.totalorder %s16935_s13, %s16935_s13 }
 0x325   : > { %p16938_p3 = pnand %p16936_p2, %p17369_p7  ;;  %p16945_p1 = por %p16944_p0, %p16943_p13 }
 0x327   : > { %p16939_p12 = pneg %p16938_p3 }
 0x329   : > { %p16946_p4 = pnand %p16945_p1, %p16939_p12 }
 0x32b   : > { %16949 = shalt.err (!%p16946_p4)
}
 0x32c   : > { %15834 = dma.hbm_to_vmem [thread:$0]  (!%p17359_p5), %s19677_s3, 32, %s1266_s8, [#allocation44]  }
 0x32d   : > { %s17122_s11 = smov [#allocation48]   ;;  %s16950_s5 = scalar_lea.hbm %s17326_s12, 16 }
 0x32e   : > { %s1287_s16 = sshll.u32 %s17122_s11, 4  ;;  %p16951_p6 = scmp.ne.s32.totalorder %s17326_s12, %s16950_s5  ;;  %s1288_s16 = int_to_ptr.vmem [resolvable:$true] %s1287_s16 }
 0x32f   : > { %p16957_p10 = scmp.lt.u32.totalorder %s16950_s5, %s17326_s12 }
 0x330   : > { %p16953_p8 = pnand %p16951_p6, %p17369_p7 }
 0x332   : > { %p16954_p9 = pneg %p16953_p8 }
 0x334   : > { %p16959_p11 = pnand %p16957_p10, %p16954_p9 }
 0x336   : > { %16962 = shalt.err (!%p16959_p11)
}
 0x337   : > { %s16963_s10 = scalar_lea.vmem %s1288_s16, 16  ;;  %s16970_s13 = scalar_lea.vmem %s1288_s16, 32 }
 0x338   : > { %p16964_p2 = scmp.ne.s32.totalorder %s1288_s16, %s16963_s10  ;;  %p16971_p13 = scmp.lt.s32.totalorder %s1288_s16, %s1288_s16 }
 0x339   : > { %p16972_p0 = scmp.lt.s32.totalorder %s16970_s13, %s16963_s10 }
 0x33a   : > { %p16966_p3 = pnand %p16964_p2, %p17369_p7 }
 0x33b   : > { %p16973_p1 = por %p16972_p0, %p16971_p13 }
 0x33c   : > { %p16967_p12 = pneg %p16966_p3 }
 0x33e   : > { %p16974_p4 = pnand %p16973_p1, %p16967_p12 }
 0x340   : > { %16977 = shalt.err (!%p16974_p4)
}
 0x341   : > { %15840 = dma.hbm_to_vmem [thread:$0]  (!%p17359_p5), %s17326_s12, 16, %s1288_s16, [#allocation47]  }
 0x342   : > { %p19678_p6 = scmp.ne.s32.totalorder %s19656_s7, 0 }
 0x343   : > { %p19679_p8 = scmp.eq.s32.totalorder (!%p19678_p6), %s17344_s2, 0 }
 0x344   : > { %1311 = sbr.rel (%p19678_p6) target bundleno = 7217 (0x1c31), region = 164 }
 0x34b   : > { %16983 = dma.done.wait (%p19679_p8), [#allocation3], 576   ;;  %p19680_p9 = pmov %p19679_p8 }
 0x34c   : > { %p19681_p7 = pmov %p19679_p8 }
 0x34d   : > { %16985 = vsyncadd (%p19680_p9), [#allocation3], 4294966720 }
 0x34e   : > { %16987 = dma.done.wait (%p19681_p7), [#allocation5], 704   ;;  %p19682_p10 = pmov %p19681_p7 }
 0x34f   : > { %p19683_p11 = pmov %p19681_p7 }
 0x350   : > { %16989 = vsyncadd (%p19682_p10), [#allocation5], 4294966592 }
 0x351   : > { %16991 = dma.done.wait (%p19683_p11), [#allocation8], 1280   ;;  %p19684_p5 = pmov %p19681_p7 }
 0x353   : > { %16993 = vsyncadd (%p19684_p5), [#allocation8], 4294966016  ;;  %p19685_p2 = pmov %p19684_p5 }
 0x355   : > { %16995 = dma.done.wait (%p19685_p2), [#allocation11], 1408   ;;  %p19686_p3 = pmov %p19685_p2 }
 0x356   : > { %p19687_p12 = pmov %p19685_p2 }
 0x357   : > { %16997 = vsyncadd (%p19686_p3), [#allocation11], 4294965888 }
 0x358   : > { %16999 = dma.done.wait (%p19687_p12), [#allocation14], 2560   ;;  %p19688_p13 = pmov %p19685_p2 }
 0x359   : > { %p19689_p0 = pmov %p19685_p2 }
 0x35a   : > { %17001 = vsyncadd (%p19688_p13), [#allocation14], 4294964736 }
 0x35b   : > { %17003 = dma.done.wait (%p19689_p0), [#allocation17], 1024   ;;  %p19690_p1 = pmov %p19689_p0 }
 0x35c   : > { %p19691_p4 = pmov %p19689_p0 }
 0x35d   : > { %17005 = vsyncadd (%p19690_p1), [#allocation17], 4294966272 }
 0x35e   : > { %17007 = dma.done.wait (%p19691_p4), [#allocation20], 8192   ;;  %p19692_p6 = pmov %p19689_p0 }
 0x35f   : > { %p19693_p8 = pmov %p19689_p0 }
 0x360   : > { %17009 = vsyncadd (%p19692_p6), [#allocation20], 4294959104 }
 0x361   : > { %17011 = dma.done.wait (%p19693_p8), [#allocation23], 768   ;;  %p19694_p9 = pmov %p19689_p0 }
 0x362   : > { %p19695_p7 = pmov %p19689_p0 }
 0x363   : > { %17013 = vsyncadd (%p19694_p9), [#allocation23], 4294966528 }
 0x364   : > { %17015 = dma.done.wait (%p19695_p7), [#allocation26], 2304   ;;  %p19696_p10 = pmov %p19689_p0 }
 0x365   : > { %p19697_p11 = pmov %p19689_p0 }
 0x366   : > { %17017 = vsyncadd (%p19696_p10), [#allocation26], 4294964992 }
 0x367   : > { %17019 = dma.done.wait (%p19697_p11), [#allocation29], 512   ;;  %p19698_p5 = pmov %p19689_p0 }
 0x368   : > { %p19699_p2 = pmov %p19689_p0 }
 0x369   : > { %17021 = vsyncadd (%p19698_p5), [#allocation29], 4294966784 }
 0x36a   : > { %17023 = dma.done.wait (%p19699_p2), [#allocation32], 384   ;;  %p19700_p3 = pmov %p19689_p0 }
 0x36b   : > { %p19701_p12 = pmov %p19689_p0 }
 0x36c   : > { %17025 = vsyncadd (%p19700_p3), [#allocation32], 4294966912 }
 0x36d   : > { %17027 = dma.done.wait (%p19701_p12), [#allocation35], 25152   ;;  %p19702_p13 = pmov %p19689_p0 }
 0x36f   : > { %17029 = vsyncadd (%p19702_p13), [#allocation35], 4294942144 }
 0x370   : > { %17031 = dma.done.wait (%p19689_p0), [#allocation38], 704   ;;  %p19703_p1 = pmov %p19689_p0 }
 0x371   : > { %p19704_p4 = pmov %p19689_p0 }
 0x372   : > { %17033 = vsyncadd (%p19703_p1), [#allocation38], 4294966592 }
 0x373   : > { %17035 = dma.done.wait (%p19704_p4), [#allocation41], 704   ;;  %p19705_p6 = pmov %p19689_p0 }
 0x374   : > { %p19706_p8 = pmov %p19689_p0 }
 0x375   : > { %17037 = vsyncadd (%p19705_p6), [#allocation41], 4294966592 }
 0x376   : > { %17039 = dma.done.wait (%p19706_p8), [#allocation44], 64   ;;  %p19707_p9 = pmov %p19689_p0 }
 0x377   : > { %p19708_p7 = pmov %p19689_p0 }
 0x378   : > { %17041 = vsyncadd (%p19707_p9), [#allocation44], 4294967232 }
 0x379   : > { %17043 = dma.done.wait (%p19708_p7), [#allocation47], 64   ;;  %p19709_p10 = pmov %p19689_p0 }
 0x37a   : > { %s19710_s7 = sld [smem:[#allocation65_spill]]  ;;  %p1521_p11 = scmp.lt.s32.totalorder %s17344_s2, 1  ;;  %v17123_v0 = vmov 0   ;;  %v17125_v1 = vmov 0.0   ;;  %vm17126_vm0 = vmmov 0   ;;  %v2520_v8 = vld [vmem:[#allocation4] sm:$0xff] }
 0x37b   : > { %17045 = vsyncadd (%p19709_p10), [#allocation47], 4294967232  ;;  %s19598_s18 = smov 18   ;;  %1608 = vmatprep.mubr.bf16.mxu0 %v17123_v0  ;;  %16009 = vset.pattern.permute.xlu0 %v17123_v0  ;;  %s19593_s11 = smov 19   ;;  %vm19615_vm1 = vcmask 146432   ;;  %vm19595_vm2 = vcmask 1041408  }
 0x37c   : > { %1550 = vrot.lane.b32.xlu0 %v17123_v0, %s19598_s18  ;;  %s19919_s2 = smov (!%p1521_p11, %s17344_s2), 1  ;;  %16010 = vset.pattern.permute.xlu1 %v17123_v0  ;;  %s19591_s16 = smov 17   ;;  %v1545_v16 = vld [vmem:[#allocation2 + $0x4] sm:$0xf]  ;;  %vm1562_vm3 = vcmask 31744   ;;  %vm19613_vm4 = vcmask 154624  }
 0x37d   : > { %s15621_s23 = smul.u32 12, %s19919_s2  ;;  %14028 = vmatprep.subr.bf16.mxu1 %v17125_v1  ;;  %14030 = vmatprep.mubr.msk.bf16.mxu1 %vm17126_vm0, %v17125_v1  ;;  %s17129_s5 = smov 1   ;;  %v1543_v26 = vld [vmem:[#allocation2] sm:$0xf]  ;;  %vm19611_vm5 = vcmask 138240   ;;  %vm1882_vm6 = vcmask 7168  }
 0x37e   : > { %s19620_s10 = smov 127   ;;  %s19589_s13 = smov 111   ;;  %v1763_v36 = vld [vmem:[#allocation2 + $0x8] sm:$0xf]  ;;  %v1873_v46 = vld [vmem:[#allocation2 + $0xc] sm:$0xf] }
 0x37f   : > { %vm2090_vm7 = vcmask 1039360   ;;  %v1983_v57 = vld [vmem:[#allocation2 + $0x10] sm:$0xf]  ;;  %vm19610_vm8 = vcmask 908288   ;;  %vm19597_vm9 = vcmask 900096   ;;  %vm19596_vm10 = vcmask 891904  }
 0x380   : > { %s1525_s8 = scalar_lea.vmem %s19710_s7, %s15621_s23  ;;  %s19587_s7 = smov 110   ;;  %vm19614_vm11 = vcmask 1043456   ;;  %vm19612_vm12 = vcmask 64512   ;;  %vm3725_vm13 = vcmask 80896   ;;  %vm3783_vm14 = vcmask 89088  }
 0x381   : > { %v1535_v2 = vld [vmem:[%s1525_s8] sm:$0xff]  ;;  %v1536_v3 = vld [vmem:[%s1525_s8 + $0x8] sm:$0xf]  ;;  %s19585_s23 = smov 109   ;;  %s19608_s8 = smov 10   ;;  %vm3844_vm15 = vcmask 72704  }
 0x382   : > { %v17848_v4 = vpack.c.bf16 %v1535_v2, %v1535_v2  ;;  %v1538_v5 = vcombine.high %v1535_v2, %v1535_v2  ;;  %v17856_v7 = vpack.c.bf16 %v1536_v3, %v1536_v3  ;;  %s19718_s0 = smov 118   ;;  %s19722_s1 = smov 127  }
 0x384   : > { %1552 = vrot.lane.b32.xlu0 %v17848_v4, %s19598_s18  ;;  %v17852_v6 = vpack.c.bf16 %v1538_v5, %v1538_v5  ;;  %v1988_v48 = vsel %vm19595_vm2, %v17848_v4, 0  ;;  %v1994_v53 = vsel %vm19595_vm2, %v17856_v7, 0  ;;  %v2081_v5 = vld [vmem:[#allocation2 + $0x14] sm:$0xf] }
 0x386   : > { %1554 = vrot.lane.b32.xlu1 %v17852_v6, %s19598_s18 }
 0x388   : > { %1657 = vrot.lane.b32.xlu0 %v17123_v0, %s19593_s11 }
 0x38a   : > { %1556 = vrot.lane.b32.xlu1 %v17856_v7, %s19598_s18 }
 0x38c   : > { %1661 = vrot.lane.b32.xlu0 %v17852_v6, %s19593_s11 }
 0x38e   : > { %1659 = vrot.lane.b32.xlu1 %v17848_v4, %s19593_s11 }
 0x390   : > { %1764 = vrot.lane.b32.xlu0 %v17123_v0, %s19591_s16 }
 0x392   : > { %1663 = vrot.lane.b32.xlu1 %v17856_v7, %s19593_s11 }
 0x394   : > { %1768 = vrot.lane.b32.xlu0 %v17852_v6, %s19591_s16 }
 0x396   : > { %1766 = vrot.lane.b32.xlu1 %v17848_v4, %s19591_s16 }
 0x398   : > { %1874 = vrot.lane.b32.xlu0 %v17123_v0, %s17129_s5 }
 0x39a   : > { %1770 = vrot.lane.b32.xlu1 %v17856_v7, %s19591_s16 }
 0x39c   : > { %1878 = vrot.lane.b32.xlu0 %v17852_v6, %s17129_s5 }
 0x39e   : > { %1876 = vrot.lane.b32.xlu1 %v17848_v4, %s17129_s5 }
 0x3a0   : > { %2082 = vrot.lane.b32.xlu0 %v17848_v4, %s19620_s10 }
 0x3a2   : > { %1880 = vrot.lane.b32.xlu1 %v17856_v7, %s17129_s5 }
 0x3a4   : > { %2086 = vrot.lane.b32.xlu0 %v17856_v7, %s19620_s10 }
 0x3a6   : > { %2084 = vrot.lane.b32.xlu1 %v17852_v6, %s19620_s10 }
 0x3a8   : > { %2192 = vrot.lane.b32.xlu0 %v17848_v4, %s19589_s13 }
 0x3aa   : > { %2088 = vrot.lane.b32.xlu1 %v17123_v0, %s19620_s10 }
 0x3ac   : > { %2196 = vrot.lane.b32.xlu0 %v17856_v7, %s19589_s13 }
 0x3ae   : > { %2194 = vrot.lane.b32.xlu1 %v17852_v6, %s19589_s13 }
 0x3b0   : > { %2302 = vrot.lane.b32.xlu0 %v17848_v4, %s19587_s7 }
 0x3b2   : > { %2198 = vrot.lane.b32.xlu1 %v17123_v0, %s19589_s13 }
 0x3b4   : > { %2306 = vrot.lane.b32.xlu0 %v17856_v7, %s19587_s7 }
 0x3b6   : > { %2304 = vrot.lane.b32.xlu1 %v17852_v6, %s19587_s7 }
 0x3b8   : > { %2412 = vrot.lane.b32.xlu0 %v17848_v4, %s19585_s23 }
 0x3ba   : > { %2308 = vrot.lane.b32.xlu1 %v17123_v0, %s19587_s7 }
 0x3bc   : > { %2416 = vrot.lane.b32.xlu0 %v17856_v7, %s19585_s23 }
 0x3be   : > { %2414 = vrot.lane.b32.xlu1 %v17852_v6, %s19585_s23 }
 0x3c0   : > { %2523 = vperm.xlu0 %16009, %v2520_v8  }
 0x3c2   : > { %2418 = vrot.lane.b32.xlu1 %v17123_v0, %s19585_s23 }
 0x3ee   : > { %v17916_v9 = vpop.permute.xlu0 %1550 }
 0x3f6   : > { %v1553_v10 = vpop.permute.xlu0 %1552 }
 0x3f7   : > { %v1559_v11 = vsel %vm19615_vm1, %v17916_v9, %v1553_v10 }
 0x3f8   : > { %v1555_v12 = vpop.permute.xlu1 %1554  ;;  %v1568_v14 = vsel %vm19595_vm2, %v1559_v11, 0 }
 0x3f9   : > { %v1560_v13 = vsel %vm19615_vm1, %v1553_v10, %v1555_v12 }
 0x3fa   : > { %13142 = vmatprep.subr.msk.bf16.mxu0 %vm19595_vm2, %v1560_v13  ;;  %v17923_v15 = vpop.permute.xlu0 %1657 }
 0x3fb   : > { %1577 = vmatpush1.bf16.msra.mxu0 %v1568_v14 }
 0x3fc   : > { %v1557_v17 = vpop.permute.xlu1 %1556 }
 0x3fd   : > { %v1561_v18 = vsel %vm19615_vm1, %v1555_v12, %v1557_v17  ;;  %v2191_v17 = vld [vmem:[#allocation2 + $0x18] sm:$0xf] }
 0x3fe   : > { %13143 = vmatmul.mubr.msk.bf16.vlgmr.msra.gmra.mrb[0].mxu0 %vm1562_vm3, %v1545_v16  ;;  %v1574_v19 = vsel %vm19595_vm2, %v1561_v18, 0  ;;  %v1662_v20 = vpop.permute.xlu0 %1661 }
 0x3ff   : > { %14029 = vmatpush3.bf16.msra.mxu1 %v1574_v19  ;;  %1713 = vmatprep.mubr.bf16.mxu0 %v17123_v0 }
 0x400   : > { %v1660_v21 = vpop.permute.xlu1 %1659  ;;  %14034 = vmatprep.subr.bf16.mxu1 %v17125_v1 }
 0x401   : > { %v1666_v22 = vsel %vm19613_vm4, %v17923_v15, %v1660_v21  ;;  %v1667_v23 = vsel %vm19613_vm4, %v1660_v21, %v1662_v20 }
 0x402   : > { %14031 = vmatmul.mubr.msk.bf16.vlgmr.msra.gmra.mrb[0].mxu1 %vm1562_vm3, %v1545_v16  ;;  %13145 = vmatprep.subr.msk.bf16.mxu0 %vm19595_vm2, %v1667_v23  ;;  %v1673_v24 = vsel %vm19595_vm2, %v1666_v22, 0  ;;  %v17936_v25 = vpop.permute.xlu0 %1764 }
 0x403   : > { %1682 = vmatpush1.bf16.msra.mxu0 %v1673_v24  ;;  %14036 = vmatprep.mubr.msk.bf16.mxu1 %vm17126_vm0, %v17125_v1 }
 0x404   : > { %v1664_v27 = vpop.permute.xlu1 %1663 }
 0x405   : > { %v1668_v28 = vsel %vm19613_vm4, %v1662_v20, %v1664_v27  ;;  %v2301_v27 = vld [vmem:[#allocation2 + $0x1c] sm:$0xf] }
 0x406   : > { %v1679_v29 = vsel %vm19595_vm2, %v1668_v28, 0  ;;  %13146 = vmatmul.mubr.msk.bf16.vlgmr.msra.gmra.mrb[4].mxu0 %vm1562_vm3, %v1543_v26  ;;  %v1769_v30 = vpop.permute.xlu0 %1768 }
 0x407   : > { %14035 = vmatpush3.bf16.msra.mxu1 %v1679_v29  ;;  %1820 = vmatprep.mubr.bf16.mxu0 %v17123_v0 }
 0x408   : > { %v1767_v31 = vpop.permute.xlu1 %1766  ;;  %14040 = vmatprep.subr.bf16.mxu1 %v17125_v1 }
 0x409   : > { %v1773_v32 = vsel %vm19611_vm5, %v17936_v25, %v1767_v31  ;;  %v1774_v33 = vsel %vm19611_vm5, %v1767_v31, %v1769_v30 }
 0x40a   : > { %14037 = vmatmul.mubr.msk.bf16.vlgmr.msra.gmra.mrb[4].mxu1 %vm1562_vm3, %v1543_v26  ;;  %13148 = vmatprep.subr.msk.bf16.mxu0 %vm19595_vm2, %v1774_v33  ;;  %v1780_v34 = vsel %vm19595_vm2, %v1773_v32, 0  ;;  %v17951_v35 = vpop.permute.xlu0 %1874  ;;  %v2411_v32 = vld [vmem:[#allocation2 + $0x20] sm:$0xf] }
 0x40b   : > { %1789 = vmatpush1.bf16.msra.mxu0 %v1780_v34  ;;  %14042 = vmatprep.mubr.msk.bf16.mxu1 %vm17126_vm0, %v17125_v1 }
 0x40c   : > { %v1771_v37 = vpop.permute.xlu1 %1770 }
 0x40d   : > { %v1775_v38 = vsel %vm19611_vm5, %v1769_v30, %v1771_v37 }
 0x40e   : > { %v1786_v39 = vsel %vm19595_vm2, %v1775_v38, 0  ;;  %13149 = vmatmul.mubr.msk.bf16.vlgmr.msra.gmra.mrb[8].mxu0 %vm1562_vm3, %v1763_v36  ;;  %v1879_v40 = vpop.permute.xlu0 %1878 }
 0x40f   : > { %14041 = vmatpush3.bf16.msra.mxu1 %v1786_v39  ;;  %1930 = vmatprep.mubr.bf16.mxu0 %v17123_v0 }
 0x410   : > { %v1877_v41 = vpop.permute.xlu1 %1876  ;;  %14046 = vmatprep.subr.bf16.mxu1 %v17125_v1 }
 0x411   : > { %v1883_v42 = vsel %vm1882_vm6, %v17951_v35, %v1877_v41  ;;  %v1884_v43 = vsel %vm1882_vm6, %v1877_v41, %v1879_v40 }
 0x412   : > { %14043 = vmatmul.mubr.msk.bf16.vlgmr.msra.gmra.mrb[8].mxu1 %vm1562_vm3, %v1763_v36  ;;  %13151 = vmatprep.subr.msk.bf16.mxu0 %vm19595_vm2, %v1884_v43  ;;  %v1890_v44 = vsel %vm19595_vm2, %v1883_v42, 0  ;;  %v2083_v45 = vpop.permute.xlu0 %2082 }
 0x413   : > { %1899 = vmatpush1.bf16.msra.mxu0 %v1890_v44  ;;  %14048 = vmatprep.mubr.msk.bf16.mxu1 %vm17126_vm0, %v17125_v1 }
 0x414   : > { %v1881_v47 = vpop.permute.xlu1 %1880  ;;  %13154 = vmatprep.subr.msk.bf16.mxu0 %vm19595_vm2, %v17852_v6 }
 0x415   : > { %v1885_v49 = vsel %vm1882_vm6, %v1879_v40, %v1881_v47 }
 0x416   : > { %v1896_v50 = vsel %vm19595_vm2, %v1885_v49, 0  ;;  %13152 = vmatmul.mubr.msk.bf16.vlgmr.msra.gmra.mrb[12].mxu0 %vm1562_vm3, %v1873_v46  ;;  %v2087_v51 = vpop.permute.xlu0 %2086 }
 0x417   : > { %14047 = vmatpush3.bf16.msra.mxu1 %v1896_v50  ;;  %1997 = vmatpush1.bf16.msra.mxu0 %v1988_v48 }
 0x418   : > { %v2085_v52 = vpop.permute.xlu1 %2084  ;;  %2028 = vmatprep.mubr.bf16.mxu0 %v17123_v0  ;;  %14052 = vmatprep.subr.bf16.mxu1 %v17125_v1 }
 0x419   : > { %v2091_v54 = vsel %vm2090_vm7, %v2083_v45, %v2085_v52  ;;  %v2092_v55 = vsel %vm2090_vm7, %v2085_v52, %v2087_v51 }
 0x41a   : > { %14049 = vmatmul.mubr.msk.bf16.vlgmr.msra.gmra.mrb[12].mxu1 %vm1562_vm3, %v1873_v46  ;;  %13157 = vmatprep.subr.msk.bf16.mxu0 %vm19595_vm2, %v2092_v55  ;;  %v2193_v56 = vpop.permute.xlu0 %2192  ;;  %v2098_v58 = vsel %vm19595_vm2, %v2091_v54, 0 }
 0x41b   : > { %14053 = vmatpush3.bf16.msra.mxu1 %v1994_v53  ;;  %14054 = vmatprep.mubr.msk.bf16.mxu1 %vm17126_vm0, %v17125_v1 }
 0x41c   : > { %v17986_v59 = vpop.permute.xlu1 %2088  ;;  %14058 = vmatprep.subr.bf16.mxu1 %v17125_v1 }
 0x41d   : > { %v2093_v60 = vsel %vm2090_vm7, %v2087_v51, %v17986_v59 }
 0x41e   : > { %13155 = vmatmul.mubr.msk.bf16.vlgmr.msra.gmra.mrb[16].mxu0 %vm1562_vm3, %v1983_v57  ;;  %v2197_v61 = vpop.permute.xlu0 %2196  ;;  %v2104_v62 = vsel %vm19595_vm2, %v2093_v60, 0 }
 0x41f   : > { %2107 = vmatpush1.bf16.msra.mxu0 %v2098_v58  ;;  %2138 = vmatprep.mubr.bf16.mxu0 %v17123_v0 }
 0x420   : > { %v2195_v63 = vpop.permute.xlu1 %2194 }
 0x421   : > { %v2201_v2 = vsel %vm19610_vm8, %v2193_v56, %v2195_v63  ;;  %v2202_v3 = vsel %vm19610_vm8, %v2195_v63, %v2197_v61 }
 0x422   : > { %14055 = vmatmul.mubr.msk.bf16.vlgmr.msra.gmra.mrb[16].mxu1 %vm1562_vm3, %v1983_v57  ;;  %13160 = vmatprep.subr.msk.bf16.mxu0 %vm19595_vm2, %v2202_v3  ;;  %v2303_v4 = vpop.permute.xlu0 %2302  ;;  %v2208_v6 = vsel %vm19595_vm2, %v2201_v2, 0 }
 0x423   : > { %14059 = vmatpush3.bf16.msra.mxu1 %v2104_v62  ;;  %14060 = vmatprep.mubr.msk.bf16.mxu1 %vm17126_vm0, %v17125_v1 }
 0x424   : > { %v18001_v7 = vpop.permute.xlu1 %2198  ;;  %14064 = vmatprep.subr.bf16.mxu1 %v17125_v1 }
 0x425   : > { %v2203_v8 = vsel %vm19610_vm8, %v2197_v61, %v18001_v7 }
 0x426   : > { %13158 = vmatmul.mubr.msk.bf16.vlgmr.msra.gmra.mrb[20].mxu0 %vm1562_vm3, %v2081_v5  ;;  %v2307_v10 = vpop.permute.xlu0 %2306  ;;  %v2214_v11 = vsel %vm19595_vm2, %v2203_v8, 0 }
 0x427   : > { %2217 = vmatpush1.bf16.msra.mxu0 %v2208_v6  ;;  %2248 = vmatprep.mubr.bf16.mxu0 %v17123_v0 }
 0x428   : > { %v2305_v12 = vpop.permute.xlu1 %2304 }
 0x429   : > { %v2311_v13 = vsel %vm19597_vm9, %v2303_v4, %v2305_v12  ;;  %v2312_v14 = vsel %vm19597_vm9, %v2305_v12, %v2307_v10 }
 0x42a   : > { %14061 = vmatmul.mubr.msk.bf16.vlgmr.msra.gmra.mrb[20].mxu1 %vm1562_vm3, %v2081_v5  ;;  %13163 = vmatprep.subr.msk.bf16.mxu0 %vm19595_vm2, %v2312_v14  ;;  %v2413_v16 = vpop.permute.xlu0 %2412  ;;  %v2318_v18 = vsel %vm19595_vm2, %v2311_v13, 0 }
 0x42b   : > { %14065 = vmatpush3.bf16.msra.mxu1 %v2214_v11  ;;  %14066 = vmatprep.mubr.msk.bf16.mxu1 %vm17126_vm0, %v17125_v1 }
 0x42c   : > { %v18016_v19 = vpop.permute.xlu1 %2308  ;;  %14070 = vmatprep.subr.bf16.mxu1 %v17125_v1 }
 0x42d   : > { %v2313_v20 = vsel %vm19597_vm9, %v2307_v10, %v18016_v19 }
 0x42e   : > { %13161 = vmatmul.mubr.msk.bf16.vlgmr.msra.gmra.mrb[24].mxu0 %vm1562_vm3, %v2191_v17  ;;  %v2417_v21 = vpop.permute.xlu0 %2416  ;;  %v2324_v22 = vsel %vm19595_vm2, %v2313_v20, 0 }
 0x42f   : > { %2327 = vmatpush1.bf16.msra.mxu0 %v2318_v18  ;;  %2358 = vmatprep.mubr.bf16.mxu0 %v17123_v0 }
 0x430   : > { %v2415_v23 = vpop.permute.xlu1 %2414 }
 0x431   : > { %v2421_v24 = vsel %vm19596_vm10, %v2413_v16, %v2415_v23  ;;  %v2422_v26 = vsel %vm19596_vm10, %v2415_v23, %v2417_v21 }
 0x432   : > { %14067 = vmatmul.mubr.msk.bf16.vlgmr.msra.gmra.mrb[24].mxu1 %vm1562_vm3, %v2191_v17  ;;  %13166 = vmatprep.subr.msk.bf16.mxu0 %vm19595_vm2, %v2422_v26  ;;  %v2428_v28 = vsel %vm19595_vm2, %v2421_v24, 0 }
 0x433   : > { %14071 = vmatpush3.bf16.msra.mxu1 %v2324_v22  ;;  %14072 = vmatprep.mubr.msk.bf16.mxu1 %vm17126_vm0, %v17125_v1 }
 0x434   : > { %v18031_v29 = vpop.permute.xlu1 %2418  ;;  %14076 = vmatprep.subr.bf16.mxu1 %v17125_v1 }
 0x435   : > { %v2423_v30 = vsel %vm19596_vm10, %v2417_v21, %v18031_v29 }
 0x436   : > { %13164 = vmatmul.mubr.msk.bf16.vlgmr.msra.gmra.mrb[28].mxu0 %vm1562_vm3, %v2301_v27  ;;  %v2434_v31 = vsel %vm19595_vm2, %v2423_v30, 0  ;;  %vm4147_vm2 = vcmask 965632  }
 0x437   : > { %2437 = vmatpush1.bf16.msra.mxu0 %v2428_v28  ;;  %2468 = vmatprep.mubr.bf16.mxu0 %v17123_v0 }
 0x43a   : > { %14073 = vmatmul.mubr.msk.bf16.vlgmr.msra.gmra.mrb[28].mxu1 %vm1562_vm3, %v2301_v27 }
 0x43b   : > { %14077 = vmatpush3.bf16.msra.mxu1 %v2434_v31  ;;  %14078 = vmatprep.mubr.msk.bf16.mxu1 %vm17126_vm0, %v17125_v1 }
 0x43c   : > { %14082 = vmatprep.subr.bf16.mxu1 %v17125_v1 }
 0x43e   : > { %13167 = vmatmul.mubr.msk.bf16.vlgmr.msra.gmra.mrb[32].mxu0 %vm1562_vm3, %v2411_v32 }
 0x43f   : > { %2615 = vmatprep.mubr.bf16.mxu0 %v17123_v0 }
 0x442   : > { %14079 = vmatmul.mubr.msk.bf16.vlgmr.msra.gmra.mrb[32].mxu1 %vm1562_vm3, %v2411_v32  ;;  %vm4084_vm3 = vcmask 973824  }
 0x443   : > { %14084 = vmatprep.mubr.msk.bf16.mxu1 %vm17126_vm0, %v17125_v1 }
 0x4d1   : > { %v1610_v33 = vpop.f32.mrb[0].mxu0 }
 0x4d2   : > { %v1612_v34 = vpop.f32.mrb[1].mxu0 }
 0x4d3   : > { %v1614_v36 = vpop.f32.mrb[2].mxu0 }
 0x4d4   : > { %v1615_v37 = vpop.f32.mrb[3].mxu0 }
 0x4d5   : > { %v1651_v38 = vpop.f32.mrb[0].mxu1 }
 0x4d6   : > { %v14032_v39 = vpop.f32.mrb[1].mxu1 }
 0x4d7   : > { %v1654_v40 = vpop.f32.mrb[2].mxu1 }
 0x4d8   : > { %v14033_v41 = vpop.f32.mrb[3].mxu1 }
 0x4d9   : > { %v1715_v42 = vpop.f32.mrb[4].mxu0 }
 0x4da   : > { %v1716_v43 = vadd.f32 %v1715_v42, %v1610_v33  ;;  %v1717_v44 = vpop.f32.mrb[5].mxu0 }
 0x4db   : > { %v1718_v45 = vadd.f32 %v1717_v44, %v1612_v34  ;;  %v1719_v46 = vpop.f32.mrb[6].mxu0 }
 0x4dc   : > { %v1720_v47 = vpop.f32.mrb[7].mxu0 }
 0x4dd   : > { %v1756_v48 = vpop.f32.mrb[4].mxu1 }
 0x4de   : > { %v1757_v49 = vadd.f32 %v1756_v48, %v1651_v38  ;;  %v14038_v50 = vpop.f32.mrb[5].mxu1 }
 0x4df   : > { %v1759_v51 = vpop.f32.mrb[6].mxu1 }
 0x4e0   : > { %v14039_v52 = vpop.f32.mrb[7].mxu1 }
 0x4e1   : > { %v1822_v53 = vpop.f32.mrb[8].mxu0 }
 0x4e2   : > { %v1869_v54 = vadd.f32 %v1822_v53, %v1716_v43  ;;  %v1824_v55 = vpop.f32.mrb[9].mxu0 }
 0x4e3   : > { %v1870_v56 = vadd.f32 %v1824_v55, %v1718_v45  ;;  %v1826_v57 = vpop.f32.mrb[10].mxu0 }
 0x4e4   : > { %v1827_v58 = vpop.f32.mrb[11].mxu0 }
 0x4e5   : > { %v1863_v60 = vpop.f32.mrb[8].mxu1 }
 0x4e6   : > { %v1871_v61 = vadd.f32 %v1863_v60, %v1757_v49  ;;  %v14044_v62 = vpop.f32.mrb[9].mxu1 }
 0x4e7   : > { %v1866_v63 = vpop.f32.mrb[10].mxu1 }
 0x4e8   : > { %v14045_v2 = vpop.f32.mrb[11].mxu1 }
 0x4e9   : > { %v1932_v3 = vpop.f32.mrb[12].mxu0 }
 0x4ea   : > { %v1979_v4 = vadd.f32 %v1932_v3, %v1869_v54  ;;  %v1934_v5 = vpop.f32.mrb[13].mxu0  ;;  %v2533_v54 = vlaneseq }
 0x4eb   : > { %v1980_v6 = vadd.f32 %v1934_v5, %v1870_v56  ;;  %v1936_v8 = vpop.f32.mrb[14].mxu0 }
 0x4ec   : > { %v1937_v10 = vpop.f32.mrb[15].mxu0  ;;  %v18048_v62 = vshrl.u32 %v2533_v54, 7 }
 0x4ed   : > { %v1973_v11 = vpop.f32.mrb[12].mxu1  ;;  %v2524_v10 = vpop.permute.xlu0 %2523 }
 0x4ee   : > { %v1981_v12 = vadd.f32 %v1973_v11, %v1871_v61  ;;  %v14050_v13 = vpop.f32.mrb[13].mxu1  ;;  %v1532_v11 = vld [vmem:[#allocation46] sm:$0x7] }
 0x4ef   : > { %v1976_v14 = vpop.f32.mrb[14].mxu1 }
 0x4f0   : > { %v14051_v16 = vpop.f32.mrb[15].mxu1  ;;  %v2539_v14 = vsub.s32 1, %v18048_v62 }
 0x4f1   : > { %v2030_v17 = vpop.f32.mrb[16].mxu0 }
 0x4f2   : > { %v2077_v18 = vadd.f32 %v2030_v17, %v1979_v4  ;;  %v2032_v20 = vpop.f32.mrb[17].mxu0 }
 0x4f3   : > { %v2078_v21 = vadd.f32 %v2032_v20, %v1980_v6  ;;  %v2034_v22 = vpop.f32.mrb[18].mxu0  ;;  %v2535_v6 = vsub.s32 0, %v18048_v62 }
 0x4f4   : > { %v2035_v23 = vpop.f32.mrb[19].mxu0  ;;  %v2543_v22 = vsub.s32 2, %v18048_v62 }
 0x4f5   : > { %v2071_v24 = vpop.f32.mrb[16].mxu1  ;;  %v18052_v20 = vrot.slane %v1532_v11, %v2535_v6 }
 0x4f6   : > { %v2079_v26 = vadd.f32 %v2071_v24, %v1981_v12  ;;  %v14056_v27 = vpop.f32.mrb[17].mxu1 }
 0x4f7   : > { %v2074_v28 = vpop.f32.mrb[18].mxu1  ;;  %v18055_v27 = vrot.slane %v1532_v11, %v2539_v14 }
 0x4f8   : > { %v14057_v30 = vpop.f32.mrb[19].mxu1 }
 0x4f9   : > { %v2140_v31 = vpop.f32.mrb[20].mxu0 }
 0x4fa   : > { %v2187_v32 = vadd.f32 %v2140_v31, %v2077_v18  ;;  %v2142_v33 = vpop.f32.mrb[21].mxu0 }
 0x4fb   : > { %v2188_v34 = vadd.f32 %v2142_v33, %v2078_v21  ;;  %v2144_v36 = vpop.f32.mrb[22].mxu0 }
 0x4fc   : > { %v2145_v37 = vpop.f32.mrb[23].mxu0  ;;  %v18058_v36 = vrot.slane %v1532_v11, %v2543_v22 }
 0x4fd   : > { %v2181_v38 = vpop.f32.mrb[20].mxu1 }
 0x4fe   : > { %v14062_v39 = vpop.f32.mrb[21].mxu1  ;;  %v2189_v40 = vadd.f32 %v2181_v38, %v2079_v26 }
 0x4ff   : > { %v2184_v41 = vpop.f32.mrb[22].mxu1 }
 0x500   : > { %v14063_v42 = vpop.f32.mrb[23].mxu1 }
 0x501   : > { %v2250_v43 = vpop.f32.mrb[24].mxu0 }
 0x502   : > { %v2297_v44 = vadd.f32 %v2250_v43, %v2187_v32  ;;  %v2252_v45 = vpop.f32.mrb[25].mxu0 }
 0x503   : > { %v2298_v46 = vadd.f32 %v2252_v45, %v2188_v34  ;;  %v2254_v47 = vpop.f32.mrb[26].mxu0 }
 0x504   : > { %v2255_v48 = vpop.f32.mrb[27].mxu0 }
 0x505   : > { %v2291_v49 = vpop.f32.mrb[24].mxu1 }
 0x506   : > { %v2299_v50 = vadd.f32 %v2291_v49, %v2189_v40  ;;  %v14068_v51 = vpop.f32.mrb[25].mxu1 }
 0x507   : > { %v2294_v52 = vpop.f32.mrb[26].mxu1 }
 0x508   : > { %v14069_v53 = vpop.f32.mrb[27].mxu1 }
 0x509   : > { %v2360_v55 = vpop.f32.mrb[28].mxu0  ;;  %v2556_v53 = vld [vmem:[#allocation6 + $0x4] sm:$0xf] }
 0x50a   : > { %v2407_v56 = vadd.f32 %v2360_v55, %v2297_v44  ;;  %v2362_v57 = vpop.f32.mrb[29].mxu0  ;;  %v3506_v44 = vld [vmem:[#allocation7] sm:$0xff] }
 0x50b   : > { %v2408_v58 = vadd.f32 %v2362_v57, %v2298_v46  ;;  %v2364_v60 = vpop.f32.mrb[30].mxu0 }
 0x50c   : > { %v2365_v61 = vpop.f32.mrb[31].mxu0 }
 0x50d   : > { %v2401_v63 = vpop.f32.mrb[28].mxu1 }
 0x50e   : > { %v2409_v2 = vadd.f32 %v2401_v63, %v2299_v50  ;;  %v14074_v3 = vpop.f32.mrb[29].mxu1 }
 0x50f   : > { %v2404_v4 = vpop.f32.mrb[30].mxu1  ;;  %v2554_v3 = vld [vmem:[#allocation6] sm:$0xf] }
 0x510   : > { %v14075_v5 = vpop.f32.mrb[31].mxu1 }
 0x511   : > { %v2470_v8 = vpop.f32.mrb[32].mxu0 }
 0x512   : > { %v2517_v12 = vadd.f32 %v2470_v8, %v2407_v56  ;;  %v2472_v13 = vpop.f32.mrb[33].mxu0 }
 0x513   : > { %v2518_v16 = vadd.f32 %v2472_v13, %v2408_v58  ;;  %v2474_v17 = vpop.f32.mrb[34].mxu0 }
 0x514   : > { %v2526_v18 = vadd.f32 %v2524_v10, %v2517_v12  ;;  %v2475_v21 = vpop.f32.mrb[35].mxu0 }
 0x515   : > { %v2527_v23 = vadd.f32 %v2524_v10, %v2518_v16  ;;  %v2511_v24 = vpop.f32.mrb[32].mxu1 }
 0x516   : > { %v2529_v26 = vmax.f32 %v2526_v18, 0.0  ;;  %v2519_v28 = vadd.f32 %v2511_v24, %v2409_v2  ;;  %v14080_v30 = vpop.f32.mrb[33].mxu1  ;;  %v2767_v18 = vld [vmem:[#allocation6 + $0x8] sm:$0xf] }
 0x517   : > { %v2530_v31 = vmax.f32 %v2527_v23, 0.0  ;;  %v2514_v32 = vpop.f32.mrb[34].mxu1 }
 0x518   : > { %v2548_v33 = vmul.f32 %v18052_v20, %v2529_v26  ;;  %v2528_v34 = vadd.f32 %v2524_v10, %v2519_v28  ;;  %v14081_v37 = vpop.f32.mrb[35].mxu1 }
 0x519   : > { %v2549_v38 = vmul.f32 %v18055_v27, %v2530_v31  ;;  %v2874_v31 = vld [vmem:[#allocation6 + $0xc] sm:$0xf] }
 0x51a   : > { %v18061_v39 = vpack.c.bf16 %v2548_v33, %v2548_v33  ;;  %v2531_v40 = vmax.f32 %v2528_v34, 0.0 }
 0x51b   : > { %v18066_v42 = vpack.c.bf16 %v2549_v38, %v2549_v38 }
 0x51c   : > { %v2550_v41 = vmul.f32 %v18058_v36, %v2531_v40  ;;  %2560 = vrot.lane.b32.xlu1 %v18061_v39, %s19598_s18  ;;  %v2986_v33 = vsel %vm19614_vm11, %v18061_v39, 0 }
 0x51e   : > { %v18068_v43 = vpack.c.bf16 %v2550_v41, %v2550_v41 }
 0x520   : > { %2564 = vrot.lane.b32.xlu0 %v18068_v43, %s19598_s18  ;;  %2562 = vrot.lane.b32.xlu1 %v18066_v42, %s19598_s18  ;;  %v2992_v34 = vsel %vm19614_vm11, %v18068_v43, 0  ;;  %s17141_s18 = smov 6  }
 0x524   : > { %2666 = vrot.lane.b32.xlu0 %v18066_v42, %s19593_s11  ;;  %2664 = vrot.lane.b32.xlu1 %v18061_v39, %s19593_s11 }
 0x528   : > { %2768 = vrot.lane.b32.xlu0 %v18061_v39, %s19591_s16  ;;  %2668 = vrot.lane.b32.xlu1 %v18068_v43, %s19593_s11  ;;  %s19602_s11 = smov 117  }
 0x52c   : > { %2772 = vrot.lane.b32.xlu0 %v18068_v43, %s19591_s16  ;;  %2770 = vrot.lane.b32.xlu1 %v18066_v42, %s19591_s16  ;;  %s19600_s16 = smov 118  }
 0x530   : > { %2877 = vrot.lane.b32.xlu0 %v18066_v42, %s17129_s5  ;;  %2875 = vrot.lane.b32.xlu1 %v18061_v39, %s17129_s5 }
 0x534   : > { %3080 = vrot.lane.b32.xlu0 %v18061_v39, %s19620_s10  ;;  %2879 = vrot.lane.b32.xlu1 %v18068_v43, %s17129_s5 }
 0x538   : > { %3084 = vrot.lane.b32.xlu0 %v18068_v43, %s19620_s10  ;;  %3082 = vrot.lane.b32.xlu1 %v18066_v42, %s19620_s10 }
 0x53c   : > { %3189 = vrot.lane.b32.xlu0 %v18066_v42, %s19589_s13  ;;  %3187 = vrot.lane.b32.xlu1 %v18061_v39, %s19589_s13 }
 0x540   : > { %3294 = vrot.lane.b32.xlu0 %v18061_v39, %s19587_s7  ;;  %3191 = vrot.lane.b32.xlu1 %v18068_v43, %s19589_s13  ;;  %s19604_s13 = smov 119  }
 0x544   : > { %3298 = vrot.lane.b32.xlu0 %v18068_v43, %s19587_s7  ;;  %3296 = vrot.lane.b32.xlu1 %v18066_v42, %s19587_s7  ;;  %s19606_s7 = smov 9  }
 0x548   : > { %3403 = vrot.lane.b32.xlu0 %v18066_v42, %s19585_s23  ;;  %3401 = vrot.lane.b32.xlu1 %v18061_v39, %s19585_s23 }
 0x54c   : > { %3509 = vperm.xlu0 %16009, %v3506_v44   ;;  %3405 = vrot.lane.b32.xlu1 %v18068_v43, %s19585_s23  ;;  %s19616_s23 = smov 11  }
 0x550   : > { %3721 = vrot.lane.b32.xlu1 %v17123_v0, %s19608_s8 }
 0x554   : > { %3779 = vrot.lane.b32.xlu1 %v17123_v0, %s19616_s23 }
 0x558   : > { %3840 = vrot.lane.b32.xlu1 %v17123_v0, %s19606_s7 }
 0x58e   : > { %v2561_v45 = vpop.permute.xlu1 %2560 }
 0x58f   : > { %v2566_v46 = vsel %vm19615_vm1, %v17916_v9, %v2561_v45 }
 0x590   : > { %v2575_v51 = vsel %vm19614_vm11, %v2566_v46, 0 }
 0x592   : > { %v2565_v47 = vpop.permute.xlu0 %2564  ;;  %v2563_v48 = vpop.permute.xlu1 %2562 }
 0x593   : > { %v2568_v49 = vsel %vm19615_vm1, %v2563_v48, %v2565_v47  ;;  %v2567_v50 = vsel %vm19615_vm1, %v2561_v45, %v2563_v48  ;;  %vm5557_vm1 = vcmask 990208  }
 0x594   : > { %13169 = vmatprep.subr.msk.bf16.mxu0 %vm19614_vm11, %v2567_v50  ;;  %v2581_v52 = vsel %vm19614_vm11, %v2568_v49, 0  ;;  %v3079_v50 = vld [vmem:[#allocation6 + $0x14] sm:$0xf] }
 0x595   : > { %2584 = vmatpush1.bf16.msra.mxu0 %v2575_v51  ;;  %14083 = vmatpush3.bf16.msra.mxu1 %v2581_v52 }
 0x596   : > { %v2667_v54 = vpop.permute.xlu0 %2666  ;;  %v2665_v55 = vpop.permute.xlu1 %2664  ;;  %14088 = vmatprep.subr.bf16.mxu1 %v17125_v1 }
 0x597   : > { %v2670_v56 = vsel %vm19613_vm4, %v17923_v15, %v2665_v55  ;;  %v2671_v57 = vsel %vm19613_vm4, %v2665_v55, %v2667_v54 }
 0x598   : > { %13170 = vmatmul.mubr.msk.bf16.vlgmr.msra.gmra.mrb[36].mxu0 %vm19612_vm12, %v2556_v53  ;;  %14085 = vmatmul.mubr.msk.bf16.vlgmr.msra.gmra.mrb[36].mxu1 %vm19612_vm12, %v2556_v53  ;;  %v2677_v58 = vsel %vm19614_vm11, %v2670_v56, 0 }
 0x599   : > { %13172 = vmatprep.subr.msk.bf16.mxu0 %vm19614_vm11, %v2671_v57  ;;  %2717 = vmatprep.mubr.bf16.mxu0 %v17123_v0 }
 0x59a   : > { %2686 = vmatpush1.bf16.msra.mxu0 %v2677_v58  ;;  %v2769_v60 = vpop.permute.xlu0 %2768  ;;  %v2669_v61 = vpop.permute.xlu1 %2668  ;;  %14090 = vmatprep.mubr.msk.bf16.mxu1 %vm17126_vm0, %v17125_v1  ;;  %v3186_v58 = vld [vmem:[#allocation6 + $0x18] sm:$0xf] }
 0x59b   : > { %v2672_v63 = vsel %vm19613_vm4, %v2667_v54, %v2669_v61  ;;  %v2774_v4 = vsel %vm19611_vm5, %v17936_v25, %v2769_v60  ;;  %vm5395_vm4 = vcmask 1006592  }
 0x59c   : > { %v2683_v2 = vsel %vm19614_vm11, %v2672_v63, 0  ;;  %v2781_v12 = vsel %vm19614_vm11, %v2774_v4, 0 }
 0x59d   : > { %14089 = vmatpush3.bf16.msra.mxu1 %v2683_v2 }
 0x59e   : > { %v2773_v5 = vpop.permute.xlu0 %2772  ;;  %v2771_v6 = vpop.permute.xlu1 %2770  ;;  %14094 = vmatprep.subr.bf16.mxu1 %v17125_v1 }
 0x59f   : > { %v2776_v8 = vsel %vm19611_vm5, %v2771_v6, %v2773_v5  ;;  %v2775_v10 = vsel %vm19611_vm5, %v2769_v60, %v2771_v6  ;;  %v3293_v6 = vld [vmem:[#allocation6 + $0x1c] sm:$0xf]  ;;  %vm5007_vm5 = vcmask 56320  }
 0x5a0   : > { %13173 = vmatmul.mubr.msk.bf16.vlgmr.msra.gmra.mrb[40].mxu0 %vm19612_vm12, %v2554_v3  ;;  %14091 = vmatmul.mubr.msk.bf16.vlgmr.msra.gmra.mrb[40].mxu1 %vm19612_vm12, %v2554_v3  ;;  %v2787_v11 = vsel %vm19614_vm11, %v2776_v8, 0 }
 0x5a1   : > { %13175 = vmatprep.subr.msk.bf16.mxu0 %vm19614_vm11, %v2775_v10  ;;  %14095 = vmatpush3.bf16.msra.mxu1 %v2787_v11  ;;  %v3400_v11 = vld [vmem:[#allocation6 + $0x20] sm:$0xf] }
 0x5a2   : > { %2790 = vmatpush1.bf16.msra.mxu0 %v2781_v12  ;;  %v2878_v13 = vpop.permute.xlu0 %2877  ;;  %v2876_v14 = vpop.permute.xlu1 %2875  ;;  %2821 = vmatprep.mubr.bf16.mxu0 %v17123_v0  ;;  %v3553_v12 = vld [vmem:[#allocation19 + $0x100] sm:$0xff] }
 0x5a3   : > { %v2882_v16 = vsel %vm1882_vm6, %v2876_v14, %v2878_v13  ;;  %14096 = vmatprep.mubr.msk.bf16.mxu1 %vm17126_vm0, %v17125_v1  ;;  %14100 = vmatprep.subr.bf16.mxu1 %v17125_v1  ;;  %v2881_v17 = vsel %vm1882_vm6, %v17951_v35, %v2876_v14 }
 0x5a4   : > { %13178 = vmatprep.subr.msk.bf16.mxu0 %vm19614_vm11, %v2882_v16  ;;  %v2888_v26 = vsel %vm19614_vm11, %v2881_v17, 0  ;;  %v3537_v16 = vld [vmem:[#allocation19 + $0x80] sm:$0xff]  ;;  %v3538_v17 = vld [vmem:[#allocation19 + $0x88] sm:$0xff] }
 0x5a6   : > { %v3081_v21 = vpop.permute.xlu0 %3080  ;;  %v2880_v22 = vpop.permute.xlu1 %2879 }
 0x5a7   : > { %v2883_v23 = vsel %vm1882_vm6, %v2878_v13, %v2880_v22  ;;  %v3554_v13 = vld [vmem:[#allocation19 + $0x108] sm:$0xff]  ;;  %v3521_v22 = vld [vmem:[#allocation19] sm:$0xff] }
 0x5a8   : > { %v2894_v24 = vsel %vm19614_vm11, %v2883_v23, 0  ;;  %13176 = vmatmul.mubr.msk.bf16.vlgmr.msra.gmra.mrb[44].mxu0 %vm19612_vm12, %v2767_v18  ;;  %14097 = vmatmul.mubr.msk.bf16.vlgmr.msra.gmra.mrb[44].mxu1 %vm19612_vm12, %v2767_v18  ;;  %v15138_v14 = vpack.c.bf16 %v3554_v13, %v3553_v12  ;;  %v17134_v18 = vmov 0.0|0.0   ;;  %v3522_v23 = vld [vmem:[#allocation19 + $0x8] sm:$0xff]  ;;  %v3548_v12 = vld [vmem:[#allocation19 + $0xd8] sm:$0xff] }
 0x5a9   : > { %2897 = vmatpush1.bf16.msra.mxu0 %v2888_v26  ;;  %14101 = vmatpush3.bf16.msra.mxu1 %v2894_v24  ;;  %v15107_v24 = vpack.c.bf16 %v3522_v23, %v3521_v22  ;;  %v3555_v26 = vld [vmem:[#allocation19 + $0x110] sm:$0xff]  ;;  %v3566_v22 = vld [vmem:[#allocation19 + $0x168] sm:$0xff] }
 0x5aa   : > { %13181 = vmatprep.subr.msk.bf16.mxu0 %vm19614_vm11, %v18066_v42  ;;  %v3083_v28 = vpop.permute.xlu1 %3082  ;;  %2928 = vmatprep.mubr.bf16.mxu0 %v17123_v0  ;;  %v3085_v30 = vpop.permute.xlu0 %3084  ;;  %v2981_v42 = vld [vmem:[#allocation6 + $0x10] sm:$0xf] }
 0x5ab   : > { %14102 = vmatprep.mubr.msk.bf16.mxu1 %vm17126_vm0, %v17125_v1  ;;  %14106 = vmatprep.subr.bf16.mxu1 %v17125_v1  ;;  %v3087_v37 = vsel %vm2090_vm7, %v3083_v28, %v3085_v30  ;;  %v3088_v39 = vsel %vm2090_vm7, %v3085_v30, %v17986_v59  ;;  %v3086_v41 = vsel %vm2090_vm7, %v3081_v21, %v3083_v28  ;;  %v3556_v28 = vld [vmem:[#allocation19 + $0x118] sm:$0xff]  ;;  %v3539_v30 = vld [vmem:[#allocation19 + $0x90] sm:$0xff] }
 0x5ac   : > { %v3093_v44 = vsel %vm19614_vm11, %v3086_v41, 0  ;;  %v3099_v45 = vsel %vm19614_vm11, %v3088_v39, 0  ;;  %v15105_v21 = vpack.c.bf16 %v3538_v17, %v3537_v16  ;;  %v3558_v39 = vld [vmem:[#allocation19 + $0x128] sm:$0xff]  ;;  %v3532_v16 = vld [vmem:[#allocation19 + $0x58] sm:$0xff] }
 0x5ae   : > { %v3188_v32 = vpop.permute.xlu1 %3187  ;;  %v3190_v38 = vpop.permute.xlu0 %3189 }
 0x5af   : > { %v3193_v48 = vsel %vm19610_vm8, %v3188_v32, %v3190_v38  ;;  %v3540_v32 = vld [vmem:[#allocation19 + $0x98] sm:$0xff] }
 0x5b0   : > { %13179 = vmatmul.mubr.msk.bf16.vlgmr.msra.gmra.mrb[48].mxu0 %vm19612_vm12, %v2874_v31  ;;  %14103 = vmatmul.mubr.msk.bf16.vlgmr.msra.gmra.mrb[48].mxu1 %vm19612_vm12, %v2874_v31  ;;  %v3200_v52 = vsel %vm19614_vm11, %v3193_v48, 0  ;;  %v15141_v31 = vpack.c.bf16 %v3556_v28, %v3555_v26  ;;  %v3559_v48 = vld [vmem:[#allocation19 + $0x130] sm:$0xff]  ;;  %v3550_v26 = vld [vmem:[#allocation19 + $0xe8] sm:$0xff] }
 0x5b1   : > { %2995 = vmatpush1.bf16.msra.mxu0 %v2986_v33  ;;  %14107 = vmatpush3.bf16.msra.mxu1 %v2992_v34  ;;  %v15109_v33 = vpack.c.bf16 %v3540_v32, %v3539_v30  ;;  %v3523_v34 = vld [vmem:[#allocation19 + $0x10] sm:$0xff]  ;;  %v3533_v30 = vld [vmem:[#allocation19 + $0x60] sm:$0xff] }
 0x5b2   : > { %13184 = vmatprep.subr.msk.bf16.mxu0 %vm19614_vm11, %v3087_v37  ;;  %3026 = vmatprep.mubr.bf16.mxu0 %v17123_v0  ;;  %v3192_v40 = vpop.permute.xlu1 %3191  ;;  %v3295_v43 = vpop.permute.xlu0 %3294  ;;  %v3524_v37 = vld [vmem:[#allocation19 + $0x18] sm:$0xff] }
 0x5b3   : > { %14108 = vmatprep.mubr.msk.bf16.mxu1 %vm17126_vm0, %v17125_v1  ;;  %14112 = vmatprep.subr.bf16.mxu1 %v17125_v1  ;;  %v3194_v46 = vsel %vm19610_vm8, %v3190_v38, %v3192_v40  ;;  %v3195_v49 = vsel %vm19610_vm8, %v3192_v40, %v18001_v7  ;;  %v15111_v38 = vpack.c.bf16 %v3524_v37, %v3523_v34  ;;  %v3557_v40 = vld [vmem:[#allocation19 + $0x120] sm:$0xff]  ;;  %v3568_v34 = vld [vmem:[#allocation19 + $0x178] sm:$0xff]  ;;  %vm4935_vm8 = vcmask 48128  }
 0x5b4   : > { %v3206_v54 = vsel %vm19614_vm11, %v3195_v49, 0  ;;  %v15144_v41 = vpack.c.bf16 %v3558_v39, %v3557_v40  ;;  %v3560_v49 = vld [vmem:[#allocation19 + $0x138] sm:$0xff] }
 0x5b5   : > { %v3552_v40 = vld [vmem:[#allocation19 + $0xf8] sm:$0xff] }
 0x5b6   : > { %v3297_v47 = vpop.permute.xlu1 %3296  ;;  %v3299_v51 = vpop.permute.xlu0 %3298 }
 0x5b7   : > { %v3301_v55 = vsel %vm19597_vm9, %v3297_v47, %v3299_v51  ;;  %v3302_v56 = vsel %vm19597_vm9, %v3299_v51, %v18016_v19  ;;  %v3300_v57 = vsel %vm19597_vm9, %v3295_v43, %v3297_v47  ;;  %v3542_v43 = vld [vmem:[#allocation19 + $0xa8] sm:$0xff]  ;;  %v15147_v51 = vpack.c.bf16 %v3560_v49, %v3559_v48 }
 0x5b8   : > { %13182 = vmatmul.mubr.msk.bf16.vlgmr.msra.gmra.mrb[52].mxu0 %vm19612_vm12, %v2981_v42  ;;  %14109 = vmatmul.mubr.msk.bf16.vlgmr.msra.gmra.mrb[52].mxu1 %vm19612_vm12, %v2981_v42  ;;  %v3307_v63 = vsel %vm19614_vm11, %v3300_v57, 0  ;;  %v3313_v2 = vsel %vm19614_vm11, %v3302_v56, 0  ;;  %v3541_v42 = vld [vmem:[#allocation19 + $0xa0] sm:$0xff]  ;;  %vm4301_vm9 = vcmask 130048  }
 0x5b9   : > { %3102 = vmatpush1.bf16.msra.mxu0 %v3093_v44  ;;  %14113 = vmatpush3.bf16.msra.mxu1 %v3099_v45  ;;  %v15113_v44 = vpack.c.bf16 %v3542_v43, %v3541_v42  ;;  %v3525_v45 = vld [vmem:[#allocation19 + $0x20] sm:$0xff]  ;;  %v3536_v42 = vld [vmem:[#allocation19 + $0x78] sm:$0xff] }
 0x5ba   : > { %13187 = vmatprep.subr.msk.bf16.mxu0 %vm19614_vm11, %v3194_v46  ;;  %3133 = vmatprep.mubr.bf16.mxu0 %v17123_v0  ;;  %v3402_v53 = vpop.permute.xlu1 %3401  ;;  %v3404_v61 = vpop.permute.xlu0 %3403  ;;  %v3526_v46 = vld [vmem:[#allocation19 + $0x28] sm:$0xff]  ;;  %v3561_v57 = vld [vmem:[#allocation19 + $0x140] sm:$0xff] }
 0x5bb   : > { %14114 = vmatprep.mubr.msk.bf16.mxu1 %vm17126_vm0, %v17125_v1  ;;  %14118 = vmatprep.subr.bf16.mxu1 %v17125_v1  ;;  %v3407_v4 = vsel %vm19596_vm10, %v3402_v53, %v3404_v61  ;;  %v15115_v47 = vpack.c.bf16 %v3526_v46, %v3525_v45 }
 0x5bc   : > { %v3414_v8 = vsel %vm19614_vm11, %v3407_v4, 0  ;;  %v3530_v4 = vld [vmem:[#allocation19 + $0x48] sm:$0xff] }
 0x5be   : > { %v3406_v60 = vpop.permute.xlu1 %3405 }
 0x5bf   : > { %v3408_v3 = vsel %vm19596_vm10, %v3404_v61, %v3406_v60  ;;  %v3409_v5 = vsel %vm19596_vm10, %v3406_v60, %v18031_v29  ;;  %v3545_v61 = vld [vmem:[#allocation19 + $0xc0] sm:$0xff]  ;;  %vm19618_vm10 = vcmask 957440  }
 0x5c0   : > { %13185 = vmatmul.mubr.msk.bf16.vlgmr.msra.gmra.mrb[56].mxu0 %vm19612_vm12, %v3079_v50  ;;  %14115 = vmatmul.mubr.msk.bf16.vlgmr.msra.gmra.mrb[56].mxu1 %vm19612_vm12, %v3079_v50  ;;  %v3420_v10 = vsel %vm19614_vm11, %v3409_v5, 0  ;;  %v3543_v50 = vld [vmem:[#allocation19 + $0xb0] sm:$0xff] }
 0x5c1   : > { %3209 = vmatpush1.bf16.msra.mxu0 %v3200_v52  ;;  %14119 = vmatpush3.bf16.msra.mxu1 %v3206_v54  ;;  %v3544_v52 = vld [vmem:[#allocation19 + $0xb8] sm:$0xff]  ;;  %v3527_v54 = vld [vmem:[#allocation19 + $0x30] sm:$0xff] }
 0x5c2   : > { %13190 = vmatprep.subr.msk.bf16.mxu0 %vm19614_vm11, %v3301_v55  ;;  %3240 = vmatprep.mubr.bf16.mxu0 %v17123_v0  ;;  %v15117_v53 = vpack.c.bf16 %v3544_v52, %v3543_v50  ;;  %v3528_v55 = vld [vmem:[#allocation19 + $0x38] sm:$0xff] }
 0x5c3   : > { %14120 = vmatprep.mubr.msk.bf16.mxu1 %vm17126_vm0, %v17125_v1  ;;  %14124 = vmatprep.subr.bf16.mxu1 %v17125_v1  ;;  %v15119_v56 = vpack.c.bf16 %v3528_v55, %v3527_v54 }
 0x5c8   : > { %13188 = vmatmul.mubr.msk.bf16.vlgmr.msra.gmra.mrb[60].mxu0 %vm19612_vm12, %v3186_v58  ;;  %14121 = vmatmul.mubr.msk.bf16.vlgmr.msra.gmra.mrb[60].mxu1 %vm19612_vm12, %v3186_v58  ;;  %v3562_v58 = vld [vmem:[#allocation19 + $0x148] sm:$0xff] }
 0x5c9   : > { %3316 = vmatpush1.bf16.msra.mxu0 %v3307_v63  ;;  %14125 = vmatpush3.bf16.msra.mxu1 %v3313_v2  ;;  %v15150_v60 = vpack.c.bf16 %v3562_v58, %v3561_v57  ;;  %v3546_v63 = vld [vmem:[#allocation19 + $0xc8] sm:$0xff] }
 0x5ca   : > { %13193 = vmatprep.subr.msk.bf16.mxu0 %vm19614_vm11, %v3408_v3  ;;  %3347 = vmatprep.mubr.bf16.mxu0 %v17123_v0  ;;  %v15121_v2 = vpack.c.bf16 %v3546_v63, %v3545_v61  ;;  %v3529_v3 = vld [vmem:[#allocation19 + $0x40] sm:$0xff] }
 0x5cb   : > { %14126 = vmatprep.mubr.msk.bf16.mxu1 %vm17126_vm0, %v17125_v1  ;;  %14130 = vmatprep.subr.bf16.mxu1 %v17125_v1  ;;  %v15123_v5 = vpack.c.bf16 %v3530_v4, %v3529_v3 }
 0x5d0   : > { %13191 = vmatmul.mubr.msk.bf16.vlgmr.msra.gmra.mrb[64].mxu0 %vm19612_vm12, %v3293_v6  ;;  %14127 = vmatmul.mubr.msk.bf16.vlgmr.msra.gmra.mrb[64].mxu1 %vm19612_vm12, %v3293_v6  ;;  %v3563_v6 = vld [vmem:[#allocation19 + $0x150] sm:$0xff] }
 0x5d1   : > { %3423 = vmatpush1.bf16.msra.mxu0 %v3414_v8  ;;  %14131 = vmatpush3.bf16.msra.mxu1 %v3420_v10  ;;  %v3564_v8 = vld [vmem:[#allocation19 + $0x158] sm:$0xff]  ;;  %v3547_v10 = vld [vmem:[#allocation19 + $0xd0] sm:$0xff] }
 0x5d2   : > { %3454 = vmatprep.mubr.bf16.mxu0 %v17123_v0  ;;  %14132 = vmatprep.mubr.msk.bf16.mxu1 %vm17126_vm0, %v17125_v1  ;;  %v15125_v13 = vpack.c.bf16 %v3548_v12, %v3547_v10 }
 0x5d3   : > { %15137 = vmatprep.subr.bf16.mxu1 %v17134_v18  ;;  %15106 = vmatprep.subr.bf16.mxu0 %v15105_v21  ;;  %v3565_v21 = vld [vmem:[#allocation19 + $0x160] sm:$0xff] }
 0x5d4   : > { %v15156_v23 = vpack.c.bf16 %v3566_v22, %v3565_v21 }
 0x5d8   : > { %13194 = vmatmul.mubr.msk.bf16.vlgmr.msra.gmra.mrb[68].mxu0 %vm19612_vm12, %v3400_v11  ;;  %14133 = vmatmul.mubr.msk.bf16.vlgmr.msra.gmra.mrb[68].mxu1 %vm19612_vm12, %v3400_v11  ;;  %v15153_v11 = vpack.c.bf16 %v3564_v8, %v3563_v6 }
 0x5d9   : > { %14168 = vmatprep.mubr.msk.f32.mxu1 %vm17126_vm0, %v17125_v1  ;;  %15139 = vmatpush3.bf16.msra.mxu1 %v15138_v14  ;;  %v3531_v14 = vld [vmem:[#allocation19 + $0x50] sm:$0xff] }
 0x5da   : > { %15140 = vmatprep.subr.bf16.mxu1 %v17134_v18  ;;  %15108 = vmatpush3.bf16.msra.mxu0 %v15107_v24  ;;  %v15127_v17 = vpack.c.bf16 %v3532_v16, %v3531_v14  ;;  %v3549_v24 = vld [vmem:[#allocation19 + $0xe0] sm:$0xff] }
 0x5db   : > { %15110 = vmatprep.subr.bf16.mxu0 %v15109_v33  ;;  %v15129_v28 = vpack.c.bf16 %v3550_v26, %v3549_v24  ;;  %v3567_v33 = vld [vmem:[#allocation19 + $0x170] sm:$0xff] }
 0x5dc   : > { %v15159_v37 = vpack.c.bf16 %v3568_v34, %v3567_v33 }
 0x5dd   : > { %15142 = vmatpush3.bf16.msra.mxu1 %v15141_v31  ;;  %v3534_v31 = vld [vmem:[#allocation19 + $0x68] sm:$0xff] }
 0x5de   : > { %15143 = vmatprep.subr.bf16.mxu1 %v17134_v18  ;;  %15112 = vmatpush3.bf16.msra.mxu0 %v15111_v38  ;;  %v15131_v32 = vpack.c.bf16 %v3534_v31, %v3533_v30  ;;  %v3551_v38 = vld [vmem:[#allocation19 + $0xf0] sm:$0xff] }
 0x5df   : > { %15114 = vmatprep.subr.bf16.mxu0 %v15113_v44  ;;  %v15133_v39 = vpack.c.bf16 %v3552_v40, %v3551_v38 }
 0x5e1   : > { %15145 = vmatpush3.bf16.msra.mxu1 %v15144_v41  ;;  %v3535_v41 = vld [vmem:[#allocation19 + $0x70] sm:$0xff] }
 0x5e2   : > { %15146 = vmatprep.subr.bf16.mxu1 %v17134_v18  ;;  %15116 = vmatpush3.bf16.msra.mxu0 %v15115_v47  ;;  %v15135_v43 = vpack.c.bf16 %v3536_v42, %v3535_v41 }
 0x5e3   : > { %15118 = vmatprep.subr.bf16.mxu0 %v15117_v53 }
 0x5e5   : > { %15148 = vmatpush3.bf16.msra.mxu1 %v15147_v51 }
 0x5e6   : > { %15149 = vmatprep.subr.bf16.mxu1 %v17134_v18  ;;  %15120 = vmatpush3.bf16.msra.mxu0 %v15119_v56 }
 0x5e7   : > { %15122 = vmatprep.subr.bf16.mxu0 %v15121_v2 }
 0x5e9   : > { %15151 = vmatpush3.bf16.msra.mxu1 %v15150_v60 }
 0x5ea   : > { %15152 = vmatprep.subr.bf16.mxu1 %v17134_v18  ;;  %15124 = vmatpush3.bf16.msra.mxu0 %v15123_v5 }
 0x5eb   : > { %15126 = vmatprep.subr.bf16.mxu0 %v15125_v13 }
 0x5ed   : > { %15154 = vmatpush3.bf16.msra.mxu1 %v15153_v11 }
 0x5ee   : > { %15155 = vmatprep.subr.bf16.mxu1 %v17134_v18  ;;  %15128 = vmatpush3.bf16.msra.mxu0 %v15127_v17 }
 0x5ef   : > { %15130 = vmatprep.subr.bf16.mxu0 %v15129_v28 }
 0x5f1   : > { %15157 = vmatpush3.bf16.msra.mxu1 %v15156_v23 }
 0x5f2   : > { %15158 = vmatprep.subr.bf16.mxu1 %v17134_v18  ;;  %15132 = vmatpush3.bf16.msra.mxu0 %v15131_v32 }
 0x5f3   : > { %15134 = vmatprep.subr.bf16.mxu0 %v15133_v39 }
 0x5f5   : > { %15160 = vmatpush3.bf16.msra.mxu1 %v15159_v37 }
 0x5f6   : > { %14177 = vmatprep.subr.bf16.mxu1 %v17125_v1  ;;  %15136 = vmatpush3.bf16.msra.mxu0 %v15135_v43 }
 0x5f7   : > { %14171 = vmatprep.subr.bf16.mxu0 %v17125_v1 }
 0x66b   : > { %v2617_v44 = vpop.f32.mrb[36].mxu0  ;;  %v2658_v45 = vpop.f32.mrb[36].mxu1 }
 0x66c   : > { %v2619_v46 = vpop.f32.mrb[37].mxu0  ;;  %v14086_v47 = vpop.f32.mrb[37].mxu1 }
 0x66d   : > { %v2621_v48 = vpop.f32.mrb[38].mxu0  ;;  %v2661_v49 = vpop.f32.mrb[38].mxu1 }
 0x66e   : > { %v2622_v50 = vpop.f32.mrb[39].mxu0  ;;  %v14087_v51 = vpop.f32.mrb[39].mxu1 }
 0x673   : > { %v2719_v52 = vpop.f32.mrb[40].mxu0  ;;  %v2760_v53 = vpop.f32.mrb[40].mxu1 }
 0x674   : > { %v2720_v54 = vadd.f32 %v2719_v52, %v2617_v44  ;;  %v2761_v55 = vadd.f32 %v2760_v53, %v2658_v45  ;;  %v2721_v56 = vpop.f32.mrb[41].mxu0  ;;  %v14092_v57 = vpop.f32.mrb[41].mxu1 }
 0x675   : > { %v2722_v58 = vadd.f32 %v2721_v56, %v2619_v46  ;;  %v2723_v60 = vpop.f32.mrb[42].mxu0  ;;  %v2763_v61 = vpop.f32.mrb[42].mxu1 }
 0x676   : > { %v2724_v63 = vpop.f32.mrb[43].mxu0  ;;  %v14093_v2 = vpop.f32.mrb[43].mxu1 }
 0x67b   : > { %v2823_v3 = vpop.f32.mrb[44].mxu0  ;;  %v2864_v4 = vpop.f32.mrb[44].mxu1 }
 0x67c   : > { %v2870_v5 = vadd.f32 %v2823_v3, %v2720_v54  ;;  %v2872_v6 = vadd.f32 %v2864_v4, %v2761_v55  ;;  %v2825_v8 = vpop.f32.mrb[45].mxu0  ;;  %v14098_v10 = vpop.f32.mrb[45].mxu1 }
 0x67d   : > { %v2871_v11 = vadd.f32 %v2825_v8, %v2722_v58  ;;  %v2827_v12 = vpop.f32.mrb[46].mxu0  ;;  %v2867_v13 = vpop.f32.mrb[46].mxu1 }
 0x67e   : > { %v2828_v14 = vpop.f32.mrb[47].mxu0  ;;  %v14099_v16 = vpop.f32.mrb[47].mxu1 }
 0x683   : > { %v2930_v17 = vpop.f32.mrb[48].mxu0  ;;  %v2971_v21 = vpop.f32.mrb[48].mxu1 }
 0x684   : > { %v2977_v22 = vadd.f32 %v2930_v17, %v2870_v5  ;;  %v2979_v23 = vadd.f32 %v2971_v21, %v2872_v6  ;;  %v2932_v24 = vpop.f32.mrb[49].mxu0  ;;  %v14104_v26 = vpop.f32.mrb[49].mxu1 }
 0x685   : > { %v2978_v28 = vadd.f32 %v2932_v24, %v2871_v11  ;;  %v2934_v30 = vpop.f32.mrb[50].mxu0  ;;  %v2974_v31 = vpop.f32.mrb[50].mxu1 }
 0x686   : > { %v2935_v32 = vpop.f32.mrb[51].mxu0  ;;  %v14105_v33 = vpop.f32.mrb[51].mxu1 }
 0x68b   : > { %v3028_v34 = vpop.f32.mrb[52].mxu0  ;;  %v3069_v37 = vpop.f32.mrb[52].mxu1 }
 0x68c   : > { %v3075_v38 = vadd.f32 %v3028_v34, %v2977_v22  ;;  %v3077_v40 = vadd.f32 %v3069_v37, %v2979_v23  ;;  %v3030_v39 = vpop.f32.mrb[53].mxu0  ;;  %v14110_v41 = vpop.f32.mrb[53].mxu1 }
 0x68d   : > { %v3076_v42 = vadd.f32 %v3030_v39, %v2978_v28  ;;  %v3032_v43 = vpop.f32.mrb[54].mxu0  ;;  %v3072_v44 = vpop.f32.mrb[54].mxu1 }
 0x68e   : > { %v3033_v45 = vpop.f32.mrb[55].mxu0  ;;  %v14111_v46 = vpop.f32.mrb[55].mxu1 }
 0x68f   : > { %v3510_v28 = vpop.permute.xlu0 %3509 }
 0x693   : > { %v3135_v47 = vpop.f32.mrb[56].mxu0  ;;  %v3176_v48 = vpop.f32.mrb[56].mxu1 }
 0x694   : > { %v3182_v49 = vadd.f32 %v3135_v47, %v3075_v38  ;;  %v3184_v50 = vadd.f32 %v3176_v48, %v3077_v40  ;;  %v3137_v51 = vpop.f32.mrb[57].mxu0  ;;  %v14116_v52 = vpop.f32.mrb[57].mxu1 }
 0x695   : > { %v3183_v53 = vadd.f32 %v3137_v51, %v3076_v42  ;;  %v3139_v54 = vpop.f32.mrb[58].mxu0  ;;  %v3179_v55 = vpop.f32.mrb[58].mxu1 }
 0x696   : > { %v3140_v56 = vpop.f32.mrb[59].mxu0  ;;  %v14117_v57 = vpop.f32.mrb[59].mxu1 }
 0x69b   : > { %v3242_v58 = vpop.f32.mrb[60].mxu0  ;;  %v3283_v60 = vpop.f32.mrb[60].mxu1 }
 0x69c   : > { %v3289_v61 = vadd.f32 %v3242_v58, %v3182_v49  ;;  %v3291_v63 = vadd.f32 %v3283_v60, %v3184_v50  ;;  %v3244_v2 = vpop.f32.mrb[61].mxu0  ;;  %v14122_v3 = vpop.f32.mrb[61].mxu1  ;;  %v4262_v60 = vld [vmem:[#allocation10 + $0x8] sm:$0xff] }
 0x69d   : > { %v3290_v4 = vadd.f32 %v3244_v2, %v3183_v53  ;;  %v3246_v5 = vpop.f32.mrb[62].mxu0  ;;  %v3286_v6 = vpop.f32.mrb[62].mxu1 }
 0x69e   : > { %v3247_v8 = vpop.f32.mrb[63].mxu0  ;;  %v14123_v10 = vpop.f32.mrb[63].mxu1 }
 0x69f   : > { %v16012_v8 = vld [vmem:[#allocation9 + $0x8] sm:$0xff]  }
 0x6a3   : > { %v3349_v11 = vpop.f32.mrb[64].mxu0  ;;  %v3390_v12 = vpop.f32.mrb[64].mxu1 }
 0x6a4   : > { %v3398_v13 = vadd.f32 %v3390_v12, %v3291_v63  ;;  %v3351_v14 = vpop.f32.mrb[65].mxu0  ;;  %v14128_v16 = vpop.f32.mrb[65].mxu1  ;;  %v3396_v17 = vadd.f32 %v3349_v11, %v3289_v61  ;;  %v4261_v61 = vld [vmem:[#allocation10] sm:$0xff] }
 0x6a5   : > { %v3353_v21 = vpop.f32.mrb[66].mxu0  ;;  %v3393_v22 = vpop.f32.mrb[66].mxu1  ;;  %v3397_v23 = vadd.f32 %v3351_v14, %v3290_v4  ;;  %v16013_v14 = vld [vmem:[#allocation9] sm:$0xff]  }
 0x6a6   : > { %v3354_v24 = vpop.f32.mrb[67].mxu0  ;;  %v14129_v26 = vpop.f32.mrb[67].mxu1 }
 0x6a7   : > { %v18276_v63 = vpop.permute.xlu1 %3721  ;;  %v16014_v24 = vld [vmem:[#allocation9 + $0x10] sm:$0xff]  }
 0x6ab   : > { %v3456_v30 = vpop.f32.mrb[68].mxu0  ;;  %v3497_v31 = vpop.f32.mrb[68].mxu1 }
 0x6ac   : > { %v3503_v32 = vadd.f32 %v3456_v30, %v3396_v17  ;;  %v3505_v33 = vadd.f32 %v3497_v31, %v3398_v13  ;;  %v3458_v34 = vpop.f32.mrb[69].mxu0  ;;  %v14134_v37 = vpop.f32.mrb[69].mxu1  ;;  %v16015_v31 = vld [vmem:[#allocation9 + $0x18] sm:$0xff]  }
 0x6ad   : > { %v3504_v38 = vadd.f32 %v3458_v34, %v3397_v23  ;;  %v3460_v40 = vpop.f32.mrb[70].mxu0  ;;  %v3500_v39 = vpop.f32.mrb[70].mxu1  ;;  %v16016_v37 = vld [vmem:[#allocation9 + $0x20] sm:$0xff]  }
 0x6ae   : > { %v3512_v41 = vadd.f32 %v3510_v28, %v3503_v32  ;;  %v3514_v42 = vadd.f32 %v3510_v28, %v3505_v33  ;;  %v3461_v43 = vpop.f32.mrb[71].mxu0  ;;  %v14135_v44 = vpop.f32.mrb[71].mxu1 }
 0x6af   : > { %v3513_v45 = vadd.f32 %v3510_v28, %v3504_v38  ;;  %v18278_v2 = vpop.permute.xlu1 %3779 }
 0x6b0   : > { %v3515_v46 = vmax.f32 %v3512_v41, 0.0  ;;  %v3517_v47 = vmax.f32 %v3514_v42, 0.0  ;;  %v16017_v42 = vld [vmem:[#allocation9 + $0x28] sm:$0xff]  }
 0x6b1   : > { %v3516_v48 = vmax.f32 %v3513_v45, 0.0 }
 0x6b2   : > { %v18243_v49 = vmul.f32 %v3517_v47, %v18058_v36  ;;  %v18249_v51 = vmul.f32 %v3515_v46, %v18052_v20  ;;  %v16018_v47 = vld [vmem:[#allocation9 + $0x30] sm:$0xff]  }
 0x6b3   : > { %v18246_v50 = vmul.f32 %v3516_v48, %v18055_v27  ;;  %v18280_v3 = vpop.permute.xlu1 %3840 }
 0x6b4   : > { %14169 = vmatmul.mubr.f32.vlgmr.msra.gmra.mrb[72].mxu1 %v18243_v49 }
 0x6b5   : > { %3633 = vmatprep.mubr.f32.mxu0 %v18246_v50  ;;  %14179 = vmatprep.mubr.msk.bf16.mxu1 %vm17126_vm0, %v17125_v1 }
 0x6b6   : > { %3634 = vmatmul.mubr.f32.vlgmr.msra.gmra.mrb[72].mxu0 %v18249_v51 }
 0x6b7   : > { %14173 = vmatprep.mubr.msk.bf16.mxu0 %vm17126_vm0, %v17125_v1 }
 0x787   : > { %v3705_v52 = vpop.f32.mrb[72].mxu1 }
 0x788   : > { %v14170_v53 = vpop.f32.mrb[73].mxu1 }
 0x789   : > { %v13621_v54 = vpop.f32.mrb[72].mxu0  ;;  %v16019_v53 = vld [vmem:[#allocation9 + $0x38] sm:$0xff]  }
 0x78a   : > { %v13622_v55 = vpop.f32.mrb[73].mxu0 }
 0x78b   : > { %v13623_v56 = vadd.f32 %v13622_v55, %v13621_v54  ;;  %v16020_v54 = vld [vmem:[#allocation9 + $0x40] sm:$0xff]  }
 0x78d   : > { %v3706_v57 = vadd.f32 %v13623_v56, %v3705_v52 }
 0x78f   : > { %v3709_v58 = vpack.c.bf16 %v3706_v57, %v3706_v57 }
 0x791   : > { %3903 = vrot.lane.b32.xlu1 %v3709_v58, %s17129_s5  ;;  %3723 = vrot.lane.b32.xlu0 %v3709_v58, %s19608_s8  ;;  %v3967_v30 = vsel %vm19614_vm11, %v3709_v58, 0 }
 0x795   : > { %4080 = vrot.lane.b32.xlu1 %v3709_v58, %s19604_s13  ;;  %3781 = vrot.lane.b32.xlu0 %v3709_v58, %s19616_s23 }
 0x799   : > { %4143 = vrot.lane.b32.xlu1 %v3709_v58, %s19600_s16  ;;  %3842 = vrot.lane.b32.xlu0 %v3709_v58, %s19606_s7 }
 0x79d   : > { %4206 = vrot.lane.b32.xlu1 %v3709_v58, %s19602_s11  ;;  %4020 = vrot.lane.b32.xlu0 %v3709_v58, %s19620_s10 }
 0x7a1   : > { %4082 = vrot.lane.b32.xlu0 %v17123_v0, %s19604_s13  ;;  %4265 = vperm.xlu1 %16010, %v4261_v61  }
 0x7a5   : > { %4145 = vrot.lane.b32.xlu0 %v17123_v0, %s19600_s16 }
 0x7a9   : > { %4208 = vrot.lane.b32.xlu0 %v17123_v0, %s19602_s11 }
 0x7ad   : > { %4270 = vperm.xlu0 %16009, %v4262_v60  }
 0x803   : > { %v3724_v4 = vpop.permute.xlu0 %3723  ;;  %v3904_v10 = vpop.permute.xlu1 %3903 }
 0x804   : > { %v3726_v5 = vsel %vm3725_vm13, %v18276_v63, %v3724_v4  ;;  %v3905_v16 = vsel %vm1882_vm6, %v17951_v35, %v3904_v10 }
 0x805   : > { %v3731_v6 = vsel %vm19614_vm11, %v3726_v5, 0  ;;  %v3910_v22 = vsel %vm19614_vm11, %v3905_v16, 0 }
 0x806   : > { %14172 = vmatpush3.bf16.msra.mxu0 %v3731_v6 }
 0x807   : > { %v3782_v11 = vpop.permute.xlu0 %3781  ;;  %14183 = vmatprep.subr.bf16.mxu0 %v17125_v1  ;;  %v4081_v28 = vpop.permute.xlu1 %4080 }
 0x808   : > { %v3784_v12 = vsel %vm3783_vm14, %v18278_v2, %v3782_v11 }
 0x809   : > { %v3789_v13 = vsel %vm19614_vm11, %v3784_v12, 0  ;;  %14174 = vmatmul.mubr.msk.bf16.vlgmr.msra.gmra.mrb[76].mxu0 %vm19612_vm12, %v16012_v8 }
 0x80a   : > { %14178 = vmatpush3.bf16.msra.mxu1 %v3789_v13  ;;  %14185 = vmatprep.mubr.msk.bf16.mxu0 %vm17126_vm0, %v17125_v1 }
 0x80b   : > { %v3843_v17 = vpop.permute.xlu0 %3842  ;;  %14189 = vmatprep.subr.bf16.mxu1 %v17125_v1  ;;  %v4144_v40 = vpop.permute.xlu1 %4143 }
 0x80c   : > { %v3845_v21 = vsel %vm3844_vm15, %v18280_v3, %v3843_v17 }
 0x80d   : > { %v3850_v23 = vsel %vm19614_vm11, %v3845_v21, 0  ;;  %14180 = vmatmul.mubr.msk.bf16.vlgmr.msra.gmra.mrb[76].mxu1 %vm19612_vm12, %v16013_v14 }
 0x80e   : > { %14184 = vmatpush3.bf16.msra.mxu0 %v3850_v23  ;;  %14190 = vmatpush3.bf16.msra.mxu1 %v3910_v22 }
 0x80f   : > { %v4021_v26 = vpop.permute.xlu0 %4020  ;;  %14195 = vmatprep.subr.bf16.mxu0 %v17125_v1  ;;  %14191 = vmatprep.mubr.msk.bf16.mxu1 %vm17126_vm0, %v17125_v1  ;;  %v4207_v45 = vpop.permute.xlu1 %4206 }
 0x810   : > { %14201 = vmatprep.subr.bf16.mxu1 %v17125_v1  ;;  %v4022_v32 = vsel %vm2090_vm7, %v4021_v26, %v17986_v59 }
 0x811   : > { %14186 = vmatmul.mubr.msk.bf16.vlgmr.msra.gmra.mrb[80].mxu0 %vm19612_vm12, %v16014_v24  ;;  %v4027_v34 = vsel %vm19614_vm11, %v4022_v32, 0 }
 0x812   : > { %14196 = vmatpush3.bf16.msra.mxu0 %v3967_v30  ;;  %14197 = vmatprep.mubr.msk.bf16.mxu0 %vm17126_vm0, %v17125_v1 }
 0x813   : > { %v18310_v33 = vpop.permute.xlu0 %4082  ;;  %14207 = vmatprep.subr.bf16.mxu0 %v17125_v1 }
 0x814   : > { %v4085_v38 = vsel %vm4084_vm3, %v4081_v28, %v18310_v33 }
 0x815   : > { %14192 = vmatmul.mubr.msk.bf16.vlgmr.msra.gmra.mrb[80].mxu1 %vm19612_vm12, %v16015_v31  ;;  %v4090_v41 = vsel %vm19614_vm11, %v4085_v38, 0 }
 0x816   : > { %14202 = vmatpush3.bf16.msra.mxu1 %v4027_v34  ;;  %14203 = vmatprep.mubr.msk.bf16.mxu1 %vm17126_vm0, %v17125_v1 }
 0x817   : > { %v18319_v39 = vpop.permute.xlu0 %4145  ;;  %14213 = vmatprep.subr.bf16.mxu1 %v17125_v1 }
 0x818   : > { %v4148_v43 = vsel %vm4147_vm2, %v4144_v40, %v18319_v39 }
 0x819   : > { %14198 = vmatmul.mubr.msk.bf16.vlgmr.msra.gmra.mrb[84].mxu0 %vm19612_vm12, %v16016_v37  ;;  %v4153_v46 = vsel %vm19614_vm11, %v4148_v43, 0 }
 0x81a   : > { %14208 = vmatpush3.bf16.msra.mxu0 %v4090_v41  ;;  %14209 = vmatprep.mubr.msk.bf16.mxu0 %vm17126_vm0, %v17125_v1 }
 0x81b   : > { %v18328_v44 = vpop.permute.xlu0 %4208  ;;  %14219 = vmatprep.subr.bf16.mxu0 %v17125_v1 }
 0x81c   : > { %v4211_v48 = vsel %vm19618_vm10, %v4207_v45, %v18328_v44 }
 0x81d   : > { %14204 = vmatmul.mubr.msk.bf16.vlgmr.msra.gmra.mrb[84].mxu1 %vm19612_vm12, %v16017_v42  ;;  %v4216_v52 = vsel %vm19614_vm11, %v4211_v48, 0  ;;  %vm5476_vm11 = vcmask 998400  }
 0x81e   : > { %14214 = vmatpush3.bf16.msra.mxu1 %v4153_v46  ;;  %14215 = vmatprep.mubr.msk.bf16.mxu1 %vm17126_vm0, %v17125_v1 }
 0x81f   : > { %14225 = vmatprep.subr.bf16.mxu1 %v17125_v1 }
 0x821   : > { %14210 = vmatmul.mubr.msk.bf16.vlgmr.msra.gmra.mrb[88].mxu0 %vm19612_vm12, %v16018_v47 }
 0x822   : > { %14220 = vmatpush3.bf16.msra.mxu0 %v4216_v52  ;;  %14221 = vmatprep.mubr.msk.bf16.mxu0 %vm17126_vm0, %v17125_v1 }
 0x823   : > { %14231 = vmatprep.subr.bf16.mxu0 %v17125_v1 }
 0x825   : > { %14216 = vmatmul.mubr.msk.bf16.vlgmr.msra.gmra.mrb[88].mxu1 %vm19612_vm12, %v16019_v53 }
 0x826   : > { %14227 = vmatprep.mubr.msk.bf16.mxu1 %vm17126_vm0, %v17125_v1 }
 0x829   : > { %14222 = vmatmul.mubr.msk.bf16.vlgmr.msra.gmra.mrb[92].mxu0 %vm19612_vm12, %v16020_v54  ;;  %vm5084_vm12 = vcmask 39936  }
 0x82a   : > { %14233 = vmatprep.mubr.msk.bf16.mxu0 %vm17126_vm0, %v17125_v1 }
 0x8dc   : > { %v3767_v55 = vpop.f32.mrb[76].mxu0 }
 0x8dd   : > { %v14175_v56 = vpop.f32.mrb[77].mxu0 }
 0x8de   : > { %v3770_v57 = vpop.f32.mrb[78].mxu0 }
 0x8df   : > { %v14176_v58 = vpop.f32.mrb[79].mxu0 }
 0x8e0   : > { %v3825_v60 = vpop.f32.mrb[76].mxu1 }
 0x8e1   : > { %v3826_v61 = vadd.f32 %v3825_v60, %v3767_v55  ;;  %v14181_v4 = vpop.f32.mrb[77].mxu1 }
 0x8e2   : > { %v3828_v5 = vpop.f32.mrb[78].mxu1 }
 0x8e3   : > { %v3829_v6 = vadd.f32 %v3828_v5, %v3770_v57  ;;  %v14182_v8 = vpop.f32.mrb[79].mxu1  ;;  %v4266_v5 = vpop.permute.xlu1 %4265 }
 0x8e4   : > { %v3886_v10 = vpop.f32.mrb[80].mxu0 }
 0x8e5   : > { %v3893_v11 = vadd.f32 %v3886_v10, %v3826_v61  ;;  %v14187_v12 = vpop.f32.mrb[81].mxu0 }
 0x8e6   : > { %v3889_v13 = vpop.f32.mrb[82].mxu0 }
 0x8e7   : > { %v3894_v14 = vadd.f32 %v3889_v13, %v3829_v6  ;;  %v14188_v16 = vpop.f32.mrb[83].mxu0 }
 0x8e8   : > { %v3946_v17 = vpop.f32.mrb[80].mxu1 }
 0x8e9   : > { %v3953_v21 = vadd.f32 %v3946_v17, %v3893_v11  ;;  %v14193_v22 = vpop.f32.mrb[81].mxu1 }
 0x8ea   : > { %v3949_v23 = vpop.f32.mrb[82].mxu1 }
 0x8eb   : > { %v3954_v24 = vadd.f32 %v3949_v23, %v3894_v14  ;;  %v14194_v26 = vpop.f32.mrb[83].mxu1  ;;  %v4271_v14 = vpop.permute.xlu0 %4270 }
 0x8ec   : > { %v4003_v28 = vpop.f32.mrb[84].mxu0 }
 0x8ed   : > { %v4010_v30 = vadd.f32 %v4003_v28, %v3953_v21  ;;  %v14199_v31 = vpop.f32.mrb[85].mxu0  ;;  %v18349_v21 = vld [vmem:[#allocation48] ss:$0 sm:$0xff]  ;;  %v4802_v28 = vld [vmem:[#allocation13 + $0x8] sm:$0xff] }
 0x8ee   : > { %v4006_v32 = vpop.f32.mrb[86].mxu0 }
 0x8ef   : > { %v4011_v34 = vadd.f32 %v4006_v32, %v3954_v24  ;;  %v14200_v37 = vpop.f32.mrb[87].mxu0 }
 0x8f0   : > { %v4063_v38 = vpop.f32.mrb[84].mxu1 }
 0x8f1   : > { %v4070_v40 = vadd.f32 %v4063_v38, %v4010_v30  ;;  %v14205_v41 = vpop.f32.mrb[85].mxu1  ;;  %v4801_v30 = vld [vmem:[#allocation13] sm:$0xff] }
 0x8f2   : > { %v4066_v42 = vpop.f32.mrb[86].mxu1  ;;  %v16021_v38 = vld [vmem:[#allocation12 + $0x8] sm:$0xff]  }
 0x8f3   : > { %v4071_v43 = vadd.f32 %v4066_v42, %v4011_v34  ;;  %v14206_v45 = vpop.f32.mrb[87].mxu1 }
 0x8f4   : > { %v4126_v46 = vpop.f32.mrb[88].mxu0 }
 0x8f5   : > { %v4133_v47 = vadd.f32 %v4126_v46, %v4070_v40  ;;  %v14211_v48 = vpop.f32.mrb[89].mxu0  ;;  %v16022_v40 = vld [vmem:[#allocation12] sm:$0xff]   ;;  %v16023_v46 = vld [vmem:[#allocation12 + $0x10] sm:$0xff]  }
 0x8f6   : > { %v4129_v52 = vpop.f32.mrb[90].mxu0 }
 0x8f7   : > { %v4134_v53 = vadd.f32 %v4129_v52, %v4071_v43  ;;  %v14212_v54 = vpop.f32.mrb[91].mxu0 }
 0x8f8   : > { %v4189_v55 = vpop.f32.mrb[88].mxu1  ;;  %v16026_v54 = vld [vmem:[#allocation12 + $0x28] sm:$0xff]  }
 0x8f9   : > { %v4196_v56 = vadd.f32 %v4189_v55, %v4133_v47  ;;  %v14217_v57 = vpop.f32.mrb[89].mxu1  ;;  %v16024_v47 = vld [vmem:[#allocation12 + $0x18] sm:$0xff]  }
 0x8fa   : > { %v4192_v58 = vpop.f32.mrb[90].mxu1 }
 0x8fb   : > { %v4197_v60 = vadd.f32 %v4192_v58, %v4134_v53  ;;  %v14218_v61 = vpop.f32.mrb[91].mxu1  ;;  %v16025_v53 = vld [vmem:[#allocation12 + $0x20] sm:$0xff]  }
 0x8fc   : > { %v4252_v4 = vpop.f32.mrb[92].mxu0  ;;  %v16028_v61 = vld [vmem:[#allocation12 + $0x38] sm:$0xff]  }
 0x8fd   : > { %v4259_v6 = vadd.f32 %v4252_v4, %v4196_v56  ;;  %v14223_v8 = vpop.f32.mrb[93].mxu0 }
 0x8fe   : > { %v4255_v10 = vpop.f32.mrb[94].mxu0  ;;  %v4819_v8 = vld [vmem:[#allocation21] sm:$0xff] }
 0x8ff   : > { %v4273_v11 = vadd.f32 %v4266_v5, %v4259_v6  ;;  %v4260_v12 = vadd.f32 %v4255_v10, %v4197_v60  ;;  %v14224_v13 = vpop.f32.mrb[95].mxu0  ;;  %v16027_v60 = vld [vmem:[#allocation12 + $0x30] sm:$0xff]   ;;  %v16029_v6 = vld [vmem:[#allocation12 + $0x40] sm:$0xff]  }
 0x900   : > { %v4820_v10 = vld [vmem:[#allocation21 + $0x8] sm:$0xff]  ;;  %v4822_v13 = vld [vmem:[#allocation21 + $0x18] sm:$0xff] }
 0x901   : > { %v4275_v16 = vmax.f32 %v4273_v11, 0.0  ;;  %v4274_v17 = vadd.f32 %v4271_v14, %v4260_v12  ;;  %v15161_v11 = vpack.c.bf16 %v4820_v10, %v4819_v8  ;;  %v4821_v12 = vld [vmem:[#allocation21 + $0x10] sm:$0xff] }
 0x902   : > { %v15165_v14 = vpack.c.bf16 %v4822_v13, %v4821_v12 }
 0x903   : > { %v4276_v22 = vmax.f32 %v4274_v17, 0.0  ;;  %v4283_v23 = vmul.f32 %v18349_v21, %v4275_v16  ;;  %v4823_v16 = vld [vmem:[#allocation21 + $0x20] sm:$0xff]  ;;  %v4824_v17 = vld [vmem:[#allocation21 + $0x28] sm:$0xff] }
 0x905   : > { %v4284_v24 = vmul.f32 %v18349_v21, %v4276_v22  ;;  %v15169_v22 = vpack.c.bf16 %v4824_v17, %v4823_v16 }
 0x907   : > { %v4285_v26 = vpack.c.bf16 %v4284_v24, %v4283_v23  ;;  %v4825_v23 = vld [vmem:[#allocation21 + $0x30] sm:$0xff]  ;;  %v4826_v24 = vld [vmem:[#allocation21 + $0x38] sm:$0xff] }
 0x909   : > { %4351 = vrot.lane.b32.xlu0 %v4285_v26, %s19616_s23  ;;  %4297 = vrot.lane.b32.xlu1 %v4285_v26, %s19608_s8  ;;  %s17146_s8 = smov 121   ;;  %s19711_s23 = sld [smem:[#allocation73_spill]] }
 0x90d   : > { %4465 = vrot.lane.b32.xlu0 %v4285_v26, %s17129_s5  ;;  %4407 = vrot.lane.b32.xlu1 %v4285_v26, %s19606_s7  ;;  %s17145_s7 = smov 122  }
 0x911   : > { %4635 = vrot.lane.b32.xlu0 %v4285_v26, %s19604_s13  ;;  %4577 = vrot.lane.b32.xlu1 %v4285_v26, %s19620_s10  ;;  %s17144_s13 = smov 123  }
 0x915   : > { %4751 = vrot.lane.b32.xlu0 %v4285_v26, %s19602_s11  ;;  %4693 = vrot.lane.b32.xlu1 %v4285_v26, %s19600_s16  ;;  %s17142_s16 = smov 7   ;;  %s17143_s11 = smov 5  }
 0x919   : > { %4810 = vperm.xlu0 %16009, %v4802_v28   ;;  %4805 = vperm.xlu1 %16010, %v4801_v30   ;;  %v4827_v28 = vld [vmem:[#allocation21 + $0x40] sm:$0xff]  ;;  %v4828_v30 = vld [vmem:[#allocation21 + $0x48] sm:$0xff] }
 0x91d   : > { %4931 = vrot.lane.b32.xlu1 %v17123_v0, %s17141_s18 }
 0x921   : > { %5003 = vrot.lane.b32.xlu1 %v17123_v0, %s17142_s16 }
 0x925   : > { %5080 = vrot.lane.b32.xlu1 %v17123_v0, %s17143_s11 }
 0x97b   : > { %v4352_v31 = vpop.permute.xlu0 %4351  ;;  %v4298_v32 = vpop.permute.xlu1 %4297 }
 0x97c   : > { %v4353_v34 = vsel %vm3783_vm14, %v18278_v2, %v4352_v31  ;;  %v4299_v37 = vsel %vm3725_vm13, %v18276_v63, %v4298_v32  ;;  %v15177_v31 = vpack.c.bf16 %v4828_v30, %v4827_v28  ;;  %v4829_v32 = vld [vmem:[#allocation21 + $0x50] sm:$0xff] }
 0x97d   : > { %14226 = vmatpush3.bf16.msra.mxu1 %v4299_v37  ;;  %14232 = vmatpush3.bf16.msra.mxu0 %v4353_v34  ;;  %v4830_v34 = vld [vmem:[#allocation21 + $0x58] sm:$0xff] }
 0x97e   : > { %14237 = vmatprep.subr.bf16.mxu1 %v17125_v1  ;;  %14243 = vmatprep.subr.bf16.mxu0 %v17125_v1  ;;  %v15181_v37 = vpack.c.bf16 %v4830_v34, %v4829_v32 }
 0x97f   : > { %v4466_v41 = vpop.permute.xlu0 %4465  ;;  %v4408_v42 = vpop.permute.xlu1 %4407 }
 0x980   : > { %v4467_v43 = vsel %vm1882_vm6, %v17951_v35, %v4466_v41  ;;  %v4409_v45 = vsel %vm3844_vm15, %v18280_v3, %v4408_v42  ;;  %14228 = vmatmul.mubr.msk.bf16.vlgmr.msra.gmra.mrb[92].mxu1 %vm4301_vm9, %v16021_v38  ;;  %14234 = vmatmul.mubr.msk.bf16.vlgmr.msra.gmra.mrb[96].mxu0 %vm4301_vm9, %v16022_v40  ;;  %v4831_v38 = vld [vmem:[#allocation21 + $0x60] sm:$0xff]  ;;  %v4832_v40 = vld [vmem:[#allocation21 + $0x68] sm:$0xff]  ;;  %v4833_v42 = vld [vmem:[#allocation21 + $0x70] sm:$0xff] }
 0x981   : > { %14238 = vmatpush3.bf16.msra.mxu1 %v4409_v45  ;;  %14244 = vmatpush3.bf16.msra.mxu0 %v4467_v43  ;;  %v15185_v41 = vpack.c.bf16 %v4832_v40, %v4831_v38  ;;  %v4834_v43 = vld [vmem:[#allocation21 + $0x78] sm:$0xff] }
 0x982   : > { %14245 = vmatprep.mubr.msk.bf16.mxu0 %vm17126_vm0, %v17125_v1  ;;  %14255 = vmatprep.subr.bf16.mxu0 %v17125_v1  ;;  %v15189_v45 = vpack.c.bf16 %v4834_v43, %v4833_v42 }
 0x983   : > { %14239 = vmatprep.mubr.msk.bf16.mxu1 %vm17126_vm0, %v17125_v1  ;;  %14249 = vmatprep.subr.bf16.mxu1 %v17125_v1  ;;  %v4578_v48 = vpop.permute.xlu1 %4577  ;;  %v4636_v55 = vpop.permute.xlu0 %4635 }
 0x984   : > { %v4579_v52 = vsel %vm2090_vm7, %v4578_v48, %v17986_v59  ;;  %v4637_v57 = vsel %vm4084_vm3, %v4636_v55, %v18310_v33 }
 0x987   : > { %v4694_v56 = vpop.permute.xlu1 %4693  ;;  %v4752_v4 = vpop.permute.xlu0 %4751 }
 0x988   : > { %14240 = vmatmul.mubr.msk.bf16.vlgmr.msra.gmra.mrb[96].mxu1 %vm4301_vm9, %v16023_v46  ;;  %14246 = vmatmul.mubr.msk.bf16.vlgmr.msra.gmra.mrb[100].mxu0 %vm4301_vm9, %v16024_v47  ;;  %v4695_v58 = vsel %vm4147_vm2, %v4694_v56, %v18319_v39  ;;  %v4753_v5 = vsel %vm19618_vm10, %v4752_v4, %v18328_v44  ;;  %vm5692_vm10 = vcmask 261120  }
 0x989   : > { %14250 = vmatpush3.bf16.msra.mxu1 %v4285_v26  ;;  %14256 = vmatpush3.bf16.msra.mxu0 %v4579_v52  ;;  %v15173_v26 = vpack.c.bf16 %v4826_v24, %v4825_v23 }
 0x98a   : > { %14251 = vmatprep.mubr.msk.bf16.mxu1 %vm17126_vm0, %v17125_v1  ;;  %14257 = vmatprep.mubr.msk.bf16.mxu0 %vm17126_vm0, %v17125_v1 }
 0x98b   : > { %14261 = vmatprep.subr.bf16.mxu1 %v17125_v1  ;;  %14267 = vmatprep.subr.bf16.mxu0 %v17125_v1 }
 0x990   : > { %14252 = vmatmul.mubr.msk.bf16.vlgmr.msra.gmra.mrb[100].mxu1 %vm4301_vm9, %v16025_v53  ;;  %14258 = vmatmul.mubr.msk.bf16.vlgmr.msra.gmra.mrb[104].mxu0 %vm4301_vm9, %v16026_v54 }
 0x991   : > { %14262 = vmatpush3.bf16.msra.mxu1 %v4637_v57  ;;  %14268 = vmatpush3.bf16.msra.mxu0 %v4695_v58 }
 0x992   : > { %14263 = vmatprep.mubr.msk.bf16.mxu1 %vm17126_vm0, %v17125_v1  ;;  %14273 = vmatprep.subr.bf16.mxu1 %v17125_v1 }
 0x993   : > { %14269 = vmatprep.mubr.msk.bf16.mxu0 %vm17126_vm0, %v17125_v1  ;;  %15162 = vmatprep.subr.bf16.mxu0 %v15161_v11 }
 0x998   : > { %14264 = vmatmul.mubr.msk.bf16.vlgmr.msra.gmra.mrb[104].mxu1 %vm4301_vm9, %v16027_v60  ;;  %14270 = vmatmul.mubr.msk.bf16.vlgmr.msra.gmra.mrb[108].mxu0 %vm4301_vm9, %v16028_v61 }
 0x999   : > { %14274 = vmatpush3.bf16.msra.mxu1 %v4753_v5  ;;  %14275 = vmatprep.mubr.msk.bf16.mxu1 %vm17126_vm0, %v17125_v1 }
 0x99a   : > { %15164 = vmatpush3.bf16.msra.mxu0 %v15161_v11 }
 0x99b   : > { %15166 = vmatprep.subr.bf16.mxu0 %v15165_v14 }
 0x99e   : > { %15168 = vmatpush3.bf16.msra.mxu0 %v15165_v14 }
 0x99f   : > { %15170 = vmatprep.subr.bf16.mxu0 %v15169_v22 }
 0x9a0   : > { %14276 = vmatmul.mubr.msk.bf16.vlgmr.msra.gmra.mrb[108].mxu1 %vm4301_vm9, %v16029_v6 }
 0x9a2   : > { %15172 = vmatpush3.bf16.msra.mxu0 %v15169_v22 }
 0x9a3   : > { %15174 = vmatprep.subr.bf16.mxu0 %v15173_v26 }
 0x9a6   : > { %15176 = vmatpush3.bf16.msra.mxu0 %v15173_v26 }
 0x9a7   : > { %15178 = vmatprep.subr.bf16.mxu0 %v15177_v31 }
 0x9aa   : > { %15180 = vmatpush3.bf16.msra.mxu0 %v15177_v31 }
 0x9ab   : > { %15182 = vmatprep.subr.bf16.mxu0 %v15181_v37 }
 0x9ae   : > { %15184 = vmatpush3.bf16.msra.mxu0 %v15181_v37 }
 0x9af   : > { %15186 = vmatprep.subr.bf16.mxu0 %v15185_v41 }
 0x9b2   : > { %15188 = vmatpush3.bf16.msra.mxu0 %v15185_v41 }
 0x9b3   : > { %15190 = vmatprep.subr.bf16.mxu0 %v15189_v45 }
 0x9b6   : > { %15192 = vmatpush3.bf16.msra.mxu0 %v15189_v45 }
 0xa53   : > { %v4339_v46 = vpop.f32.mrb[92].mxu1  ;;  %v4392_v47 = vpop.f32.mrb[96].mxu0 }
 0xa54   : > { %v4393_v48 = vadd.f32 %v4392_v47, %v4339_v46  ;;  %v14229_v52 = vpop.f32.mrb[93].mxu1  ;;  %v14235_v53 = vpop.f32.mrb[97].mxu0 }
 0xa55   : > { %v4342_v54 = vpop.f32.mrb[94].mxu1  ;;  %v4395_v55 = vpop.f32.mrb[98].mxu0 }
 0xa56   : > { %v4396_v56 = vadd.f32 %v4395_v55, %v4342_v54  ;;  %v14230_v57 = vpop.f32.mrb[95].mxu1  ;;  %v14236_v58 = vpop.f32.mrb[99].mxu0 }
 0xa5b   : > { %v4448_v60 = vpop.f32.mrb[96].mxu1  ;;  %v4506_v61 = vpop.f32.mrb[100].mxu0 }
 0xa5c   : > { %v4455_v4 = vadd.f32 %v4448_v60, %v4393_v48  ;;  %v14241_v5 = vpop.f32.mrb[97].mxu1  ;;  %v14247_v6 = vpop.f32.mrb[101].mxu0 }
 0xa5d   : > { %v4451_v8 = vpop.f32.mrb[98].mxu1  ;;  %v4509_v10 = vpop.f32.mrb[102].mxu0 }
 0xa5e   : > { %v4456_v11 = vadd.f32 %v4451_v8, %v4396_v56  ;;  %v4513_v12 = vadd.f32 %v4506_v61, %v4455_v4  ;;  %v14242_v13 = vpop.f32.mrb[99].mxu1  ;;  %v14248_v14 = vpop.f32.mrb[103].mxu0 }
 0xa5f   : > { %v4806_v60 = vpop.permute.xlu1 %4805  ;;  %v4811_v8 = vpop.permute.xlu0 %4810 }
 0xa60   : > { %v4514_v16 = vadd.f32 %v4509_v10, %v4456_v11 }
 0xa63   : > { %v4560_v17 = vpop.f32.mrb[100].mxu1  ;;  %v4618_v22 = vpop.f32.mrb[104].mxu0 }
 0xa64   : > { %v4567_v23 = vadd.f32 %v4560_v17, %v4513_v12  ;;  %v14253_v24 = vpop.f32.mrb[101].mxu1  ;;  %v14259_v26 = vpop.f32.mrb[105].mxu0  ;;  %v16030_v17 = vld [vmem:[#allocation15 + $0x10] sm:$0xff]  }
 0xa65   : > { %v4563_v28 = vpop.f32.mrb[102].mxu1  ;;  %v4621_v30 = vpop.f32.mrb[106].mxu0  ;;  %14316 = vmatprep.mubr.msk.bf16.mxu1 %vm4301_vm9, %v16030_v17  ;;  %v5621_v26 = vld [vmem:[#allocation16 + $0x10] sm:$0xff]  ;;  %v16043_v17 = vld [vmem:[#allocation15 + $0x68] sm:$0xff]  }
 0xa66   : > { %v4568_v31 = vadd.f32 %v4563_v28, %v4514_v16  ;;  %v4625_v32 = vadd.f32 %v4618_v22, %v4567_v23  ;;  %v14254_v34 = vpop.f32.mrb[103].mxu1  ;;  %v14260_v37 = vpop.f32.mrb[107].mxu0  ;;  %v5620_v28 = vld [vmem:[#allocation16 + $0x8] sm:$0xff] }
 0xa68   : > { %v4626_v38 = vadd.f32 %v4621_v30, %v4568_v31  ;;  %v5622_v30 = vld [vmem:[#allocation16 + $0x18] sm:$0xff]  ;;  %v18432_v31 = vpop.permute.xlu1 %4931 }
 0xa6b   : > { %v4676_v40 = vpop.f32.mrb[104].mxu1  ;;  %v4734_v41 = vpop.f32.mrb[108].mxu0 }
 0xa6c   : > { %v4683_v42 = vadd.f32 %v4676_v40, %v4625_v32  ;;  %v14265_v43 = vpop.f32.mrb[105].mxu1  ;;  %v14271_v45 = vpop.f32.mrb[109].mxu0  ;;  %v16032_v40 = vld [vmem:[#allocation15] sm:$0xff]  }
 0xa6d   : > { %v4679_v46 = vpop.f32.mrb[106].mxu1  ;;  %v4737_v47 = vpop.f32.mrb[110].mxu0 }
 0xa6e   : > { %v4684_v48 = vadd.f32 %v4679_v46, %v4626_v38  ;;  %v4741_v52 = vadd.f32 %v4734_v41, %v4683_v42  ;;  %v14266_v53 = vpop.f32.mrb[107].mxu1  ;;  %v14272_v54 = vpop.f32.mrb[111].mxu0  ;;  %v16031_v38 = vld [vmem:[#allocation15 + $0x18] sm:$0xff]  }
 0xa6f   : > { %v18436_v37 = vpop.permute.xlu1 %5003  ;;  %v16035_v54 = vld [vmem:[#allocation15 + $0x28] sm:$0xff]  }
 0xa70   : > { %v4742_v55 = vadd.f32 %v4737_v47, %v4684_v48  ;;  %v16033_v47 = vld [vmem:[#allocation15 + $0x8] sm:$0xff]   ;;  %v16034_v48 = vld [vmem:[#allocation15 + $0x20] sm:$0xff]  }
 0xa73   : > { %v4792_v56 = vpop.f32.mrb[108].mxu1  ;;  %v18442_v43 = vpop.permute.xlu1 %5080 }
 0xa74   : > { %v4799_v57 = vadd.f32 %v4792_v56, %v4741_v52  ;;  %v14277_v58 = vpop.f32.mrb[109].mxu1  ;;  %v16037_v56 = vld [vmem:[#allocation15 + $0x38] sm:$0xff]  }
 0xa75   : > { %v4795_v61 = vpop.f32.mrb[110].mxu1 }
 0xa76   : > { %v4813_v4 = vadd.f32 %v4806_v60, %v4799_v57  ;;  %v4800_v5 = vadd.f32 %v4795_v61, %v4742_v55  ;;  %v14278_v6 = vpop.f32.mrb[111].mxu1  ;;  %v16036_v55 = vld [vmem:[#allocation15 + $0x30] sm:$0xff]   ;;  %v16038_v57 = vld [vmem:[#allocation15 + $0x40] sm:$0xff]   ;;  %v16039_v61 = vld [vmem:[#allocation15 + $0x48] sm:$0xff]  }
 0xa78   : > { %v4815_v10 = vmax.f32 %v4813_v4, 0.0  ;;  %v4814_v11 = vadd.f32 %v4811_v8, %v4800_v5  ;;  %v16040_v4 = vld [vmem:[#allocation15 + $0x50] sm:$0xff]  }
 0xa7a   : > { %v4816_v12 = vmax.f32 %v4814_v11, 0.0  ;;  %v4817_v13 = vmul.f32 %v18349_v21, %v4815_v10  ;;  %v16041_v10 = vld [vmem:[#allocation15 + $0x58] sm:$0xff]   ;;  %v16042_v11 = vld [vmem:[#allocation15 + $0x60] sm:$0xff]  }
 0xa7c   : > { %v4818_v14 = vmul.f32 %v18349_v21, %v4816_v12  ;;  %14311 = vmatprep.mubr.f32.mxu0 %v4817_v13  ;;  %v5619_v21 = vld [vmem:[#allocation16] sm:$0xff] }
 0xa7e   : > { %v18415_v16 = vpack.c.bf16 %v4818_v14, %v4817_v13  ;;  %14312 = vmatmul.mubr.f32.vlgmr.msra.gmra.mrb[74].mxu0 %v4818_v14 }
 0xb51   : > { %v14313_v22 = vpop.f32.mrb[74].mxu0 }
 0xb52   : > { %v4901_v23 = vpop.f32.mrb[75].mxu0 }
 0xb53   : > { %v4910_v24 = vpack.c.bf16 %v14313_v22, %v4901_v23  ;;  %v16044_v22 = vld [vmem:[#allocation15 + $0x70] sm:$0xff]  }
 0xb55   : > { %5161 = vrot.lane.b32.xlu1 %v4910_v24, %s17129_s5  ;;  %4933 = vrot.lane.b32.xlu0 %v4910_v24, %s17141_s18 }
 0xb59   : > { %5391 = vrot.lane.b32.xlu1 %v4910_v24, %s17144_s13  ;;  %5005 = vrot.lane.b32.xlu0 %v4910_v24, %s17142_s16 }
 0xb5d   : > { %5472 = vrot.lane.b32.xlu1 %v4910_v24, %s17145_s7  ;;  %5082 = vrot.lane.b32.xlu0 %v4910_v24, %s17143_s11 }
 0xb61   : > { %5553 = vrot.lane.b32.xlu1 %v4910_v24, %s17146_s8  ;;  %5313 = vrot.lane.b32.xlu0 %v4910_v24, %s19620_s10 }
 0xb65   : > { %5625 = vperm.xlu1 %16010, %v5619_v21   ;;  %5393 = vrot.lane.b32.xlu0 %v17123_v0, %s17144_s13 }
 0xb69   : > { %5635 = vperm.xlu1 %16010, %v5621_v26   ;;  %5474 = vrot.lane.b32.xlu0 %v17123_v0, %s17145_s7  ;;  %v16045_v26 = vld [vmem:[#allocation15 + $0x78] sm:$0xff]  }
 0xb6d   : > { %5555 = vrot.lane.b32.xlu0 %v17123_v0, %s17146_s8 }
 0xb71   : > { %5630 = vperm.xlu0 %16009, %v5620_v28   ;;  %v16046_v28 = vld [vmem:[#allocation15 + $0x80] sm:$0xff]  }
 0xb75   : > { %5640 = vperm.xlu0 %16009, %v5622_v30   ;;  %v16047_v30 = vld [vmem:[#allocation15 + $0x88] sm:$0xff]  }
 0xbc7   : > { %v4934_v32 = vpop.permute.xlu0 %4933  ;;  %v5162_v52 = vpop.permute.xlu1 %5161 }
 0xbc8   : > { %v4936_v34 = vsel %vm4935_vm8, %v18432_v31, %v4934_v32  ;;  %v5163_v53 = vsel %vm1882_vm6, %v17951_v35, %v5162_v52 }
 0xbc9   : > { %14314 = vmatprep.subr.bf16.mxu1 %v4936_v34 }
 0xbca   : > { %14315 = vmatpush3.bf16.msra.mxu1 %v4936_v34 }
 0xbcb   : > { %v5006_v41 = vpop.permute.xlu0 %5005  ;;  %v5392_v6 = vpop.permute.xlu1 %5391 }
 0xbcc   : > { %v5008_v42 = vsel %vm5007_vm5, %v18436_v37, %v5006_v41 }
 0xbcd   : > { %14317 = vmatmul.mubr.msk.bf16.vlgmr.msra.gmra.mrb[112].mxu1 %vm4301_vm9, %v16031_v38  ;;  %14320 = vmatprep.subr.bf16.mxu1 %v5008_v42 }
 0xbce   : > { %14321 = vmatpush3.bf16.msra.mxu1 %v5008_v42  ;;  %14322 = vmatprep.mubr.msk.bf16.mxu1 %vm4301_vm9, %v16032_v40 }
 0xbcf   : > { %v5083_v45 = vpop.permute.xlu0 %5082  ;;  %v5473_v13 = vpop.permute.xlu1 %5472 }
 0xbd0   : > { %v5085_v46 = vsel %vm5084_vm12, %v18442_v43, %v5083_v45 }
 0xbd1   : > { %14326 = vmatprep.subr.bf16.mxu1 %v5085_v46 }
 0xbd3   : > { %v5314_v58 = vpop.permute.xlu0 %5313 }
 0xbd4   : > { %v5315_v60 = vsel %vm2090_vm7, %v5314_v58, %v17986_v59 }
 0xbd7   : > { %v18456_v5 = vpop.permute.xlu0 %5393 }
 0xbd8   : > { %v5396_v8 = vsel %vm5395_vm4, %v5392_v6, %v18456_v5 }
 0xbd9   : > { %14323 = vmatmul.mubr.msk.bf16.vlgmr.msra.gmra.mrb[112].mxu1 %vm4301_vm9, %v16033_v47 }
 0xbda   : > { %14327 = vmatpush3.bf16.msra.mxu1 %v5085_v46  ;;  %14328 = vmatprep.mubr.msk.bf16.mxu1 %vm4301_vm9, %v16034_v48 }
 0xbdb   : > { %14332 = vmatprep.subr.bf16.mxu1 %v5163_v53  ;;  %v18462_v12 = vpop.permute.xlu0 %5474 }
 0xbdc   : > { %v5477_v14 = vsel %vm5476_vm11, %v5473_v13, %v18462_v12  ;;  %v6388_v13 = vld [vmem:[#allocation18 + $0x8] sm:$0xff] }
 0xbdf   : > { %v18468_v23 = vpop.permute.xlu0 %5555 }
 0xbe5   : > { %14329 = vmatmul.mubr.msk.bf16.vlgmr.msra.gmra.mrb[112].mxu1 %vm4301_vm9, %v16035_v54  ;;  %v18481_v54 = vld [vmem:[%s17331_s9] ss:$0 sm:$0xff] }
 0xbe6   : > { %14333 = vmatpush3.bf16.msra.mxu1 %v5163_v53  ;;  %14334 = vmatprep.mubr.msk.bf16.mxu1 %vm4301_vm9, %v16036_v55 }
 0xbe7   : > { %14338 = vmatprep.subr.bf16.mxu1 %v4910_v24 }
 0xbf0   : > { %v5631_v34 = vpop.permute.xlu0 %5630 }
 0xbf1   : > { %14335 = vmatmul.mubr.msk.bf16.vlgmr.msra.gmra.mrb[112].mxu1 %vm4301_vm9, %v16037_v56 }
 0xbf2   : > { %14339 = vmatpush3.bf16.msra.mxu1 %v4910_v24  ;;  %14340 = vmatprep.mubr.msk.bf16.mxu1 %vm4301_vm9, %v16038_v57  ;;  %v5554_v24 = vpop.permute.xlu1 %5553 }
 0xbf3   : > { %14344 = vmatprep.subr.bf16.mxu1 %v5315_v60  ;;  %v5558_v21 = vsel %vm5557_vm1, %v5554_v24, %v18468_v23  ;;  %v7004_v24 = vld [vmem:[#allocation24 + $0x8] sm:$0xff] }
 0xbf4   : > { %v5641_v45 = vpop.permute.xlu0 %5640 }
 0xbf6   : > { %v5626_v32 = vpop.permute.xlu1 %5625 }
 0xbfa   : > { %v5636_v38 = vpop.permute.xlu1 %5635 }
 0xbfd   : > { %14341 = vmatmul.mubr.msk.bf16.vlgmr.msra.gmra.mrb[112].mxu1 %vm4301_vm9, %v16039_v61 }
 0xbfe   : > { %14345 = vmatpush3.bf16.msra.mxu1 %v5315_v60  ;;  %14346 = vmatprep.mubr.msk.bf16.mxu1 %vm4301_vm9, %v16040_v4  ;;  %v16048_v60 = vld [vmem:[%s19711_s23 + $0x10] sm:$0xff]  }
 0xbff   : > { %14350 = vmatprep.subr.bf16.mxu1 %v5396_v8  ;;  %14372 = vmatprep.mubr.msk.bf16.mxu0 %vm5692_vm10, %v16048_v60  ;;  %v16055_v60 = vld [vmem:[%s19711_s23 + $0x38] sm:$0xff]  }
 0xc09   : > { %14347 = vmatmul.mubr.msk.bf16.vlgmr.msra.gmra.mrb[112].mxu1 %vm4301_vm9, %v16041_v10 }
 0xc0a   : > { %14351 = vmatpush3.bf16.msra.mxu1 %v5396_v8  ;;  %14352 = vmatprep.mubr.msk.bf16.mxu1 %vm4301_vm9, %v16042_v11 }
 0xc0b   : > { %14356 = vmatprep.subr.bf16.mxu1 %v5477_v14 }
 0xc15   : > { %14353 = vmatmul.mubr.msk.bf16.vlgmr.msra.gmra.mrb[112].mxu1 %vm4301_vm9, %v16043_v17  ;;  %v6390_v17 = vld [vmem:[#allocation18 + $0x18] sm:$0xff] }
 0xc16   : > { %14357 = vmatpush3.bf16.msra.mxu1 %v5477_v14  ;;  %14358 = vmatprep.mubr.msk.bf16.mxu1 %vm4301_vm9, %v16044_v22  ;;  %v6387_v14 = vld [vmem:[#allocation18] sm:$0xff]  ;;  %v6389_v22 = vld [vmem:[#allocation18 + $0x10] sm:$0xff] }
 0xc17   : > { %14362 = vmatprep.subr.bf16.mxu1 %v5558_v21 }
 0xc21   : > { %14359 = vmatmul.mubr.msk.bf16.vlgmr.msra.gmra.mrb[112].mxu1 %vm4301_vm9, %v16045_v26 }
 0xc22   : > { %14363 = vmatpush3.bf16.msra.mxu1 %v5558_v21  ;;  %14364 = vmatprep.mubr.msk.bf16.mxu1 %vm4301_vm9, %v16046_v28  ;;  %v7003_v21 = vld [vmem:[#allocation24] sm:$0xff] }
 0xc23   : > { %14440 = vmatprep.subr.bf16.mxu1 %v17125_v1 }
 0xc2d   : > { %14365 = vmatmul.mubr.msk.bf16.vlgmr.msra.gmra.mrb[112].mxu1 %vm4301_vm9, %v16047_v30 }
 0xc2e   : > { %14444 = vmatprep.mubr.msk.bf16.mxu1 %vm17126_vm0, %v17125_v1 }
 0xd00   : > { %v14366_v40 = vpop.f32.mrb[112].mxu1 }
 0xd01   : > { %v5645_v41 = vadd.f32 %v14366_v40, %v5636_v38  ;;  %v5600_v42 = vpop.f32.mrb[113].mxu1  ;;  %v16049_v38 = vld [vmem:[%s19711_s23 + $0x18] sm:$0xff]  }
 0xd02   : > { %v5643_v46 = vadd.f32 %v5626_v32, %v5600_v42  ;;  %v14367_v47 = vpop.f32.mrb[114].mxu1 }
 0xd03   : > { %v5649_v48 = vmax.f32 %v5645_v41, 0.0  ;;  %v5646_v52 = vadd.f32 %v14367_v47, %v5641_v45  ;;  %v5603_v53 = vpop.f32.mrb[115].mxu1  ;;  %v16050_v41 = vld [vmem:[%s19711_s23] sm:$0xff]   ;;  %v16051_v47 = vld [vmem:[%s19711_s23 + $0x8] sm:$0xff]  }
 0xd04   : > { %v5647_v55 = vmax.f32 %v5643_v46, 0.0  ;;  %v5644_v56 = vadd.f32 %v5631_v34, %v5603_v53 }
 0xd05   : > { %v5650_v57 = vmax.f32 %v5646_v52, 0.0  ;;  %v5659_v61 = vmul.f32 %v18481_v54, %v5649_v48  ;;  %v16052_v48 = vld [vmem:[%s19711_s23 + $0x20] sm:$0xff]  }
 0xd06   : > { %v5648_v58 = vmax.f32 %v5644_v56, 0.0  ;;  %v5657_v6 = vmul.f32 %v18481_v54, %v5647_v55  ;;  %v16053_v56 = vld [vmem:[%s19711_s23 + $0x28] sm:$0xff]  }
 0xd07   : > { %v5660_v4 = vmul.f32 %v18481_v54, %v5650_v57  ;;  %v16054_v57 = vld [vmem:[%s19711_s23 + $0x30] sm:$0xff]  }
 0xd08   : > { %v5658_v8 = vmul.f32 %v18481_v54, %v5648_v58 }
 0xd09   : > { %v18489_v10 = vpack.c.bf16 %v5660_v4, %v5659_v61  ;;  %v16056_v61 = vld [vmem:[%s19711_s23 + $0x40] sm:$0xff]  }
 0xd0a   : > { %v18491_v11 = vpack.c.bf16 %v5658_v8, %v5657_v6  ;;  %v16057_v8 = vld [vmem:[%s19711_s23 + $0x48] sm:$0xff]  }
 0xd0b   : > { %5686 = vrot.lane.b32.xlu0 %v18489_v10, %s17141_s18 }
 0xd0c   : > { %5684 = vrot.lane.b32.xlu1 %v18491_v11, %s17141_s18  ;;  %s19712_s18 = sld [smem:[#allocation78_spill]] }
 0xd0f   : > { %5760 = vrot.lane.b32.xlu0 %v18489_v10, %s17142_s16 }
 0xd10   : > { %5758 = vrot.lane.b32.xlu1 %v18491_v11, %s17142_s16  ;;  %s19714_s16 = smov 10  }
 0xd13   : > { %5838 = vrot.lane.b32.xlu0 %v18489_v10, %s17143_s11 }
 0xd14   : > { %5836 = vrot.lane.b32.xlu1 %v18491_v11, %s17143_s11  ;;  %s19713_s11 = smov 11  }
 0xd17   : > { %5920 = vrot.lane.b32.xlu0 %v18489_v10, %s17129_s5 }
 0xd18   : > { %5918 = vrot.lane.b32.xlu1 %v18491_v11, %s17129_s5 }
 0xd1b   : > { %6076 = vrot.lane.b32.xlu0 %v18489_v10, %s19620_s10 }
 0xd1c   : > { %6074 = vrot.lane.b32.xlu1 %v18491_v11, %s19620_s10 }
 0xd1f   : > { %6158 = vrot.lane.b32.xlu0 %v18489_v10, %s17144_s13 }
 0xd20   : > { %6156 = vrot.lane.b32.xlu1 %v18491_v11, %s17144_s13  ;;  %s19715_s13 = smov 9  }
 0xd23   : > { %6240 = vrot.lane.b32.xlu0 %v18489_v10, %s17145_s7 }
 0xd24   : > { %6238 = vrot.lane.b32.xlu1 %v18491_v11, %s17145_s7  ;;  %s19716_s7 = smov 119  }
 0xd27   : > { %6322 = vrot.lane.b32.xlu0 %v18489_v10, %s17146_s8 }
 0xd28   : > { %6320 = vrot.lane.b32.xlu1 %v18491_v11, %s17146_s8  ;;  %s19717_s8 = smov 117  }
 0xd2b   : > { %6398 = vperm.xlu0 %16009, %v6388_v13   ;;  %v16058_v13 = vld [vmem:[%s19711_s23 + $0x50] sm:$0xff]  }
 0xd2c   : > { %6393 = vperm.xlu1 %16010, %v6387_v14  }
 0xd2f   : > { %6408 = vperm.xlu0 %16009, %v6390_v17  }
 0xd30   : > { %6403 = vperm.xlu1 %16010, %v6389_v22   ;;  %v16059_v22 = vld [vmem:[%s19711_s23 + $0x58] sm:$0xff]  }
 0xd33   : > { %7012 = vperm.xlu0 %16009, %v7004_v24   ;;  %v16060_v24 = vld [vmem:[%s19711_s23 + $0x60] sm:$0xff]  }
 0xd34   : > { %7007 = vperm.xlu1 %16010, %v7003_v21  }
 0xd7d   : > { %v5687_v26 = vpop.permute.xlu0 %5686 }
 0xd7e   : > { %v5685_v28 = vpop.permute.xlu1 %5684  ;;  %v5689_v32 = vsel %vm4935_vm8, %v18432_v31, %v5687_v26 }
 0xd7f   : > { %v5688_v30 = vsel %vm4935_vm8, %v18432_v31, %v5685_v28  ;;  %vm19731_vm8 = vcmask 1043456  }
 0xd80   : > { %14368 = vmatprep.subr.bf16.mxu0 %v5688_v30 }
 0xd81   : > { %14369 = vmatpush3.bf16.msra.mxu0 %v5688_v30  ;;  %v5761_v42 = vpop.permute.xlu0 %5760 }
 0xd82   : > { %v5759_v34 = vpop.permute.xlu1 %5758  ;;  %14370 = vmatprep.subr.bf16.mxu0 %v5689_v32  ;;  %v5763_v45 = vsel %vm5007_vm5, %v18436_v37, %v5761_v42  ;;  %v16063_v42 = vld [vmem:[%s19711_s23 + $0x78] sm:$0xff]  }
 0xd83   : > { %v5762_v40 = vsel %vm5007_vm5, %v18436_v37, %v5759_v34  ;;  %v16062_v34 = vld [vmem:[%s19711_s23 + $0x70] sm:$0xff]   ;;  %vm19730_vm5 = vcmask 146432  }
 0xd85   : > { %14371 = vmatpush3.bf16.msra.mxu0 %v5689_v32  ;;  %v5839_v52 = vpop.permute.xlu0 %5838  ;;  %v16061_v32 = vld [vmem:[%s19711_s23 + $0x68] sm:$0xff]  }
 0xd86   : > { %14376 = vmatprep.subr.bf16.mxu0 %v5762_v40  ;;  %v5837_v31 = vpop.permute.xlu1 %5836  ;;  %v5841_v37 = vsel %vm5084_vm12, %v18442_v43, %v5839_v52 }
 0xd87   : > { %v5840_v46 = vsel %vm5084_vm12, %v18442_v43, %v5837_v31  ;;  %vm19735_vm12 = vmmov %vm19731_vm8 }
 0xd88   : > { %14373 = vmatmul.mubr.msk.bf16.vlgmr.msra.gmra.mrb[112].mxu0 %vm5692_vm10, %v16049_v38 }
 0xd89   : > { %14377 = vmatpush3.bf16.msra.mxu0 %v5762_v40  ;;  %14380 = vmatprep.mubr.msk.bf16.mxu0 %vm5692_vm10, %v16050_v41  ;;  %v5921_v58 = vpop.permute.xlu0 %5920 }
 0xd8a   : > { %14378 = vmatprep.subr.bf16.mxu0 %v5763_v45  ;;  %v5919_v53 = vpop.permute.xlu1 %5918  ;;  %v5923_v43 = vsel %vm1882_vm6, %v17951_v35, %v5921_v58 }
 0xd8b   : > { %v5922_v55 = vsel %vm1882_vm6, %v17951_v35, %v5919_v53 }
 0xd8d   : > { %14379 = vmatpush3.bf16.msra.mxu0 %v5763_v45  ;;  %v6077_v14 = vpop.permute.xlu0 %6076  ;;  %v16064_v45 = vld [vmem:[%s19711_s23 + $0x80] sm:$0xff]  }
 0xd8e   : > { %14384 = vmatprep.subr.bf16.mxu0 %v5840_v46  ;;  %v6075_v4 = vpop.permute.xlu1 %6074 }
 0xd8f   : > { %v6078_v6 = vsel %vm2090_vm7, %v6075_v4, %v17986_v59 }
 0xd91   : > { %v6159_v21 = vpop.permute.xlu0 %6158 }
 0xd92   : > { %v6157_v17 = vpop.permute.xlu1 %6156  ;;  %v6161_v26 = vsel %vm5395_vm4, %v6159_v21, %v18456_v5  ;;  %v16067_v21 = vld [vmem:[#allocation22 + $0x10] sm:$0xff]  }
 0xd94   : > { %14381 = vmatmul.mubr.msk.bf16.vlgmr.msra.gmra.mrb[112].mxu0 %vm5692_vm10, %v16051_v47 }
 0xd95   : > { %14385 = vmatpush3.bf16.msra.mxu0 %v5840_v46  ;;  %14388 = vmatprep.mubr.msk.bf16.mxu0 %vm5692_vm10, %v16052_v48  ;;  %v6241_v38 = vpop.permute.xlu0 %6240 }
 0xd96   : > { %14386 = vmatprep.subr.bf16.mxu0 %v5841_v37  ;;  %v6239_v28 = vpop.permute.xlu1 %6238 }
 0xd97   : > { %v6242_v30 = vsel %vm5476_vm11, %v6239_v28, %v18462_v12 }
 0xd99   : > { %14387 = vmatpush3.bf16.msra.mxu0 %v5841_v37  ;;  %v6323_v31 = vpop.permute.xlu0 %6322 }
 0xd9a   : > { %14392 = vmatprep.subr.bf16.mxu0 %v5922_v55  ;;  %v6321_v40 = vpop.permute.xlu1 %6320  ;;  %v6325_v46 = vsel %vm5557_vm1, %v6323_v31, %v18468_v23  ;;  %v13349_v31 = vld [vmem:[%s19712_s18 + $0xb8] sm:$0xff] }
 0xd9b   : > { %v6324_v41 = vsel %vm5557_vm1, %v6321_v40, %v18468_v23  ;;  %v13346_v40 = vld [vmem:[%s19712_s18 + $0xa0] sm:$0xff]  ;;  %vm19719_vm1 = vcmask 957440  }
 0xda0   : > { %14389 = vmatmul.mubr.msk.bf16.vlgmr.msra.gmra.mrb[112].mxu0 %vm5692_vm10, %v16053_v56 }
 0xda1   : > { %14393 = vmatpush3.bf16.msra.mxu0 %v5922_v55  ;;  %14396 = vmatprep.mubr.msk.bf16.mxu0 %vm5692_vm10, %v16054_v57 }
 0xda2   : > { %14394 = vmatprep.subr.bf16.mxu0 %v5923_v43 }
 0xda5   : > { %14395 = vmatpush3.bf16.msra.mxu0 %v5923_v43 }
 0xda6   : > { %14400 = vmatprep.subr.bf16.mxu0 %v18491_v11 }
 0xdaa   : > { %v6399_v48 = vpop.permute.xlu0 %6398 }
 0xdab   : > { %v6394_v47 = vpop.permute.xlu1 %6393 }
 0xdac   : > { %14397 = vmatmul.mubr.msk.bf16.vlgmr.msra.gmra.mrb[112].mxu0 %vm5692_vm10, %v16055_v60 }
 0xdad   : > { %14401 = vmatpush3.bf16.msra.mxu0 %v18491_v11  ;;  %14404 = vmatprep.mubr.msk.bf16.mxu0 %vm5692_vm10, %v16056_v61  ;;  %v6079_v11 = vsel %vm2090_vm7, %v6077_v14, %v17986_v59 }
 0xdae   : > { %14402 = vmatprep.subr.bf16.mxu0 %v18489_v10  ;;  %v6409_v56 = vpop.permute.xlu0 %6408 }
 0xdaf   : > { %v6404_v52 = vpop.permute.xlu1 %6403 }
 0xdb1   : > { %14403 = vmatpush3.bf16.msra.mxu0 %v18489_v10  ;;  %v6160_v10 = vsel %vm5395_vm4, %v6157_v17, %v18456_v5  ;;  %v6243_v5 = vsel %vm5476_vm11, %v6241_v38, %v18462_v12  ;;  %v16065_v12 = vld [vmem:[%s19711_s23 + $0x88] sm:$0xff]   ;;  %v16069_v38 = vld [vmem:[#allocation22 + $0x18] sm:$0xff]   ;;  %vm19720_vm4 = vmmov %vm19719_vm1 }
 0xdb2   : > { %14408 = vmatprep.subr.bf16.mxu0 %v6078_v6  ;;  %vm19734_vm11 = vmmov %vm19730_vm5 }
 0xdb8   : > { %14405 = vmatmul.mubr.msk.bf16.vlgmr.msra.gmra.mrb[112].mxu0 %vm5692_vm10, %v16057_v8 }
 0xdb9   : > { %14409 = vmatpush3.bf16.msra.mxu0 %v6078_v6  ;;  %14412 = vmatprep.mubr.msk.bf16.mxu0 %vm5692_vm10, %v16058_v13 }
 0xdba   : > { %14410 = vmatprep.subr.bf16.mxu0 %v6079_v11 }
 0xdbd   : > { %14411 = vmatpush3.bf16.msra.mxu0 %v6079_v11 }
 0xdbe   : > { %14416 = vmatprep.subr.bf16.mxu0 %v6160_v10 }
 0xdc4   : > { %14413 = vmatmul.mubr.msk.bf16.vlgmr.msra.gmra.mrb[112].mxu0 %vm5692_vm10, %v16059_v22 }
 0xdc5   : > { %14417 = vmatpush3.bf16.msra.mxu0 %v6160_v10  ;;  %14420 = vmatprep.mubr.msk.bf16.mxu0 %vm5692_vm10, %v16060_v24  ;;  %v16066_v24 = vld [vmem:[#allocation22] sm:$0xff]  }
 0xdc6   : > { %14418 = vmatprep.subr.bf16.mxu0 %v6161_v26 }
 0xdc9   : > { %14419 = vmatpush3.bf16.msra.mxu0 %v6161_v26  ;;  %v13342_v26 = vld [vmem:[%s19712_s18 + $0x80] sm:$0xff] }
 0xdca   : > { %14424 = vmatprep.subr.bf16.mxu0 %v6242_v30 }
 0xdd0   : > { %14421 = vmatmul.mubr.msk.bf16.vlgmr.msra.gmra.mrb[112].mxu0 %vm5692_vm10, %v16061_v32  ;;  %v13345_v32 = vld [vmem:[%s19712_s18 + $0x98] sm:$0xff] }
 0xdd1   : > { %14425 = vmatpush3.bf16.msra.mxu0 %v6242_v30  ;;  %14428 = vmatprep.mubr.msk.bf16.mxu0 %vm5692_vm10, %v16062_v34  ;;  %v13344_v30 = vld [vmem:[%s19712_s18 + $0x90] sm:$0xff]  ;;  %v16068_v34 = vld [vmem:[#allocation22 + $0x8] sm:$0xff]  }
 0xdd2   : > { %14426 = vmatprep.subr.bf16.mxu0 %v6243_v5 }
 0xdd5   : > { %14427 = vmatpush3.bf16.msra.mxu0 %v6243_v5  ;;  %v15197_v5 = vpack.c.bf16 %v13345_v32, %v13344_v30 }
 0xdd6   : > { %14432 = vmatprep.subr.bf16.mxu0 %v6324_v41 }
 0xddc   : > { %14429 = vmatmul.mubr.msk.bf16.vlgmr.msra.gmra.mrb[112].mxu0 %vm5692_vm10, %v16063_v42 }
 0xddd   : > { %14433 = vmatpush3.bf16.msra.mxu0 %v6324_v41  ;;  %14436 = vmatprep.mubr.msk.bf16.mxu0 %vm5692_vm10, %v16064_v45  ;;  %v13347_v41 = vld [vmem:[%s19712_s18 + $0xa8] sm:$0xff]  ;;  %v13348_v45 = vld [vmem:[%s19712_s18 + $0xb0] sm:$0xff] }
 0xdde   : > { %14434 = vmatprep.subr.bf16.mxu0 %v6325_v46  ;;  %v15201_v42 = vpack.c.bf16 %v13347_v41, %v13346_v40 }
 0xde1   : > { %14435 = vmatpush3.bf16.msra.mxu0 %v6325_v46  ;;  %v15205_v46 = vpack.c.bf16 %v13349_v31, %v13348_v45  ;;  %v6482_v31 = vld [vmem:[%s19712_s18 + $0x30] sm:$0xff] }
 0xde2   : > { %14526 = vmatprep.subr.bf16.mxu0 %v17125_v1 }
 0xde8   : > { %14437 = vmatmul.mubr.msk.bf16.vlgmr.msra.gmra.mrb[112].mxu0 %vm5692_vm10, %v16065_v12  ;;  %v13350_v12 = vld [vmem:[%s19712_s18 + $0xc0] sm:$0xff] }
 0xde9   : > { %14530 = vmatprep.mubr.msk.bf16.mxu0 %vm17126_vm0, %v17125_v1 }
 0xebb   : > { %v14438_v37 = vpop.f32.mrb[112].mxu0 }
 0xebc   : > { %v6413_v53 = vadd.f32 %v14438_v37, %v6404_v52  ;;  %v6368_v55 = vpop.f32.mrb[113].mxu0  ;;  %v13352_v52 = vld [vmem:[%s19712_s18 + $0xd0] sm:$0xff]  ;;  %v13353_v37 = vld [vmem:[%s19712_s18 + $0xd8] sm:$0xff] }
 0xebd   : > { %v6411_v23 = vadd.f32 %v6394_v47, %v6368_v55  ;;  %v14439_v57 = vpop.f32.mrb[114].mxu0  ;;  %v13351_v47 = vld [vmem:[%s19712_s18 + $0xc8] sm:$0xff]  ;;  %v13354_v55 = vld [vmem:[%s19712_s18 + $0xe0] sm:$0xff] }
 0xebe   : > { %v6417_v58 = vmax.f32 %v6413_v53, 0.0  ;;  %v6414_v43 = vadd.f32 %v14439_v57, %v6409_v56  ;;  %v6371_v60 = vpop.f32.mrb[115].mxu0  ;;  %v15213_v53 = vpack.c.bf16 %v13353_v37, %v13352_v52  ;;  %v13355_v56 = vld [vmem:[%s19712_s18 + $0xe8] sm:$0xff]  ;;  %v13356_v57 = vld [vmem:[%s19712_s18 + $0xf0] sm:$0xff] }
 0xebf   : > { %v6415_v61 = vmax.f32 %v6411_v23, 0.0  ;;  %v6412_v4 = vadd.f32 %v6399_v48, %v6371_v60  ;;  %v15209_v48 = vpack.c.bf16 %v13351_v47, %v13350_v12  ;;  %v15217_v23 = vpack.c.bf16 %v13355_v56, %v13354_v55  ;;  %v6476_v60 = vld [vmem:[%s19712_s18] sm:$0xff]  ;;  %v6486_v37 = vld [vmem:[%s19712_s18 + $0x50] sm:$0xff] }
 0xec0   : > { %v6418_v6 = vmax.f32 %v6414_v43, 0.0  ;;  %v6421_v13 = vmul.f32 %v18481_v54, %v6417_v58  ;;  %v13357_v58 = vld [vmem:[%s19712_s18 + $0xf8] sm:$0xff]  ;;  %v6484_v47 = vld [vmem:[%s19712_s18 + $0x40] sm:$0xff] }
 0xec1   : > { %v6416_v8 = vmax.f32 %v6412_v4, 0.0  ;;  %v6419_v11 = vmul.f32 %v18481_v54, %v6415_v61  ;;  %v15221_v43 = vpack.c.bf16 %v13357_v58, %v13356_v57  ;;  %v6477_v61 = vld [vmem:[%s19712_s18 + $0x8] sm:$0xff]  ;;  %v6488_v56 = vld [vmem:[%s19712_s18 + $0x60] sm:$0xff]  ;;  %v6490_v58 = vld [vmem:[%s19712_s18 + $0x70] sm:$0xff] }
 0xec2   : > { %v6422_v14 = vmul.f32 %v18481_v54, %v6418_v6  ;;  %v15225_v4 = vpack.c.bf16 %v6477_v61, %v6476_v60  ;;  %v13360_v61 = vld [vmem:[%s19712_s18 + $0x100] sm:$0xff] }
 0xec3   : > { %v6420_v17 = vmul.f32 %v18481_v54, %v6416_v8  ;;  %v13343_v54 = vld [vmem:[%s19712_s18 + $0x88] sm:$0xff] }
 0xec4   : > { %v6424_v10 = vpack.c.bf16 %v6422_v14, %v6421_v13  ;;  %v15193_v28 = vpack.c.bf16 %v13343_v54, %v13342_v26 }
 0xec5   : > { %v6423_v22 = vpack.c.bf16 %v6420_v17, %v6419_v11 }
 0xec7   : > { %14441 = vmatpush3.bf16.msra.mxu1 %v6423_v22  ;;  %14527 = vmatpush3.bf16.msra.mxu0 %v6423_v22 }
 0xec8   : > { %14442 = vmatprep.subr.bf16.mxu1 %v17125_v1  ;;  %14528 = vmatprep.subr.bf16.mxu0 %v17125_v1 }
 0xecb   : > { %14443 = vmatpush3.bf16.msra.mxu1 %v6424_v10  ;;  %14529 = vmatpush3.bf16.msra.mxu0 %v6424_v10 }
 0xecc   : > { %14448 = vmatprep.subr.bf16.mxu1 %v17125_v1  ;;  %14569 = vmatprep.subr.bf16.mxu0 %v17125_v1 }
 0xece   : > { %14445 = vmatmul.mubr.msk.bf16.vlgmr.msra.gmra.mrb[116].mxu1 %vm5692_vm10, %v16066_v24  ;;  %14531 = vmatmul.mubr.msk.bf16.vlgmr.msra.gmra.mrb[116].mxu0 %vm5692_vm10, %v16067_v21  ;;  %v6478_v24 = vld [vmem:[%s19712_s18 + $0x10] sm:$0xff]  ;;  %v6479_v21 = vld [vmem:[%s19712_s18 + $0x18] sm:$0xff] }
 0xecf   : > { %14449 = vmatpush3.bf16.msra.mxu1 %v6423_v22  ;;  %14570 = vmatpush3.bf16.msra.mxu0 %v6423_v22  ;;  %v15229_v30 = vpack.c.bf16 %v6479_v21, %v6478_v24  ;;  %v13365_v24 = vld [vmem:[%s19712_s18 + $0x128] sm:$0xff] }
 0xed0   : > { %14450 = vmatprep.subr.bf16.mxu1 %v17125_v1  ;;  %14571 = vmatprep.subr.bf16.mxu0 %v17125_v1 }
 0xed1   : > { %14452 = vmatprep.mubr.msk.bf16.mxu1 %vm17126_vm0, %v17125_v1  ;;  %14573 = vmatprep.mubr.msk.bf16.mxu0 %vm17126_vm0, %v17125_v1 }
 0xed3   : > { %14451 = vmatpush3.bf16.msra.mxu1 %v6424_v10  ;;  %14572 = vmatpush3.bf16.msra.mxu0 %v6424_v10 }
 0xed4   : > { %15194 = vmatprep.subr.bf16.mxu1 %v15193_v28  ;;  %14612 = vmatprep.subr.bf16.mxu0 %v17125_v1 }
 0xed6   : > { %14453 = vmatmul.mubr.msk.bf16.vlgmr.msra.gmra.mrb[120].mxu1 %vm5692_vm10, %v16068_v34  ;;  %14574 = vmatmul.mubr.msk.bf16.vlgmr.msra.gmra.mrb[120].mxu0 %vm5692_vm10, %v16069_v38  ;;  %v6480_v38 = vld [vmem:[%s19712_s18 + $0x20] sm:$0xff]  ;;  %vm19733_vm10 = vmmov %vm19731_vm8 }
 0xed7   : > { %15196 = vmatpush3.bf16.msra.mxu1 %v15193_v28  ;;  %14614 = vmatprep.mubr.msk.bf16.mxu0 %vm17126_vm0, %v17125_v1 }
 0xed8   : > { %15198 = vmatprep.subr.bf16.mxu1 %v15197_v5 }
 0xedb   : > { %15200 = vmatpush3.bf16.msra.mxu1 %v15197_v5  ;;  %v6481_v5 = vld [vmem:[%s19712_s18 + $0x28] sm:$0xff] }
 0xedc   : > { %15202 = vmatprep.subr.bf16.mxu1 %v15201_v42  ;;  %v15233_v45 = vpack.c.bf16 %v6481_v5, %v6480_v38  ;;  %v13370_v38 = vld [vmem:[%s19712_s18 + $0x150] sm:$0xff] }
 0xedf   : > { %15204 = vmatpush3.bf16.msra.mxu1 %v15201_v42 }
 0xee0   : > { %15206 = vmatprep.subr.bf16.mxu1 %v15205_v46 }
 0xee3   : > { %15208 = vmatpush3.bf16.msra.mxu1 %v15205_v46  ;;  %v6483_v46 = vld [vmem:[%s19712_s18 + $0x38] sm:$0xff] }
 0xee4   : > { %15210 = vmatprep.subr.bf16.mxu1 %v15209_v48  ;;  %v15237_v12 = vpack.c.bf16 %v6483_v46, %v6482_v31  ;;  %v13374_v31 = vld [vmem:[%s19712_s18 + $0x170] sm:$0xff]  ;;  %v13375_v46 = vld [vmem:[%s19712_s18 + $0x178] sm:$0xff] }
 0xee7   : > { %15212 = vmatpush3.bf16.msra.mxu1 %v15209_v48  ;;  %v6485_v48 = vld [vmem:[%s19712_s18 + $0x48] sm:$0xff] }
 0xee8   : > { %15214 = vmatprep.subr.bf16.mxu1 %v15213_v53  ;;  %v15241_v52 = vpack.c.bf16 %v6485_v48, %v6484_v47  ;;  %v13378_v47 = vld [vmem:[%s19712_s18 + $0x180] sm:$0xff]  ;;  %v13379_v48 = vld [vmem:[%s19712_s18 + $0x188] sm:$0xff] }
 0xeeb   : > { %15216 = vmatpush3.bf16.msra.mxu1 %v15213_v53  ;;  %v6487_v53 = vld [vmem:[%s19712_s18 + $0x58] sm:$0xff] }
 0xeec   : > { %15218 = vmatprep.subr.bf16.mxu1 %v15217_v23  ;;  %v15245_v55 = vpack.c.bf16 %v6487_v53, %v6486_v37  ;;  %v13380_v37 = vld [vmem:[%s19712_s18 + $0x190] sm:$0xff]  ;;  %v13381_v53 = vld [vmem:[%s19712_s18 + $0x198] sm:$0xff] }
 0xeef   : > { %15220 = vmatpush3.bf16.msra.mxu1 %v15217_v23  ;;  %v6489_v23 = vld [vmem:[%s19712_s18 + $0x68] sm:$0xff] }
 0xef0   : > { %15222 = vmatprep.subr.bf16.mxu1 %v15221_v43  ;;  %v15249_v57 = vpack.c.bf16 %v6489_v23, %v6488_v56  ;;  %v13382_v56 = vld [vmem:[%s19712_s18 + $0x1a0] sm:$0xff]  ;;  %v13383_v23 = vld [vmem:[%s19712_s18 + $0x1a8] sm:$0xff] }
 0xef3   : > { %15224 = vmatpush3.bf16.msra.mxu1 %v15221_v43  ;;  %v6491_v43 = vld [vmem:[%s19712_s18 + $0x78] sm:$0xff] }
 0xef4   : > { %15226 = vmatprep.subr.bf16.mxu1 %v15225_v4  ;;  %v15253_v60 = vpack.c.bf16 %v6491_v43, %v6490_v58  ;;  %v13384_v58 = vld [vmem:[%s19712_s18 + $0x1b0] sm:$0xff]  ;;  %v13385_v43 = vld [vmem:[%s19712_s18 + $0x1b8] sm:$0xff] }
 0xfa1   : > { %v6469_v6 = vpop.f32.mrb[116].mxu1  ;;  %v18637_v8 = vpop.f32.mrb[116].mxu0 }
 0xfa2   : > { %v14446_v13 = vpop.f32.mrb[117].mxu1  ;;  %v14532_v14 = vpop.f32.mrb[117].mxu0 }
 0xfa3   : > { %v6472_v11 = vpop.f32.mrb[118].mxu1  ;;  %v18639_v17 = vpop.f32.mrb[118].mxu0  ;;  %v13362_v13 = vld [vmem:[%s19712_s18 + $0x110] sm:$0xff]  ;;  %v13363_v14 = vld [vmem:[%s19712_s18 + $0x118] sm:$0xff] }
 0xfa4   : > { %v14447_v10 = vpop.f32.mrb[119].mxu1  ;;  %v14533_v22 = vpop.f32.mrb[119].mxu0 }
 0xfa5   : > { %v15261_v10 = vpack.c.bf16 %v13363_v14, %v13362_v13  ;;  %v13364_v22 = vld [vmem:[%s19712_s18 + $0x120] sm:$0xff]  ;;  %v13389_v13 = vld [vmem:[%s19712_s18 + $0x1d8] sm:$0xff] }
 0xfa6   : > { %v15265_v21 = vpack.c.bf16 %v13365_v24, %v13364_v22  ;;  %v13390_v14 = vld [vmem:[%s19712_s18 + $0x1e0] sm:$0xff]  ;;  %v13392_v24 = vld [vmem:[%s19712_s18 + $0x1f0] sm:$0xff] }
 0xfa9   : > { %v6537_v26 = vpop.f32.mrb[120].mxu1  ;;  %v18643_v54 = vpop.f32.mrb[120].mxu0 }
 0xfaa   : > { %v14454_v28 = vpop.f32.mrb[121].mxu1  ;;  %14488 = vmatprep.mubr.f32.mxu1 %v6537_v26  ;;  %v14575_v32 = vpop.f32.mrb[121].mxu0  ;;  %v13366_v26 = vld [vmem:[%s19712_s18 + $0x130] sm:$0xff] }
 0xfab   : > { %v6540_v34 = vpop.f32.mrb[122].mxu1  ;;  %v18647_v40 = vpop.f32.mrb[122].mxu0  ;;  %v13367_v28 = vld [vmem:[%s19712_s18 + $0x138] sm:$0xff]  ;;  %v13368_v32 = vld [vmem:[%s19712_s18 + $0x140] sm:$0xff] }
 0xfac   : > { %v14455_v41 = vpop.f32.mrb[123].mxu1  ;;  %14489 = vmatmul.mubr.f32.vlgmr.msra.gmra.mrb[74].mxu1 %v6540_v34  ;;  %v14576_v42 = vpop.f32.mrb[123].mxu0  ;;  %v13369_v34 = vld [vmem:[%s19712_s18 + $0x148] sm:$0xff] }
 0xfad   : > { %15228 = vmatpush3.bf16.msra.mxu1 %v15225_v4  ;;  %14523 = vmatprep.mubr.f32.mxu1 %v6469_v6  ;;  %v13361_v4 = vld [vmem:[%s19712_s18 + $0x108] sm:$0xff]  ;;  %v13372_v41 = vld [vmem:[%s19712_s18 + $0x160] sm:$0xff] }
 0xfae   : > { %15230 = vmatprep.subr.bf16.mxu1 %v15229_v30  ;;  %v15257_v6 = vpack.c.bf16 %v13361_v4, %v13360_v61  ;;  %v13373_v42 = vld [vmem:[%s19712_s18 + $0x168] sm:$0xff]  ;;  %v13386_v61 = vld [vmem:[%s19712_s18 + $0x1c0] sm:$0xff] }
 0xfaf   : > { %v13387_v4 = vld [vmem:[%s19712_s18 + $0x1c8] sm:$0xff] }
 0xfb1   : > { %15232 = vmatpush3.bf16.msra.mxu1 %v15229_v30  ;;  %v15269_v30 = vpack.c.bf16 %v13367_v28, %v13366_v26  ;;  %v7013_v28 = vpop.permute.xlu0 %7012 }
 0xfb2   : > { %15234 = vmatprep.subr.bf16.mxu1 %v15233_v45 }
 0xfb5   : > { %15236 = vmatpush3.bf16.msra.mxu1 %v15233_v45  ;;  %v15281_v45 = vpack.c.bf16 %v13373_v42, %v13372_v41 }
 0xfb6   : > { %15238 = vmatprep.subr.bf16.mxu1 %v15237_v12 }
 0xfb9   : > { %15240 = vmatpush3.bf16.msra.mxu1 %v15237_v12  ;;  %v15285_v12 = vpack.c.bf16 %v13375_v46, %v13374_v31 }
 0xfba   : > { %15242 = vmatprep.subr.bf16.mxu1 %v15241_v52 }
 0xfbd   : > { %15244 = vmatpush3.bf16.msra.mxu1 %v15241_v52  ;;  %v15289_v52 = vpack.c.bf16 %v13379_v48, %v13378_v47  ;;  %v16070_v47 = vld [vmem:[#allocation25 + $0x8] sm:$0xff]  }
 0xfbe   : > { %15246 = vmatprep.subr.bf16.mxu1 %v15245_v55 }
 0xfc1   : > { %15248 = vmatpush3.bf16.msra.mxu1 %v15245_v55  ;;  %v15293_v55 = vpack.c.bf16 %v13381_v53, %v13380_v37 }
 0xfc2   : > { %15250 = vmatprep.subr.bf16.mxu1 %v15249_v57 }
 0xfc5   : > { %15252 = vmatpush3.bf16.msra.mxu1 %v15249_v57  ;;  %v15297_v57 = vpack.c.bf16 %v13383_v23, %v13382_v56  ;;  %v16071_v56 = vld [vmem:[#allocation25] sm:$0xff]  }
 0xfc6   : > { %15254 = vmatprep.subr.bf16.mxu1 %v15253_v60 }
 0xfc9   : > { %15256 = vmatpush3.bf16.msra.mxu1 %v15253_v60  ;;  %v15301_v60 = vpack.c.bf16 %v13385_v43, %v13384_v58 }
 0xfca   : > { %15258 = vmatprep.subr.bf16.mxu1 %v15257_v6 }
 0xfcc   : > { %14524 = vmatmul.mubr.f32.vlgmr.msra.gmra.mrb[74].mxu1 %v6472_v11  ;;  %v15273_v11 = vpack.c.bf16 %v13369_v34, %v13368_v32  ;;  %v7008_v32 = vpop.permute.xlu1 %7007 }
 0xfcd   : > { %15260 = vmatpush3.bf16.msra.mxu1 %v15257_v6  ;;  %14566 = vmatprep.mubr.f32.mxu1 %v18637_v8  ;;  %v13371_v8 = vld [vmem:[%s19712_s18 + $0x158] sm:$0xff]  ;;  %v13388_v6 = vld [vmem:[%s19712_s18 + $0x1d0] sm:$0xff] }
 0xfce   : > { %15262 = vmatprep.subr.bf16.mxu1 %v15261_v10  ;;  %v15277_v5 = vpack.c.bf16 %v13371_v8, %v13370_v38  ;;  %v18698_v8 = vld [vmem:[#allocation48] ss:$0 sm:$0xff] }
 0xfd1   : > { %15264 = vmatpush3.bf16.msra.mxu1 %v15261_v10  ;;  %v13391_v10 = vld [vmem:[%s19712_s18 + $0x1e8] sm:$0xff] }
 0xfd2   : > { %15266 = vmatprep.subr.bf16.mxu1 %v15265_v21  ;;  %v15313_v22 = vpack.c.bf16 %v13391_v10, %v13390_v14 }
 0xfd5   : > { %15268 = vmatpush3.bf16.msra.mxu1 %v15265_v21  ;;  %v13393_v21 = vld [vmem:[%s19712_s18 + $0x1f8] sm:$0xff] }
 0xfd6   : > { %15270 = vmatprep.subr.bf16.mxu1 %v15269_v30  ;;  %v15317_v26 = vpack.c.bf16 %v13393_v21, %v13392_v24  ;;  %v16075_v24 = vld [vmem:[#allocation27 + $0x28] sm:$0xff]  }
 0xfd9   : > { %15272 = vmatpush3.bf16.msra.mxu1 %v15269_v30 }
 0xfda   : > { %15274 = vmatprep.subr.bf16.mxu1 %v15273_v11 }
 0xfdd   : > { %15276 = vmatpush3.bf16.msra.mxu1 %v15273_v11 }
 0xfde   : > { %15278 = vmatprep.subr.bf16.mxu1 %v15277_v5 }
 0xfe1   : > { %15280 = vmatpush3.bf16.msra.mxu1 %v15277_v5 }
 0xfe2   : > { %15282 = vmatprep.subr.bf16.mxu1 %v15281_v45 }
 0xfe5   : > { %15284 = vmatpush3.bf16.msra.mxu1 %v15281_v45  ;;  %v8053_v45 = vld [vmem:[#allocation28] sm:$0xff] }
 0xfe6   : > { %15286 = vmatprep.subr.bf16.mxu1 %v15285_v12 }
 0xfe9   : > { %15288 = vmatpush3.bf16.msra.mxu1 %v15285_v12 }
 0xfea   : > { %15290 = vmatprep.subr.bf16.mxu1 %v15289_v52 }
 0xfec   : > { %14567 = vmatmul.mubr.f32.vlgmr.msra.gmra.mrb[74].mxu1 %v18639_v17  ;;  %v15305_v17 = vpack.c.bf16 %v13387_v4, %v13386_v61  ;;  %v16072_v61 = vld [vmem:[#allocation25 + $0x10] sm:$0xff]  }
 0xfed   : > { %15292 = vmatpush3.bf16.msra.mxu1 %v15289_v52  ;;  %14609 = vmatprep.mubr.f32.mxu1 %v18643_v54  ;;  %v15309_v54 = vpack.c.bf16 %v13389_v13, %v13388_v6 }
 0xfee   : > { %15294 = vmatprep.subr.bf16.mxu1 %v15293_v55 }
 0xff1   : > { %15296 = vmatpush3.bf16.msra.mxu1 %v15293_v55 }
 0xff2   : > { %15298 = vmatprep.subr.bf16.mxu1 %v15297_v57 }
 0xff5   : > { %15300 = vmatpush3.bf16.msra.mxu1 %v15297_v57 }
 0xff6   : > { %15302 = vmatprep.subr.bf16.mxu1 %v15301_v60 }
 0xff9   : > { %15304 = vmatpush3.bf16.msra.mxu1 %v15301_v60 }
 0xffa   : > { %15306 = vmatprep.subr.bf16.mxu1 %v15305_v17 }
 0xffd   : > { %15308 = vmatpush3.bf16.msra.mxu1 %v15305_v17 }
 0xffe   : > { %15310 = vmatprep.subr.bf16.mxu1 %v15309_v54 }
0x1001   : > { %15312 = vmatpush3.bf16.msra.mxu1 %v15309_v54  ;;  %v16073_v54 = vld [vmem:[#allocation27 + $0x18] sm:$0xff]  }
0x1002   : > { %15314 = vmatprep.subr.bf16.mxu1 %v15313_v22 }
0x1005   : > { %15316 = vmatpush3.bf16.msra.mxu1 %v15313_v22  ;;  %v16074_v22 = vld [vmem:[#allocation25 + $0x18] sm:$0xff]  }
0x1006   : > { %15318 = vmatprep.subr.bf16.mxu1 %v15317_v26 }
0x1009   : > { %15320 = vmatpush3.bf16.msra.mxu1 %v15317_v26 }
0x100a   : > { %14684 = vmatprep.subr.bf16.mxu1 %v17125_v1 }
0x100c   : > { %14610 = vmatmul.mubr.f32.vlgmr.msra.gmra.mrb[74].mxu1 %v18647_v40  ;;  %v8054_v40 = vld [vmem:[#allocation28 + $0x8] sm:$0xff] }
0x100d   : > { %14686 = vmatprep.mubr.msk.bf16.mxu1 %vm17126_vm0, %v17125_v1 }
0x10df   : > { %v14611_v30 = vpop.f32.mrb[74].mxu1 }
0x10e0   : > { %v7016_v34 = vadd.f32 %v14611_v30, %v7013_v28  ;;  %v6992_v11 = vpop.f32.mrb[75].mxu1  ;;  %v16076_v28 = vld [vmem:[#allocation25 + $0x20] sm:$0xff]  }
0x10e1   : > { %v7015_v38 = vadd.f32 %v7008_v32, %v6992_v11  ;;  %v16086_v32 = vld [vmem:[#allocation27 + $0x38] sm:$0xff]  }
0x10e2   : > { %v7018_v5 = vmul.f32 %v18698_v8, %v7016_v34  ;;  %v16077_v34 = vld [vmem:[#allocation25 + $0x28] sm:$0xff]  }
0x10e3   : > { %v7017_v41 = vmul.f32 %v18698_v8, %v7015_v38  ;;  %v16078_v38 = vld [vmem:[#allocation25 + $0x30] sm:$0xff]  }
0x10e5   : > { %v18702_v42 = vpack.c.bf16 %v7018_v5, %v7017_v41  ;;  %v16079_v41 = vld [vmem:[#allocation25 + $0x38] sm:$0xff]  }
0x10e7   : > { %7084 = vrot.lane.b32.xlu0 %v18702_v42, %s19713_s11  ;;  %7031 = vrot.lane.b32.xlu1 %v18702_v42, %s19714_s16 }
0x10eb   : > { %7198 = vrot.lane.b32.xlu0 %v18702_v42, %s17129_s5  ;;  %7140 = vrot.lane.b32.xlu1 %v18702_v42, %s19715_s13 }
0x10ef   : > { %7368 = vrot.lane.b32.xlu0 %v18702_v42, %s19716_s7  ;;  %7310 = vrot.lane.b32.xlu1 %v18702_v42, %s19620_s10 }
0x10f3   : > { %7484 = vrot.lane.b32.xlu0 %v18702_v42, %s19717_s8  ;;  %7426 = vrot.lane.b32.xlu1 %v18702_v42, %s19718_s0 }
0x10f7   : > { %7601 = vrot.lane.b32.xlu0 %v18415_v16, %s19714_s16  ;;  %7543 = vrot.lane.b32.xlu1 %v18415_v16, %s19713_s11 }
0x10fb   : > { %7717 = vrot.lane.b32.xlu0 %v18415_v16, %s17129_s5  ;;  %7659 = vrot.lane.b32.xlu1 %v18415_v16, %s19715_s13 }
0x10ff   : > { %7887 = vrot.lane.b32.xlu0 %v18415_v16, %s19716_s7  ;;  %7829 = vrot.lane.b32.xlu1 %v18415_v16, %s19620_s10  ;;  %s19721_s10 = sld [smem:[#allocation80_spill]] }
0x1103   : > { %8003 = vrot.lane.b32.xlu0 %v18415_v16, %s19717_s8  ;;  %7945 = vrot.lane.b32.xlu1 %v18415_v16, %s19718_s0 }
0x1107   : > { %8062 = vperm.xlu0 %16009, %v8054_v40   ;;  %8057 = vperm.xlu1 %16010, %v8053_v45   ;;  %v16080_v40 = vld [vmem:[#allocation25 + $0x40] sm:$0xff]  }
0x1159   : > { %v7085_v31 = vpop.permute.xlu0 %7084  ;;  %v7032_v46 = vpop.permute.xlu1 %7031 }
0x115a   : > { %v7033_v12 = vsel %vm3725_vm13, %v18276_v63, %v7032_v46  ;;  %v7086_v37 = vsel %vm3783_vm14, %v18278_v2, %v7085_v31  ;;  %v16081_v31 = vld [vmem:[#allocation27] sm:$0xff]  }
0x115b   : > { %14613 = vmatpush3.bf16.msra.mxu0 %v7033_v12  ;;  %v16082_v12 = vld [vmem:[#allocation27 + $0x8] sm:$0xff]  }
0x115c   : > { %14618 = vmatprep.subr.bf16.mxu0 %v17125_v1 }
0x115d   : > { %v7199_v48 = vpop.permute.xlu0 %7198  ;;  %v7141_v52 = vpop.permute.xlu1 %7140 }
0x115e   : > { %14615 = vmatmul.mubr.msk.bf16.vlgmr.msra.gmra.mrb[124].mxu0 %vm4301_vm9, %v16070_v47  ;;  %v7142_v58 = vsel %vm3844_vm15, %v18280_v3, %v7141_v52  ;;  %v7200_v6 = vsel %vm1882_vm6, %v17951_v35, %v7199_v48  ;;  %v16083_v48 = vld [vmem:[#allocation27 + $0x10] sm:$0xff]   ;;  %v16084_v52 = vld [vmem:[#allocation27 + $0x20] sm:$0xff]  }
0x115f   : > { %14619 = vmatpush3.bf16.msra.mxu0 %v7086_v37  ;;  %14620 = vmatprep.mubr.msk.bf16.mxu0 %vm17126_vm0, %v17125_v1 }
0x1160   : > { %14624 = vmatprep.subr.bf16.mxu0 %v17125_v1 }
0x1161   : > { %v7369_v53 = vpop.permute.xlu0 %7368  ;;  %v7311_v55 = vpop.permute.xlu1 %7310 }
0x1162   : > { %v7312_v30 = vsel %vm2090_vm7, %v7311_v55, %v17986_v59  ;;  %v7370_v11 = vsel %vm4084_vm3, %v7369_v53, %v18310_v33  ;;  %v16085_v55 = vld [vmem:[#allocation27 + $0x30] sm:$0xff]  }
0x1165   : > { %v7485_v23 = vpop.permute.xlu0 %7484  ;;  %v7427_v57 = vpop.permute.xlu1 %7426 }
0x1166   : > { %14621 = vmatmul.mubr.msk.bf16.vlgmr.msra.gmra.mrb[128].mxu0 %vm4301_vm9, %v16071_v56  ;;  %v7428_v5 = vsel %vm4147_vm2, %v7427_v57, %v18319_v39 }
0x1167   : > { %14625 = vmatpush3.bf16.msra.mxu0 %v7142_v58  ;;  %14626 = vmatprep.mubr.msk.bf16.mxu0 %vm17126_vm0, %v17125_v1 }
0x1168   : > { %14630 = vmatprep.subr.bf16.mxu0 %v17125_v1 }
0x1169   : > { %v18751_v43 = vpop.permute.xlu0 %7601  ;;  %v7544_v60 = vpop.permute.xlu1 %7543 }
0x116a   : > { %v7545_v45 = vsel %vm3783_vm14, %v18278_v2, %v7544_v60  ;;  %v7603_v46 = vsel %vm3725_vm13, %v18276_v63, %v18751_v43 }
0x116d   : > { %v7718_v4 = vpop.permute.xlu0 %7717  ;;  %v18753_v17 = vpop.permute.xlu1 %7659 }
0x116e   : > { %v7719_v13 = vsel %vm1882_vm6, %v17951_v35, %v7718_v4  ;;  %14627 = vmatmul.mubr.msk.bf16.vlgmr.msra.gmra.mrb[132].mxu0 %vm4301_vm9, %v16072_v61  ;;  %v7661_v47 = vsel %vm3844_vm15, %v18280_v3, %v18753_v17 }
0x116f   : > { %14631 = vmatpush3.bf16.msra.mxu0 %v7200_v6  ;;  %14685 = vmatpush3.bf16.msra.mxu1 %v7719_v13 }
0x1170   : > { %14696 = vmatprep.subr.bf16.mxu1 %v17125_v1  ;;  %14632 = vmatprep.mubr.msk.bf16.mxu0 %vm17126_vm0, %v17125_v1 }
0x1171   : > { %v7830_v14 = vpop.permute.xlu1 %7829  ;;  %14636 = vmatprep.subr.bf16.mxu0 %v17125_v1  ;;  %v7888_v37 = vpop.permute.xlu0 %7887 }
0x1172   : > { %v7831_v10 = vsel %vm2090_vm7, %v7830_v14, %v17986_v59  ;;  %14687 = vmatmul.mubr.msk.bf16.vlgmr.msra.gmra.mrb[124].mxu1 %vm4301_vm9, %v16073_v54  ;;  %v7889_v53 = vsel %vm4084_vm3, %v7888_v37, %v18310_v33 }
0x1173   : > { %14697 = vmatpush3.bf16.msra.mxu1 %v7831_v10  ;;  %14698 = vmatprep.mubr.msk.bf16.mxu1 %vm17126_vm0, %v17125_v1 }
0x1174   : > { %14708 = vmatprep.subr.bf16.mxu1 %v17125_v1 }
0x1175   : > { %v7946_v21 = vpop.permute.xlu1 %7945 }
0x1176   : > { %14633 = vmatmul.mubr.msk.bf16.vlgmr.msra.gmra.mrb[136].mxu0 %vm4301_vm9, %v16074_v22  ;;  %v7947_v26 = vsel %vm4147_vm2, %v7946_v21, %v18319_v39 }
0x1177   : > { %14637 = vmatpush3.bf16.msra.mxu0 %v18702_v42  ;;  %14638 = vmatprep.mubr.msk.bf16.mxu0 %vm17126_vm0, %v17125_v1  ;;  %v7486_v42 = vsel %vm19719_vm1, %v7485_v23, %v18328_v44  ;;  %v16087_v23 = vld [vmem:[#allocation27 + $0x40] sm:$0xff]  }
0x1178   : > { %14642 = vmatprep.subr.bf16.mxu0 %v17125_v1 }
0x117a   : > { %14699 = vmatmul.mubr.msk.bf16.vlgmr.msra.gmra.mrb[128].mxu1 %vm4301_vm9, %v16075_v24 }
0x117b   : > { %14709 = vmatpush3.bf16.msra.mxu1 %v7947_v26  ;;  %14710 = vmatprep.mubr.msk.bf16.mxu1 %vm17126_vm0, %v17125_v1 }
0x117c   : > { %14720 = vmatprep.subr.bf16.mxu1 %v17125_v1 }
0x117e   : > { %14639 = vmatmul.mubr.msk.bf16.vlgmr.msra.gmra.mrb[140].mxu0 %vm4301_vm9, %v16076_v28 }
0x117f   : > { %14643 = vmatpush3.bf16.msra.mxu0 %v7312_v30  ;;  %14644 = vmatprep.mubr.msk.bf16.mxu0 %vm17126_vm0, %v17125_v1 }
0x1180   : > { %14648 = vmatprep.subr.bf16.mxu0 %v17125_v1 }
0x1182   : > { %14711 = vmatmul.mubr.msk.bf16.vlgmr.msra.gmra.mrb[132].mxu1 %vm4301_vm9, %v16086_v32 }
0x1183   : > { %14722 = vmatprep.mubr.msk.bf16.mxu1 %vm17126_vm0, %v17125_v1 }
0x1186   : > { %14645 = vmatmul.mubr.msk.bf16.vlgmr.msra.gmra.mrb[144].mxu0 %vm4301_vm9, %v16077_v34 }
0x1187   : > { %14649 = vmatpush3.bf16.msra.mxu0 %v7370_v11  ;;  %14650 = vmatprep.mubr.msk.bf16.mxu0 %vm17126_vm0, %v17125_v1 }
0x1188   : > { %14654 = vmatprep.subr.bf16.mxu0 %v17125_v1 }
0x118e   : > { %14651 = vmatmul.mubr.msk.bf16.vlgmr.msra.gmra.mrb[148].mxu0 %vm4301_vm9, %v16078_v38 }
0x118f   : > { %14655 = vmatpush3.bf16.msra.mxu0 %v7428_v5  ;;  %14656 = vmatprep.mubr.msk.bf16.mxu0 %vm17126_vm0, %v17125_v1 }
0x1190   : > { %14660 = vmatprep.subr.bf16.mxu0 %v17125_v1 }
0x1196   : > { %14657 = vmatmul.mubr.msk.bf16.vlgmr.msra.gmra.mrb[152].mxu0 %vm4301_vm9, %v16079_v41 }
0x1197   : > { %14661 = vmatpush3.bf16.msra.mxu0 %v7486_v42  ;;  %14662 = vmatprep.mubr.msk.bf16.mxu0 %vm17126_vm0, %v17125_v1 }
0x1198   : > { %14666 = vmatprep.subr.bf16.mxu0 %v17125_v1 }
0x119e   : > { %14663 = vmatmul.mubr.msk.bf16.vlgmr.msra.gmra.mrb[156].mxu0 %vm4301_vm9, %v16080_v40 }
0x119f   : > { %14667 = vmatpush3.bf16.msra.mxu0 %v7545_v45  ;;  %14668 = vmatprep.mubr.msk.bf16.mxu0 %vm17126_vm0, %v17125_v1 }
0x11a0   : > { %14672 = vmatprep.subr.bf16.mxu0 %v17125_v1 }
0x11a6   : > { %14669 = vmatmul.mubr.msk.bf16.vlgmr.msra.gmra.mrb[160].mxu0 %vm4301_vm9, %v16081_v31 }
0x11a7   : > { %14673 = vmatpush3.bf16.msra.mxu0 %v7603_v46  ;;  %14674 = vmatprep.mubr.msk.bf16.mxu0 %vm17126_vm0, %v17125_v1 }
0x11a8   : > { %14678 = vmatprep.subr.bf16.mxu0 %v17125_v1 }
0x11ae   : > { %14675 = vmatmul.mubr.msk.bf16.vlgmr.msra.gmra.mrb[164].mxu0 %vm4301_vm9, %v16082_v12 }
0x11af   : > { %14679 = vmatpush3.bf16.msra.mxu0 %v7661_v47  ;;  %14680 = vmatprep.mubr.msk.bf16.mxu0 %vm17126_vm0, %v17125_v1 }
0x11b0   : > { %14690 = vmatprep.subr.bf16.mxu0 %v17125_v1 }
0x11b6   : > { %14681 = vmatmul.mubr.msk.bf16.vlgmr.msra.gmra.mrb[168].mxu0 %vm4301_vm9, %v16083_v48 }
0x11b7   : > { %14691 = vmatpush3.bf16.msra.mxu0 %v18415_v16  ;;  %14692 = vmatprep.mubr.msk.bf16.mxu0 %vm17126_vm0, %v17125_v1  ;;  %v8004_v16 = vpop.permute.xlu0 %8003 }
0x11b8   : > { %14702 = vmatprep.subr.bf16.mxu0 %v17125_v1  ;;  %v8005_v56 = vsel %vm19720_vm4, %v8004_v16, %v18328_v44 }
0x11be   : > { %14693 = vmatmul.mubr.msk.bf16.vlgmr.msra.gmra.mrb[172].mxu0 %vm4301_vm9, %v16084_v52 }
0x11bf   : > { %14703 = vmatpush3.bf16.msra.mxu0 %v7889_v53  ;;  %14704 = vmatprep.mubr.msk.bf16.mxu0 %vm17126_vm0, %v17125_v1 }
0x11c0   : > { %14714 = vmatprep.subr.bf16.mxu0 %v17125_v1 }
0x11c6   : > { %14705 = vmatmul.mubr.msk.bf16.vlgmr.msra.gmra.mrb[176].mxu0 %vm4301_vm9, %v16085_v55 }
0x11c7   : > { %14715 = vmatpush3.bf16.msra.mxu0 %v8005_v56  ;;  %14716 = vmatprep.mubr.msk.bf16.mxu0 %vm17126_vm0, %v17125_v1 }
0x11c8   : > { %14726 = vmatprep.subr.bf16.mxu0 %v17125_v1 }
0x11ce   : > { %14717 = vmatmul.mubr.msk.bf16.vlgmr.msra.gmra.mrb[180].mxu0 %vm4301_vm9, %v16087_v23 }
0x11cf   : > { %14728 = vmatprep.mubr.msk.bf16.mxu0 %vm17126_vm0, %v17125_v1 }
0x1231   : > { %v7072_v57 = vpop.f32.mrb[124].mxu0 }
0x1232   : > { %v14616_v58 = vpop.f32.mrb[125].mxu0 }
0x1233   : > { %v7075_v43 = vpop.f32.mrb[126].mxu0 }
0x1234   : > { %v14617_v60 = vpop.f32.mrb[127].mxu0 }
0x1239   : > { %v7125_v61 = vpop.f32.mrb[128].mxu0 }
0x123a   : > { %v7126_v4 = vadd.f32 %v7125_v61, %v7072_v57  ;;  %v14622_v17 = vpop.f32.mrb[129].mxu0 }
0x123b   : > { %v7128_v6 = vpop.f32.mrb[130].mxu0 }
0x123c   : > { %v7129_v13 = vadd.f32 %v7128_v6, %v7075_v43  ;;  %v14623_v54 = vpop.f32.mrb[131].mxu0 }
0x1241   : > { %v7181_v14 = vpop.f32.mrb[132].mxu0 }
0x1242   : > { %v7188_v10 = vadd.f32 %v7181_v14, %v7126_v4  ;;  %v14628_v22 = vpop.f32.mrb[133].mxu0 }
0x1243   : > { %v7184_v24 = vpop.f32.mrb[134].mxu0 }
0x1244   : > { %v7189_v21 = vadd.f32 %v7184_v24, %v7129_v13  ;;  %v14629_v26 = vpop.f32.mrb[135].mxu0 }
0x1245   : > { %v18848_v28 = vpop.f32.mrb[124].mxu1 }
0x1246   : > { %v14688_v30 = vpop.f32.mrb[125].mxu1 }
0x1247   : > { %v18850_v32 = vpop.f32.mrb[126].mxu1 }
0x1248   : > { %v14689_v34 = vpop.f32.mrb[127].mxu1 }
0x1249   : > { %v7239_v11 = vpop.f32.mrb[136].mxu0 }
0x124a   : > { %v7246_v38 = vadd.f32 %v7239_v11, %v7188_v10  ;;  %v14634_v5 = vpop.f32.mrb[137].mxu0 }
0x124b   : > { %v7242_v41 = vpop.f32.mrb[138].mxu0 }
0x124c   : > { %v7247_v42 = vadd.f32 %v7242_v41, %v7189_v21  ;;  %v14635_v40 = vpop.f32.mrb[139].mxu0 }
0x124d   : > { %v18852_v45 = vpop.f32.mrb[128].mxu1 }
0x124e   : > { %v14700_v31 = vpop.f32.mrb[129].mxu1 }
0x124f   : > { %v18854_v46 = vpop.f32.mrb[130].mxu1 }
0x1250   : > { %v14701_v12 = vpop.f32.mrb[131].mxu1 }
0x1251   : > { %v7293_v47 = vpop.f32.mrb[140].mxu0 }
0x1252   : > { %v7300_v48 = vadd.f32 %v7293_v47, %v7246_v38  ;;  %v14640_v52 = vpop.f32.mrb[141].mxu0 }
0x1253   : > { %v7296_v37 = vpop.f32.mrb[142].mxu0 }
0x1254   : > { %v7301_v53 = vadd.f32 %v7296_v37, %v7247_v42  ;;  %v14641_v55 = vpop.f32.mrb[143].mxu0 }
0x1255   : > { %v7986_v16 = vpop.f32.mrb[132].mxu1 }
0x1256   : > { %v14712_v56 = vpop.f32.mrb[133].mxu1 }
0x1257   : > { %v7989_v23 = vpop.f32.mrb[134].mxu1 }
0x1258   : > { %v14713_v57 = vpop.f32.mrb[135].mxu1 }
0x1259   : > { %v7351_v58 = vpop.f32.mrb[144].mxu0 }
0x125a   : > { %v7358_v43 = vadd.f32 %v7351_v58, %v7300_v48  ;;  %v14646_v60 = vpop.f32.mrb[145].mxu0 }
0x125b   : > { %v7354_v61 = vpop.f32.mrb[146].mxu0 }
0x125c   : > { %v7359_v4 = vadd.f32 %v7354_v61, %v7301_v53  ;;  %v14647_v17 = vpop.f32.mrb[147].mxu0 }
0x1261   : > { %v7409_v6 = vpop.f32.mrb[148].mxu0 }
0x1262   : > { %v7416_v13 = vadd.f32 %v7409_v6, %v7358_v43  ;;  %v14652_v54 = vpop.f32.mrb[149].mxu0 }
0x1263   : > { %v7412_v14 = vpop.f32.mrb[150].mxu0 }
0x1264   : > { %v7417_v10 = vadd.f32 %v7412_v14, %v7359_v4  ;;  %v14653_v22 = vpop.f32.mrb[151].mxu0 }
0x1269   : > { %v7467_v24 = vpop.f32.mrb[152].mxu0 }
0x126a   : > { %v7474_v21 = vadd.f32 %v7467_v24, %v7416_v13  ;;  %v14658_v26 = vpop.f32.mrb[153].mxu0 }
0x126b   : > { %v7470_v30 = vpop.f32.mrb[154].mxu0 }
0x126c   : > { %v7475_v34 = vadd.f32 %v7470_v30, %v7417_v10  ;;  %v14659_v11 = vpop.f32.mrb[155].mxu0 }
0x1271   : > { %v7525_v38 = vpop.f32.mrb[156].mxu0 }
0x1272   : > { %v7532_v5 = vadd.f32 %v7525_v38, %v7474_v21  ;;  %v14664_v41 = vpop.f32.mrb[157].mxu0 }
0x1273   : > { %v7528_v42 = vpop.f32.mrb[158].mxu0 }
0x1274   : > { %v7533_v40 = vadd.f32 %v7528_v42, %v7475_v34  ;;  %v14665_v31 = vpop.f32.mrb[159].mxu0 }
0x1279   : > { %v7584_v12 = vpop.f32.mrb[160].mxu0 }
0x127a   : > { %v7591_v47 = vadd.f32 %v7584_v12, %v7532_v5  ;;  %v14670_v48 = vpop.f32.mrb[161].mxu0 }
0x127b   : > { %v7587_v52 = vpop.f32.mrb[162].mxu0 }
0x127c   : > { %v7592_v37 = vadd.f32 %v7587_v52, %v7533_v40  ;;  %v14671_v53 = vpop.f32.mrb[163].mxu0 }
0x1281   : > { %v7642_v55 = vpop.f32.mrb[164].mxu0 }
0x1282   : > { %v7649_v56 = vadd.f32 %v7642_v55, %v7591_v47  ;;  %v14676_v57 = vpop.f32.mrb[165].mxu0 }
0x1283   : > { %v7645_v58 = vpop.f32.mrb[166].mxu0 }
0x1284   : > { %v7650_v43 = vadd.f32 %v7645_v58, %v7592_v37  ;;  %v14677_v60 = vpop.f32.mrb[167].mxu0  ;;  %v8058_v37 = vpop.permute.xlu1 %8057 }
0x1289   : > { %v7700_v61 = vpop.f32.mrb[168].mxu0 }
0x128a   : > { %v7707_v4 = vadd.f32 %v7700_v61, %v7649_v56  ;;  %v14682_v17 = vpop.f32.mrb[169].mxu0 }
0x128b   : > { %v7703_v6 = vpop.f32.mrb[170].mxu0  ;;  %v9549_v17 = vld [vmem:[#allocation33] sm:$0xff] }
0x128c   : > { %v7708_v13 = vadd.f32 %v7703_v6, %v7650_v43  ;;  %v7765_v54 = vadd.f32 %v18848_v28, %v7707_v4  ;;  %v14683_v14 = vpop.f32.mrb[171].mxu0 }
0x128e   : > { %v7766_v10 = vadd.f32 %v18850_v32, %v7708_v13 }
0x1291   : > { %v7812_v22 = vpop.f32.mrb[172].mxu0 }
0x1292   : > { %v7819_v24 = vadd.f32 %v7812_v22, %v7765_v54  ;;  %v14694_v21 = vpop.f32.mrb[173].mxu0  ;;  %v16089_v22 = vld [vmem:[%s19721_s10] sm:$0xff]  }
0x1293   : > { %v7815_v26 = vpop.f32.mrb[174].mxu0 }
0x1294   : > { %v7820_v30 = vadd.f32 %v7815_v26, %v7766_v10  ;;  %v7877_v34 = vadd.f32 %v18852_v45, %v7819_v24  ;;  %v14695_v11 = vpop.f32.mrb[175].mxu0  ;;  %v8063_v45 = vpop.permute.xlu0 %8062  ;;  %v16088_v10 = vld [vmem:[%s19721_s10 + $0x8] sm:$0xff]  }
0x1295   : > { %v16092_v11 = vld [vmem:[%s19721_s10 + $0x20] sm:$0xff]  }
0x1296   : > { %v7878_v38 = vadd.f32 %v18854_v46, %v7820_v30 }
0x1299   : > { %v7928_v5 = vpop.f32.mrb[176].mxu0 }
0x129a   : > { %v7935_v41 = vadd.f32 %v7928_v5, %v7877_v34  ;;  %v14706_v42 = vpop.f32.mrb[177].mxu0 }
0x129b   : > { %v7931_v40 = vpop.f32.mrb[178].mxu0 }
0x129c   : > { %v7936_v31 = vadd.f32 %v7931_v40, %v7878_v38  ;;  %v7993_v12 = vadd.f32 %v7986_v16, %v7935_v41  ;;  %v14707_v28 = vpop.f32.mrb[179].mxu0  ;;  %v8587_v16 = vld [vmem:[#allocation30 + $0x8] sm:$0xff]  ;;  %v16093_v38 = vld [vmem:[%s19721_s10 + $0x28] sm:$0xff]  }
0x129d   : > { %v16096_v28 = vld [vmem:[%s19721_s10 + $0x40] sm:$0xff]  }
0x129e   : > { %v7994_v47 = vadd.f32 %v7989_v23, %v7936_v31  ;;  %v8586_v23 = vld [vmem:[#allocation30] sm:$0xff]  ;;  %v16095_v31 = vld [vmem:[%s19721_s10 + $0x38] sm:$0xff]  }
0x12a1   : > { %v8044_v48 = vpop.f32.mrb[180].mxu0 }
0x12a2   : > { %v8051_v32 = vadd.f32 %v8044_v48, %v7993_v12  ;;  %v14718_v52 = vpop.f32.mrb[181].mxu0 }
0x12a3   : > { %v8047_v53 = vpop.f32.mrb[182].mxu0 }
0x12a4   : > { %v8065_v55 = vadd.f32 %v8058_v37, %v8051_v32  ;;  %v8052_v56 = vadd.f32 %v8047_v53, %v7994_v47  ;;  %v14719_v57 = vpop.f32.mrb[183].mxu0 }
0x12a6   : > { %v8067_v58 = vmax.f32 %v8065_v55, 0.0  ;;  %v8066_v43 = vadd.f32 %v8063_v45, %v8052_v56 }
0x12a8   : > { %v8068_v46 = vmax.f32 %v8066_v43, 0.0  ;;  %v8069_v60 = vmul.f32 %v18698_v8, %v8067_v58 }
0x12aa   : > { %v8070_v61 = vmul.f32 %v18698_v8, %v8068_v46 }
0x12ac   : > { %v8071_v4 = vpack.c.bf16 %v8070_v61, %v8069_v60 }
0x12ae   : > { %8136 = vrot.lane.b32.xlu0 %v8071_v4, %s19713_s11  ;;  %8083 = vrot.lane.b32.xlu1 %v8071_v4, %s19714_s16  ;;  %s19725_s11 = smov 19   ;;  %s19726_s16 = smov 17  }
0x12b2   : > { %8250 = vrot.lane.b32.xlu0 %v8071_v4, %s17129_s5  ;;  %8192 = vrot.lane.b32.xlu1 %v8071_v4, %s19715_s13  ;;  %s19727_s13 = smov 111  }
0x12b6   : > { %8420 = vrot.lane.b32.xlu0 %v8071_v4, %s19716_s7  ;;  %8362 = vrot.lane.b32.xlu1 %v8071_v4, %s19722_s1  ;;  %s19728_s7 = smov 110  }
0x12ba   : > { %8536 = vrot.lane.b32.xlu0 %v8071_v4, %s19717_s8  ;;  %8478 = vrot.lane.b32.xlu1 %v8071_v4, %s19718_s0  ;;  %s19724_s0 = smov 18   ;;  %s19729_s8 = smov 109  }
0x12be   : > { %8595 = vperm.xlu0 %16009, %v8587_v16   ;;  %8590 = vperm.xlu1 %16010, %v8586_v23  }
0x12c2   : > { %9552 = vperm.xlu1 %16010, %v9549_v17  }
0x1320   : > { %v8137_v6 = vpop.permute.xlu0 %8136  ;;  %v8084_v13 = vpop.permute.xlu1 %8083 }
0x1321   : > { %v8138_v54 = vsel %vm3783_vm14, %v18278_v2, %v8137_v6  ;;  %v8085_v14 = vsel %vm3725_vm13, %v18276_v63, %v8084_v13  ;;  %v16090_v63 = vld [vmem:[%s19721_s10 + $0x10] sm:$0xff]   ;;  %vm19736_vm13 = vcmask 154624   ;;  %vm19737_vm14 = vcmask 64512  }
0x1322   : > { %14721 = vmatpush3.bf16.msra.mxu1 %v8085_v14  ;;  %14727 = vmatpush3.bf16.msra.mxu0 %v8138_v54  ;;  %vm19741_vm4 = vmmov %vm19737_vm14 }
0x1323   : > { %14732 = vmatprep.subr.bf16.mxu1 %v17125_v1  ;;  %14738 = vmatprep.subr.bf16.mxu0 %v17125_v1 }
0x1324   : > { %v8251_v24 = vpop.permute.xlu0 %8250  ;;  %v8193_v21 = vpop.permute.xlu1 %8192 }
0x1325   : > { %v8252_v26 = vsel %vm1882_vm6, %v17951_v35, %v8251_v24  ;;  %v8194_v2 = vsel %vm3844_vm15, %v18280_v3, %v8193_v21  ;;  %14723 = vmatmul.mubr.msk.bf16.vlgmr.msra.gmra.mrb[136].mxu1 %vm4301_vm9, %v16088_v10  ;;  %14729 = vmatmul.mubr.msk.bf16.vlgmr.msra.gmra.mrb[184].mxu0 %vm4301_vm9, %v16089_v22  ;;  %v16091_v3 = vld [vmem:[%s19721_s10 + $0x18] sm:$0xff]   ;;  %vm19738_vm15 = vmmov %vm19736_vm13 }
0x1326   : > { %14733 = vmatpush3.bf16.msra.mxu1 %v8194_v2  ;;  %14739 = vmatpush3.bf16.msra.mxu0 %v8252_v26 }
0x1327   : > { %14740 = vmatprep.mubr.msk.bf16.mxu0 %vm17126_vm0, %v17125_v1  ;;  %14750 = vmatprep.subr.bf16.mxu0 %v17125_v1 }
0x1328   : > { %14734 = vmatprep.mubr.msk.bf16.mxu1 %vm17126_vm0, %v17125_v1  ;;  %14744 = vmatprep.subr.bf16.mxu1 %v17125_v1  ;;  %v8363_v30 = vpop.permute.xlu1 %8362  ;;  %v8421_v5 = vpop.permute.xlu0 %8420 }
0x1329   : > { %v8364_v34 = vsel %vm2090_vm7, %v8363_v30, %v17986_v59  ;;  %v8422_v42 = vsel %vm4084_vm3, %v8421_v5, %v18310_v33  ;;  %v16094_v33 = vld [vmem:[%s19721_s10 + $0x30] sm:$0xff]   ;;  %vm19739_vm3 = vmmov %vm19731_vm8 }
0x132c   : > { %v8479_v41 = vpop.permute.xlu1 %8478 }
0x132d   : > { %14735 = vmatmul.mubr.msk.bf16.vlgmr.msra.gmra.mrb[140].mxu1 %vm4301_vm9, %v16090_v63  ;;  %14741 = vmatmul.mubr.msk.bf16.vlgmr.msra.gmra.mrb[188].mxu0 %vm4301_vm9, %v16091_v3  ;;  %v8480_v40 = vsel %vm4147_vm2, %v8479_v41, %v18319_v39  ;;  %v8537_v39 = vpop.permute.xlu0 %8536  ;;  %vm19723_vm2 = vmmov %vm19719_vm1 }
0x132e   : > { %14745 = vmatpush3.bf16.msra.mxu1 %v8071_v4  ;;  %14751 = vmatpush3.bf16.msra.mxu0 %v8364_v34  ;;  %v8538_v12 = vsel %vm19723_vm2, %v8537_v39, %v18328_v44  ;;  %vm19740_vm1 = vmmov %vm19736_vm13 }
0x132f   : > { %14746 = vmatprep.mubr.msk.bf16.mxu1 %vm17126_vm0, %v17125_v1  ;;  %14752 = vmatprep.mubr.msk.bf16.mxu0 %vm17126_vm0, %v17125_v1  ;;  %vm19742_vm2 = vmmov %vm19739_vm3 }
0x1330   : > { %14756 = vmatprep.subr.bf16.mxu1 %v17125_v1  ;;  %14762 = vmatprep.subr.bf16.mxu0 %v17125_v1 }
0x1335   : > { %14747 = vmatmul.mubr.msk.bf16.vlgmr.msra.gmra.mrb[144].mxu1 %vm4301_vm9, %v16092_v11  ;;  %14753 = vmatmul.mubr.msk.bf16.vlgmr.msra.gmra.mrb[192].mxu0 %vm4301_vm9, %v16093_v38 }
0x1336   : > { %14757 = vmatpush3.bf16.msra.mxu1 %v8422_v42  ;;  %14763 = vmatpush3.bf16.msra.mxu0 %v8480_v40 }
0x1337   : > { %14758 = vmatprep.mubr.msk.bf16.mxu1 %vm17126_vm0, %v17125_v1  ;;  %14768 = vmatprep.subr.bf16.mxu1 %v17125_v1 }
0x1338   : > { %14764 = vmatprep.mubr.msk.bf16.mxu0 %vm17126_vm0, %v17125_v1  ;;  %14774 = vmatprep.subr.bf16.mxu0 %v17125_v1 }
0x133d   : > { %14759 = vmatmul.mubr.msk.bf16.vlgmr.msra.gmra.mrb[148].mxu1 %vm4301_vm9, %v16094_v33  ;;  %14765 = vmatmul.mubr.msk.bf16.vlgmr.msra.gmra.mrb[196].mxu0 %vm4301_vm9, %v16095_v31 }
0x133e   : > { %14769 = vmatpush3.bf16.msra.mxu1 %v8538_v12  ;;  %14770 = vmatprep.mubr.msk.bf16.mxu1 %vm17126_vm0, %v17125_v1 }
0x133f   : > { %14780 = vmatprep.subr.bf16.mxu1 %v17125_v1  ;;  %14776 = vmatprep.mubr.msk.bf16.mxu0 %vm17126_vm0, %v17125_v1 }
0x1345   : > { %14771 = vmatmul.mubr.msk.bf16.vlgmr.msra.gmra.mrb[152].mxu1 %vm4301_vm9, %v16096_v28 }
0x1346   : > { %14782 = vmatprep.mubr.msk.bf16.mxu1 %vm17126_vm0, %v17125_v1 }
0x13f8   : > { %v8124_v44 = vpop.f32.mrb[136].mxu1  ;;  %v8177_v47 = vpop.f32.mrb[184].mxu0 }
0x13f9   : > { %v8178_v48 = vadd.f32 %v8177_v47, %v8124_v44  ;;  %v14724_v32 = vpop.f32.mrb[137].mxu1  ;;  %v14730_v52 = vpop.f32.mrb[185].mxu0 }
0x13fa   : > { %v8127_v37 = vpop.f32.mrb[138].mxu1  ;;  %v8180_v53 = vpop.f32.mrb[186].mxu0 }
0x13fb   : > { %v8181_v55 = vadd.f32 %v8180_v53, %v8127_v37  ;;  %v14725_v56 = vpop.f32.mrb[139].mxu1  ;;  %v14731_v57 = vpop.f32.mrb[187].mxu0 }
0x13fc   : > { %v8591_v52 = vpop.permute.xlu1 %8590  ;;  %v8596_v57 = vpop.permute.xlu0 %8595 }
0x1400   : > { %v8233_v45 = vpop.f32.mrb[140].mxu1  ;;  %v8291_v58 = vpop.f32.mrb[188].mxu0 }
0x1401   : > { %v8240_v43 = vadd.f32 %v8233_v45, %v8178_v48  ;;  %v14736_v46 = vpop.f32.mrb[141].mxu1  ;;  %v14742_v60 = vpop.f32.mrb[189].mxu0 }
0x1402   : > { %v8236_v61 = vpop.f32.mrb[142].mxu1  ;;  %v8294_v4 = vpop.f32.mrb[190].mxu0  ;;  %v8744_v46 = vld [vmem:[#allocation34 + $0x188] sm:$0xff]  ;;  %v8747_v60 = vld [vmem:[#allocation34 + $0x1a0] sm:$0xff] }
0x1403   : > { %v8241_v16 = vadd.f32 %v8236_v61, %v8181_v55  ;;  %v8298_v23 = vadd.f32 %v8291_v58, %v8240_v43  ;;  %v14737_v17 = vpop.f32.mrb[143].mxu1  ;;  %v14743_v6 = vpop.f32.mrb[191].mxu0 }
0x1404   : > { %v8746_v17 = vld [vmem:[#allocation34 + $0x198] sm:$0xff]  ;;  %v8745_v6 = vld [vmem:[#allocation34 + $0x190] sm:$0xff] }
0x1405   : > { %v8299_v13 = vadd.f32 %v8294_v4, %v8241_v16  ;;  %v8743_v16 = vld [vmem:[#allocation34 + $0x180] sm:$0xff] }
0x1408   : > { %v8345_v54 = vpop.f32.mrb[144].mxu1  ;;  %v8403_v14 = vpop.f32.mrb[192].mxu0 }
0x1409   : > { %v8352_v10 = vadd.f32 %v8345_v54, %v8298_v23  ;;  %v14748_v22 = vpop.f32.mrb[145].mxu1  ;;  %v14754_v24 = vpop.f32.mrb[193].mxu0  ;;  %v15321_v23 = vpack.c.bf16 %v8747_v60, %v8744_v46  ;;  %v8769_v46 = vld [vmem:[#allocation34 + $0x250] sm:$0xff]  ;;  %v8772_v60 = vld [vmem:[#allocation34 + $0x268] sm:$0xff] }
0x140a   : > { %v8348_v21 = vpop.f32.mrb[146].mxu1  ;;  %v8406_v26 = vpop.f32.mrb[194].mxu0  ;;  %v8698_v22 = vld [vmem:[#allocation31 + $0x4] sm:$0xf]  ;;  %v8605_v24 = vld [vmem:[#allocation31] sm:$0xf] }
0x140b   : > { %v8353_v2 = vadd.f32 %v8348_v21, %v8299_v13  ;;  %v8410_v63 = vadd.f32 %v8403_v14, %v8352_v10  ;;  %v14749_v3 = vpop.f32.mrb[147].mxu1  ;;  %v14755_v30 = vpop.f32.mrb[195].mxu0  ;;  %v8748_v13 = vld [vmem:[#allocation34 + $0x1a8] sm:$0xff]  ;;  %v8750_v14 = vld [vmem:[#allocation34 + $0x1b8] sm:$0xff]  ;;  %v8753_v10 = vld [vmem:[#allocation34 + $0x1d0] sm:$0xff]  ;;  %v15323_v21 = vpack.c.bf16 %v8746_v17, %v8743_v16 }
0x140c   : > { %v8751_v3 = vld [vmem:[#allocation34 + $0x1c0] sm:$0xff]  ;;  %v8754_v30 = vld [vmem:[#allocation34 + $0x1d8] sm:$0xff]  ;;  %v8773_v17 = vld [vmem:[#allocation34 + $0x270] sm:$0xff] }
0x140d   : > { %v8411_v34 = vadd.f32 %v8406_v26, %v8353_v2  ;;  %v15354_v26 = vpack.c.bf16 %v8748_v13, %v8745_v6  ;;  %v8749_v2 = vld [vmem:[#allocation34 + $0x1b0] sm:$0xff]  ;;  %v8776_v13 = vld [vmem:[#allocation34 + $0x288] sm:$0xff] }
0x1410   : > { %v8461_v11 = vpop.f32.mrb[148].mxu1  ;;  %v8519_v38 = vpop.f32.mrb[196].mxu0 }
0x1411   : > { %v8468_v5 = vadd.f32 %v8461_v11, %v8410_v63  ;;  %v14760_v41 = vpop.f32.mrb[149].mxu1  ;;  %v14766_v42 = vpop.f32.mrb[197].mxu0  ;;  %v8752_v63 = vld [vmem:[#allocation34 + $0x1c8] sm:$0xff]  ;;  %v8759_v11 = vld [vmem:[#allocation34 + $0x200] sm:$0xff] }
0x1412   : > { %v8464_v40 = vpop.f32.mrb[150].mxu1  ;;  %v8522_v33 = vpop.f32.mrb[198].mxu0  ;;  %v8755_v41 = vld [vmem:[#allocation34 + $0x1e0] sm:$0xff] }
0x1413   : > { %v8469_v31 = vadd.f32 %v8464_v40, %v8411_v34  ;;  %v8526_v39 = vadd.f32 %v8519_v38, %v8468_v5  ;;  %v14761_v12 = vpop.f32.mrb[151].mxu1  ;;  %v14767_v28 = vpop.f32.mrb[199].mxu0  ;;  %v8756_v34 = vld [vmem:[#allocation34 + $0x1e8] sm:$0xff]  ;;  %v15327_v38 = vpack.c.bf16 %v8752_v63, %v8749_v2  ;;  %v15357_v5 = vpack.c.bf16 %v8754_v30, %v8751_v3  ;;  %v8758_v40 = vld [vmem:[#allocation34 + $0x1f8] sm:$0xff]  ;;  %v8779_v2 = vld [vmem:[#allocation34 + $0x2a0] sm:$0xff] }
0x1414   : > { %v15329_v42 = vpack.c.bf16 %v8759_v11, %v8756_v34  ;;  %v8765_v12 = vld [vmem:[#allocation34 + $0x230] sm:$0xff]  ;;  %v15331_v28 = vpack.c.bf16 %v8758_v40, %v8755_v41  ;;  %v8782_v63 = vld [vmem:[#allocation34 + $0x2b8] sm:$0xff]  ;;  %v8784_v30 = vld [vmem:[#allocation34 + $0x2c8] sm:$0xff] }
0x1415   : > { %v8527_v44 = vadd.f32 %v8522_v33, %v8469_v31  ;;  %v8757_v33 = vld [vmem:[#allocation34 + $0x1f0] sm:$0xff]  ;;  %v8760_v31 = vld [vmem:[#allocation34 + $0x208] sm:$0xff]  ;;  %v8786_v34 = vld [vmem:[#allocation34 + $0x2d8] sm:$0xff] }
0x1416   : > { %v8781_v3 = vld [vmem:[#allocation34 + $0x2b0] sm:$0xff]  ;;  %v8788_v40 = vld [vmem:[#allocation34 + $0x2e8] sm:$0xff] }
0x1417   : > { %v8789_v11 = vld [vmem:[#allocation34 + $0x2f0] sm:$0xff] }
0x1418   : > { %v8577_v47 = vpop.f32.mrb[152].mxu1  ;;  %v8785_v41 = vld [vmem:[#allocation34 + $0x2d0] sm:$0xff] }
0x1419   : > { %v8584_v48 = vadd.f32 %v8577_v47, %v8526_v39  ;;  %v14772_v32 = vpop.f32.mrb[153].mxu1  ;;  %v8762_v39 = vld [vmem:[#allocation34 + $0x218] sm:$0xff]  ;;  %v8761_v47 = vld [vmem:[#allocation34 + $0x210] sm:$0xff] }
0x141a   : > { %v8580_v37 = vpop.f32.mrb[154].mxu1  ;;  %v8764_v32 = vld [vmem:[#allocation34 + $0x228] sm:$0xff] }
0x141b   : > { %v8598_v53 = vadd.f32 %v8591_v52, %v8584_v48  ;;  %v8585_v55 = vadd.f32 %v8580_v37, %v8527_v44  ;;  %v14773_v56 = vpop.f32.mrb[155].mxu1  ;;  %v15360_v44 = vpack.c.bf16 %v8760_v31, %v8757_v33  ;;  %v15333_v48 = vpack.c.bf16 %v8765_v12, %v8762_v39  ;;  %v8763_v52 = vld [vmem:[#allocation34 + $0x220] sm:$0xff]  ;;  %v8766_v37 = vld [vmem:[#allocation34 + $0x238] sm:$0xff] }
0x141c   : > { %v15335_v56 = vpack.c.bf16 %v8764_v32, %v8761_v47  ;;  %v8787_v33 = vld [vmem:[#allocation34 + $0x2e0] sm:$0xff]  ;;  %v8790_v31 = vld [vmem:[#allocation34 + $0x2f8] sm:$0xff]  ;;  %v15351_v39 = vpack.c.bf16 %v8788_v40, %v8785_v41 }
0x141d   : > { %v8600_v45 = vmax.f32 %v8598_v53, 0.0  ;;  %v8599_v58 = vadd.f32 %v8596_v57, %v8585_v55  ;;  %v8768_v53 = vld [vmem:[#allocation34 + $0x248] sm:$0xff]  ;;  %v8771_v55 = vld [vmem:[#allocation34 + $0x260] sm:$0xff]  ;;  %v15363_v57 = vpack.c.bf16 %v8766_v37, %v8763_v52  ;;  %v15375_v12 = vpack.c.bf16 %v8790_v31, %v8787_v33  ;;  %v8652_v32 = vld [vmem:[#allocation34 + $0x18] sm:$0xff] }
0x141e   : > { %v8651_v52 = vld [vmem:[#allocation34 + $0x10] sm:$0xff]  ;;  %v8654_v37 = vld [vmem:[#allocation34 + $0x28] sm:$0xff]  ;;  %v8669_v40 = vld [vmem:[#allocation34 + $0xa0] sm:$0xff] }
0x141f   : > { %v8601_v43 = vmax.f32 %v8599_v58, 0.0  ;;  %v8602_v61 = vmul.f32 %v18698_v8, %v8600_v45  ;;  %v8767_v45 = vld [vmem:[#allocation34 + $0x240] sm:$0xff]  ;;  %v15337_v58 = vpack.c.bf16 %v8771_v55, %v8768_v53  ;;  %v8656_v53 = vld [vmem:[#allocation34 + $0x38] sm:$0xff]  ;;  %v8659_v55 = vld [vmem:[#allocation34 + $0x50] sm:$0xff] }
0x1420   : > { %v8672_v33 = vld [vmem:[#allocation34 + $0xb8] sm:$0xff]  ;;  %v8674_v31 = vld [vmem:[#allocation34 + $0xc8] sm:$0xff] }
0x1421   : > { %v8603_v4 = vmul.f32 %v18698_v8, %v8601_v43  ;;  %v15325_v8 = vpack.c.bf16 %v8753_v10, %v8750_v14  ;;  %v8770_v43 = vld [vmem:[#allocation34 + $0x258] sm:$0xff]  ;;  %v8775_v14 = vld [vmem:[#allocation34 + $0x280] sm:$0xff] }
0x1422   : > { %v15339_v16 = vpack.c.bf16 %v8770_v43, %v8767_v45  ;;  %v8778_v10 = vld [vmem:[#allocation34 + $0x298] sm:$0xff]  ;;  %v8655_v45 = vld [vmem:[#allocation34 + $0x30] sm:$0xff]  ;;  %v8658_v43 = vld [vmem:[#allocation34 + $0x48] sm:$0xff] }
0x1423   : > { %v18933_v54 = vpack.c.bf16 %v8603_v4, %v8602_v61  ;;  %v8774_v61 = vld [vmem:[#allocation34 + $0x278] sm:$0xff]  ;;  %v8777_v4 = vld [vmem:[#allocation34 + $0x290] sm:$0xff] }
0x1424   : > { %v15341_v6 = vpack.c.bf16 %v8777_v4, %v8774_v61  ;;  %v8662_v4 = vld [vmem:[#allocation34 + $0x68] sm:$0xff] }
0x1425   : > { %14775 = vmatpush3.bf16.msra.mxu0 %v18933_v54  ;;  %14781 = vmatpush3.bf16.msra.mxu1 %v18933_v54 }
0x1426   : > { %15322 = vmatprep.subr.bf16.mxu0 %v15321_v23  ;;  %15353 = vmatprep.subr.bf16.mxu1 %v17134_v18  ;;  %v15366_v23 = vpack.c.bf16 %v8772_v60, %v8769_v46  ;;  %v8657_v46 = vld [vmem:[#allocation34 + $0x40] sm:$0xff]  ;;  %v8660_v60 = vld [vmem:[#allocation34 + $0x58] sm:$0xff] }
0x1428   : > { %14783 = vmatmul.mubr.msk.bf16.vlgmr.msra.gmra.mrb[156].mxu1 %vm4301_vm9, %v8698_v22  ;;  %14777 = vmatmul.mubr.msk.bf16.vlgmr.msra.gmra.mrb[200].mxu0 %vm4301_vm9, %v8605_v24  ;;  %v8780_v22 = vld [vmem:[#allocation34 + $0x2a8] sm:$0xff]  ;;  %v8783_v24 = vld [vmem:[#allocation34 + $0x2c0] sm:$0xff] }
0x1429   : > { %15324 = vmatpush1.bf16.msra.mxu0 %v15323_v21  ;;  %15355 = vmatpush3.bf16.msra.mxu1 %v15354_v26  ;;  %v15343_v21 = vpack.c.bf16 %v8776_v13, %v8773_v17  ;;  %v15369_v26 = vpack.c.bf16 %v8778_v10, %v8775_v14  ;;  %v15383_v14 = vpack.c.bf16 %v8658_v43, %v8655_v45  ;;  %v8681_v43 = vld [vmem:[#allocation34 + $0x100] sm:$0xff] }
0x142a   : > { %15326 = vmatprep.subr.bf16.mxu0 %v15325_v8  ;;  %15356 = vmatprep.subr.bf16.mxu1 %v17134_v18  ;;  %v15345_v8 = vpack.c.bf16 %v8783_v24, %v8780_v22  ;;  %v15413_v10 = vpack.c.bf16 %v8660_v60, %v8657_v46  ;;  %v8661_v22 = vld [vmem:[#allocation34 + $0x60] sm:$0xff]  ;;  %v8684_v46 = vld [vmem:[#allocation34 + $0x118] sm:$0xff]  ;;  %v8686_v60 = vld [vmem:[#allocation34 + $0x128] sm:$0xff] }
0x142b   : > { %8855 = vmatprep.mubr.f32.mxu0 %v17125_v1  ;;  %14818 = vmatprep.mubr.msk.f32.mxu1 %vm17126_vm0, %v17125_v1 }
0x142d   : > { %15328 = vmatpush1.bf16.msra.mxu0 %v15327_v38  ;;  %15358 = vmatpush3.bf16.msra.mxu1 %v15357_v5  ;;  %v15347_v38 = vpack.c.bf16 %v8782_v63, %v8779_v2  ;;  %v15372_v5 = vpack.c.bf16 %v8784_v30, %v8781_v3  ;;  %v8664_v2 = vld [vmem:[#allocation34 + $0x78] sm:$0xff]  ;;  %v8666_v63 = vld [vmem:[#allocation34 + $0x88] sm:$0xff] }
0x142e   : > { %15330 = vmatprep.subr.bf16.mxu0 %v15329_v42  ;;  %15359 = vmatprep.subr.bf16.mxu1 %v17134_v18  ;;  %v15349_v42 = vpack.c.bf16 %v8789_v11, %v8786_v34  ;;  %v8668_v30 = vld [vmem:[#allocation34 + $0x98] sm:$0xff]  ;;  %v8671_v34 = vld [vmem:[#allocation34 + $0xb0] sm:$0xff]  ;;  %v15387_v11 = vpack.c.bf16 %v8664_v2, %v8661_v22 }
0x142f   : > { %v15389_v41 = vpack.c.bf16 %v8671_v34, %v8668_v30  ;;  %v8692_v22 = vld [vmem:[#allocation34 + $0x158] sm:$0xff]  ;;  %v8691_v2 = vld [vmem:[#allocation34 + $0x150] sm:$0xff] }
0x1430   : > { %v8696_v30 = vld [vmem:[#allocation34 + $0x178] sm:$0xff] }
0x1431   : > { %15332 = vmatpush1.bf16.msra.mxu0 %v15331_v28  ;;  %15361 = vmatpush3.bf16.msra.mxu1 %v15360_v44  ;;  %v8650_v28 = vld [vmem:[#allocation34 + $0x8] sm:$0xff]  ;;  %v8653_v44 = vld [vmem:[#allocation34 + $0x20] sm:$0xff] }
0x1432   : > { %15334 = vmatprep.subr.bf16.mxu0 %v15333_v48  ;;  %15362 = vmatprep.subr.bf16.mxu1 %v17134_v18  ;;  %v15377_v47 = vpack.c.bf16 %v8653_v44, %v8650_v28  ;;  %v8649_v48 = vld [vmem:[#allocation34] sm:$0xff]  ;;  %v15419_v28 = vpack.c.bf16 %v8672_v33, %v8669_v40  ;;  %v9122_v33 = vld [vmem:[#allocation34 + $0x318] sm:$0xff] }
0x1433   : > { %v8673_v44 = vld [vmem:[#allocation34 + $0xc0] sm:$0xff] }
0x1435   : > { %15336 = vmatpush1.bf16.msra.mxu0 %v15335_v56  ;;  %15364 = vmatpush3.bf16.msra.mxu1 %v15363_v57  ;;  %v15379_v56 = vpack.c.bf16 %v8652_v32, %v8649_v48  ;;  %v15410_v57 = vpack.c.bf16 %v8654_v37, %v8651_v52  ;;  %v8676_v48 = vld [vmem:[#allocation34 + $0xd8] sm:$0xff]  ;;  %v8675_v32 = vld [vmem:[#allocation34 + $0xd0] sm:$0xff]  ;;  %v8678_v52 = vld [vmem:[#allocation34 + $0xe8] sm:$0xff] }
0x1436   : > { %15338 = vmatprep.subr.bf16.mxu0 %v15337_v58  ;;  %15365 = vmatprep.subr.bf16.mxu1 %v17134_v18  ;;  %v15381_v58 = vpack.c.bf16 %v8659_v55, %v8656_v53  ;;  %v8680_v37 = vld [vmem:[#allocation34 + $0xf8] sm:$0xff]  ;;  %v8683_v53 = vld [vmem:[#allocation34 + $0x110] sm:$0xff]  ;;  %v15395_v55 = vpack.c.bf16 %v8676_v48, %v8673_v44 }
0x1437   : > { %v15397_v45 = vpack.c.bf16 %v8683_v53, %v8680_v37  ;;  %v9129_v44 = vld [vmem:[#allocation34 + $0x350] sm:$0xff]  ;;  %v9130_v37 = vld [vmem:[#allocation34 + $0x358] sm:$0xff] }
0x1439   : > { %15340 = vmatpush1.bf16.msra.mxu0 %v15339_v16  ;;  %15367 = vmatpush3.bf16.msra.mxu1 %v15366_v23  ;;  %v8665_v16 = vld [vmem:[#allocation34 + $0x80] sm:$0xff] }
0x143a   : > { %15342 = vmatprep.subr.bf16.mxu0 %v15341_v6  ;;  %15368 = vmatprep.subr.bf16.mxu1 %v17134_v18 }
0x143d   : > { %15344 = vmatpush1.bf16.msra.mxu0 %v15343_v21  ;;  %15370 = vmatpush3.bf16.msra.mxu1 %v15369_v26  ;;  %v15385_v26 = vpack.c.bf16 %v8665_v16, %v8662_v4  ;;  %v15425_v16 = vpack.c.bf16 %v8684_v46, %v8681_v43  ;;  %v9134_v43 = vld [vmem:[#allocation34 + $0x378] sm:$0xff]  ;;  %v9133_v46 = vld [vmem:[#allocation34 + $0x370] sm:$0xff] }
0x143e   : > { %15346 = vmatprep.subr.bf16.mxu0 %v15345_v8  ;;  %15371 = vmatprep.subr.bf16.mxu1 %v17134_v18  ;;  %v8663_v8 = vld [vmem:[#allocation34 + $0x70] sm:$0xff] }
0x1441   : > { %15348 = vmatpush1.bf16.msra.mxu0 %v15347_v38  ;;  %15373 = vmatpush3.bf16.msra.mxu1 %v15372_v5  ;;  %v15416_v38 = vpack.c.bf16 %v8666_v63, %v8663_v8  ;;  %v8667_v5 = vld [vmem:[#allocation34 + $0x90] sm:$0xff]  ;;  %v8694_v63 = vld [vmem:[#allocation34 + $0x168] sm:$0xff] }
0x1442   : > { %15350 = vmatprep.subr.bf16.mxu0 %v15349_v42  ;;  %15374 = vmatprep.subr.bf16.mxu1 %v17134_v18  ;;  %v8670_v42 = vld [vmem:[#allocation34 + $0xa8] sm:$0xff]  ;;  %v15407_v34 = vpack.c.bf16 %v8694_v63, %v8691_v2 }
0x1445   : > { %15352 = vmatpush1.bf16.msra.mxu0 %v15351_v39  ;;  %15376 = vmatpush3.bf16.msra.mxu1 %v15375_v12  ;;  %v8677_v39 = vld [vmem:[#allocation34 + $0xe0] sm:$0xff]  ;;  %v15391_v12 = vpack.c.bf16 %v8670_v42, %v8667_v5  ;;  %v9120_v5 = vld [vmem:[#allocation34 + $0x308] sm:$0xff] }
0x1446   : > { %15409 = vmatprep.subr.bf16.mxu1 %v17134_v18  ;;  %15378 = vmatprep.subr.bf16.mxu0 %v15377_v47  ;;  %v15393_v47 = vpack.c.bf16 %v8677_v39, %v8674_v31  ;;  %v9119_v42 = vld [vmem:[#allocation34 + $0x300] sm:$0xff]  ;;  %v9121_v31 = vld [vmem:[#allocation34 + $0x310] sm:$0xff] }
0x1447   : > { %v15435_v39 = vpack.c.bf16 %v9122_v33, %v9119_v42  ;;  %v9149_v42 = vld [vmem:[#allocation34 + $0x3f0] sm:$0xff]  ;;  %v9152_v33 = vld [vmem:[#allocation34 + $0x408] sm:$0xff] }
0x14fb   : > { %v8736_v61 = vpop.f32.mrb[156].mxu1  ;;  %v18951_v23 = vpop.f32.mrb[200].mxu0 }
0x14fc   : > { %v14784_v17 = vpop.f32.mrb[157].mxu1  ;;  %8856 = vmatmul.mubr.f32.vlgmr.msra.gmra.mrb[204].mxu0 %v8736_v61  ;;  %14819 = vmatmul.mubr.f32.vlgmr.msra.gmra.mrb[160].mxu1 %v8736_v61  ;;  %v14778_v6 = vpop.f32.mrb[201].mxu0  ;;  %v8689_v61 = vld [vmem:[#allocation34 + $0x140] sm:$0xff] }
0x14fd   : > { %15380 = vmatpush1.bf16.msra.mxu0 %v15379_v56  ;;  %15411 = vmatpush3.bf16.msra.mxu1 %v15410_v57  ;;  %v8739_v13 = vpop.f32.mrb[158].mxu1  ;;  %v8646_v24 = vpop.f32.mrb[202].mxu0  ;;  %v15422_v56 = vpack.c.bf16 %v8678_v52, %v8675_v32  ;;  %v8679_v57 = vld [vmem:[#allocation34 + $0xf0] sm:$0xff]  ;;  %v8685_v17 = vld [vmem:[#allocation34 + $0x120] sm:$0xff]  ;;  %v15401_v6 = vpack.c.bf16 %v8689_v61, %v8686_v60  ;;  %v9128_v32 = vld [vmem:[#allocation34 + $0x348] sm:$0xff] }
0x14fe   : > { %v14785_v21 = vpop.f32.mrb[159].mxu1  ;;  %15382 = vmatprep.subr.bf16.mxu0 %v15381_v58  ;;  %15412 = vmatprep.subr.bf16.mxu1 %v17134_v18  ;;  %v14779_v3 = vpop.f32.mrb[203].mxu0  ;;  %v8682_v58 = vld [vmem:[#allocation34 + $0x108] sm:$0xff]  ;;  %v8688_v13 = vld [vmem:[#allocation34 + $0x138] sm:$0xff]  ;;  %v8695_v24 = vld [vmem:[#allocation34 + $0x170] sm:$0xff] }
0x14ff   : > { %8996 = vmatprep.mubr.f32.mxu0 %v17125_v1  ;;  %14853 = vmatprep.mubr.msk.f32.mxu1 %vm17126_vm0, %v17125_v1  ;;  %v15399_v4 = vpack.c.bf16 %v8682_v58, %v8679_v57  ;;  %v15403_v21 = vpack.c.bf16 %v8688_v13, %v8685_v17  ;;  %v15405_v8 = vpack.c.bf16 %v8695_v24, %v8692_v22  ;;  %v8693_v3 = vld [vmem:[#allocation34 + $0x160] sm:$0xff]  ;;  %v9136_v60 = vld [vmem:[#allocation34 + $0x388] sm:$0xff]  ;;  %v9138_v61 = vld [vmem:[#allocation34 + $0x398] sm:$0xff] }
0x1500   : > { %v9127_v52 = vld [vmem:[#allocation34 + $0x340] sm:$0xff]  ;;  %v15472_v17 = vpack.c.bf16 %v9136_v60, %v9133_v46  ;;  %v9142_v22 = vld [vmem:[#allocation34 + $0x3b8] sm:$0xff]  ;;  %v9144_v24 = vld [vmem:[#allocation34 + $0x3c8] sm:$0xff] }
0x1501   : > { %15384 = vmatpush1.bf16.msra.mxu0 %v15383_v14  ;;  %15414 = vmatpush3.bf16.msra.mxu1 %v15413_v10  ;;  %v8687_v14 = vld [vmem:[#allocation34 + $0x130] sm:$0xff]  ;;  %v8690_v10 = vld [vmem:[#allocation34 + $0x148] sm:$0xff]  ;;  %v9135_v57 = vld [vmem:[#allocation34 + $0x380] sm:$0xff] }
0x1502   : > { %15386 = vmatprep.subr.bf16.mxu0 %v15385_v26  ;;  %15415 = vmatprep.subr.bf16.mxu1 %v17134_v18  ;;  %v15428_v26 = vpack.c.bf16 %v8690_v10, %v8687_v14  ;;  %v9140_v14 = vld [vmem:[#allocation34 + $0x3a8] sm:$0xff]  ;;  %v9139_v10 = vld [vmem:[#allocation34 + $0x3a0] sm:$0xff] }
0x1503   : > { %v15475_v2 = vpack.c.bf16 %v9142_v22, %v9139_v10  ;;  %v9163_v60 = vld [vmem:[#allocation34 + $0x460] sm:$0xff]  ;;  %v9359_v10 = vld [vmem:[#allocation34 + $0x490] sm:$0xff]  ;;  %v9362_v22 = vld [vmem:[#allocation34 + $0x4a8] sm:$0xff] }
0x1505   : > { %15388 = vmatpush1.bf16.msra.mxu0 %v15387_v11  ;;  %15417 = vmatpush3.bf16.msra.mxu1 %v15416_v38  ;;  %v15431_v11 = vpack.c.bf16 %v8696_v30, %v8693_v3  ;;  %v9074_v38 = vld [vmem:[#allocation31 + $0x8] sm:$0xf]  ;;  %v9146_v3 = vld [vmem:[#allocation34 + $0x3d8] sm:$0xff] }
0x1506   : > { %15390 = vmatprep.subr.bf16.mxu0 %v15389_v41  ;;  %15418 = vmatprep.subr.bf16.mxu1 %v17134_v18  ;;  %v9123_v41 = vld [vmem:[#allocation34 + $0x320] sm:$0xff]  ;;  %v9145_v30 = vld [vmem:[#allocation34 + $0x3d0] sm:$0xff] }
0x1507   : > { %v15433_v40 = vpack.c.bf16 %v9123_v41, %v9120_v5 }
0x1509   : > { %15392 = vmatpush1.bf16.msra.mxu0 %v15391_v12  ;;  %15420 = vmatpush3.bf16.msra.mxu1 %v15419_v28  ;;  %v9126_v28 = vld [vmem:[#allocation34 + $0x338] sm:$0xff] }
0x150a   : > { %15394 = vmatprep.subr.bf16.mxu0 %v15393_v47  ;;  %15421 = vmatprep.subr.bf16.mxu1 %v17134_v18  ;;  %v9125_v47 = vld [vmem:[#allocation34 + $0x330] sm:$0xff]  ;;  %v15437_v48 = vpack.c.bf16 %v9129_v44, %v9126_v28  ;;  %v15455_v28 = vpack.c.bf16 %v9152_v33, %v9149_v42 }
0x150b   : > { %v15439_v53 = vpack.c.bf16 %v9128_v32, %v9125_v47  ;;  %v9155_v47 = vld [vmem:[#allocation34 + $0x420] sm:$0xff]  ;;  %v9158_v32 = vld [vmem:[#allocation34 + $0x438] sm:$0xff]  ;;  %v9312_v42 = vld [vmem:[#allocation31 + $0xc] sm:$0xf] }
0x150d   : > { %15396 = vmatpush1.bf16.msra.mxu0 %v15395_v55  ;;  %15423 = vmatpush3.bf16.msra.mxu1 %v15422_v56  ;;  %v15469_v55 = vpack.c.bf16 %v9130_v37, %v9127_v52  ;;  %v9132_v56 = vld [vmem:[#allocation34 + $0x368] sm:$0xff]  ;;  %v9157_v52 = vld [vmem:[#allocation34 + $0x430] sm:$0xff] }
0x150e   : > { %15398 = vmatprep.subr.bf16.mxu0 %v15397_v45  ;;  %15424 = vmatprep.subr.bf16.mxu1 %v17134_v18  ;;  %v9131_v45 = vld [vmem:[#allocation34 + $0x360] sm:$0xff]  ;;  %v15441_v58 = vpack.c.bf16 %v9135_v57, %v9132_v56  ;;  %v9160_v37 = vld [vmem:[#allocation34 + $0x448] sm:$0xff]  ;;  %v9162_v56 = vld [vmem:[#allocation34 + $0x458] sm:$0xff] }
0x150f   : > { %v9165_v57 = vld [vmem:[#allocation34 + $0x470] sm:$0xff] }
0x1511   : > { %15400 = vmatpush1.bf16.msra.mxu0 %v15399_v4  ;;  %15426 = vmatpush3.bf16.msra.mxu1 %v15425_v16  ;;  %v9141_v4 = vld [vmem:[#allocation34 + $0x3b0] sm:$0xff]  ;;  %v15443_v16 = vpack.c.bf16 %v9134_v43, %v9131_v45  ;;  %v15461_v45 = vpack.c.bf16 %v9165_v57, %v9162_v56  ;;  %v9164_v43 = vld [vmem:[#allocation34 + $0x468] sm:$0xff]  ;;  %v9377_v57 = vld [vmem:[#allocation34 + $0x520] sm:$0xff] }
0x1512   : > { %15402 = vmatprep.subr.bf16.mxu0 %v15401_v6  ;;  %15427 = vmatprep.subr.bf16.mxu1 %v17134_v18  ;;  %v9137_v6 = vld [vmem:[#allocation34 + $0x390] sm:$0xff]  ;;  %v15445_v13 = vpack.c.bf16 %v9141_v4, %v9138_v61  ;;  %v9166_v61 = vld [vmem:[#allocation34 + $0x478] sm:$0xff] }
0x1513   : > { %v15487_v4 = vpack.c.bf16 %v9166_v61, %v9163_v60  ;;  %v9379_v56 = vld [vmem:[#allocation34 + $0x530] sm:$0xff]  ;;  %v9378_v60 = vld [vmem:[#allocation34 + $0x528] sm:$0xff] }
0x1515   : > { %15404 = vmatpush1.bf16.msra.mxu0 %v15403_v21  ;;  %15429 = vmatpush3.bf16.msra.mxu1 %v15428_v26  ;;  %v9147_v21 = vld [vmem:[#allocation34 + $0x3e0] sm:$0xff]  ;;  %v15447_v26 = vpack.c.bf16 %v9140_v14, %v9137_v6  ;;  %v9358_v6 = vld [vmem:[#allocation34 + $0x488] sm:$0xff] }
0x1516   : > { %15406 = vmatprep.subr.bf16.mxu0 %v15405_v8  ;;  %15430 = vmatprep.subr.bf16.mxu1 %v17134_v18  ;;  %v9143_v8 = vld [vmem:[#allocation34 + $0x3c0] sm:$0xff]  ;;  %v15449_v63 = vpack.c.bf16 %v9147_v21, %v9144_v24 }
0x1517   : > { %v15451_v5 = vpack.c.bf16 %v9146_v3, %v9143_v8  ;;  %v9361_v14 = vld [vmem:[#allocation34 + $0x4a0] sm:$0xff]  ;;  %v9360_v8 = vld [vmem:[#allocation34 + $0x498] sm:$0xff] }
0x1518   : > { %v9364_v3 = vld [vmem:[#allocation34 + $0x4b8] sm:$0xff] }
0x1519   : > { %15408 = vmatpush1.bf16.msra.mxu0 %v15407_v34  ;;  %15432 = vmatpush3.bf16.msra.mxu1 %v15431_v11  ;;  %v9148_v34 = vld [vmem:[#allocation34 + $0x3e8] sm:$0xff]  ;;  %v9150_v11 = vld [vmem:[#allocation34 + $0x3f8] sm:$0xff] }
0x151a   : > { %14856 = vmatprep.subr.bf16.mxu0 %v17125_v1  ;;  %15465 = vmatprep.subr.bf16.mxu1 %v17134_v18  ;;  %v15478_v41 = vpack.c.bf16 %v9148_v34, %v9145_v30  ;;  %v9367_v34 = vld [vmem:[#allocation34 + $0x4d0] sm:$0xff] }
0x151c   : > { %8997 = vmatmul.mubr.f32.vlgmr.msra.gmra.mrb[204].mxu0 %v18951_v23  ;;  %14854 = vmatmul.mubr.f32.vlgmr.msra.gmra.mrb[162].mxu1 %v18951_v23  ;;  %v9124_v23 = vld [vmem:[#allocation34 + $0x328] sm:$0xff] }
0x151d   : > { %14857 = vmatpush3.bf16.msra.mxu0 %v18933_v54  ;;  %14858 = vmatprep.mubr.msk.bf16.mxu0 %vm17126_vm0, %v17125_v1  ;;  %v15466_v12 = vpack.c.bf16 %v9124_v23, %v9121_v31  ;;  %v9151_v31 = vld [vmem:[#allocation34 + $0x400] sm:$0xff]  ;;  %v9154_v23 = vld [vmem:[#allocation34 + $0x418] sm:$0xff] }
0x151e   : > { %14894 = vmatprep.mubr.msk.f32.mxu1 %vm17126_vm0, %v17125_v1  ;;  %15434 = vmatprep.subr.bf16.mxu0 %v15433_v40  ;;  %v15481_v44 = vpack.c.bf16 %v9154_v23, %v9151_v31  ;;  %v15493_v31 = vpack.c.bf16 %v9367_v34, %v9364_v3  ;;  %v9363_v23 = vld [vmem:[#allocation34 + $0x4b0] sm:$0xff] }
0x151f   : > { %15467 = vmatpush3.bf16.msra.mxu1 %v15466_v12  ;;  %v9159_v12 = vld [vmem:[#allocation34 + $0x440] sm:$0xff]  ;;  %v9387_v34 = vld [vmem:[#allocation34 + $0x570] sm:$0xff] }
0x1520   : > { %14859 = vmatmul.mubr.msk.bf16.vlgmr.msra.gmra.mrb[208].mxu0 %vm4301_vm9, %v9074_v38  ;;  %15468 = vmatprep.subr.bf16.mxu1 %v17134_v18  ;;  %v9153_v38 = vld [vmem:[#allocation34 + $0x410] sm:$0xff] }
0x1521   : > { %9231 = vmatprep.mubr.f32.mxu0 %v17125_v1  ;;  %15436 = vmatpush1.bf16.msra.mxu0 %v15435_v39  ;;  %v15453_v40 = vpack.c.bf16 %v9153_v38, %v9150_v11  ;;  %v9156_v39 = vld [vmem:[#allocation34 + $0x428] sm:$0xff]  ;;  %v9365_v11 = vld [vmem:[#allocation34 + $0x4c0] sm:$0xff]  ;;  %v9368_v38 = vld [vmem:[#allocation34 + $0x4d8] sm:$0xff] }
0x1522   : > { %15438 = vmatprep.subr.bf16.mxu0 %v15437_v48  ;;  %v15457_v48 = vpack.c.bf16 %v9159_v12, %v9156_v39  ;;  %v9366_v39 = vld [vmem:[#allocation34 + $0x4c8] sm:$0xff]  ;;  %v15525_v12 = vpack.c.bf16 %v9368_v38, %v9365_v11 }
0x1523   : > { %15470 = vmatpush3.bf16.msra.mxu1 %v15469_v55  ;;  %v15484_v55 = vpack.c.bf16 %v9160_v37, %v9157_v52  ;;  %v9369_v52 = vld [vmem:[#allocation34 + $0x4e0] sm:$0xff]  ;;  %v9372_v37 = vld [vmem:[#allocation34 + $0x4f8] sm:$0xff]  ;;  %v9390_v11 = vld [vmem:[#allocation34 + $0x588] sm:$0xff] }
0x1524   : > { %15471 = vmatprep.subr.bf16.mxu1 %v17134_v18 }
0x1525   : > { %15440 = vmatpush1.bf16.msra.mxu0 %v15439_v53  ;;  %v15459_v53 = vpack.c.bf16 %v9158_v32, %v9155_v47  ;;  %v9371_v47 = vld [vmem:[#allocation34 + $0x4f0] sm:$0xff] }
0x1526   : > { %15442 = vmatprep.subr.bf16.mxu0 %v15441_v58  ;;  %v9161_v58 = vld [vmem:[#allocation34 + $0x450] sm:$0xff] }
0x1527   : > { %15473 = vmatpush3.bf16.msra.mxu1 %v15472_v17  ;;  %v15463_v46 = vpack.c.bf16 %v9164_v43, %v9161_v58  ;;  %v15499_v58 = vpack.c.bf16 %v9372_v37, %v9369_v52  ;;  %v9401_v52 = vld [vmem:[#allocation34 + $0x5e0] sm:$0xff] }
0x1528   : > { %15474 = vmatprep.subr.bf16.mxu1 %v17134_v18 }
0x1529   : > { %15444 = vmatpush1.bf16.msra.mxu0 %v15443_v16 }
0x152a   : > { %15446 = vmatprep.subr.bf16.mxu0 %v15445_v13 }
0x152b   : > { %15476 = vmatpush3.bf16.msra.mxu1 %v15475_v2  ;;  %v9357_v2 = vld [vmem:[#allocation34 + $0x480] sm:$0xff] }
0x152c   : > { %15477 = vmatprep.subr.bf16.mxu1 %v17134_v18 }
0x152d   : > { %15448 = vmatpush1.bf16.msra.mxu0 %v15447_v26  ;;  %v15489_v26 = vpack.c.bf16 %v9361_v14, %v9358_v6  ;;  %v9386_v6 = vld [vmem:[#allocation34 + $0x568] sm:$0xff] }
0x152e   : > { %15450 = vmatprep.subr.bf16.mxu0 %v15449_v63  ;;  %v15522_v63 = vpack.c.bf16 %v9362_v22, %v9359_v10  ;;  %v9381_v10 = vld [vmem:[#allocation34 + $0x540] sm:$0xff]  ;;  %v9384_v22 = vld [vmem:[#allocation34 + $0x558] sm:$0xff] }
0x152f   : > { %15479 = vmatpush3.bf16.msra.mxu1 %v15478_v41  ;;  %v15507_v3 = vpack.c.bf16 %v9384_v22, %v9381_v10 }
0x1530   : > { %15480 = vmatprep.subr.bf16.mxu1 %v17134_v18 }
0x1531   : > { %15452 = vmatpush1.bf16.msra.mxu0 %v15451_v5 }
0x1532   : > { %15454 = vmatprep.subr.bf16.mxu0 %v15453_v40  ;;  %v15491_v40 = vpack.c.bf16 %v9360_v8, %v9357_v2  ;;  %v9391_v2 = vld [vmem:[#allocation34 + $0x590] sm:$0xff]  ;;  %v9389_v8 = vld [vmem:[#allocation34 + $0x580] sm:$0xff] }
0x1533   : > { %15482 = vmatpush3.bf16.msra.mxu1 %v15481_v44  ;;  %v9373_v44 = vld [vmem:[#allocation34 + $0x500] sm:$0xff] }
0x1534   : > { %15483 = vmatprep.subr.bf16.mxu1 %v17134_v18 }
0x1535   : > { %15456 = vmatpush1.bf16.msra.mxu0 %v15455_v28  ;;  %v9370_v28 = vld [vmem:[#allocation34 + $0x4e8] sm:$0xff] }
0x1536   : > { %15458 = vmatprep.subr.bf16.mxu0 %v15457_v48  ;;  %v9374_v48 = vld [vmem:[#allocation34 + $0x508] sm:$0xff]  ;;  %v15497_v32 = vpack.c.bf16 %v9373_v44, %v9370_v28  ;;  %v9400_v44 = vld [vmem:[#allocation34 + $0x5d8] sm:$0xff] }
0x1537   : > { %15485 = vmatpush3.bf16.msra.mxu1 %v15484_v55  ;;  %v9376_v55 = vld [vmem:[#allocation34 + $0x518] sm:$0xff] }
0x1538   : > { %15486 = vmatprep.subr.bf16.mxu1 %v17134_v18  ;;  %v15501_v43 = vpack.c.bf16 %v9379_v56, %v9376_v55 }
0x1539   : > { %15460 = vmatpush1.bf16.msra.mxu0 %v15459_v53  ;;  %v15528_v53 = vpack.c.bf16 %v9374_v48, %v9371_v47  ;;  %v9403_v47 = vld [vmem:[#allocation34 + $0x5f0] sm:$0xff] }
0x153a   : > { %15462 = vmatprep.subr.bf16.mxu0 %v15461_v45  ;;  %v9380_v45 = vld [vmem:[#allocation34 + $0x538] sm:$0xff]  ;;  %v15517_v48 = vpack.c.bf16 %v9403_v47, %v9400_v44 }
0x153b   : > { %15488 = vmatpush3.bf16.msra.mxu1 %v15487_v4  ;;  %v15531_v61 = vpack.c.bf16 %v9380_v45, %v9377_v57  ;;  %v9382_v4 = vld [vmem:[#allocation34 + $0x548] sm:$0xff] }
0x153c   : > { %15521 = vmatprep.subr.bf16.mxu1 %v17134_v18 }
0x153d   : > { %15464 = vmatpush1.bf16.msra.mxu0 %v15463_v46  ;;  %v9375_v46 = vld [vmem:[#allocation34 + $0x510] sm:$0xff] }
0x153e   : > { %14897 = vmatprep.subr.bf16.mxu0 %v17125_v1 }
0x15cf   : > { %v8928_v16 = vpop.f32.mrb[160].mxu1 }
0x15d0   : > { %v14820_v17 = vpop.f32.mrb[161].mxu1 }
0x15d1   : > { %v9383_v17 = vld [vmem:[#allocation34 + $0x550] sm:$0xff] }
0x15ef   : > { %v9069_v13 = vpop.f32.mrb[162].mxu1 }
0x15f0   : > { %v18983_v24 = vadd.f32 %v9069_v13, %v8928_v16  ;;  %v14855_v21 = vpop.f32.mrb[163].mxu1  ;;  %v9385_v16 = vld [vmem:[#allocation34 + $0x560] sm:$0xff]  ;;  %v15503_v13 = vpack.c.bf16 %v9378_v60, %v9375_v46  ;;  %v9553_v60 = vpop.permute.xlu1 %9552 }
0x15f1   : > { %v15505_v14 = vpack.c.bf16 %v9385_v16, %v9382_v4  ;;  %v15534_v21 = vpack.c.bf16 %v9386_v6, %v9383_v17 }
0x15f3   : > { %v9112_v30 = vpop.f32.mrb[208].mxu0 }
0x15f4   : > { %v14860_v5 = vpop.f32.mrb[209].mxu0  ;;  %9232 = vmatmul.mubr.f32.vlgmr.msra.gmra.mrb[204].mxu0 %v9112_v30  ;;  %14895 = vmatmul.mubr.f32.vlgmr.msra.gmra.mrb[164].mxu1 %v9112_v30 }
0x15f5   : > { %14898 = vmatpush3.bf16.msra.mxu0 %v18933_v54  ;;  %v9115_v41 = vpop.f32.mrb[210].mxu0  ;;  %14899 = vmatprep.mubr.msk.bf16.mxu0 %vm17126_vm0, %v17125_v1  ;;  %v15495_v54 = vpack.c.bf16 %v9366_v39, %v9363_v23  ;;  %v9394_v5 = vld [vmem:[#allocation34 + $0x5a8] sm:$0xff]  ;;  %v9393_v23 = vld [vmem:[#allocation34 + $0x5a0] sm:$0xff]  ;;  %v9396_v39 = vld [vmem:[#allocation34 + $0x5b8] sm:$0xff] }
0x15f6   : > { %v14861_v33 = vpop.f32.mrb[211].mxu0  ;;  %15490 = vmatprep.subr.bf16.mxu0 %v15489_v26  ;;  %15523 = vmatpush3.bf16.msra.mxu1 %v15522_v63  ;;  %v9388_v26 = vld [vmem:[#allocation34 + $0x578] sm:$0xff]  ;;  %v9397_v41 = vld [vmem:[#allocation34 + $0x5c0] sm:$0xff]  ;;  %v15515_v28 = vpack.c.bf16 %v9396_v39, %v9393_v23 }
0x15f7   : > { %15524 = vmatprep.subr.bf16.mxu1 %v17134_v18  ;;  %14935 = vmatprep.mubr.msk.f32.mxu1 %vm17126_vm0, %v17125_v1  ;;  %v9392_v63 = vld [vmem:[#allocation34 + $0x598] sm:$0xff]  ;;  %v15509_v30 = vpack.c.bf16 %v9391_v2, %v9388_v26  ;;  %v15511_v33 = vpack.c.bf16 %v9390_v11, %v9387_v34 }
0x15f8   : > { %14900 = vmatmul.mubr.msk.bf16.vlgmr.msra.gmra.mrb[212].mxu0 %vm4301_vm9, %v9312_v42  ;;  %v15537_v38 = vpack.c.bf16 %v9392_v63, %v9389_v8  ;;  %v9395_v42 = vld [vmem:[#allocation34 + $0x5b0] sm:$0xff]  ;;  %v19063_v63 = vpack.c.bf16 %v18249_v51, %v18249_v51  ;;  %vm19732_vm9 = vmmov %vm19730_vm5 }
0x15f9   : > { %15492 = vmatpush1.bf16.msra.mxu0 %v15491_v40  ;;  %9469 = vmatprep.mubr.f32.mxu0 %v17125_v1  ;;  %v9398_v40 = vld [vmem:[#allocation34 + $0x5c8] sm:$0xff] }
0x15fa   : > { %15494 = vmatprep.subr.bf16.mxu0 %v15493_v31  ;;  %15526 = vmatpush3.bf16.msra.mxu1 %v15525_v12  ;;  %v15513_v31 = vpack.c.bf16 %v9397_v41, %v9394_v5  ;;  %v15540_v12 = vpack.c.bf16 %v9398_v40, %v9395_v42  ;;  %v9566_v41 = vld [vmem:[#allocation36 + $0x4] sm:$0xf] }
0x15fb   : > { %15527 = vmatprep.subr.bf16.mxu1 %v17134_v18 }
0x15fd   : > { %15496 = vmatpush1.bf16.msra.mxu0 %v15495_v54  ;;  %v9399_v54 = vld [vmem:[#allocation34 + $0x5d0] sm:$0xff] }
0x15fe   : > { %15498 = vmatprep.subr.bf16.mxu0 %v15497_v32  ;;  %15529 = vmatpush3.bf16.msra.mxu1 %v15528_v53  ;;  %v9402_v32 = vld [vmem:[#allocation34 + $0x5e8] sm:$0xff]  ;;  %v9404_v53 = vld [vmem:[#allocation34 + $0x5f8] sm:$0xff] }
0x15ff   : > { %15530 = vmatprep.subr.bf16.mxu1 %v17134_v18  ;;  %v15519_v37 = vpack.c.bf16 %v9402_v32, %v9399_v54  ;;  %v15543_v55 = vpack.c.bf16 %v9404_v53, %v9401_v52  ;;  %v9564_v54 = vld [vmem:[#allocation36] sm:$0xf] }
0x1601   : > { %15500 = vmatpush1.bf16.msra.mxu0 %v15499_v58 }
0x1602   : > { %15502 = vmatprep.subr.bf16.mxu0 %v15501_v43  ;;  %15532 = vmatpush3.bf16.msra.mxu1 %v15531_v61 }
0x1603   : > { %15533 = vmatprep.subr.bf16.mxu1 %v17134_v18 }
0x1605   : > { %15504 = vmatpush1.bf16.msra.mxu0 %v15503_v13 }
0x1606   : > { %15506 = vmatprep.subr.bf16.mxu0 %v15505_v14  ;;  %15535 = vmatpush3.bf16.msra.mxu1 %v15534_v21 }
0x1607   : > { %15536 = vmatprep.subr.bf16.mxu1 %v17134_v18 }
0x1609   : > { %15508 = vmatpush1.bf16.msra.mxu0 %v15507_v3  ;;  %v19067_v3 = vpack.c.bf16 %v18246_v50, %v18246_v50 }
0x160a   : > { %15510 = vmatprep.subr.bf16.mxu0 %v15509_v30  ;;  %15538 = vmatpush3.bf16.msra.mxu1 %v15537_v38  ;;  %v19075_v30 = vpack.c.bf16 %v18243_v49, %v18243_v49  ;;  %v11473_v49 = vld [vmem:[#allocation39] sm:$0xff] }
0x160b   : > { %15539 = vmatprep.subr.bf16.mxu1 %v17134_v18 }
0x160d   : > { %15512 = vmatpush1.bf16.msra.mxu0 %v15511_v33 }
0x160e   : > { %15514 = vmatprep.subr.bf16.mxu0 %v15513_v31  ;;  %15541 = vmatpush3.bf16.msra.mxu1 %v15540_v12 }
0x160f   : > { %15542 = vmatprep.subr.bf16.mxu1 %v17134_v18 }
0x1611   : > { %15516 = vmatpush1.bf16.msra.mxu0 %v15515_v28 }
0x1612   : > { %15518 = vmatprep.subr.bf16.mxu0 %v15517_v48  ;;  %15544 = vmatpush3.bf16.msra.mxu1 %v15543_v55 }
0x1615   : > { %15520 = vmatpush1.bf16.msra.mxu0 %v15519_v37 }
0x1616   : > { %14938 = vmatprep.subr.bf16.mxu0 %v17125_v1 }
0x16c7   : > { %v9304_v56 = vpop.f32.mrb[164].mxu1 }
0x16c8   : > { %v9310_v57 = vadd.f32 %v9304_v56, %v18983_v24  ;;  %v14896_v45 = vpop.f32.mrb[165].mxu1 }
0x16cb   : > { %v9350_v18 = vpop.f32.mrb[212].mxu0 }
0x16cc   : > { %v14901_v58 = vpop.f32.mrb[213].mxu0  ;;  %9470 = vmatmul.mubr.f32.vlgmr.msra.gmra.mrb[204].mxu0 %v9350_v18  ;;  %14936 = vmatmul.mubr.f32.vlgmr.msra.gmra.mrb[166].mxu1 %v9350_v18 }
0x16cd   : > { %v9353_v43 = vpop.f32.mrb[214].mxu0  ;;  %9623 = vmatprep.mubr.bf16.mxu1 %v17123_v0  ;;  %14940 = vmatprep.mubr.msk.bf16.mxu0 %vm17126_vm0, %v17125_v1 }
0x16ce   : > { %v14902_v46 = vpop.f32.mrb[215].mxu0  ;;  %v9775_v43 = vld [vmem:[#allocation36 + $0x8] sm:$0xf] }
0x179f   : > { %v9471_v61 = vpop.f32.mrb[204].mxu0  ;;  %v9542_v4 = vpop.f32.mrb[166].mxu1 }
0x17a0   : > { %v9555_v16 = vadd.f32 %v9553_v60, %v9471_v61  ;;  %v9548_v17 = vadd.f32 %v9542_v4, %v9310_v57  ;;  %v9473_v6 = vpop.f32.mrb[205].mxu0  ;;  %v14937_v13 = vpop.f32.mrb[167].mxu1 }
0x17a1   : > { %v9556_v24 = vadd.f32 %v9553_v60, %v9473_v6 }
0x17a2   : > { %v9558_v14 = vmul.f32 %v9555_v16, %v18052_v20  ;;  %v9557_v10 = vadd.f32 %v9553_v60, %v9548_v17 }
0x17a3   : > { %v9559_v22 = vmul.f32 %v9556_v24, %v18055_v27  ;;  %v9882_v24 = vld [vmem:[#allocation36 + $0xc] sm:$0xf] }
0x17a4   : > { %v19006_v21 = vpack.c.bf16 %v9558_v14, %v9558_v14  ;;  %v9560_v26 = vmul.f32 %v9557_v10, %v18058_v36 }
0x17a5   : > { %v19009_v2 = vpack.c.bf16 %v9559_v22, %v9559_v22 }
0x17a6   : > { %9570 = vrot.lane.b32.xlu0 %v19006_v21, %s19724_s0  ;;  %v19015_v8 = vpack.c.bf16 %v9560_v26, %v9560_v26 }
0x17a7   : > { %9572 = vrot.lane.b32.xlu1 %v19009_v2, %s19724_s0 }
0x17aa   : > { %9574 = vrot.lane.b32.xlu0 %v19015_v8, %s19724_s0 }
0x17ab   : > { %9672 = vrot.lane.b32.xlu1 %v19006_v21, %s19725_s11 }
0x17ae   : > { %9674 = vrot.lane.b32.xlu0 %v19009_v2, %s19725_s11 }
0x17af   : > { %9676 = vrot.lane.b32.xlu1 %v19015_v8, %s19725_s11 }
0x17b2   : > { %9776 = vrot.lane.b32.xlu0 %v19006_v21, %s19726_s16 }
0x17b3   : > { %9778 = vrot.lane.b32.xlu1 %v19009_v2, %s19726_s16 }
0x17b6   : > { %9780 = vrot.lane.b32.xlu0 %v19015_v8, %s19726_s16 }
0x17b7   : > { %9883 = vrot.lane.b32.xlu1 %v19006_v21, %s17129_s5 }
0x17ba   : > { %9885 = vrot.lane.b32.xlu0 %v19009_v2, %s17129_s5 }
0x17bb   : > { %9887 = vrot.lane.b32.xlu1 %v19015_v8, %s17129_s5 }
0x17be   : > { %10088 = vrot.lane.b32.xlu0 %v19006_v21, %s19722_s1 }
0x17bf   : > { %10090 = vrot.lane.b32.xlu1 %v19009_v2, %s19722_s1 }
0x17c2   : > { %10092 = vrot.lane.b32.xlu0 %v19015_v8, %s19722_s1 }
0x17c3   : > { %10195 = vrot.lane.b32.xlu1 %v19006_v21, %s19727_s13 }
0x17c6   : > { %10197 = vrot.lane.b32.xlu0 %v19009_v2, %s19727_s13 }
0x17c7   : > { %10199 = vrot.lane.b32.xlu1 %v19015_v8, %s19727_s13 }
0x17ca   : > { %10302 = vrot.lane.b32.xlu0 %v19006_v21, %s19728_s7 }
0x17cb   : > { %10304 = vrot.lane.b32.xlu1 %v19009_v2, %s19728_s7 }
0x17ce   : > { %10306 = vrot.lane.b32.xlu0 %v19015_v8, %s19728_s7 }
0x17cf   : > { %10409 = vrot.lane.b32.xlu1 %v19006_v21, %s19729_s8 }
0x17d2   : > { %10411 = vrot.lane.b32.xlu0 %v19009_v2, %s19729_s8 }
0x17d3   : > { %10413 = vrot.lane.b32.xlu1 %v19015_v8, %s19729_s8 }
0x17d6   : > { %10521 = vrot.lane.b32.xlu0 %v19063_v63, %s19725_s11 }
0x17d7   : > { %10523 = vrot.lane.b32.xlu1 %v19067_v3, %s19725_s11 }
0x17da   : > { %10525 = vrot.lane.b32.xlu0 %v19075_v30, %s19725_s11 }
0x17db   : > { %10628 = vrot.lane.b32.xlu1 %v19063_v63, %s19724_s0 }
0x17de   : > { %10630 = vrot.lane.b32.xlu0 %v19067_v3, %s19724_s0 }
0x17df   : > { %10632 = vrot.lane.b32.xlu1 %v19075_v30, %s19724_s0 }
0x17e2   : > { %10735 = vrot.lane.b32.xlu0 %v19063_v63, %s19726_s16 }
0x17e3   : > { %10737 = vrot.lane.b32.xlu1 %v19067_v3, %s19726_s16 }
0x17e6   : > { %10739 = vrot.lane.b32.xlu0 %v19075_v30, %s19726_s16 }
0x17e7   : > { %10842 = vrot.lane.b32.xlu1 %v19063_v63, %s17129_s5 }
0x17ea   : > { %10844 = vrot.lane.b32.xlu0 %v19067_v3, %s17129_s5 }
0x17eb   : > { %10846 = vrot.lane.b32.xlu1 %v19075_v30, %s17129_s5 }
0x17ee   : > { %11047 = vrot.lane.b32.xlu0 %v19063_v63, %s19722_s1 }
0x17ef   : > { %11049 = vrot.lane.b32.xlu1 %v19067_v3, %s19722_s1 }
0x17f2   : > { %11051 = vrot.lane.b32.xlu0 %v19075_v30, %s19722_s1 }
0x17f3   : > { %11154 = vrot.lane.b32.xlu1 %v19063_v63, %s19727_s13 }
0x17f6   : > { %11156 = vrot.lane.b32.xlu0 %v19067_v3, %s19727_s13 }
0x17f7   : > { %11158 = vrot.lane.b32.xlu1 %v19075_v30, %s19727_s13 }
0x17fa   : > { %11261 = vrot.lane.b32.xlu0 %v19063_v63, %s19728_s7 }
0x17fb   : > { %11263 = vrot.lane.b32.xlu1 %v19067_v3, %s19728_s7 }
0x17fe   : > { %11265 = vrot.lane.b32.xlu0 %v19075_v30, %s19728_s7 }
0x17ff   : > { %11368 = vrot.lane.b32.xlu1 %v19063_v63, %s19729_s8 }
0x1802   : > { %11370 = vrot.lane.b32.xlu0 %v19067_v3, %s19729_s8 }
0x1803   : > { %11372 = vrot.lane.b32.xlu1 %v19075_v30, %s19729_s8 }
0x1806   : > { %11476 = vperm.xlu0 %16009, %v11473_v49  }
0x1818   : > { %v9571_v50 = vpop.permute.xlu0 %9570 }
0x1819   : > { %v9576_v51 = vsel %vm19730_vm5, %v17916_v9, %v9571_v50  ;;  %v9573_v34 = vpop.permute.xlu1 %9572  ;;  %vm19743_vm5 = vmmov %vm19742_vm2 }
0x181a   : > { %v9583_v11 = vsel %vm19731_vm8, %v9576_v51, 0  ;;  %v9577_v38 = vsel %vm19732_vm9, %v9571_v50, %v9573_v34  ;;  %vm19744_vm8 = vcmask 138240   ;;  %vm19745_vm9 = vmmov %vm19742_vm2  ;;  %v9989_v50 = vld [vmem:[#allocation36 + $0x10] sm:$0xf] }
0x181b   : > { %13468 = vmatprep.subr.msk.bf16.mxu1 %vm19733_vm10, %v9577_v38  ;;  %vm19746_vm10 = vmmov %vm19744_vm8 }
0x181c   : > { %9592 = vmatpush1.bf16.msra.mxu1 %v9583_v11  ;;  %v9575_v5 = vpop.permute.xlu0 %9574 }
0x181d   : > { %v9578_v42 = vsel %vm19734_vm11, %v9573_v34, %v9575_v5  ;;  %v9673_v40 = vpop.permute.xlu1 %9672  ;;  %vm19747_vm11 = vmmov %vm19741_vm4 }
0x181e   : > { %v9589_v33 = vsel %vm19735_vm12, %v9578_v42, 0  ;;  %v9678_v31 = vsel %vm19736_vm13, %v17923_v15, %v9673_v40  ;;  %vm19748_vm12 = vmmov %vm19742_vm2 }
0x181f   : > { %13469 = vmatmul.mubr.msk.bf16.vlgmr.msra.gmra.mrb[168].mxu1 %vm19737_vm14, %v9566_v41  ;;  %14939 = vmatpush3.bf16.msra.mxu0 %v9589_v33  ;;  %v9685_v28 = vsel %vm19739_vm3, %v9678_v31, 0  ;;  %vm19749_vm13 = vmmov %vm19744_vm8 }
0x1820   : > { %v9675_v23 = vpop.permute.xlu0 %9674  ;;  %14944 = vmatprep.subr.bf16.mxu0 %v17125_v1  ;;  %9725 = vmatprep.mubr.bf16.mxu1 %v17123_v0  ;;  %vm19750_vm14 = vmmov %vm19742_vm2 }
0x1821   : > { %v9679_v39 = vsel %vm19738_vm15, %v9673_v40, %v9675_v23  ;;  %v9677_v12 = vpop.permute.xlu1 %9676  ;;  %vm19751_vm15 = vmmov %vm19741_vm4  ;;  %v10087_v40 = vld [vmem:[#allocation36 + $0x14] sm:$0xf] }
0x1822   : > { %v9680_v44 = vsel %vm19740_vm1, %v9675_v23, %v9677_v12  ;;  %14941 = vmatmul.mubr.msk.bf16.vlgmr.msra.gmra.mrb[216].mxu0 %vm19741_vm4, %v9566_v41  ;;  %13471 = vmatprep.subr.msk.bf16.mxu1 %vm19742_vm2, %v9679_v39  ;;  %vm19752_vm3 = vmmov %vm19742_vm2 }
0x1823   : > { %v9691_v47 = vsel %vm19743_vm5, %v9680_v44, 0  ;;  %9694 = vmatpush1.bf16.msra.mxu1 %v9685_v28  ;;  %14946 = vmatprep.mubr.msk.bf16.mxu0 %vm17126_vm0, %v17125_v1  ;;  %vm19753_vm1 = vmmov %vm19742_vm2 }
0x1824   : > { %14945 = vmatpush3.bf16.msra.mxu0 %v9691_v47  ;;  %v9777_v48 = vpop.permute.xlu0 %9776  ;;  %vm19754_vm2 = vmmov %vm19753_vm1  ;;  %v10194_v47 = vld [vmem:[#allocation36 + $0x18] sm:$0xf] }
0x1825   : > { %v9782_v32 = vsel %vm19744_vm8, %v17936_v25, %v9777_v48  ;;  %v9779_v52 = vpop.permute.xlu1 %9778  ;;  %14950 = vmatprep.subr.bf16.mxu0 %v17125_v1  ;;  %vm19755_vm5 = vmmov %vm19753_vm1 }
0x1826   : > { %v9789_v37 = vsel %vm19745_vm9, %v9782_v32, 0  ;;  %v9783_v53 = vsel %vm19746_vm10, %v9777_v48, %v9779_v52  ;;  %vm19756_vm8 = vmmov %vm19741_vm4 }
0x1827   : > { %13472 = vmatmul.mubr.msk.bf16.vlgmr.msra.gmra.mrb[172].mxu1 %vm19747_vm11, %v9564_v54  ;;  %13474 = vmatprep.subr.msk.bf16.mxu1 %vm19748_vm12, %v9783_v53  ;;  %vm19757_vm9 = vmmov %vm19741_vm4 }
0x1828   : > { %9798 = vmatpush1.bf16.msra.mxu1 %v9789_v37  ;;  %v9781_v55 = vpop.permute.xlu0 %9780  ;;  %9829 = vmatprep.mubr.bf16.mxu1 %v17123_v0  ;;  %vm19758_vm10 = vmmov %vm19753_vm1 }
0x1829   : > { %v9784_v56 = vsel %vm19749_vm13, %v9779_v52, %v9781_v55  ;;  %v9884_v57 = vpop.permute.xlu1 %9883  ;;  %v9994_v10 = vsel %vm19758_vm10, %v19006_v21, 0  ;;  %vm19759_vm11 = vmmov %vm19753_vm1 }
0x182a   : > { %v9795_v45 = vsel %vm19750_vm14, %v9784_v56, 0  ;;  %14947 = vmatmul.mubr.msk.bf16.vlgmr.msra.gmra.mrb[220].mxu0 %vm19751_vm15, %v9564_v54  ;;  %v9889_v18 = vsel %vm1882_vm6, %v17951_v35, %v9884_v57  ;;  %vm19760_vm12 = vmmov %vm19741_vm4 }
0x182b   : > { %14951 = vmatpush3.bf16.msra.mxu0 %v9795_v45  ;;  %14952 = vmatprep.mubr.msk.bf16.mxu0 %vm17126_vm0, %v17125_v1  ;;  %v9896_v61 = vsel %vm19753_vm1, %v9889_v18, 0  ;;  %vm19761_vm13 = vmmov %vm19753_vm1 }
0x182c   : > { %v9886_v58 = vpop.permute.xlu0 %9885  ;;  %14956 = vmatprep.subr.bf16.mxu0 %v17125_v1  ;;  %vm19762_vm14 = vmmov %vm19753_vm1 }
0x182d   : > { %v9890_v46 = vsel %vm1882_vm6, %v9884_v57, %v9886_v58  ;;  %v9888_v60 = vpop.permute.xlu1 %9887  ;;  %vm19763_vm15 = vmmov %vm19741_vm4  ;;  %v10301_v57 = vld [vmem:[#allocation36 + $0x1c] sm:$0xf] }
0x182e   : > { %13477 = vmatprep.subr.msk.bf16.mxu1 %vm19752_vm3, %v9890_v46  ;;  %v9891_v4 = vsel %vm1882_vm6, %v9886_v58, %v9888_v60  ;;  %vm19764_vm3 = vcmask 908288  }
0x182f   : > { %13475 = vmatmul.mubr.msk.bf16.vlgmr.msra.gmra.mrb[176].mxu1 %vm19741_vm4, %v9775_v43  ;;  %v9902_v6 = vsel %vm19755_vm5, %v9891_v4, 0  ;;  %vm19765_vm4 = vmmov %vm19753_vm1 }
0x1830   : > { %9905 = vmatpush1.bf16.msra.mxu1 %v9896_v61  ;;  %v10089_v16 = vpop.permute.xlu0 %10088  ;;  %9936 = vmatprep.mubr.bf16.mxu1 %v17123_v0  ;;  %vm19767_vm5 = vmmov %vm19764_vm3 }
0x1831   : > { %13480 = vmatprep.subr.msk.bf16.mxu1 %vm19754_vm2, %v19009_v2  ;;  %v10091_v17 = vpop.permute.xlu1 %10090  ;;  %v10000_v2 = vsel %vm19761_vm13, %v19015_v8, 0  ;;  %vm19766_vm2 = vmmov %vm19756_vm8 }
0x1832   : > { %14953 = vmatmul.mubr.msk.bf16.vlgmr.msra.gmra.mrb[224].mxu0 %vm19756_vm8, %v9775_v43  ;;  %v10094_v21 = vsel %vm2090_vm7, %v10089_v16, %v10091_v17  ;;  %vm19768_vm8 = vmmov %vm19753_vm1  ;;  %v10408_v16 = vld [vmem:[#allocation36 + $0x20] sm:$0xf] }
0x1833   : > { %14957 = vmatpush3.bf16.msra.mxu0 %v9902_v6  ;;  %14958 = vmatprep.mubr.msk.bf16.mxu0 %vm17126_vm0, %v17125_v1  ;;  %v10101_v34 = vsel %vm19762_vm14, %v10094_v21, 0  ;;  %vm19770_vm10 = vmmov %vm19766_vm2 }
0x1834   : > { %v10093_v13 = vpop.permute.xlu0 %10092  ;;  %14962 = vmatprep.subr.bf16.mxu0 %v17125_v1  ;;  %vm19773_vm13 = vmmov %vm19753_vm1 }
0x1835   : > { %v10196_v14 = vpop.permute.xlu1 %10195  ;;  %v10095_v22 = vsel %vm2090_vm7, %v10091_v17, %v10093_v13  ;;  %v10096_v11 = vsel %vm2090_vm7, %v10093_v13, %v17986_v59  ;;  %vm19774_vm14 = vmmov %vm19766_vm2 }
0x1836   : > { %v10107_v5 = vsel %vm19765_vm4, %v10096_v11, 0  ;;  %vm19778_vm4 = vmmov %vm19766_vm2 }
0x1837   : > { %13478 = vmatmul.mubr.msk.bf16.vlgmr.msra.gmra.mrb[180].mxu1 %vm19757_vm9, %v9882_v24  ;;  %vm19769_vm9 = vmmov %vm19764_vm3 }
0x1838   : > { %10003 = vmatpush1.bf16.msra.mxu1 %v9994_v10  ;;  %v10198_v26 = vpop.permute.xlu0 %10197  ;;  %10034 = vmatprep.mubr.bf16.mxu1 %v17123_v0 }
0x1839   : > { %13483 = vmatprep.subr.msk.bf16.mxu1 %vm19759_vm11, %v10095_v22  ;;  %v10200_v49 = vpop.permute.xlu1 %10199  ;;  %v10201_v42 = vsel %vm19767_vm5, %v10196_v14, %v10198_v26  ;;  %vm19771_vm11 = vcmask 900096  }
0x183a   : > { %14959 = vmatmul.mubr.msk.bf16.vlgmr.msra.gmra.mrb[228].mxu0 %vm19760_vm12, %v9882_v24  ;;  %v10202_v8 = vsel %vm19764_vm3, %v10198_v26, %v10200_v49  ;;  %v10208_v33 = vsel %vm19768_vm8, %v10201_v42, 0  ;;  %v10203_v31 = vsel %vm19769_vm9, %v10200_v49, %v18001_v7  ;;  %vm19772_vm12 = vmmov %vm19753_vm1  ;;  %v10517_v26 = vld [vmem:[#allocation37] sm:$0xf] }
0x183b   : > { %14963 = vmatpush3.bf16.msra.mxu0 %v10000_v2  ;;  %14964 = vmatprep.mubr.msk.bf16.mxu0 %vm17126_vm0, %v17125_v1  ;;  %v10214_v28 = vsel %vm19773_vm13, %v10203_v31, 0  ;;  %vm19776_vm3 = vmmov %vm19753_vm1 }
0x183c   : > { %14968 = vmatprep.subr.bf16.mxu0 %v17125_v1  ;;  %v10303_v51 = vpop.permute.xlu0 %10302  ;;  %vm19780_vm5 = vmmov %vm19776_vm3 }
0x183d   : > { %v10305_v38 = vpop.permute.xlu1 %10304  ;;  %vm19781_vm8 = vmmov %vm19776_vm3 }
0x183e   : > { %vm19782_vm9 = vmmov %vm19778_vm4 }
0x183f   : > { %13481 = vmatmul.mubr.msk.bf16.vlgmr.msra.gmra.mrb[184].mxu1 %vm19763_vm15, %v9989_v50  ;;  %vm19775_vm15 = vmmov %vm19771_vm11 }
0x1840   : > { %10110 = vmatpush1.bf16.msra.mxu1 %v10101_v34  ;;  %10141 = vmatprep.mubr.bf16.mxu1 %v17123_v0  ;;  %v10307_v41 = vpop.permute.xlu0 %10306  ;;  %v10308_v44 = vsel %vm19775_vm15, %v10303_v51, %v10305_v38  ;;  %vm19786_vm13 = vmmov %vm19778_vm4 }
0x1841   : > { %13486 = vmatprep.subr.msk.bf16.mxu1 %vm19753_vm1, %v10202_v8  ;;  %v10410_v23 = vpop.permute.xlu1 %10409  ;;  %v10309_v39 = vsel %vm19771_vm11, %v10305_v38, %v10307_v41  ;;  %v10315_v54 = vsel %vm19776_vm3, %v10308_v44, 0  ;;  %vm19777_vm1 = vmmov %vm19771_vm11  ;;  %v10627_v38 = vld [vmem:[#allocation37 + $0x4] sm:$0xf] }
0x1842   : > { %14965 = vmatmul.mubr.msk.bf16.vlgmr.msra.gmra.mrb[232].mxu0 %vm19766_vm2, %v9989_v50  ;;  %v10310_v32 = vsel %vm19777_vm1, %v10307_v41, %v18016_v19  ;;  %vm19779_vm2 = vcmask 891904   ;;  %vm19784_vm11 = vmmov %vm19776_vm3 }
0x1843   : > { %14969 = vmatpush3.bf16.msra.mxu0 %v10107_v5  ;;  %14970 = vmatprep.mubr.msk.bf16.mxu0 %vm17126_vm0, %v17125_v1  ;;  %v10321_v53 = vsel %vm19781_vm8, %v10310_v32, 0  ;;  %vm19788_vm15 = vmmov %vm19776_vm3  ;;  %v10841_v32 = vld [vmem:[#allocation37 + $0xc] sm:$0xf] }
0x1844   : > { %14974 = vmatprep.subr.bf16.mxu0 %v17125_v1  ;;  %v10412_v12 = vpop.permute.xlu0 %10411  ;;  %vm19789_vm1 = vmmov %vm19778_vm4 }
0x1845   : > { %v10414_v48 = vpop.permute.xlu1 %10413  ;;  %vm19793_vm8 = vmmov %vm19789_vm1 }
0x1846   : > { %v10416_v37 = vsel %vm19779_vm2, %v10412_v12, %v10414_v48 }
0x1847   : > { %13484 = vmatmul.mubr.msk.bf16.vlgmr.msra.gmra.mrb[188].mxu1 %vm19770_vm10, %v10087_v40  ;;  %vm19783_vm10 = vmmov %vm19779_vm2 }
0x1848   : > { %10217 = vmatpush1.bf16.msra.mxu1 %v10208_v33  ;;  %10248 = vmatprep.mubr.bf16.mxu1 %v17123_v0  ;;  %v10522_v52 = vpop.permute.xlu0 %10521  ;;  %v10415_v56 = vsel %vm19783_vm10, %v10410_v23, %v10412_v12 }
0x1849   : > { %13489 = vmatprep.subr.msk.bf16.mxu1 %vm19772_vm12, %v10309_v39  ;;  %v10524_v55 = vpop.permute.xlu1 %10523  ;;  %v10422_v18 = vsel %vm19784_vm11, %v10415_v56, 0  ;;  %vm19785_vm12 = vmmov %vm19779_vm2  ;;  %v10734_v39 = vld [vmem:[#allocation37 + $0x8] sm:$0xf] }
0x184a   : > { %14971 = vmatmul.mubr.msk.bf16.vlgmr.msra.gmra.mrb[236].mxu0 %vm19774_vm14, %v10087_v40  ;;  %v10417_v58 = vsel %vm19785_vm12, %v10414_v48, %v18031_v29  ;;  %vm19787_vm14 = vcmask 154624   ;;  %vm19791_vm2 = vmmov %vm19776_vm3 }
0x184b   : > { %14975 = vmatpush3.bf16.msra.mxu0 %v10214_v28  ;;  %14976 = vmatprep.mubr.msk.bf16.mxu0 %vm17126_vm0, %v17125_v1  ;;  %v10528_v43 = vsel %vm19787_vm14, %v10522_v52, %v10524_v55  ;;  %v10428_v60 = vsel %vm19776_vm3, %v10417_v58, 0  ;;  %vm19795_vm10 = vmmov %vm19791_vm2 }
0x184c   : > { %14980 = vmatprep.subr.bf16.mxu0 %v17125_v1  ;;  %v10526_v45 = vpop.permute.xlu0 %10525  ;;  %vm19796_vm11 = vmmov %vm19791_vm2 }
0x184d   : > { %v10629_v46 = vpop.permute.xlu1 %10628  ;;  %vm19797_vm12 = vmmov %vm19789_vm1 }
0x184e   : > { %vm19801_vm3 = vmmov %vm19789_vm1 }
0x184f   : > { %13487 = vmatmul.mubr.msk.bf16.vlgmr.msra.gmra.mrb[192].mxu1 %vm19778_vm4, %v10194_v47  ;;  %vm19790_vm4 = vmmov %vm19787_vm14 }
0x1850   : > { %10324 = vmatpush1.bf16.msra.mxu1 %v10315_v54  ;;  %10355 = vmatprep.mubr.bf16.mxu1 %v17123_v0  ;;  %v10631_v61 = vpop.permute.xlu0 %10630  ;;  %v10527_v4 = vsel %vm19790_vm4, %v17923_v15, %v10522_v52  ;;  %vm19799_vm14 = vmmov %vm19791_vm2 }
0x1851   : > { %13492 = vmatprep.subr.msk.bf16.mxu1 %vm19780_vm5, %v10416_v37  ;;  %v10534_v17 = vsel %vm19791_vm2, %v10527_v4, 0  ;;  %vm19792_vm5 = vmmov %vm19790_vm4  ;;  %v10633_v13 = vpop.permute.xlu1 %10632 }
0x1852   : > { %14977 = vmatmul.mubr.msk.bf16.vlgmr.msra.gmra.mrb[240].mxu0 %vm19782_vm9, %v10194_v47  ;;  %v10529_v6 = vsel %vm19792_vm5, %v10524_v55, %v10526_v45  ;;  %vm19794_vm9 = vcmask 146432   ;;  %vm19803_vm4 = vmmov %vm19791_vm2 }
0x1853   : > { %14981 = vmatpush3.bf16.msra.mxu0 %v10321_v53  ;;  %14982 = vmatprep.mubr.msk.bf16.mxu0 %vm17126_vm0, %v17125_v1  ;;  %v10635_v24 = vsel %vm19794_vm9, %v10629_v46, %v10631_v61  ;;  %v10540_v10 = vsel %vm19796_vm11, %v10529_v6, 0  ;;  %vm19804_vm5 = vmmov %vm19801_vm3 }
0x1854   : > { %14986 = vmatprep.subr.bf16.mxu0 %v17125_v1  ;;  %v10736_v14 = vpop.permute.xlu0 %10735  ;;  %vm19808_vm11 = vmmov %vm19801_vm3 }
0x1855   : > { %v10738_v2 = vpop.permute.xlu1 %10737 }
0x1857   : > { %13490 = vmatmul.mubr.msk.bf16.vlgmr.msra.gmra.mrb[196].mxu1 %vm19786_vm13, %v10301_v57  ;;  %vm19798_vm13 = vmmov %vm19794_vm9 }
0x1858   : > { %10431 = vmatpush1.bf16.msra.mxu1 %v10422_v18  ;;  %10462 = vmatprep.mubr.bf16.mxu1 %v17123_v0  ;;  %v10634_v22 = vsel %vm19798_vm13, %v17916_v9, %v10629_v46  ;;  %v10740_v50 = vpop.permute.xlu0 %10739  ;;  %vm19810_vm13 = vmmov %vm19791_vm2 }
0x1859   : > { %13495 = vmatprep.subr.msk.bf16.mxu1 %vm19788_vm15, %v10528_v43  ;;  %v10641_v49 = vsel %vm19799_vm14, %v10634_v22, 0  ;;  %vm19800_vm15 = vmmov %vm19794_vm9  ;;  %v10843_v11 = vpop.permute.xlu1 %10842 }
0x185a   : > { %14983 = vmatmul.mubr.msk.bf16.vlgmr.msra.gmra.mrb[244].mxu0 %vm19789_vm1, %v10301_v57  ;;  %v10636_v21 = vsel %vm19800_vm15, %v10631_v61, %v10633_v13  ;;  %vm19802_vm1 = vcmask 138240   ;;  %vm19806_vm9 = vmmov %vm19791_vm2  ;;  %v10848_v23 = vsel %vm1882_vm6, %v17951_v35, %v10843_v11  ;;  %v10948_v57 = vld [vmem:[#allocation37 + $0x10] sm:$0xf]  ;;  %v11046_v61 = vld [vmem:[#allocation37 + $0x14] sm:$0xf] }
0x185b   : > { %14987 = vmatpush3.bf16.msra.mxu0 %v10428_v60  ;;  %14988 = vmatprep.mubr.msk.bf16.mxu0 %vm17126_vm0, %v17125_v1  ;;  %v10742_v51 = vsel %vm19802_vm1, %v10736_v14, %v10738_v2  ;;  %v10647_v34 = vsel %vm19791_vm2, %v10636_v21, 0  ;;  %vm19811_vm14 = vmmov %vm19801_vm3 }
0x185c   : > { %14992 = vmatprep.subr.bf16.mxu0 %v17125_v1  ;;  %v10845_v5 = vpop.permute.xlu0 %10844  ;;  %vm19812_vm15 = vmmov %vm19791_vm2 }
0x185d   : > { %v10849_v40 = vsel %vm1882_vm6, %v10843_v11, %v10845_v5  ;;  %v10847_v33 = vpop.permute.xlu1 %10846  ;;  %v10855_v28 = vsel %vm19812_vm15, %v10848_v23, 0 }
0x185e   : > { %v10850_v44 = vsel %vm1882_vm6, %v10845_v5, %v10847_v33  ;;  %v11367_v5 = vld [vmem:[#allocation37 + $0x20] sm:$0xf] }
0x185f   : > { %13493 = vmatmul.mubr.msk.bf16.vlgmr.msra.gmra.mrb[200].mxu1 %vm19793_vm8, %v10408_v16  ;;  %vm19805_vm8 = vmmov %vm19802_vm1 }
0x1860   : > { %10543 = vmatpush1.bf16.msra.mxu1 %v10534_v17  ;;  %10574 = vmatprep.mubr.bf16.mxu1 %v17123_v0  ;;  %v10741_v8 = vsel %vm19805_vm8, %v17936_v25, %v10736_v14  ;;  %v11048_v12 = vpop.permute.xlu0 %11047 }
0x1861   : > { %13498 = vmatprep.subr.msk.bf16.mxu1 %vm19795_vm10, %v10635_v24  ;;  %v10748_v41 = vsel %vm19806_vm9, %v10741_v8, 0  ;;  %vm19807_vm10 = vmmov %vm19802_vm1  ;;  %v11050_v47 = vpop.permute.xlu1 %11049 }
0x1862   : > { %14989 = vmatmul.mubr.msk.bf16.vlgmr.msra.gmra.mrb[248].mxu0 %vm19797_vm12, %v10408_v16  ;;  %v10743_v42 = vsel %vm19807_vm10, %v10738_v2, %v10740_v50  ;;  %vm19809_vm12 = vmmov %vm19791_vm2 }
0x1863   : > { %14993 = vmatpush3.bf16.msra.mxu0 %v10540_v10  ;;  %14994 = vmatprep.mubr.msk.bf16.mxu0 %vm17126_vm0, %v17125_v1  ;;  %v10754_v31 = vsel %vm19810_vm13, %v10743_v42, 0  ;;  %vm19813_vm1 = vmmov %vm19791_vm2  ;;  %v11153_v10 = vld [vmem:[#allocation37 + $0x18] sm:$0xf] }
0x1864   : > { %14998 = vmatprep.subr.bf16.mxu0 %v17125_v1  ;;  %vm19815_vm2 = vmmov %vm19801_vm3  ;;  %v11052_v54 = vpop.permute.xlu0 %11051 }
0x1865   : > { %v11155_v52 = vpop.permute.xlu1 %11154  ;;  %vm19817_vm8 = vmmov %vm19813_vm1  ;;  %v11055_v18 = vsel %vm2090_vm7, %v11052_v54, %v17986_v59 }
0x1866   : > { %v10953_v37 = vsel %vm19817_vm8, %v19063_v63, 0  ;;  %vm19818_vm9 = vmmov %vm19813_vm1  ;;  %v11053_v63 = vsel %vm2090_vm7, %v11048_v12, %v11050_v47 }
0x1867   : > { %13496 = vmatmul.mubr.msk.bf16.vlgmr.msra.gmra.mrb[204].mxu1 %vm19801_vm3, %v10517_v26  ;;  %vm19819_vm10 = vmmov %vm19815_vm2 }
0x1868   : > { %10650 = vmatpush1.bf16.msra.mxu1 %v10641_v49  ;;  %10681 = vmatprep.mubr.bf16.mxu1 %v17123_v0  ;;  %v11157_v53 = vpop.permute.xlu0 %11156  ;;  %vm19822_vm13 = vmmov %vm19815_vm2 }
0x1869   : > { %13501 = vmatprep.subr.msk.bf16.mxu1 %vm19803_vm4, %v10742_v51  ;;  %vm19814_vm4 = vmmov %vm19813_vm1  ;;  %v11159_v56 = vpop.permute.xlu1 %11158 }
0x186a   : > { %14995 = vmatmul.mubr.msk.bf16.vlgmr.msra.gmra.mrb[252].mxu0 %vm19804_vm5, %v10517_v26  ;;  %v10861_v48 = vsel %vm19814_vm4, %v10850_v44, 0  ;;  %vm19816_vm5 = vmmov %vm19815_vm2 }
0x186b   : > { %14999 = vmatpush3.bf16.msra.mxu0 %v10647_v34  ;;  %15000 = vmatprep.mubr.msk.bf16.mxu0 %vm17126_vm0, %v17125_v1  ;;  %vm19824_vm15 = vmmov %vm19813_vm1  ;;  %v11260_v34 = vld [vmem:[#allocation37 + $0x1c] sm:$0xf] }
0x186c   : > { %15004 = vmatprep.subr.bf16.mxu0 %v17125_v1  ;;  %v11262_v58 = vpop.permute.xlu0 %11261 }
0x186d   : > { %v11264_v43 = vpop.permute.xlu1 %11263 }
0x186f   : > { %13499 = vmatmul.mubr.msk.bf16.vlgmr.msra.gmra.mrb[208].mxu1 %vm19808_vm11, %v10627_v38  ;;  %vm19820_vm11 = vmmov %vm19813_vm1 }
0x1870   : > { %10757 = vmatpush1.bf16.msra.mxu1 %v10748_v41  ;;  %10788 = vmatprep.mubr.bf16.mxu1 %v17123_v0  ;;  %v10959_v55 = vsel %vm19820_vm11, %v19075_v30, 0  ;;  %v11266_v4 = vpop.permute.xlu0 %11265 }
0x1871   : > { %13504 = vmatprep.subr.msk.bf16.mxu1 %vm19809_vm12, %v10849_v40  ;;  %vm19821_vm12 = vmmov %vm19813_vm1  ;;  %v11369_v6 = vpop.permute.xlu1 %11368 }
0x1872   : > { %15001 = vmatmul.mubr.msk.bf16.vlgmr.msra.gmra.mrb[0].mxu0 %vm19811_vm14, %v10627_v38  ;;  %v11060_v45 = vsel %vm19821_vm12, %v11053_v63, 0  ;;  %vm19823_vm14 = vcmask 908288  }
0x1873   : > { %15005 = vmatpush3.bf16.msra.mxu0 %v10754_v31  ;;  %15006 = vmatprep.mubr.msk.bf16.mxu0 %vm17126_vm0, %v17125_v1  ;;  %v11161_v30 = vsel %vm19823_vm14, %v11157_v53, %v11159_v56  ;;  %vm19827_vm4 = vmmov %vm19823_vm14 }
0x1874   : > { %15010 = vmatprep.subr.bf16.mxu0 %v17125_v1  ;;  %v11160_v60 = vsel %vm19827_vm4, %v11155_v52, %v11157_v53  ;;  %v11371_v22 = vpop.permute.xlu0 %11370 }
0x1875   : > { %v11373_v26 = vpop.permute.xlu1 %11372 }
0x1877   : > { %13502 = vmatmul.mubr.msk.bf16.vlgmr.msra.gmra.mrb[212].mxu1 %vm19801_vm3, %v10734_v39  ;;  %vm19825_vm3 = vmmov %vm19813_vm1 }
0x1878   : > { %10864 = vmatpush1.bf16.msra.mxu1 %v10855_v28  ;;  %10895 = vmatprep.mubr.bf16.mxu1 %v17123_v0  ;;  %v11066_v46 = vsel %vm19825_vm3, %v11055_v18, 0 }
0x1879   : > { %13507 = vmatprep.subr.msk.bf16.mxu1 %vm19813_vm1, %v19067_v3  ;;  %v11054_v3 = vsel %vm2090_vm7, %v11050_v47, %v11052_v54  ;;  %vm19826_vm1 = vmmov %vm19815_vm2 }
0x187a   : > { %15007 = vmatmul.mubr.msk.bf16.vlgmr.msra.gmra.mrb[4].mxu0 %vm19815_vm2, %v10734_v39  ;;  %vm19828_vm2 = vmmov %vm19825_vm3 }
0x187b   : > { %15011 = vmatpush3.bf16.msra.mxu0 %v10861_v48  ;;  %15012 = vmatprep.mubr.msk.bf16.mxu0 %vm17126_vm0, %v17125_v1  ;;  %v11167_v16 = vsel %vm19828_vm2, %v11160_v60, 0  ;;  %vm19830_vm8 = vmmov %vm19826_vm1 }
0x187c   : > { %15016 = vmatprep.subr.bf16.mxu0 %v17125_v1  ;;  %vm19833_vm11 = vmmov %vm19828_vm2 }
0x187d   : > { %vm19834_vm12 = vmmov %vm19826_vm1 }
0x187e   : > { %vm19836_vm14 = vmmov %vm19828_vm2 }
0x187f   : > { %13505 = vmatmul.mubr.msk.bf16.vlgmr.msra.gmra.mrb[216].mxu1 %vm19816_vm5, %v10841_v32  ;;  %vm19829_vm5 = vmmov %vm19827_vm4 }
0x1880   : > { %10962 = vmatpush1.bf16.msra.mxu1 %v10953_v37  ;;  %10993 = vmatprep.mubr.bf16.mxu1 %v17123_v0  ;;  %v11162_v17 = vsel %vm19829_vm5, %v11159_v56, %v18001_v7  ;;  %vm19838_vm3 = vmmov %vm19826_vm1 }
0x1881   : > { %13510 = vmatprep.subr.msk.bf16.mxu1 %vm19818_vm9, %v11054_v3  ;;  %vm19831_vm9 = vcmask 900096   ;;  %v11173_v24 = vsel %vm19833_vm11, %v11162_v17, 0  ;;  %vm19840_vm4 = vmmov %vm19828_vm2 }
0x1882   : > { %15013 = vmatmul.mubr.msk.bf16.vlgmr.msra.gmra.mrb[8].mxu0 %vm19819_vm10, %v10841_v32  ;;  %v11268_v13 = vsel %vm19831_vm9, %v11264_v43, %v11266_v4  ;;  %vm19832_vm10 = vmmov %vm19828_vm2 }
0x1883   : > { %15017 = vmatpush3.bf16.msra.mxu0 %v10959_v55  ;;  %15018 = vmatprep.mubr.msk.bf16.mxu0 %vm17126_vm0, %v17125_v1  ;;  %vm19841_vm5 = vmmov %vm19838_vm3 }
0x1884   : > { %15022 = vmatprep.subr.bf16.mxu0 %v17125_v1  ;;  %vm19845_vm11 = vmmov %vm19838_vm3 }
0x1887   : > { %13508 = vmatmul.mubr.msk.bf16.vlgmr.msra.gmra.mrb[220].mxu1 %vm19822_vm13, %v10948_v57  ;;  %vm19835_vm13 = vmmov %vm19831_vm9 }
0x1888   : > { %11069 = vmatpush1.bf16.msra.mxu1 %v11060_v45  ;;  %11100 = vmatprep.mubr.bf16.mxu1 %v17123_v0  ;;  %v11267_v14 = vsel %vm19835_vm13, %v11262_v58, %v11264_v43  ;;  %vm19847_vm13 = vmmov %vm19838_vm3 }
0x1889   : > { %13513 = vmatprep.subr.msk.bf16.mxu1 %vm19824_vm15, %v11161_v30  ;;  %v11274_v2 = vsel %vm19836_vm14, %v11267_v14, 0  ;;  %vm19837_vm15 = vmmov %vm19831_vm9 }
0x188a   : > { %15019 = vmatmul.mubr.msk.bf16.vlgmr.msra.gmra.mrb[12].mxu0 %vm19826_vm1, %v10948_v57  ;;  %v11269_v49 = vsel %vm19837_vm15, %v11266_v4, %v18016_v19  ;;  %vm19839_vm1 = vcmask 891904   ;;  %vm19843_vm9 = vmmov %vm19828_vm2 }
0x188b   : > { %15023 = vmatpush3.bf16.msra.mxu0 %v11066_v46  ;;  %15024 = vmatprep.mubr.msk.bf16.mxu0 %vm17126_vm0, %v17125_v1  ;;  %v11375_v21 = vsel %vm19839_vm1, %v11371_v22, %v11373_v26  ;;  %v11280_v50 = vsel %vm19828_vm2, %v11269_v49, 0  ;;  %vm19848_vm14 = vmmov %vm19838_vm3 }
0x188c   : > { %15028 = vmatprep.subr.bf16.mxu0 %v17125_v1  ;;  %vm19849_vm15 = vmmov %vm19838_vm3 }
0x188f   : > { %13511 = vmatmul.mubr.msk.bf16.vlgmr.msra.gmra.mrb[224].mxu1 %vm19830_vm8, %v11046_v61  ;;  %vm19842_vm8 = vmmov %vm19839_vm1 }
0x1890   : > { %11176 = vmatpush1.bf16.msra.mxu1 %v11167_v16  ;;  %11207 = vmatprep.mubr.bf16.mxu1 %v17123_v0  ;;  %v11374_v51 = vsel %vm19842_vm8, %v11369_v6, %v11371_v22 }
0x1891   : > { %13516 = vmatprep.subr.msk.bf16.mxu1 %vm19832_vm10, %v11268_v13  ;;  %v11381_v11 = vsel %vm19843_vm9, %v11374_v51, 0  ;;  %vm19844_vm10 = vmmov %vm19839_vm1  ;;  %vm19856_vm9 = vcmask 154624  }
0x1892   : > { %15025 = vmatmul.mubr.msk.bf16.vlgmr.msra.gmra.mrb[16].mxu0 %vm19834_vm12, %v11046_v61  ;;  %v11376_v8 = vsel %vm19844_vm10, %v11373_v26, %v18031_v29  ;;  %vm19846_vm12 = vmmov %vm19828_vm2 }
0x1893   : > { %15029 = vmatpush3.bf16.msra.mxu0 %v11173_v24  ;;  %15030 = vmatprep.mubr.msk.bf16.mxu0 %vm17126_vm0, %v17125_v1  ;;  %v11387_v38 = vsel %vm19846_vm12, %v11376_v8, 0  ;;  %vm19851_vm1 = vmmov %vm19828_vm2 }
0x1894   : > { %15034 = vmatprep.subr.bf16.mxu0 %v17125_v1  ;;  %vm19853_vm2 = vmmov %vm19851_vm1 }
0x1895   : > { %vm19855_vm8 = vmmov %vm19851_vm1 }
0x1896   : > { %vm19857_vm10 = vmmov %vm19845_vm11 }
0x1897   : > { %13514 = vmatmul.mubr.msk.bf16.vlgmr.msra.gmra.mrb[228].mxu1 %vm19838_vm3, %v11153_v10  ;;  %vm19850_vm3 = vcmask 146432   ;;  %vm19859_vm12 = vmmov %vm19851_vm1 }
0x1898   : > { %11283 = vmatpush1.bf16.msra.mxu1 %v11274_v2  ;;  %11314 = vmatprep.mubr.bf16.mxu1 %v17123_v0 }
0x1899   : > { %13519 = vmatprep.subr.msk.bf16.mxu1 %vm19840_vm4, %v11375_v21  ;;  %vm19852_vm4 = vmmov %vm19850_vm3 }
0x189a   : > { %15031 = vmatmul.mubr.msk.bf16.vlgmr.msra.gmra.mrb[20].mxu0 %vm19841_vm5, %v11153_v10  ;;  %vm19854_vm5 = vmmov %vm19850_vm3 }
0x189b   : > { %15035 = vmatpush3.bf16.msra.mxu0 %v11280_v50  ;;  %15036 = vmatprep.mubr.msk.bf16.mxu0 %vm17126_vm0, %v17125_v1 }
0x189c   : > { %15040 = vmatprep.subr.bf16.mxu0 %v17125_v1 }
0x189f   : > { %13517 = vmatmul.mubr.msk.bf16.vlgmr.msra.gmra.mrb[232].mxu1 %vm19845_vm11, %v11260_v34  ;;  %vm19858_vm11 = vmmov %vm19856_vm9 }
0x18a0   : > { %11390 = vmatpush1.bf16.msra.mxu1 %v11381_v11  ;;  %11421 = vmatprep.mubr.bf16.mxu1 %v17123_v0 }
0x18a2   : > { %15037 = vmatmul.mubr.msk.bf16.vlgmr.msra.gmra.mrb[24].mxu0 %vm19847_vm13, %v11260_v34  ;;  %vm19860_vm13 = vmmov %vm19856_vm9 }
0x18a3   : > { %15041 = vmatpush3.bf16.msra.mxu0 %v11387_v38  ;;  %15042 = vmatprep.mubr.msk.bf16.mxu0 %vm17126_vm0, %v17125_v1 }
0x18a4   : > { %15046 = vmatprep.subr.bf16.mxu0 %v17125_v1 }
0x18a7   : > { %13520 = vmatmul.mubr.msk.bf16.vlgmr.msra.gmra.mrb[236].mxu1 %vm19848_vm14, %v11367_v5  ;;  %vm19861_vm14 = vmmov %vm19857_vm10 }
0x18a8   : > { %11550 = vmatprep.mubr.bf16.mxu1 %v17123_v0 }
0x18aa   : > { %15043 = vmatmul.mubr.msk.bf16.vlgmr.msra.gmra.mrb[28].mxu0 %vm19849_vm15, %v11367_v5  ;;  %vm19862_vm15 = vmmov %vm19851_vm1 }
0x18ab   : > { %15048 = vmatprep.mubr.msk.bf16.mxu0 %vm17126_vm0, %v17125_v1 }
0x18f2   : > { %v9625_v41 = vpop.f32.mrb[168].mxu1 }
0x18f3   : > { %v9627_v42 = vpop.f32.mrb[169].mxu1 }
0x18f4   : > { %v9629_v40 = vpop.f32.mrb[170].mxu1 }
0x18f5   : > { %v9630_v33 = vpop.f32.mrb[171].mxu1  ;;  %v9666_v31 = vpop.f32.mrb[216].mxu0 }
0x18f6   : > { %v14942_v23 = vpop.f32.mrb[217].mxu0 }
0x18f7   : > { %v9669_v39 = vpop.f32.mrb[218].mxu0 }
0x18f8   : > { %v14943_v12 = vpop.f32.mrb[219].mxu0 }
0x18fa   : > { %v9727_v28 = vpop.f32.mrb[172].mxu1 }
0x18fb   : > { %v9728_v44 = vadd.f32 %v9727_v28, %v9625_v41  ;;  %v9729_v47 = vpop.f32.mrb[173].mxu1 }
0x18fc   : > { %v9730_v48 = vadd.f32 %v9729_v47, %v9627_v42  ;;  %v9731_v54 = vpop.f32.mrb[174].mxu1 }
0x18fd   : > { %v9732_v32 = vpop.f32.mrb[175].mxu1  ;;  %v9768_v52 = vpop.f32.mrb[220].mxu0 }
0x18fe   : > { %v9769_v37 = vadd.f32 %v9768_v52, %v9666_v31  ;;  %v14948_v3 = vpop.f32.mrb[221].mxu0 }
0x18ff   : > { %v9771_v53 = vpop.f32.mrb[222].mxu0 }
0x1900   : > { %v14949_v55 = vpop.f32.mrb[223].mxu0 }
0x1902   : > { %v9831_v56 = vpop.f32.mrb[176].mxu1 }
0x1903   : > { %v9878_v63 = vadd.f32 %v9831_v56, %v9728_v44  ;;  %v9833_v57 = vpop.f32.mrb[177].mxu1 }
0x1904   : > { %v9879_v45 = vadd.f32 %v9833_v57, %v9730_v48  ;;  %v9835_v18 = vpop.f32.mrb[178].mxu1 }
0x1905   : > { %v9836_v58 = vpop.f32.mrb[179].mxu1  ;;  %v9872_v30 = vpop.f32.mrb[224].mxu0 }
0x1906   : > { %v9880_v43 = vadd.f32 %v9872_v30, %v9769_v37  ;;  %v14954_v46 = vpop.f32.mrb[225].mxu0 }
0x1907   : > { %v9875_v60 = vpop.f32.mrb[226].mxu0 }
0x1908   : > { %v14955_v61 = vpop.f32.mrb[227].mxu0 }
0x190a   : > { %v9938_v4 = vpop.f32.mrb[180].mxu1 }
0x190b   : > { %v9985_v16 = vadd.f32 %v9938_v4, %v9878_v63  ;;  %v9940_v17 = vpop.f32.mrb[181].mxu1 }
0x190c   : > { %v9986_v6 = vadd.f32 %v9940_v17, %v9879_v45  ;;  %v9942_v13 = vpop.f32.mrb[182].mxu1 }
0x190d   : > { %v9943_v24 = vpop.f32.mrb[183].mxu1  ;;  %v9979_v14 = vpop.f32.mrb[228].mxu0 }
0x190e   : > { %v9987_v10 = vadd.f32 %v9979_v14, %v9880_v43  ;;  %v14960_v22 = vpop.f32.mrb[229].mxu0 }
0x190f   : > { %v9982_v26 = vpop.f32.mrb[230].mxu0 }
0x1910   : > { %v14961_v2 = vpop.f32.mrb[231].mxu0 }
0x1912   : > { %v10036_v49 = vpop.f32.mrb[184].mxu1 }
0x1913   : > { %v10083_v21 = vadd.f32 %v10036_v49, %v9985_v16  ;;  %v10038_v50 = vpop.f32.mrb[185].mxu1 }
0x1914   : > { %v10084_v51 = vadd.f32 %v10038_v50, %v9986_v6  ;;  %v10040_v34 = vpop.f32.mrb[186].mxu1 }
0x1915   : > { %v10041_v11 = vpop.f32.mrb[187].mxu1  ;;  %v10077_v8 = vpop.f32.mrb[232].mxu0 }
0x1916   : > { %v10085_v38 = vadd.f32 %v10077_v8, %v9987_v10  ;;  %v14966_v5 = vpop.f32.mrb[233].mxu0 }
0x1917   : > { %v10080_v41 = vpop.f32.mrb[234].mxu0 }
0x1918   : > { %v14967_v42 = vpop.f32.mrb[235].mxu0 }
0x191a   : > { %v10143_v40 = vpop.f32.mrb[188].mxu1 }
0x191b   : > { %v10190_v33 = vadd.f32 %v10143_v40, %v10083_v21  ;;  %v10145_v31 = vpop.f32.mrb[189].mxu1 }
0x191c   : > { %v10191_v23 = vadd.f32 %v10145_v31, %v10084_v51  ;;  %v10147_v39 = vpop.f32.mrb[190].mxu1 }
0x191d   : > { %v10148_v12 = vpop.f32.mrb[191].mxu1  ;;  %v10184_v28 = vpop.f32.mrb[236].mxu0 }
0x191e   : > { %v10192_v44 = vadd.f32 %v10184_v28, %v10085_v38  ;;  %v14972_v47 = vpop.f32.mrb[237].mxu0 }
0x191f   : > { %v10187_v48 = vpop.f32.mrb[238].mxu0 }
0x1920   : > { %v14973_v54 = vpop.f32.mrb[239].mxu0 }
0x1922   : > { %v10250_v32 = vpop.f32.mrb[192].mxu1 }
0x1923   : > { %v10297_v52 = vadd.f32 %v10250_v32, %v10190_v33  ;;  %v10252_v37 = vpop.f32.mrb[193].mxu1 }
0x1924   : > { %v10298_v3 = vadd.f32 %v10252_v37, %v10191_v23  ;;  %v10254_v53 = vpop.f32.mrb[194].mxu1 }
0x1925   : > { %v10255_v55 = vpop.f32.mrb[195].mxu1  ;;  %v10291_v56 = vpop.f32.mrb[240].mxu0 }
0x1926   : > { %v10299_v63 = vadd.f32 %v10291_v56, %v10192_v44  ;;  %v14978_v57 = vpop.f32.mrb[241].mxu0 }
0x1927   : > { %v10294_v45 = vpop.f32.mrb[242].mxu0 }
0x1928   : > { %v14979_v18 = vpop.f32.mrb[243].mxu0 }
0x192a   : > { %v10357_v58 = vpop.f32.mrb[196].mxu1 }
0x192b   : > { %v10404_v30 = vadd.f32 %v10357_v58, %v10297_v52  ;;  %v10359_v43 = vpop.f32.mrb[197].mxu1 }
0x192c   : > { %v10405_v46 = vadd.f32 %v10359_v43, %v10298_v3  ;;  %v10361_v60 = vpop.f32.mrb[198].mxu1 }
0x192d   : > { %v10362_v61 = vpop.f32.mrb[199].mxu1  ;;  %v10398_v4 = vpop.f32.mrb[244].mxu0 }
0x192e   : > { %v10406_v16 = vadd.f32 %v10398_v4, %v10299_v63  ;;  %v14984_v17 = vpop.f32.mrb[245].mxu0 }
0x192f   : > { %v10401_v6 = vpop.f32.mrb[246].mxu0 }
0x1930   : > { %v14985_v13 = vpop.f32.mrb[247].mxu0 }
0x1932   : > { %v10464_v24 = vpop.f32.mrb[200].mxu1 }
0x1933   : > { %v10511_v14 = vadd.f32 %v10464_v24, %v10404_v30  ;;  %v10466_v10 = vpop.f32.mrb[201].mxu1 }
0x1934   : > { %v10512_v22 = vadd.f32 %v10466_v10, %v10405_v46  ;;  %v10468_v26 = vpop.f32.mrb[202].mxu1 }
0x1935   : > { %v10469_v2 = vpop.f32.mrb[203].mxu1  ;;  %v10505_v49 = vpop.f32.mrb[248].mxu0 }
0x1936   : > { %v10513_v21 = vadd.f32 %v10505_v49, %v10406_v16  ;;  %v14990_v50 = vpop.f32.mrb[249].mxu0 }
0x1937   : > { %v10508_v51 = vpop.f32.mrb[250].mxu0 }
0x1938   : > { %v14991_v34 = vpop.f32.mrb[251].mxu0 }
0x193a   : > { %v10576_v11 = vpop.f32.mrb[204].mxu1 }
0x193b   : > { %v10623_v8 = vadd.f32 %v10576_v11, %v10511_v14  ;;  %v10578_v38 = vpop.f32.mrb[205].mxu1 }
0x193c   : > { %v10624_v5 = vadd.f32 %v10578_v38, %v10512_v22  ;;  %v10580_v41 = vpop.f32.mrb[206].mxu1 }
0x193d   : > { %v10581_v42 = vpop.f32.mrb[207].mxu1  ;;  %v10617_v40 = vpop.f32.mrb[252].mxu0 }
0x193e   : > { %v10625_v33 = vadd.f32 %v10617_v40, %v10513_v21  ;;  %v14996_v31 = vpop.f32.mrb[253].mxu0 }
0x193f   : > { %v10620_v23 = vpop.f32.mrb[254].mxu0 }
0x1940   : > { %v14997_v39 = vpop.f32.mrb[255].mxu0 }
0x1942   : > { %v10683_v12 = vpop.f32.mrb[208].mxu1 }
0x1943   : > { %v10730_v28 = vadd.f32 %v10683_v12, %v10623_v8  ;;  %v10685_v44 = vpop.f32.mrb[209].mxu1 }
0x1944   : > { %v10731_v47 = vadd.f32 %v10685_v44, %v10624_v5  ;;  %v10687_v48 = vpop.f32.mrb[210].mxu1 }
0x1945   : > { %v10688_v54 = vpop.f32.mrb[211].mxu1  ;;  %v10724_v32 = vpop.f32.mrb[0].mxu0 }
0x1946   : > { %v10732_v52 = vadd.f32 %v10724_v32, %v10625_v33  ;;  %v15002_v37 = vpop.f32.mrb[1].mxu0 }
0x1947   : > { %v10727_v3 = vpop.f32.mrb[2].mxu0 }
0x1948   : > { %v15003_v53 = vpop.f32.mrb[3].mxu0 }
0x194a   : > { %v10790_v55 = vpop.f32.mrb[212].mxu1 }
0x194b   : > { %v10837_v56 = vadd.f32 %v10790_v55, %v10730_v28  ;;  %v10792_v63 = vpop.f32.mrb[213].mxu1 }
0x194c   : > { %v10838_v57 = vadd.f32 %v10792_v63, %v10731_v47  ;;  %v10794_v45 = vpop.f32.mrb[214].mxu1 }
0x194d   : > { %v10795_v18 = vpop.f32.mrb[215].mxu1  ;;  %v10831_v58 = vpop.f32.mrb[4].mxu0 }
0x194e   : > { %v10839_v30 = vadd.f32 %v10831_v58, %v10732_v52  ;;  %v15008_v43 = vpop.f32.mrb[5].mxu0 }
0x194f   : > { %v10834_v46 = vpop.f32.mrb[6].mxu0 }
0x1950   : > { %v15009_v60 = vpop.f32.mrb[7].mxu0 }
0x1952   : > { %v10897_v61 = vpop.f32.mrb[216].mxu1 }
0x1953   : > { %v10944_v4 = vadd.f32 %v10897_v61, %v10837_v56  ;;  %v10899_v16 = vpop.f32.mrb[217].mxu1 }
0x1954   : > { %v10945_v17 = vadd.f32 %v10899_v16, %v10838_v57  ;;  %v10901_v6 = vpop.f32.mrb[218].mxu1 }
0x1955   : > { %v10902_v13 = vpop.f32.mrb[219].mxu1  ;;  %v10938_v24 = vpop.f32.mrb[8].mxu0 }
0x1956   : > { %v10946_v14 = vadd.f32 %v10938_v24, %v10839_v30  ;;  %v15014_v10 = vpop.f32.mrb[9].mxu0 }
0x1957   : > { %v10941_v22 = vpop.f32.mrb[10].mxu0  ;;  %v11477_v10 = vpop.permute.xlu0 %11476 }
0x1958   : > { %v15015_v26 = vpop.f32.mrb[11].mxu0 }
0x195a   : > { %v10995_v2 = vpop.f32.mrb[220].mxu1 }
0x195b   : > { %v11042_v49 = vadd.f32 %v10995_v2, %v10944_v4  ;;  %v10997_v21 = vpop.f32.mrb[221].mxu1 }
0x195c   : > { %v11043_v50 = vadd.f32 %v10997_v21, %v10945_v17  ;;  %v10999_v51 = vpop.f32.mrb[222].mxu1 }
0x195d   : > { %v11000_v34 = vpop.f32.mrb[223].mxu1  ;;  %v11036_v11 = vpop.f32.mrb[12].mxu0 }
0x195e   : > { %v11044_v8 = vadd.f32 %v11036_v11, %v10946_v14  ;;  %v15020_v38 = vpop.f32.mrb[13].mxu0 }
0x195f   : > { %v11039_v5 = vpop.f32.mrb[14].mxu0 }
0x1960   : > { %v15021_v41 = vpop.f32.mrb[15].mxu0 }
0x1962   : > { %v11102_v42 = vpop.f32.mrb[224].mxu1 }
0x1963   : > { %v11149_v40 = vadd.f32 %v11102_v42, %v11042_v49  ;;  %v11104_v33 = vpop.f32.mrb[225].mxu1 }
0x1964   : > { %v11150_v31 = vadd.f32 %v11104_v33, %v11043_v50  ;;  %v11106_v23 = vpop.f32.mrb[226].mxu1 }
0x1965   : > { %v11107_v39 = vpop.f32.mrb[227].mxu1  ;;  %v11143_v12 = vpop.f32.mrb[16].mxu0 }
0x1966   : > { %v11151_v28 = vadd.f32 %v11143_v12, %v11044_v8  ;;  %v15026_v44 = vpop.f32.mrb[17].mxu0 }
0x1967   : > { %v11146_v47 = vpop.f32.mrb[18].mxu0  ;;  %v12457_v44 = vld [vmem:[#allocation45] sm:$0x3] }
0x1968   : > { %v15027_v48 = vpop.f32.mrb[19].mxu0 }
0x196a   : > { %v11209_v54 = vpop.f32.mrb[228].mxu1 }
0x196b   : > { %v11256_v32 = vadd.f32 %v11209_v54, %v11149_v40  ;;  %v11211_v52 = vpop.f32.mrb[229].mxu1 }
0x196c   : > { %v11257_v37 = vadd.f32 %v11211_v52, %v11150_v31  ;;  %v11213_v3 = vpop.f32.mrb[230].mxu1 }
0x196d   : > { %v11214_v53 = vpop.f32.mrb[231].mxu1  ;;  %v11250_v55 = vpop.f32.mrb[20].mxu0  ;;  %v11493_v3 = vld [vmem:[#allocation40 + $0x4] sm:$0xf] }
0x196e   : > { %v11258_v56 = vadd.f32 %v11250_v55, %v11151_v28  ;;  %v15032_v63 = vpop.f32.mrb[21].mxu0  ;;  %v12441_v28 = vld [vmem:[#allocation42] sm:$0xff] }
0x196f   : > { %v11253_v57 = vpop.f32.mrb[22].mxu0 }
0x1970   : > { %v15033_v45 = vpop.f32.mrb[23].mxu0 }
0x1972   : > { %v11316_v18 = vpop.f32.mrb[232].mxu1 }
0x1973   : > { %v11363_v58 = vadd.f32 %v11316_v18, %v11256_v32  ;;  %v11318_v30 = vpop.f32.mrb[233].mxu1 }
0x1974   : > { %v11364_v43 = vadd.f32 %v11318_v30, %v11257_v37  ;;  %v11320_v46 = vpop.f32.mrb[234].mxu1 }
0x1975   : > { %v11321_v60 = vpop.f32.mrb[235].mxu1  ;;  %v11357_v61 = vpop.f32.mrb[24].mxu0 }
0x1976   : > { %v11365_v4 = vadd.f32 %v11357_v61, %v11258_v56  ;;  %v15038_v16 = vpop.f32.mrb[25].mxu0 }
0x1977   : > { %v11360_v17 = vpop.f32.mrb[26].mxu0 }
0x1978   : > { %v15039_v6 = vpop.f32.mrb[27].mxu0 }
0x197a   : > { %v11423_v13 = vpop.f32.mrb[236].mxu1 }
0x197b   : > { %v11470_v24 = vadd.f32 %v11423_v13, %v11363_v58  ;;  %v11425_v14 = vpop.f32.mrb[237].mxu1 }
0x197c   : > { %v11471_v22 = vadd.f32 %v11425_v14, %v11364_v43  ;;  %v11427_v26 = vpop.f32.mrb[238].mxu1  ;;  %v11491_v43 = vld [vmem:[#allocation40] sm:$0xf]  ;;  %v11702_v14 = vld [vmem:[#allocation40 + $0x8] sm:$0xf] }
0x197d   : > { %v11479_v2 = vadd.f32 %v11477_v10, %v11470_v24  ;;  %v11428_v49 = vpop.f32.mrb[239].mxu1  ;;  %v11464_v21 = vpop.f32.mrb[28].mxu0 }
0x197e   : > { %v11480_v50 = vadd.f32 %v11477_v10, %v11471_v22  ;;  %v11472_v51 = vadd.f32 %v11464_v21, %v11365_v4  ;;  %v15044_v34 = vpop.f32.mrb[29].mxu0 }
0x197f   : > { %v11482_v11 = vmax.f32 %v11479_v2, 0.0  ;;  %v11467_v8 = vpop.f32.mrb[30].mxu0 }
0x1980   : > { %v11483_v38 = vmax.f32 %v11480_v50, 0.0  ;;  %v11481_v5 = vadd.f32 %v11477_v10, %v11472_v51  ;;  %v15045_v41 = vpop.f32.mrb[31].mxu0  ;;  %v11809_v51 = vld [vmem:[#allocation40 + $0xc] sm:$0xf] }
0x1981   : > { %v11485_v42 = vmul.f32 %v11482_v11, %v18052_v20 }
0x1982   : > { %v11486_v40 = vmul.f32 %v11483_v38, %v18055_v27  ;;  %v11484_v33 = vmax.f32 %v11481_v5, 0.0 }
0x1983   : > { %v19355_v31 = vpack.c.bf16 %v11485_v42, %v11485_v42 }
0x1984   : > { %v19357_v23 = vpack.c.bf16 %v11486_v40, %v11486_v40  ;;  %v11487_v39 = vmul.f32 %v11484_v33, %v18058_v36  ;;  %v11916_v40 = vld [vmem:[#allocation40 + $0x10] sm:$0xf] }
0x1985   : > { %11497 = vrot.lane.b32.xlu1 %v19355_v31, %s19724_s0 }
0x1986   : > { %v19362_v12 = vpack.c.bf16 %v11487_v39, %v11487_v39  ;;  %11499 = vrot.lane.b32.xlu0 %v19357_v23, %s19724_s0 }
0x1989   : > { %11501 = vrot.lane.b32.xlu1 %v19362_v12, %s19724_s0 }
0x198a   : > { %11599 = vrot.lane.b32.xlu0 %v19355_v31, %s19725_s11 }
0x198d   : > { %11601 = vrot.lane.b32.xlu1 %v19357_v23, %s19725_s11 }
0x198e   : > { %11603 = vrot.lane.b32.xlu0 %v19362_v12, %s19725_s11 }
0x1991   : > { %11703 = vrot.lane.b32.xlu1 %v19355_v31, %s19726_s16 }
0x1992   : > { %11705 = vrot.lane.b32.xlu0 %v19357_v23, %s19726_s16 }
0x1995   : > { %11707 = vrot.lane.b32.xlu1 %v19362_v12, %s19726_s16 }
0x1996   : > { %11810 = vrot.lane.b32.xlu0 %v19355_v31, %s17129_s5 }
0x1999   : > { %11812 = vrot.lane.b32.xlu1 %v19357_v23, %s17129_s5 }
0x199a   : > { %11814 = vrot.lane.b32.xlu0 %v19362_v12, %s17129_s5 }
0x199d   : > { %12015 = vrot.lane.b32.xlu1 %v19355_v31, %s19722_s1 }
0x199e   : > { %12017 = vrot.lane.b32.xlu0 %v19357_v23, %s19722_s1 }
0x19a1   : > { %12019 = vrot.lane.b32.xlu1 %v19362_v12, %s19722_s1  ;;  %s15622_s1 = smul.u32 6, %s19919_s2 }
0x19a2   : > { %12122 = vrot.lane.b32.xlu0 %v19355_v31, %s19727_s13 }
0x19a3   : > { %s1530_s5 = scalar_lea.vmem %s17336_s30, %s15622_s1 }
0x19a5   : > { %12124 = vrot.lane.b32.xlu1 %v19357_v23, %s19727_s13 }
0x19a6   : > { %12126 = vrot.lane.b32.xlu0 %v19362_v12, %s19727_s13 }
0x19a9   : > { %12229 = vrot.lane.b32.xlu1 %v19355_v31, %s19728_s7 }
0x19aa   : > { %12231 = vrot.lane.b32.xlu0 %v19357_v23, %s19728_s7 }
0x19ad   : > { %12233 = vrot.lane.b32.xlu1 %v19362_v12, %s19728_s7 }
0x19ae   : > { %12336 = vrot.lane.b32.xlu0 %v19355_v31, %s19729_s8 }
0x19b1   : > { %12338 = vrot.lane.b32.xlu1 %v19357_v23, %s19729_s8 }
0x19b2   : > { %12340 = vrot.lane.b32.xlu0 %v19362_v12, %s19729_s8 }
0x19b5   : > { %12444 = vperm.xlu1 %16010, %v12441_v28  }
0x19b6   : > { %12460 = vperm.xlu0 %16009, %v12457_v44   ;;  %v12014_v44 = vld [vmem:[#allocation40 + $0x14] sm:$0xf] }
0x19f7   : > { %v11498_v47 = vpop.permute.xlu1 %11497 }
0x19f8   : > { %v11503_v48 = vsel %vm19850_vm3, %v17916_v9, %v11498_v47  ;;  %v11500_v54 = vpop.permute.xlu0 %11499  ;;  %vm19863_vm3 = vmmov %vm19851_vm1 }
0x19f9   : > { %v11510_v32 = vsel %vm19851_vm1, %v11503_v48, 0  ;;  %v11504_v52 = vsel %vm19852_vm4, %v11498_v47, %v11500_v54  ;;  %vm19864_vm1 = vcmask 138240   ;;  %vm19865_vm4 = vmmov %vm19853_vm2 }
0x19fa   : > { %13522 = vmatprep.subr.msk.bf16.mxu1 %vm19853_vm2, %v11504_v52  ;;  %vm19866_vm2 = vmmov %vm19864_vm1 }
0x19fb   : > { %v11502_v37 = vpop.permute.xlu1 %11501  ;;  %11519 = vmatpush1.bf16.msra.mxu1 %v11510_v32 }
0x19fc   : > { %v11505_v53 = vsel %vm19854_vm5, %v11500_v54, %v11502_v37  ;;  %v11600_v55 = vpop.permute.xlu0 %11599  ;;  %vm19867_vm5 = vmmov %vm19857_vm10 }
0x19fd   : > { %v11516_v56 = vsel %vm19855_vm8, %v11505_v53, 0  ;;  %v11605_v63 = vsel %vm19856_vm9, %v17923_v15, %v11600_v55  ;;  %vm19868_vm8 = vmmov %vm19863_vm3 }
0x19fe   : > { %13523 = vmatmul.mubr.msk.bf16.vlgmr.msra.gmra.mrb[240].mxu1 %vm19857_vm10, %v11493_v3  ;;  %15047 = vmatpush3.bf16.msra.mxu0 %v11516_v56  ;;  %v11612_v18 = vsel %vm19859_vm12, %v11605_v63, 0  ;;  %vm19869_vm9 = vmmov %vm19864_vm1 }
0x19ff   : > { %v11602_v9 = vpop.permute.xlu1 %11601  ;;  %15052 = vmatprep.subr.bf16.mxu0 %v17125_v1  ;;  %11652 = vmatprep.mubr.bf16.mxu1 %v17123_v0  ;;  %vm19870_vm10 = vmmov %vm19863_vm3 }
0x1a00   : > { %v11606_v57 = vsel %vm19858_vm11, %v11600_v55, %v11602_v9  ;;  %v11604_v45 = vpop.permute.xlu0 %11603  ;;  %vm19871_vm11 = vmmov %vm19867_vm5 }
0x1a01   : > { %v11607_v58 = vsel %vm19860_vm13, %v11602_v9, %v11604_v45  ;;  %15049 = vmatmul.mubr.msk.bf16.vlgmr.msra.gmra.mrb[32].mxu0 %vm19861_vm14, %v11493_v3  ;;  %13525 = vmatprep.subr.msk.bf16.mxu1 %vm19862_vm15, %v11606_v57  ;;  %vm19872_vm12 = vmmov %vm19863_vm3  ;;  %v12121_v3 = vld [vmem:[#allocation40 + $0x18] sm:$0xf] }
0x1a02   : > { %v11618_v15 = vsel %vm19863_vm3, %v11607_v58, 0  ;;  %11621 = vmatpush1.bf16.msra.mxu1 %v11612_v18  ;;  %15054 = vmatprep.mubr.msk.bf16.mxu0 %vm17126_vm0, %v17125_v1  ;;  %vm19873_vm13 = vmmov %vm19863_vm3 }
0x1a03   : > { %v11704_v30 = vpop.permute.xlu1 %11703  ;;  %15053 = vmatpush3.bf16.msra.mxu0 %v11618_v15  ;;  %vm19874_vm14 = vmmov %vm19867_vm5 }
0x1a04   : > { %v11709_v46 = vsel %vm19864_vm1, %v17936_v25, %v11704_v30  ;;  %v11706_v60 = vpop.permute.xlu0 %11705  ;;  %15058 = vmatprep.subr.bf16.mxu0 %v17125_v1  ;;  %vm19875_vm15 = vmmov %vm19863_vm3 }
0x1a05   : > { %v11716_v61 = vsel %vm19865_vm4, %v11709_v46, 0  ;;  %v11710_v4 = vsel %vm19866_vm2, %v11704_v30, %v11706_v60  ;;  %vm19876_vm1 = vmmov %vm19867_vm5  ;;  %v12335_v30 = vld [vmem:[#allocation40 + $0x20] sm:$0xf] }
0x1a06   : > { %13526 = vmatmul.mubr.msk.bf16.vlgmr.msra.gmra.mrb[244].mxu1 %vm19867_vm5, %v11491_v43  ;;  %13528 = vmatprep.subr.msk.bf16.mxu1 %vm19868_vm8, %v11710_v4  ;;  %vm19878_vm4 = vmmov %vm19863_vm3 }
0x1a07   : > { %v11708_v16 = vpop.permute.xlu1 %11707  ;;  %11725 = vmatpush1.bf16.msra.mxu1 %v11716_v61  ;;  %11756 = vmatprep.mubr.bf16.mxu1 %v17123_v0  ;;  %v11921_v11 = vsel %vm19878_vm4, %v19355_v31, 0  ;;  %vm19879_vm2 = vmmov %vm19863_vm3 }
0x1a08   : > { %v11711_v17 = vsel %vm19869_vm9, %v11706_v60, %v11708_v16  ;;  %v11811_v6 = vpop.permute.xlu0 %11810  ;;  %vm19880_vm5 = vmmov %vm19876_vm1 }
0x1a09   : > { %v11722_v25 = vsel %vm19870_vm10, %v11711_v17, 0  ;;  %15055 = vmatmul.mubr.msk.bf16.vlgmr.msra.gmra.mrb[36].mxu0 %vm19871_vm11, %v11491_v43  ;;  %v11816_v13 = vsel %vm1882_vm6, %v17951_v35, %v11811_v6  ;;  %vm19881_vm8 = vmmov %vm19879_vm2  ;;  %vm19884_vm11 = vcmask 908288  }
0x1a0a   : > { %15059 = vmatpush3.bf16.msra.mxu0 %v11722_v25  ;;  %15060 = vmatprep.mubr.msk.bf16.mxu0 %vm17126_vm0, %v17125_v1  ;;  %v11823_v26 = vsel %vm19873_vm13, %v11816_v13, 0  ;;  %v11927_v5 = vsel %vm19881_vm8, %v19362_v12, 0  ;;  %vm19882_vm9 = vmmov %vm19879_vm2 }
0x1a0b   : > { %v11813_v24 = vpop.permute.xlu1 %11812  ;;  %15064 = vmatprep.subr.bf16.mxu0 %v17125_v1  ;;  %vm19883_vm10 = vmmov %vm19876_vm1 }
0x1a0c   : > { %v11817_v10 = vsel %vm1882_vm6, %v11811_v6, %v11813_v24  ;;  %v11815_v22 = vpop.permute.xlu0 %11814  ;;  %vm19886_vm13 = vmmov %vm19879_vm2 }
0x1a0d   : > { %13531 = vmatprep.subr.msk.bf16.mxu1 %vm19872_vm12, %v11817_v10  ;;  %v11818_v2 = vsel %vm1882_vm6, %v11813_v24, %v11815_v22  ;;  %vm19877_vm6 = vmmov %vm19876_vm1 }
0x1a0e   : > { %13529 = vmatmul.mubr.msk.bf16.vlgmr.msra.gmra.mrb[248].mxu1 %vm19874_vm14, %v11702_v14  ;;  %v11829_v21 = vsel %vm19863_vm3, %v11818_v2, 0  ;;  %vm19885_vm12 = vmmov %vm19879_vm2 }
0x1a0f   : > { %11832 = vmatpush1.bf16.msra.mxu1 %v11823_v26  ;;  %v12016_v49 = vpop.permute.xlu1 %12015  ;;  %11863 = vmatprep.mubr.bf16.mxu1 %v17123_v0  ;;  %vm19887_vm14 = vmmov %vm19876_vm1 }
0x1a10   : > { %13534 = vmatprep.subr.msk.bf16.mxu1 %vm19875_vm15, %v19357_v23  ;;  %v12018_v35 = vpop.permute.xlu0 %12017  ;;  %vm19889_vm15 = vmmov %vm19879_vm2 }
0x1a11   : > { %15061 = vmatmul.mubr.msk.bf16.vlgmr.msra.gmra.mrb[40].mxu0 %vm19876_vm1, %v11702_v14  ;;  %v12021_v42 = vsel %vm2090_vm7, %v12016_v49, %v12018_v35  ;;  %vm19892_vm4 = vmmov %vm19879_vm2 }
0x1a12   : > { %15065 = vmatpush3.bf16.msra.mxu0 %v11829_v21  ;;  %15066 = vmatprep.mubr.msk.bf16.mxu0 %vm17126_vm0, %v17125_v1  ;;  %v12028_v33 = vsel %vm19882_vm9, %v12021_v42, 0  ;;  %vm19895_vm9 = vmmov %vm19879_vm2 }
0x1a13   : > { %v12020_v50 = vpop.permute.xlu1 %12019  ;;  %15070 = vmatprep.subr.bf16.mxu0 %v17125_v1 }
0x1a14   : > { %v12123_v34 = vpop.permute.xlu0 %12122  ;;  %v12022_v8 = vsel %vm2090_vm7, %v12018_v35, %v12020_v50  ;;  %v12023_v31 = vsel %vm2090_vm7, %v12020_v50, %v17986_v59  ;;  %vm19888_vm7 = vmmov %vm19884_vm11 }
0x1a15   : > { %v12034_v28 = vsel %vm19886_vm13, %v12023_v31, 0  ;;  %vm19890_vm3 = vmmov %vm19888_vm7 }
0x1a16   : > { %13532 = vmatmul.mubr.msk.bf16.vlgmr.msra.gmra.mrb[252].mxu1 %vm19877_vm6, %v11809_v51  ;;  %vm19891_vm6 = vcmask 900096   ;;  %vm19899_vm13 = vmmov %vm19879_vm2 }
0x1a17   : > { %11930 = vmatpush1.bf16.msra.mxu1 %v11921_v11  ;;  %11961 = vmatprep.mubr.bf16.mxu1 %v17123_v0  ;;  %v12125_v38 = vpop.permute.xlu1 %12124  ;;  %vm19894_vm8 = vmmov %vm19891_vm6 }
0x1a18   : > { %13537 = vmatprep.subr.msk.bf16.mxu1 %vm19879_vm2, %v12022_v8  ;;  %v12127_v41 = vpop.permute.xlu0 %12126  ;;  %v12128_v59 = vsel %vm19888_vm7, %v12123_v34, %v12125_v38  ;;  %vm19901_vm7 = vmmov %vm19876_vm1 }
0x1a19   : > { %15067 = vmatmul.mubr.msk.bf16.vlgmr.msra.gmra.mrb[44].mxu0 %vm19880_vm5, %v11809_v51  ;;  %v12129_v39 = vsel %vm19884_vm11, %v12125_v38, %v12127_v41  ;;  %v12135_v48 = vsel %vm19889_vm15, %v12128_v59, 0  ;;  %v12130_v54 = vsel %vm19890_vm3, %v12127_v41, %v18001_v7  ;;  %vm19893_vm5 = vmmov %vm19876_vm1 }
0x1a1a   : > { %15071 = vmatpush3.bf16.msra.mxu0 %v11927_v5  ;;  %15072 = vmatprep.mubr.msk.bf16.mxu0 %vm17126_vm0, %v17125_v1  ;;  %v12141_v37 = vsel %vm19879_vm2, %v12130_v54, 0  ;;  %vm19897_vm11 = vmmov %vm19876_vm1 }
0x1a1b   : > { %15076 = vmatprep.subr.bf16.mxu0 %v17125_v1  ;;  %v12230_v23 = vpop.permute.xlu1 %12229  ;;  %vm19903_vm3 = vmmov %vm19879_vm2 }
0x1a1c   : > { %v12232_v12 = vpop.permute.xlu0 %12231 }
0x1a1d   : > { %v12235_v7 = vsel %vm19894_vm8, %v12230_v23, %v12232_v12 }
0x1a1e   : > { %13535 = vmatmul.mubr.msk.bf16.vlgmr.msra.gmra.mrb[0].mxu1 %vm19883_vm10, %v11916_v40  ;;  %v12242_v56 = vsel %vm19895_vm9, %v12235_v7, 0  ;;  %vm19896_vm10 = vmmov %vm19891_vm6 }
0x1a1f   : > { %12037 = vmatpush1.bf16.msra.mxu1 %v12028_v33  ;;  %12068 = vmatprep.mubr.bf16.mxu1 %v17123_v0  ;;  %v12234_v47 = vpop.permute.xlu1 %12233 }
0x1a20   : > { %13540 = vmatprep.subr.msk.bf16.mxu1 %vm19885_vm12, %v12129_v39  ;;  %v12337_v32 = vpop.permute.xlu0 %12336  ;;  %v12236_v52 = vsel %vm19891_vm6, %v12232_v12, %v12234_v47  ;;  %v12237_v63 = vsel %vm19896_vm10, %v12234_v47, %v18016_v19  ;;  %vm19898_vm12 = vcmask 891904   ;;  %v12228_v19 = vld [vmem:[#allocation40 + $0x1c] sm:$0xf]  ;;  %vm19905_vm6 = vmmov %vm19893_vm5  ;;  %vm19912_vm10 = vcmask 1041408  }
0x1a21   : > { %15073 = vmatmul.mubr.msk.bf16.vlgmr.msra.gmra.mrb[48].mxu0 %vm19887_vm14, %v11916_v40  ;;  %vm19900_vm14 = vmmov %vm19879_vm2 }
0x1a22   : > { %15077 = vmatpush3.bf16.msra.mxu0 %v12034_v28  ;;  %15078 = vmatprep.mubr.msk.bf16.mxu0 %vm17126_vm0, %v17125_v1  ;;  %v12248_v57 = vsel %vm19900_vm14, %v12237_v63, 0  ;;  %vm19902_vm15 = vmmov %vm19898_vm12 }
0x1a23   : > { %15082 = vmatprep.subr.bf16.mxu0 %v17125_v1  ;;  %v12339_v53 = vpop.permute.xlu1 %12338  ;;  %vm19916_vm14 = vmmov %vm19912_vm10 }
0x1a24   : > { %v12341_v55 = vpop.permute.xlu0 %12340  ;;  %v12342_v45 = vsel %vm19902_vm15, %v12337_v32, %v12339_v53 }
0x1a25   : > { %v12343_v9 = vsel %vm19898_vm12, %v12339_v53, %v12341_v55  ;;  %v12349_v18 = vsel %vm19903_vm3, %v12342_v45, 0 }
0x1a26   : > { %13538 = vmatmul.mubr.msk.bf16.vlgmr.msra.gmra.mrb[4].mxu1 %vm19876_vm1, %v12014_v44  ;;  %vm19904_vm1 = vmmov %vm19898_vm12 }
0x1a27   : > { %12144 = vmatpush1.bf16.msra.mxu1 %v12135_v48  ;;  %12175 = vmatprep.mubr.bf16.mxu1 %v17123_v0  ;;  %v12344_v58 = vsel %vm19904_vm1, %v12341_v55, %v18031_v29  ;;  %vm19914_vm12 = vmmov %vm19912_vm10 }
0x1a28   : > { %13543 = vmatprep.subr.msk.bf16.mxu1 %vm19892_vm4, %v12236_v52  ;;  %vm19906_vm4 = vmmov %vm19879_vm2 }
0x1a29   : > { %15079 = vmatmul.mubr.msk.bf16.vlgmr.msra.gmra.mrb[52].mxu0 %vm19893_vm5, %v12014_v44  ;;  %v12355_v15 = vsel %vm19906_vm4, %v12344_v58, 0  ;;  %vm19907_vm2 = vmmov %vm19893_vm5 }
0x1a2a   : > { %15083 = vmatpush3.bf16.msra.mxu0 %v12141_v37  ;;  %15084 = vmatprep.mubr.msk.bf16.mxu0 %vm17126_vm0, %v17125_v1  ;;  %vm19908_vm5 = vmmov %vm19907_vm2 }
0x1a2b   : > { %15088 = vmatprep.subr.bf16.mxu0 %v17125_v1  ;;  %vm19909_vm8 = vmmov %vm19907_vm2 }
0x1a2e   : > { %13541 = vmatmul.mubr.msk.bf16.vlgmr.msra.gmra.mrb[8].mxu1 %vm19897_vm11, %v12121_v3  ;;  %vm19913_vm11 = vmmov %vm19912_vm10 }
0x1a2f   : > { %12251 = vmatpush1.bf16.msra.mxu1 %v12242_v56  ;;  %12282 = vmatprep.mubr.bf16.mxu1 %v17123_v0 }
0x1a30   : > { %13546 = vmatprep.subr.msk.bf16.mxu1 %vm19899_vm13, %v12343_v9  ;;  %vm19915_vm13 = vmmov %vm19912_vm10 }
0x1a31   : > { %15085 = vmatmul.mubr.msk.bf16.vlgmr.msra.gmra.mrb[56].mxu0 %vm19901_vm7, %v12121_v3  ;;  %vm19917_vm7 = vmmov %vm19912_vm10 }
0x1a32   : > { %15089 = vmatpush3.bf16.msra.mxu0 %v12248_v57  ;;  %15090 = vmatprep.mubr.msk.bf16.mxu0 %vm17126_vm0, %v17125_v1 }
0x1a33   : > { %15094 = vmatprep.subr.bf16.mxu0 %v17125_v1 }
0x1a36   : > { %13544 = vmatmul.mubr.msk.bf16.vlgmr.msra.gmra.mrb[12].mxu1 %vm19905_vm6, %v12228_v19 }
0x1a37   : > { %12358 = vmatpush1.bf16.msra.mxu1 %v12349_v18  ;;  %12389 = vmatprep.mubr.bf16.mxu1 %v17123_v0 }
0x1a39   : > { %15091 = vmatmul.mubr.msk.bf16.vlgmr.msra.gmra.mrb[60].mxu0 %vm19907_vm2, %v12228_v19 }
0x1a3a   : > { %15095 = vmatpush3.bf16.msra.mxu0 %v12355_v15  ;;  %15096 = vmatprep.mubr.msk.bf16.mxu0 %vm17126_vm0, %v17125_v1 }
0x1a3b   : > { %15100 = vmatprep.subr.mxu0 %v17125_v1 }
0x1a3e   : > { %13547 = vmatmul.mubr.msk.bf16.vlgmr.msra.gmra.mrb[16].mxu1 %vm19908_vm5, %v12335_v30 }
0x1a3f   : > { %12530 = vmatprep.mubr.f32.mxu1 %v17125_v1 }
0x1a41   : > { %15097 = vmatmul.mubr.msk.bf16.vlgmr.msra.gmra.mrb[64].mxu0 %vm19909_vm8, %v12335_v30 }
0x1a42   : > { %15102 = vmatprep.mubr.msk.f32.mxu0 %vm17126_vm0, %v17125_v1  ;;  %vm19910_vm0 = vmmov %vm19907_vm2 }
0x1a43   : > { %vm19911_vm9 = vmmov %vm19910_vm0 }
0x1ad1   : > { %v11552_v0 = vpop.f32.mrb[240].mxu1 }
0x1ad2   : > { %v11554_v29 = vpop.f32.mrb[241].mxu1 }
0x1ad3   : > { %v11556_v43 = vpop.f32.mrb[242].mxu1 }
0x1ad4   : > { %v11557_v46 = vpop.f32.mrb[243].mxu1  ;;  %v11593_v60 = vpop.f32.mrb[32].mxu0 }
0x1ad5   : > { %v15050_v61 = vpop.f32.mrb[33].mxu0 }
0x1ad6   : > { %v11596_v4 = vpop.f32.mrb[34].mxu0 }
0x1ad7   : > { %v15051_v16 = vpop.f32.mrb[35].mxu0 }
0x1ad9   : > { %v11654_v17 = vpop.f32.mrb[244].mxu1 }
0x1ada   : > { %v11655_v6 = vadd.f32 %v11654_v17, %v11552_v0  ;;  %v11656_v25 = vpop.f32.mrb[245].mxu1 }
0x1adb   : > { %v11657_v13 = vadd.f32 %v11656_v25, %v11554_v29  ;;  %v11658_v24 = vpop.f32.mrb[246].mxu1 }
0x1adc   : > { %v11659_v14 = vpop.f32.mrb[247].mxu1  ;;  %v11695_v10 = vpop.f32.mrb[36].mxu0 }
0x1add   : > { %v11696_v22 = vadd.f32 %v11695_v10, %v11593_v60  ;;  %v15056_v26 = vpop.f32.mrb[37].mxu0 }
0x1ade   : > { %v11698_v2 = vpop.f32.mrb[38].mxu0 }
0x1adf   : > { %v15057_v49 = vpop.f32.mrb[39].mxu0 }
0x1ae1   : > { %v11758_v1 = vpop.f32.mrb[248].mxu1 }
0x1ae2   : > { %v11805_v35 = vadd.f32 %v11758_v1, %v11655_v6  ;;  %v11760_v21 = vpop.f32.mrb[249].mxu1 }
0x1ae3   : > { %v11806_v50 = vadd.f32 %v11760_v21, %v11657_v13  ;;  %v11762_v51 = vpop.f32.mrb[250].mxu1 }
0x1ae4   : > { %v11763_v34 = vpop.f32.mrb[251].mxu1  ;;  %v11799_v11 = vpop.f32.mrb[40].mxu0 }
0x1ae5   : > { %v11807_v8 = vadd.f32 %v11799_v11, %v11696_v22  ;;  %v15062_v38 = vpop.f32.mrb[41].mxu0 }
0x1ae6   : > { %v11802_v5 = vpop.f32.mrb[42].mxu0 }
0x1ae7   : > { %v15063_v41 = vpop.f32.mrb[43].mxu0  ;;  %v12445_v5 = vpop.permute.xlu1 %12444 }
0x1ae9   : > { %v11865_v42 = vpop.f32.mrb[252].mxu1 }
0x1aea   : > { %v11912_v40 = vadd.f32 %v11865_v42, %v11805_v35  ;;  %v11867_v33 = vpop.f32.mrb[253].mxu1 }
0x1aeb   : > { %v11913_v31 = vadd.f32 %v11867_v33, %v11806_v50  ;;  %v11869_v23 = vpop.f32.mrb[254].mxu1 }
0x1aec   : > { %v11870_v39 = vpop.f32.mrb[255].mxu1  ;;  %v11906_v12 = vpop.f32.mrb[44].mxu0 }
0x1aed   : > { %v11914_v28 = vadd.f32 %v11906_v12, %v11807_v8  ;;  %v15068_v59 = vpop.f32.mrb[45].mxu0 }
0x1aee   : > { %v11909_v44 = vpop.f32.mrb[46].mxu0 }
0x1aef   : > { %v15069_v47 = vpop.f32.mrb[47].mxu0 }
0x1af1   : > { %v11963_v48 = vpop.f32.mrb[0].mxu1 }
0x1af2   : > { %v12010_v54 = vadd.f32 %v11963_v48, %v11912_v40  ;;  %v11965_v32 = vpop.f32.mrb[1].mxu1 }
0x1af3   : > { %v12011_v52 = vadd.f32 %v11965_v32, %v11913_v31  ;;  %v11967_v37 = vpop.f32.mrb[2].mxu1 }
0x1af4   : > { %v11968_v7 = vpop.f32.mrb[3].mxu1  ;;  %v12004_v3 = vpop.f32.mrb[48].mxu0  ;;  %v12456_v37 = vld [vmem:[#allocation43] sm:$0x3] }
0x1af5   : > { %v12012_v53 = vadd.f32 %v12004_v3, %v11914_v28  ;;  %v15074_v55 = vpop.f32.mrb[49].mxu0  ;;  %v12461_v3 = vpop.permute.xlu0 %12460 }
0x1af6   : > { %v12007_v56 = vpop.f32.mrb[50].mxu0 }
0x1af7   : > { %v15075_v63 = vpop.f32.mrb[51].mxu0 }
0x1af9   : > { %v12070_v9 = vpop.f32.mrb[4].mxu1 }
0x1afa   : > { %v12117_v57 = vadd.f32 %v12070_v9, %v12010_v54  ;;  %v12072_v45 = vpop.f32.mrb[5].mxu1 }
0x1afb   : > { %v12118_v19 = vadd.f32 %v12072_v45, %v12011_v52  ;;  %v12074_v18 = vpop.f32.mrb[6].mxu1 }
0x1afc   : > { %v12075_v58 = vpop.f32.mrb[7].mxu1  ;;  %v12111_v15 = vpop.f32.mrb[52].mxu0 }
0x1afd   : > { %v12119_v30 = vadd.f32 %v12111_v15, %v12012_v53  ;;  %v15080_v0 = vpop.f32.mrb[53].mxu0 }
0x1afe   : > { %v12114_v29 = vpop.f32.mrb[54].mxu0 }
0x1aff   : > { %v15081_v43 = vpop.f32.mrb[55].mxu0 }
0x1b01   : > { %v12177_v46 = vpop.f32.mrb[8].mxu1 }
0x1b02   : > { %v12224_v60 = vadd.f32 %v12177_v46, %v12117_v57  ;;  %v12179_v61 = vpop.f32.mrb[9].mxu1 }
0x1b03   : > { %v12225_v4 = vadd.f32 %v12179_v61, %v12118_v19  ;;  %v12181_v16 = vpop.f32.mrb[10].mxu1 }
0x1b04   : > { %v12182_v17 = vpop.f32.mrb[11].mxu1  ;;  %v12218_v6 = vpop.f32.mrb[56].mxu0 }
0x1b05   : > { %v12226_v25 = vadd.f32 %v12218_v6, %v12119_v30  ;;  %v15086_v13 = vpop.f32.mrb[57].mxu0 }
0x1b06   : > { %v12221_v24 = vpop.f32.mrb[58].mxu0 }
0x1b07   : > { %v15087_v14 = vpop.f32.mrb[59].mxu0 }
0x1b09   : > { %v12284_v10 = vpop.f32.mrb[12].mxu1 }
0x1b0a   : > { %v12331_v22 = vadd.f32 %v12284_v10, %v12224_v60  ;;  %v12286_v26 = vpop.f32.mrb[13].mxu1 }
0x1b0b   : > { %v12332_v2 = vadd.f32 %v12286_v26, %v12225_v4  ;;  %v12288_v49 = vpop.f32.mrb[14].mxu1 }
0x1b0c   : > { %v12289_v1 = vpop.f32.mrb[15].mxu1  ;;  %v12325_v35 = vpop.f32.mrb[60].mxu0 }
0x1b0d   : > { %v12333_v21 = vadd.f32 %v12325_v35, %v12226_v25  ;;  %v15092_v50 = vpop.f32.mrb[61].mxu0 }
0x1b0e   : > { %v12328_v51 = vpop.f32.mrb[62].mxu0 }
0x1b0f   : > { %v15093_v34 = vpop.f32.mrb[63].mxu0 }
0x1b11   : > { %v12391_v11 = vpop.f32.mrb[16].mxu1 }
0x1b12   : > { %v12438_v8 = vadd.f32 %v12391_v11, %v12331_v22  ;;  %v12393_v38 = vpop.f32.mrb[17].mxu1 }
0x1b13   : > { %v12439_v41 = vadd.f32 %v12393_v38, %v12332_v2  ;;  %v12395_v42 = vpop.f32.mrb[18].mxu1 }
0x1b14   : > { %v12447_v40 = vadd.f32 %v12445_v5, %v12438_v8  ;;  %v12396_v33 = vpop.f32.mrb[19].mxu1  ;;  %v12432_v31 = vpop.f32.mrb[64].mxu0 }
0x1b15   : > { %v12448_v23 = vadd.f32 %v12445_v5, %v12439_v41  ;;  %v12440_v39 = vadd.f32 %v12432_v31, %v12333_v21  ;;  %v15098_v12 = vpop.f32.mrb[65].mxu0 }
0x1b16   : > { %v12450_v28 = vmax.f32 %v12447_v40, 0.0  ;;  %v12435_v59 = vpop.f32.mrb[66].mxu0 }
0x1b17   : > { %v12451_v44 = vmax.f32 %v12448_v23, 0.0  ;;  %v12449_v47 = vadd.f32 %v12445_v5, %v12440_v39  ;;  %v15099_v48 = vpop.f32.mrb[67].mxu0 }
0x1b18   : > { %v12453_v52 = vmul.f32 %v12450_v28, %v18052_v20 }
0x1b19   : > { %v12452_v54 = vmax.f32 %v12449_v47, 0.0  ;;  %v12454_v32 = vmul.f32 %v12451_v44, %v18055_v27 }
0x1b1b   : > { %v12455_v7 = vmul.f32 %v12452_v54, %v18058_v36  ;;  %12466 = vmatprep.subr.mxu1 %v12454_v32  ;;  %v17147_v32 = vmov 1983009808  }
0x1b1c   : > { %12467 = vmatpush1.msra.mxu1 %v12453_v52  ;;  %v12669_v52 = vunpack.c.l.s4 %v17147_v32 }
0x1b1d   : > { %13549 = vmatmul.mubr.msk.f32.vlgmr.msra.gmra.mrb[20].mxu1 %vm19910_vm0, %v12456_v37  ;;  %15101 = vmatpush3.msra.mxu0 %v12455_v7 }
0x1b1e   : > { %15103 = vmatmul.mubr.msk.f32.vlgmr.msra.gmra.mrb[206].mxu0 %vm19911_vm9, %v12456_v37  ;;  %v12670_v37 = vunpack.c.0.s8 %v12669_v52 }
0x1bf0   : > { %v12532_v53 = vpop.f32.mrb[20].mxu1 }
0x1bf1   : > { %v12533_v55 = vadd.f32 %v12532_v53, %v12461_v3  ;;  %v12534_v56 = vpop.f32.mrb[21].mxu1  ;;  %v12603_v63 = vpop.f32.mrb[206].mxu0 }
0x1bf2   : > { %v12535_v9 = vadd.f32 %v12534_v56, %v12461_v3  ;;  %v12604_v57 = vadd.f32 %v12603_v63, %v12461_v3  ;;  %v15104_v27 = vpop.f32.mrb[207].mxu0  ;;  %v12673_v63 = vsub.s32 %v12670_v37, %v18048_v62 }
0x1bf3   : > { %v12607_v20 = vsel %vm19912_vm10, %v12533_v55, -inf }
0x1bf4   : > { %v12608_v45 = vrot.slane %v12607_v20, 4  ;;  %v12614_v36 = vsel %vm19913_vm11, %v12535_v9, -inf  ;;  %v12621_v19 = vsel %vm19914_vm12, %v12604_v57, -inf }
0x1bf5   : > { %v12615_v18 = vrot.slane %v12614_v36, 4  ;;  %v12622_v58 = vrot.slane %v12621_v19, 4 }
0x1bf6   : > { %v12609_v15 = vmax.f32 %v12607_v20, %v12608_v45 }
0x1bf7   : > { %v12616_v30 = vmax.f32 %v12614_v36, %v12615_v18  ;;  %v12623_v0 = vmax.f32 %v12621_v19, %v12622_v58 }
0x1bf8   : > { %v12610_v29 = vrot.slane %v12609_v15, 2 }
0x1bf9   : > { %v12617_v43 = vrot.slane %v12616_v30, 2  ;;  %v12624_v46 = vrot.slane %v12623_v0, 2 }
0x1bfa   : > { %v12611_v60 = vmax.f32 %v12609_v15, %v12610_v29 }
0x1bfb   : > { %v12618_v61 = vmax.f32 %v12616_v30, %v12617_v43  ;;  %v12625_v4 = vmax.f32 %v12623_v0, %v12624_v46 }
0x1bfc   : > { %v12612_v16 = vrot.slane %v12611_v60, 1 }
0x1bfd   : > { %v12619_v17 = vrot.slane %v12618_v61, 1  ;;  %v12626_v6 = vrot.slane %v12625_v4, 1 }
0x1bfe   : > { %v12613_v25 = vmax.f32 %v12611_v60, %v12612_v16 }
0x1bff   : > { %v12620_v13 = vmax.f32 %v12618_v61, %v12619_v17  ;;  %v12627_v24 = vmax.f32 %v12625_v4, %v12626_v6 }
0x1c00   : > { %v12628_v14 = vsub.f32 %v12533_v55, %v12613_v25 }
0x1c01   : > { %v12629_v10 = vsub.f32 %v12535_v9, %v12620_v13  ;;  %v12630_v22 = vsub.f32 %v12604_v57, %v12627_v24 }
0x1c02   : > { %v12631_v26 = vmul.f32 1.442695, %v12628_v14 }
0x1c03   : > { %v12633_v2 = vmul.f32 1.442695, %v12629_v10  ;;  %v12635_v49 = vmul.f32 1.442695, %v12630_v22 }
0x1c04   : > { %16097 = vpow2.f32 %v12631_v26 }
0x1c05   : > { %16099 = vpow2.f32 %v12633_v2 }
0x1c06   : > { %16101 = vpow2.f32 %v12635_v49 }
0x1c0e   : > { %v16098_v1 = vpop.eup %16097 }
0x1c0f   : > { %v16100_v35 = vpop.eup %16099  ;;  %v12637_v21 = vsel %vm19915_vm13, %v16098_v1, 0.0 }
0x1c10   : > { %v16102_v50 = vpop.eup %16101  ;;  %v12638_v51 = vrot.slane %v12637_v21, 4  ;;  %v12644_v34 = vsel %vm19916_vm14, %v16100_v35, 0.0 }
0x1c11   : > { %v12645_v11 = vrot.slane %v12644_v34, 4  ;;  %v12651_v8 = vsel %vm19917_vm7, %v16102_v50, 0.0 }
0x1c12   : > { %v12639_v38 = vadd.f32 %v12638_v51, %v12637_v21  ;;  %v12652_v5 = vrot.slane %v12651_v8, 4 }
0x1c13   : > { %v12646_v41 = vadd.f32 %v12645_v11, %v12644_v34 }
0x1c14   : > { %v12640_v42 = vrot.slane %v12639_v38, 2  ;;  %v12653_v40 = vadd.f32 %v12652_v5, %v12651_v8 }
0x1c15   : > { %v12647_v33 = vrot.slane %v12646_v41, 2 }
0x1c16   : > { %v12641_v31 = vadd.f32 %v12640_v42, %v12639_v38  ;;  %v12654_v23 = vrot.slane %v12653_v40, 2 }
0x1c17   : > { %v12648_v39 = vadd.f32 %v12647_v33, %v12646_v41 }
0x1c18   : > { %v12642_v12 = vrot.slane %v12641_v31, 1  ;;  %v12655_v28 = vadd.f32 %v12654_v23, %v12653_v40 }
0x1c19   : > { %v12649_v59 = vrot.slane %v12648_v39, 1 }
0x1c1a   : > { %v12643_v44 = vadd.f32 %v12642_v12, %v12641_v31  ;;  %v12656_v47 = vrot.slane %v12655_v28, 1 }
0x1c1b   : > { %v12650_v48 = vadd.f32 %v12649_v59, %v12648_v39 }
0x1c1c   : > { %16103 = vrcp.f32 %v12643_v44  ;;  %v12657_v54 = vadd.f32 %v12656_v47, %v12655_v28 }
0x1c1d   : > { %16105 = vrcp.f32 %v12650_v48 }
0x1c1e   : > { %16107 = vrcp.f32 %v12657_v54 }
0x1c26   : > { %v16104_v7 = vpop.eup %16103 }
0x1c27   : > { %v16106_v3 = vpop.eup %16105  ;;  %v12659_v53 = vmul.f32 %v16104_v7, %v16098_v1 }
0x1c28   : > { %v16108_v55 = vpop.eup %16107  ;;  %v12661_v56 = vmul.f32 %v16106_v3, %v16100_v35 }
0x1c29   : > { %v12663_v9 = vmul.f32 %v16108_v55, %v16102_v50 }
0x1c2a   : > { %v12667_v57 = vcombine.low %v12659_v53, %v12661_v56 }
0x1c2b   : > { %v12681_v20 = vrot.slane %v12663_v9, %v12673_v63 }
0x1c2c   : > { %v12674_v27 = vrot.slane %v12667_v57, %v12673_v63 }
0x1c2e   : > { %v12682_v45 = vcombine.low %v12674_v27, %v12681_v20 }
0x1c30   : > { %12684 = vst [vmem:[%s1530_s5] sm:$0x3f] %v12682_v45 }
0x1c31 PF: > { %s99_s28 = sadd.s32 1, %s17048_s28  }
0x1c32   : > { %p96_p5 = scmp.ge.s32.totalorder %s99_s28, 4  }
0x1c34   :  { %98 = sbr.rel (!%p96_p5) target bundleno = 80 (0x50), region = 463 }
0x1c3b   :  { %12706 = vsyncpa [#allocation3], 1 }
0x1c3c   :  { %12708 = vsyncpa [#allocation3 + $0x1], 1 }
0x1c3d   :  { %12709 = vsyncpa [#allocation5], 1 }
0x1c3e   :  { %12710 = vsyncpa [#allocation8], 1 }
0x1c3f   :  { %12711 = vsyncpa [#allocation11], 1 }
0x1c40   :  { %12712 = vsyncpa [#allocation14], 1 }
0x1c41   :  { %12713 = vsyncpa [#allocation17], 1 }
0x1c42   :  { %12714 = vsyncpa [#allocation20], 1 }
0x1c43   :  { %12715 = vsyncpa [#allocation23], 1 }
0x1c44   :  { %12716 = vsyncpa [#allocation26], 1 }
0x1c45   :  { %12717 = vsyncpa [#allocation29], 1 }
0x1c46   :  { %12718 = vsyncpa [#allocation32], 1 }
0x1c47   :  { %12719 = vsyncpa [#allocation35], 1 }
0x1c48   :  { %12720 = vsyncpa [#allocation38], 1 }
0x1c49   :  { %12721 = vsyncpa [#allocation41], 1 }
0x1c4a   :  { %12722 = vsyncpa [#allocation44], 1 }
0x1c4b   :  { %12723 = vsyncpa [#allocation47], 1 }

</bundles_post_ra>
